<compile_context>
chip_gen: v6e
topology: v6e:2x2x1
jax: 0.10.0
libtpu: 0.0.40
codegen_flags: <defaults>
</compile_context>

<pallas_src>
import jax
import jax.numpy as jnp
from jax.experimental import pallas as pl
from jax.experimental.pallas import tpu as pltpu

# Module hyper-parameters (defaults of VAEMario.__init__)
W, H, Z_DIM, N_SPRITES = 33, 16, 4, 7
INPUT_DIM = W * H * N_SPRITES  # 3696


def _vmem_spec():
    return pl.BlockSpec(memory_space=pltpu.MemorySpace.VMEM)


def _lin(h_bf16, w_ref, b_ref):
    # bf16 x bf16 matmul on the MXU with f32 accumulation, f32 bias add.
    return jnp.dot(h_bf16, w_ref[...], preferred_element_type=jnp.float32) + b_ref[...]


def _relu_bf16(y_f32):
    return jnp.maximum(y_f32, 0.0).astype(jnp.bfloat16)


def vae_kernel(x_ref, eps_ref,
               ew1, eb1, ew2, eb2, ew3, eb3, ew4, eb4,
               wh, bh,
               dw1, db1, dw2, db2, dw3, db3, dw4, db4,
               mu_ref, std_ref, z_ref, logits_ref):
    # ---------------- encoder ----------------
    h = _relu_bf16(_lin(x_ref[...].astype(jnp.bfloat16), ew1, eb1))  # input_dim -> 512
    h = _relu_bf16(_lin(h, ew2, eb2))                                # 512 -> 256
    h = _relu_bf16(_lin(h, ew3, eb3))                                # 256 -> 128
    h = _relu_bf16(_lin(h, ew4, eb4))                                # 128 -> 128

    # fused mu | log_var head: one (128, 2*z_dim) matmul
    head = _lin(h, wh, bh)                                           # (B, 2*z_dim) f32
    mu = head[:, :Z_DIM]
    log_var = head[:, Z_DIM:]

    # Normal(mu, exp(0.5*log_var)).rsample() == mu + std * eps
    std = jnp.exp(0.5 * log_var)
    z = mu + std * eps_ref[...]

    mu_ref[...] = mu
    std_ref[...] = std
    z_ref[...] = z

    # ---------------- decoder ----------------
    h = _relu_bf16(_lin(z.astype(jnp.bfloat16), dw1, db1))           # z_dim -> 256
    h = _relu_bf16(_lin(h, dw2, db2))                                # 256 -> 256
    h = _relu_bf16(_lin(h, dw3, db3))                                # 256 -> 512
    logits_ref[...] = _lin(h, dw4, db4)                              # 512 -> input_dim


def _init_linear(key, fan_in, fan_out, w_dtype=jnp.bfloat16):
    # PyTorch nn.Linear default init: U(-1/sqrt(fan_in), 1/sqrt(fan_in))
    kw, kb = jax.random.split(key)
    bound = 1.0 / (fan_in ** 0.5)
    w = jax.random.uniform(kw, (fan_in, fan_out), jnp.float32, -bound, bound)
    b = jax.random.uniform(kb, (1, fan_out), jnp.float32, -bound, bound)
    return w.astype(w_dtype), b  # weights bf16, bias f32


def init_params(key):
    keys = jax.random.split(key, 10)
    enc_dims = [(INPUT_DIM, 512), (512, 256), (256, 128), (128, 128)]
    dec_dims = [(Z_DIM, 256), (256, 256), (256, 512), (512, INPUT_DIM)]

    encoder = [_init_linear(keys[i], *enc_dims[i]) for i in range(4)]
    wmu, bmu = _init_linear(keys[4], 128, Z_DIM)
    wlv, blv = _init_linear(keys[5], 128, Z_DIM)
    # Merged mu|log_var head: (128, 2*z_dim) weight, (1, 2*z_dim) bias.
    enc_head = (jnp.concatenate([wmu, wlv], axis=1),
                jnp.concatenate([bmu, blv], axis=1))
    decoder = [_init_linear(keys[6 + i], *dec_dims[i]) for i in range(4)]
    return {"encoder": encoder, "enc_head": enc_head, "decoder": decoder}


@jax.jit
def vae_forward(x, eps, params):
    """Returns (mu, std, z, logits) with logits of shape (B, h, w, n_sprites),
    mirroring [Normal(mu, std), Categorical(logits=...)] of the torch module."""
    B = x.shape[0]
    # Matches torch `x.view(-1, input_dim)` on NCHW (B, n_sprites, h, w).
    x_flat = x.reshape(B, INPUT_DIM).astype(jnp.float32)

    inputs = [x_flat, eps]
    for w, b in params["encoder"]:
        inputs += [w, b]
    inputs += [params["enc_head"][0], params["enc_head"][1]]
    for w, b in params["decoder"]:
        inputs += [w, b]

    mu, std, z, logits_flat = pl.pallas_call(
        vae_kernel,
        out_shape=(jax.ShapeDtypeStruct((B, Z_DIM), jnp.float32),
                   jax.ShapeDtypeStruct((B, Z_DIM), jnp.float32),
                   jax.ShapeDtypeStruct((B, Z_DIM), jnp.float32),
                   jax.ShapeDtypeStruct((B, INPUT_DIM), jnp.float32)),
        in_specs=[_vmem_spec()] * len(inputs),
        out_specs=(_vmem_spec(),) * 4,
        compiler_params=pltpu.CompilerParams(vmem_limit_bytes=32 * 2**20),
    )(*inputs)

    # Matches torch `logits.reshape(-1, h, w, n_sprites)`.
    logits = logits_flat.reshape(B, H, W, N_SPRITES)
    return mu, std, z, logits


if __name__ == "__main__":
    key = jax.random.PRNGKey(0)
    k_x, k_eps, k_params = jax.random.split(key, 3)

    B = 2
    # One-hot Mario levels, NCHW = (B, n_sprites, h, w) like the torch data.
    sprite_idx = jax.random.randint(k_x, (B, H, W), 0, N_SPRITES)
    x = jax.nn.one_hot(sprite_idx, N_SPRITES, axis=1, dtype=jnp.float32)  # (B, 7, 16, 33)
    eps = jax.random.normal(k_eps, (B, Z_DIM), jnp.float32)               # rsample noise

    params = init_params(k_params)

    mu, std, z, logits = vae_forward(x, eps, params)
    jax.block_until_ready((mu, std, z, logits))

    assert mu.shape == (B, Z_DIM) and std.shape == (B, Z_DIM)
    assert z.shape == (B, Z_DIM)
    assert logits.shape == (B, H, W, N_SPRITES)
    assert bool(jnp.all(std > 0.0))
    assert bool(jnp.all(jnp.isfinite(logits)))
    print("KERNEL_OK")
</pallas_src>

<mosaic_0001>
module attributes {stable_mosaic.version = 11 : i64} {
  func.func @vae_kernel(%arg0: memref<2x3696xf32, #tpu.memory_space<vmem>>, %arg1: memref<2x4xf32, #tpu.memory_space<vmem>>, %arg2: memref<3696x512xbf16, #tpu.memory_space<vmem>>, %arg3: memref<1x512xf32, #tpu.memory_space<vmem>>, %arg4: memref<512x256xbf16, #tpu.memory_space<vmem>>, %arg5: memref<1x256xf32, #tpu.memory_space<vmem>>, %arg6: memref<256x128xbf16, #tpu.memory_space<vmem>>, %arg7: memref<1x128xf32, #tpu.memory_space<vmem>>, %arg8: memref<128x128xbf16, #tpu.memory_space<vmem>>, %arg9: memref<1x128xf32, #tpu.memory_space<vmem>>, %arg10: memref<128x8xbf16, #tpu.memory_space<vmem>>, %arg11: memref<1x8xf32, #tpu.memory_space<vmem>>, %arg12: memref<4x256xbf16, #tpu.memory_space<vmem>>, %arg13: memref<1x256xf32, #tpu.memory_space<vmem>>, %arg14: memref<256x256xbf16, #tpu.memory_space<vmem>>, %arg15: memref<1x256xf32, #tpu.memory_space<vmem>>, %arg16: memref<256x512xbf16, #tpu.memory_space<vmem>>, %arg17: memref<1x512xf32, #tpu.memory_space<vmem>>, %arg18: memref<512x3696xbf16, #tpu.memory_space<vmem>>, %arg19: memref<1x3696xf32, #tpu.memory_space<vmem>>, %arg20: memref<2x4xf32, #tpu.memory_space<vmem>>, %arg21: memref<2x4xf32, #tpu.memory_space<vmem>>, %arg22: memref<2x4xf32, #tpu.memory_space<vmem>>, %arg23: memref<2x3696xf32, #tpu.memory_space<vmem>>) attributes {dimension_semantics = [], scalar_prefetch = 0 : i64, scratch_operands = 0 : i64, tpu.core_type = #tpu.core_type<tc>} {
    %c0 = arith.constant 0 : index
    %c0_0 = arith.constant 0 : index
    %0 = vector.load %arg0[%c0, %c0_0] : memref<2x3696xf32, #tpu.memory_space<vmem>>, vector<2x3696xf32>
    %1 = arith.truncf %0 : vector<2x3696xf32> to vector<2x3696xbf16>
    %c0_1 = arith.constant 0 : index
    %c0_2 = arith.constant 0 : index
    %2 = vector.load %arg2[%c0_1, %c0_2] : memref<3696x512xbf16, #tpu.memory_space<vmem>>, vector<3696x512xbf16>
    %cst = arith.constant dense<0.000000e+00> : vector<2x512xf32>
    %3 = tpu.matmul %1, %2, %cst {dimension_numbers = #tpu.dot_dimension_numbers<[1], [0], [0], [1], [0, 0, 1, 1], [], []>} : vector<2x3696xbf16>, vector<3696x512xbf16>, vector<2x512xf32> -> vector<2x512xf32>
    %c0_3 = arith.constant 0 : index
    %c0_4 = arith.constant 0 : index
    %4 = vector.load %arg3[%c0_3, %c0_4] : memref<1x512xf32, #tpu.memory_space<vmem>>, vector<1x512xf32>
    %5 = vector.broadcast %4 : vector<1x512xf32> to vector<2x512xf32>
    %6 = arith.addf %3, %5 : vector<2x512xf32>
    %cst_5 = arith.constant 0.000000e+00 : f32
    %7 = vector.broadcast %cst_5 : f32 to vector<2x512xf32>
    %8 = arith.maximumf %6, %7 : vector<2x512xf32>
    %9 = arith.truncf %8 : vector<2x512xf32> to vector<2x512xbf16>
    %c0_6 = arith.constant 0 : index
    %c0_7 = arith.constant 0 : index
    %10 = vector.load %arg4[%c0_6, %c0_7] : memref<512x256xbf16, #tpu.memory_space<vmem>>, vector<512x256xbf16>
    %cst_8 = arith.constant dense<0.000000e+00> : vector<2x256xf32>
    %11 = tpu.matmul %9, %10, %cst_8 {dimension_numbers = #tpu.dot_dimension_numbers<[1], [0], [0], [1], [0, 0, 1, 1], [], []>} : vector<2x512xbf16>, vector<512x256xbf16>, vector<2x256xf32> -> vector<2x256xf32>
    %c0_9 = arith.constant 0 : index
    %c0_10 = arith.constant 0 : index
    %12 = vector.load %arg5[%c0_9, %c0_10] : memref<1x256xf32, #tpu.memory_space<vmem>>, vector<1x256xf32>
    %13 = vector.broadcast %12 : vector<1x256xf32> to vector<2x256xf32>
    %14 = arith.addf %11, %13 : vector<2x256xf32>
    %cst_11 = arith.constant 0.000000e+00 : f32
    %15 = vector.broadcast %cst_11 : f32 to vector<2x256xf32>
    %16 = arith.maximumf %14, %15 : vector<2x256xf32>
    %17 = arith.truncf %16 : vector<2x256xf32> to vector<2x256xbf16>
    %c0_12 = arith.constant 0 : index
    %c0_13 = arith.constant 0 : index
    %18 = vector.load %arg6[%c0_12, %c0_13] : memref<256x128xbf16, #tpu.memory_space<vmem>>, vector<256x128xbf16>
    %cst_14 = arith.constant dense<0.000000e+00> : vector<2x128xf32>
    %19 = tpu.matmul %17, %18, %cst_14 {dimension_numbers = #tpu.dot_dimension_numbers<[1], [0], [0], [1], [0, 0, 1, 1], [], []>} : vector<2x256xbf16>, vector<256x128xbf16>, vector<2x128xf32> -> vector<2x128xf32>
    %c0_15 = arith.constant 0 : index
    %c0_16 = arith.constant 0 : index
    %20 = vector.load %arg7[%c0_15, %c0_16] : memref<1x128xf32, #tpu.memory_space<vmem>>, vector<1x128xf32>
    %21 = vector.broadcast %20 : vector<1x128xf32> to vector<2x128xf32>
    %22 = arith.addf %19, %21 : vector<2x128xf32>
    %cst_17 = arith.constant 0.000000e+00 : f32
    %23 = vector.broadcast %cst_17 : f32 to vector<2x128xf32>
    %24 = arith.maximumf %22, %23 : vector<2x128xf32>
    %25 = arith.truncf %24 : vector<2x128xf32> to vector<2x128xbf16>
    %c0_18 = arith.constant 0 : index
    %c0_19 = arith.constant 0 : index
    %26 = vector.load %arg8[%c0_18, %c0_19] : memref<128x128xbf16, #tpu.memory_space<vmem>>, vector<128x128xbf16>
    %cst_20 = arith.constant dense<0.000000e+00> : vector<2x128xf32>
    %27 = tpu.matmul %25, %26, %cst_20 {dimension_numbers = #tpu.dot_dimension_numbers<[1], [0], [0], [1], [0, 0, 1, 1], [], []>} : vector<2x128xbf16>, vector<128x128xbf16>, vector<2x128xf32> -> vector<2x128xf32>
    %c0_21 = arith.constant 0 : index
    %c0_22 = arith.constant 0 : index
    %28 = vector.load %arg9[%c0_21, %c0_22] : memref<1x128xf32, #tpu.memory_space<vmem>>, vector<1x128xf32>
    %29 = vector.broadcast %28 : vector<1x128xf32> to vector<2x128xf32>
    %30 = arith.addf %27, %29 : vector<2x128xf32>
    %cst_23 = arith.constant 0.000000e+00 : f32
    %31 = vector.broadcast %cst_23 : f32 to vector<2x128xf32>
    %32 = arith.maximumf %30, %31 : vector<2x128xf32>
    %33 = arith.truncf %32 : vector<2x128xf32> to vector<2x128xbf16>
    %c0_24 = arith.constant 0 : index
    %c0_25 = arith.constant 0 : index
    %34 = vector.load %arg10[%c0_24, %c0_25] : memref<128x8xbf16, #tpu.memory_space<vmem>>, vector<128x8xbf16>
    %cst_26 = arith.constant dense<0.000000e+00> : vector<2x8xf32>
    %35 = tpu.matmul %33, %34, %cst_26 {dimension_numbers = #tpu.dot_dimension_numbers<[1], [0], [0], [1], [0, 0, 1, 1], [], []>} : vector<2x128xbf16>, vector<128x8xbf16>, vector<2x8xf32> -> vector<2x8xf32>
    %c0_27 = arith.constant 0 : index
    %c0_28 = arith.constant 0 : index
    %36 = vector.load %arg11[%c0_27, %c0_28] : memref<1x8xf32, #tpu.memory_space<vmem>>, vector<1x8xf32>
    %37 = vector.broadcast %36 : vector<1x8xf32> to vector<2x8xf32>
    %38 = arith.addf %35, %37 : vector<2x8xf32>
    %39 = vector.extract_strided_slice %38 {offsets = [0, 0], sizes = [2, 4], strides = [1, 1]} : vector<2x8xf32> to vector<2x4xf32>
    %40 = vector.extract_strided_slice %38 {offsets = [0, 4], sizes = [2, 4], strides = [1, 1]} : vector<2x8xf32> to vector<2x4xf32>
    %cst_29 = arith.constant 5.000000e-01 : f32
    %41 = vector.broadcast %cst_29 : f32 to vector<2x4xf32>
    %42 = arith.mulf %41, %40 : vector<2x4xf32>
    %43 = math.exp %42 : vector<2x4xf32>
    %c0_30 = arith.constant 0 : index
    %c0_31 = arith.constant 0 : index
    %44 = vector.load %arg1[%c0_30, %c0_31] : memref<2x4xf32, #tpu.memory_space<vmem>>, vector<2x4xf32>
    %45 = arith.mulf %43, %44 : vector<2x4xf32>
    %46 = arith.addf %39, %45 : vector<2x4xf32>
    %c0_32 = arith.constant 0 : index
    %c0_33 = arith.constant 0 : index
    %47 = vector.load %arg20[%c0_32, %c0_33] : memref<2x4xf32, #tpu.memory_space<vmem>>, vector<2x4xf32>
    tpu.vector_store %arg20[%c0_32, %c0_33], %39 {strides = array<i32>} : memref<2x4xf32, #tpu.memory_space<vmem>>, vector<2x4xf32>,
    %c0_34 = arith.constant 0 : index
    %c0_35 = arith.constant 0 : index
    %48 = vector.load %arg21[%c0_34, %c0_35] : memref<2x4xf32, #tpu.memory_space<vmem>>, vector<2x4xf32>
    tpu.vector_store %arg21[%c0_34, %c0_35], %43 {strides = array<i32>} : memref<2x4xf32, #tpu.memory_space<vmem>>, vector<2x4xf32>,
    %c0_36 = arith.constant 0 : index
    %c0_37 = arith.constant 0 : index
    %49 = vector.load %arg22[%c0_36, %c0_37] : memref<2x4xf32, #tpu.memory_space<vmem>>, vector<2x4xf32>
    tpu.vector_store %arg22[%c0_36, %c0_37], %46 {strides = array<i32>} : memref<2x4xf32, #tpu.memory_space<vmem>>, vector<2x4xf32>,
    %50 = arith.truncf %46 : vector<2x4xf32> to vector<2x4xbf16>
    %c0_38 = arith.constant 0 : index
    %c0_39 = arith.constant 0 : index
    %51 = vector.load %arg12[%c0_38, %c0_39] : memref<4x256xbf16, #tpu.memory_space<vmem>>, vector<4x256xbf16>
    %cst_40 = arith.constant dense<0.000000e+00> : vector<2x256xf32>
    %52 = tpu.matmul %50, %51, %cst_40 {dimension_numbers = #tpu.dot_dimension_numbers<[1], [0], [0], [1], [0, 0, 1, 1], [], []>} : vector<2x4xbf16>, vector<4x256xbf16>, vector<2x256xf32> -> vector<2x256xf32>
    %c0_41 = arith.constant 0 : index
    %c0_42 = arith.constant 0 : index
    %53 = vector.load %arg13[%c0_41, %c0_42] : memref<1x256xf32, #tpu.memory_space<vmem>>, vector<1x256xf32>
    %54 = vector.broadcast %53 : vector<1x256xf32> to vector<2x256xf32>
    %55 = arith.addf %52, %54 : vector<2x256xf32>
    %cst_43 = arith.constant 0.000000e+00 : f32
    %56 = vector.broadcast %cst_43 : f32 to vector<2x256xf32>
    %57 = arith.maximumf %55, %56 : vector<2x256xf32>
    %58 = arith.truncf %57 : vector<2x256xf32> to vector<2x256xbf16>
    %c0_44 = arith.constant 0 : index
    %c0_45 = arith.constant 0 : index
    %59 = vector.load %arg14[%c0_44, %c0_45] : memref<256x256xbf16, #tpu.memory_space<vmem>>, vector<256x256xbf16>
    %cst_46 = arith.constant dense<0.000000e+00> : vector<2x256xf32>
    %60 = tpu.matmul %58, %59, %cst_46 {dimension_numbers = #tpu.dot_dimension_numbers<[1], [0], [0], [1], [0, 0, 1, 1], [], []>} : vector<2x256xbf16>, vector<256x256xbf16>, vector<2x256xf32> -> vector<2x256xf32>
    %c0_47 = arith.constant 0 : index
    %c0_48 = arith.constant 0 : index
    %61 = vector.load %arg15[%c0_47, %c0_48] : memref<1x256xf32, #tpu.memory_space<vmem>>, vector<1x256xf32>
    %62 = vector.broadcast %61 : vector<1x256xf32> to vector<2x256xf32>
    %63 = arith.addf %60, %62 : vector<2x256xf32>
    %cst_49 = arith.constant 0.000000e+00 : f32
    %64 = vector.broadcast %cst_49 : f32 to vector<2x256xf32>
    %65 = arith.maximumf %63, %64 : vector<2x256xf32>
    %66 = arith.truncf %65 : vector<2x256xf32> to vector<2x256xbf16>
    %c0_50 = arith.constant 0 : index
    %c0_51 = arith.constant 0 : index
    %67 = vector.load %arg16[%c0_50, %c0_51] : memref<256x512xbf16, #tpu.memory_space<vmem>>, vector<256x512xbf16>
    %cst_52 = arith.constant dense<0.000000e+00> : vector<2x512xf32>
    %68 = tpu.matmul %66, %67, %cst_52 {dimension_numbers = #tpu.dot_dimension_numbers<[1], [0], [0], [1], [0, 0, 1, 1], [], []>} : vector<2x256xbf16>, vector<256x512xbf16>, vector<2x512xf32> -> vector<2x512xf32>
    %c0_53 = arith.constant 0 : index
    %c0_54 = arith.constant 0 : index
    %69 = vector.load %arg17[%c0_53, %c0_54] : memref<1x512xf32, #tpu.memory_space<vmem>>, vector<1x512xf32>
    %70 = vector.broadcast %69 : vector<1x512xf32> to vector<2x512xf32>
    %71 = arith.addf %68, %70 : vector<2x512xf32>
    %cst_55 = arith.constant 0.000000e+00 : f32
    %72 = vector.broadcast %cst_55 : f32 to vector<2x512xf32>
    %73 = arith.maximumf %71, %72 : vector<2x512xf32>
    %74 = arith.truncf %73 : vector<2x512xf32> to vector<2x512xbf16>
    %c0_56 = arith.constant 0 : index
    %c0_57 = arith.constant 0 : index
    %75 = vector.load %arg18[%c0_56, %c0_57] : memref<512x3696xbf16, #tpu.memory_space<vmem>>, vector<512x3696xbf16>
    %cst_58 = arith.constant dense<0.000000e+00> : vector<2x3696xf32>
    %76 = tpu.matmul %74, %75, %cst_58 {dimension_numbers = #tpu.dot_dimension_numbers<[1], [0], [0], [1], [0, 0, 1, 1], [], []>} : vector<2x512xbf16>, vector<512x3696xbf16>, vector<2x3696xf32> -> vector<2x3696xf32>
    %c0_59 = arith.constant 0 : index
    %c0_60 = arith.constant 0 : index
    %77 = vector.load %arg19[%c0_59, %c0_60] : memref<1x3696xf32, #tpu.memory_space<vmem>>, vector<1x3696xf32>
    %78 = vector.broadcast %77 : vector<1x3696xf32> to vector<2x3696xf32>
    %79 = arith.addf %76, %78 : vector<2x3696xf32>
    %c0_61 = arith.constant 0 : index
    %c0_62 = arith.constant 0 : index
    %80 = vector.load %arg23[%c0_61, %c0_62] : memref<2x3696xf32, #tpu.memory_space<vmem>>, vector<2x3696xf32>
    tpu.vector_store %arg23[%c0_61, %c0_62], %79 {strides = array<i32>} : memref<2x3696xf32, #tpu.memory_space<vmem>>, vector<2x3696xf32>,
    return
  }
}

</mosaic_0001>

<bundles_post_ra>
// kernel: vae_forward.1
= control target key start
LH: loop header
LB: loop body
LE: loop exit
PB: predicated region body
PF: predicated region fallthrough
CT: control target
= control target key end

     0   :  { %s28254_s0 = inlined_call_operand.vmem [shape: f32[2,3696], index: 0, kind: input, shape index: {}]   ;;  %s28255_s1 = inlined_call_operand.vmem [shape: f32[2,4], index: 1, kind: input, shape index: {}]   ;;  %s28256_s2 = inlined_call_operand.vmem [shape: bf16[3696,512], index: 2, kind: input, shape index: {}]   ;;  %s28257_s3 = inlined_call_operand.vmem [shape: f32[1,512], index: 3, kind: input, shape index: {}]   ;;  %s28258_s4 = inlined_call_operand.vmem [shape: bf16[512,256], index: 4, kind: input, shape index: {}]   ;;  %s28259_s5 = inlined_call_operand.vmem [shape: f32[1,256], index: 5, kind: input, shape index: {}]   ;;  %s28260_s6 = inlined_call_operand.vmem [shape: bf16[256,128], index: 6, kind: input, shape index: {}]   ;;  %s28261_s7 = inlined_call_operand.vmem [shape: f32[1,128], index: 7, kind: input, shape index: {}]   ;;  %s28262_s8 = inlined_call_operand.vmem [shape: bf16[128,128], index: 8, kind: input, shape index: {}]   ;;  %s28263_s9 = inlined_call_operand.vmem [shape: f32[1,128], index: 9, kind: input, shape index: {}]   ;;  %s28264_s10 = inlined_call_operand.vmem [shape: bf16[128,8], index: 10, kind: input, shape index: {}]   ;;  %s28265_s11 = inlined_call_operand.vmem [shape: f32[1,8], index: 11, kind: input, shape index: {}]   ;;  %s28266_s12 = inlined_call_operand.vmem [shape: bf16[4,256], index: 12, kind: input, shape index: {}]   ;;  %s28267_s13 = inlined_call_operand.vmem [shape: f32[1,256], index: 13, kind: input, shape index: {}]   ;;  %s28268_s14 = inlined_call_operand.vmem [shape: bf16[256,256], index: 14, kind: input, shape index: {}]   ;;  %s28269_s15 = inlined_call_operand.vmem [shape: f32[1,256], index: 15, kind: input, shape index: {}]   ;;  %s28270_s16 = inlined_call_operand.vmem [shape: bf16[256,512], index: 16, kind: input, shape index: {}]   ;;  %s28271_s17 = inlined_call_operand.vmem [shape: f32[1,512], index: 17, kind: input, shape index: {}]   ;;  %s28272_s18 = inlined_call_operand.vmem [shape: bf16[512,3696], index: 18, kind: input, shape index: {}]   ;;  %s28273_s19 = inlined_call_operand.vmem [shape: f32[1,3696], index: 19, kind: input, shape index: {}]   ;;  %s28274_s20 = inlined_call_operand.hbm [shape: f32[2,4], index: 20, kind: output, shape index: {0}]   ;;  %s28275_s21 = inlined_call_operand.hbm [shape: f32[2,4], index: 21, kind: output, shape index: {1}]   ;;  %s28276_s22 = inlined_call_operand.hbm [shape: f32[2,4], index: 22, kind: output, shape index: {2}]   ;;  %s28277_s23 = inlined_call_operand.vmem [shape: f32[2,3696], index: 23, kind: output, shape index: {3}]  }
   0x1   :  { %28283 = sst [smem:[#allocation9_spill]] %s28254_s0 }
   0x2   :  { %28284 = sst [smem:[#allocation10_spill]] %s28255_s1 }
   0x3   :  { %28285 = sst [smem:[#allocation11_spill]] %s28256_s2 }
   0x4   :  { %28286 = sst [smem:[#allocation12_spill]] %s28257_s3 }
   0x5   :  { %28287 = sst [smem:[#allocation13_spill]] %s28258_s4 }
   0x6   :  { %28288 = sst [smem:[#allocation14_spill]] %s28259_s5 }
   0x7   :  { %28289 = sst [smem:[#allocation15_spill]] %s28260_s6 }
   0x8   :  { %28290 = sst [smem:[#allocation16_spill]] %s28261_s7 }
   0x9   :  { %29 = vsyncpa [#allocation3], 0  ;;  %s28291_s24 = sld [smem:[#allocation11_spill]]  ;;  %v21333_v36 = vmov 1983009808   ;;  %v92_v38 = vlaneseq  ;;  %vm5838_vm0 = vcmask 916480  }
   0xa   :  { %v90_v37 = vunpack.c.l.s4 %v21333_v36  ;;  %s28292_s28 = sld [smem:[#allocation9_spill]] }
   0xb   :  { %v21579_v43 = vshrl.u32 %v92_v38, 7  ;;  %s28293_s3 = sld [smem:[#allocation12_spill]] }
   0xc   :  { %v91_v42 = vunpack.c.0.s8 %v90_v37  ;;  %s28294_s5 = sld [smem:[#allocation13_spill]] }
   0xe   :  { %v21597_v49 = vsub.s32 %v91_v42, %v21579_v43 }
   0xf   :  { %v18225_v0 = vld [vmem:[%s28291_s24 + $0xe4] ss:$16 sps:$4 sm:$0xff]   ;;  %v18229_v2 = vld [vmem:[%s28291_s24 + $0xe0] ss:$16 sps:$4 sm:$0xff]  }
  0x10   :  { %v18227_v1 = vld [vmem:[%s28291_s24 + $0x2e4] ss:$16 sps:$4 sm:$0xff]   ;;  %5842 = vmatprep.subr.bf16.mxu0 %v18225_v0  ;;  %v18230_v3 = vld [vmem:[%s28291_s24 + $0x2e0] ss:$16 sps:$4 sm:$0xff]   ;;  %v73_v42 = vld [vmem:[%s28292_s28 + $0x8] sm:$0xff] }
  0x11   :  { %5883 = vmatprep.subr.bf16.mxu1 %v18227_v1  ;;  %v18231_v4 = vld [vmem:[%s28291_s24 + $0xc4] ss:$16 sps:$4 sm:$0xff]   ;;  %5843 = vmatpush1.bf16.msra.mxu0 %v18229_v2  ;;  %v18235_v6 = vld [vmem:[%s28291_s24 + $0xc0] ss:$16 sps:$4 sm:$0xff]  }
  0x12   :  { %5884 = vmatpush1.bf16.msra.mxu1 %v18230_v3  ;;  %v18233_v5 = vld [vmem:[%s28291_s24 + $0x2c4] ss:$16 sps:$4 sm:$0xff]   ;;  %5844 = vmatprep.subr.bf16.mxu0 %v18231_v4  ;;  %v18236_v7 = vld [vmem:[%s28291_s24 + $0x2c0] ss:$16 sps:$4 sm:$0xff]  }
  0x13   :  { %5885 = vmatprep.subr.bf16.mxu1 %v18233_v5  ;;  %v18237_v8 = vld [vmem:[%s28291_s24 + $0xa4] ss:$16 sps:$4 sm:$0xff]   ;;  %v18241_v10 = vld [vmem:[%s28291_s24 + $0xa0] ss:$16 sps:$4 sm:$0xff]  }
  0x14   :  { %v18239_v9 = vld [vmem:[%s28291_s24 + $0x2a4] ss:$16 sps:$4 sm:$0xff]   ;;  %v18242_v11 = vld [vmem:[%s28291_s24 + $0x2a0] ss:$16 sps:$4 sm:$0xff]  }
  0x15   :  { %5845 = vmatpush1.bf16.msra.mxu0 %v18235_v6  ;;  %v18243_v12 = vld [vmem:[%s28291_s24 + $0x84] ss:$16 sps:$4 sm:$0xff]   ;;  %v18247_v14 = vld [vmem:[%s28291_s24 + $0x80] ss:$16 sps:$4 sm:$0xff]  }
  0x16   :  { %5886 = vmatpush1.bf16.msra.mxu1 %v18236_v7  ;;  %5846 = vmatprep.subr.bf16.mxu0 %v18237_v8  ;;  %v18245_v13 = vld [vmem:[%s28291_s24 + $0x284] ss:$16 sps:$4 sm:$0xff]   ;;  %v18248_v15 = vld [vmem:[%s28291_s24 + $0x280] ss:$16 sps:$4 sm:$0xff]  }
  0x17   :  { %5887 = vmatprep.subr.bf16.mxu1 %v18239_v9  ;;  %v18249_v16 = vld [vmem:[%s28291_s24 + $0x64] ss:$16 sps:$4 sm:$0xff]   ;;  %v18253_v18 = vld [vmem:[%s28291_s24 + $0x60] ss:$16 sps:$4 sm:$0xff]  }
  0x18   :  { %v18251_v17 = vld [vmem:[%s28291_s24 + $0x264] ss:$16 sps:$4 sm:$0xff]   ;;  %v18254_v19 = vld [vmem:[%s28291_s24 + $0x260] ss:$16 sps:$4 sm:$0xff]  }
  0x19   :  { %5847 = vmatpush1.bf16.msra.mxu0 %v18241_v10  ;;  %v18255_v20 = vld [vmem:[%s28291_s24 + $0x44] ss:$16 sps:$4 sm:$0xff]   ;;  %v18259_v22 = vld [vmem:[%s28291_s24 + $0x40] ss:$16 sps:$4 sm:$0xff]  }
  0x1a   :  { %5888 = vmatpush1.bf16.msra.mxu1 %v18242_v11  ;;  %5848 = vmatprep.subr.bf16.mxu0 %v18243_v12  ;;  %v18257_v21 = vld [vmem:[%s28291_s24 + $0x244] ss:$16 sps:$4 sm:$0xff]   ;;  %v18260_v23 = vld [vmem:[%s28291_s24 + $0x240] ss:$16 sps:$4 sm:$0xff]  }
  0x1b   :  { %5889 = vmatprep.subr.bf16.mxu1 %v18245_v13  ;;  %v18261_v24 = vld [vmem:[%s28291_s24 + $0x24] ss:$16 sps:$4 sm:$0xff]   ;;  %v18265_v26 = vld [vmem:[%s28291_s24 + $0x20] ss:$16 sps:$4 sm:$0xff]  }
  0x1c   :  { %v18263_v25 = vld [vmem:[%s28291_s24 + $0x224] ss:$16 sps:$4 sm:$0xff]   ;;  %v18266_v27 = vld [vmem:[%s28291_s24 + $0x220] ss:$16 sps:$4 sm:$0xff]  }
  0x1d   :  { %5849 = vmatpush1.bf16.msra.mxu0 %v18247_v14  ;;  %v18267_v28 = vld [vmem:[%s28291_s24 + $0x4] ss:$16 sps:$4 sm:$0xff]   ;;  %v18271_v30 = vld [vmem:[%s28291_s24] ss:$16 sps:$4 sm:$0xff]  }
  0x1e   :  { %5890 = vmatpush1.bf16.msra.mxu1 %v18248_v15  ;;  %5850 = vmatprep.subr.bf16.mxu0 %v18249_v16  ;;  %v18269_v29 = vld [vmem:[%s28291_s24 + $0x204] ss:$16 sps:$4 sm:$0xff]   ;;  %v18272_v31 = vld [vmem:[%s28291_s24 + $0x200] ss:$16 sps:$4 sm:$0xff]  }
  0x1f   :  { %5891 = vmatprep.subr.bf16.mxu1 %v18251_v17  ;;  %v18273_v32 = vld [vmem:[%s28291_s24 + $0x1e4] ss:$16 sps:$4 sm:$0xff]   ;;  %v18277_v34 = vld [vmem:[%s28291_s24 + $0x1e0] ss:$16 sps:$4 sm:$0xff]  }
  0x20   :  { %v18275_v33 = vld [vmem:[%s28291_s24 + $0x3e4] ss:$16 sps:$4 sm:$0xff]   ;;  %v18278_v35 = vld [vmem:[%s28291_s24 + $0x3e0] ss:$16 sps:$4 sm:$0xff]  }
  0x21   :  { %5851 = vmatpush1.bf16.msra.mxu0 %v18253_v18  ;;  %v18279_v39 = vld [vmem:[%s28291_s24 + $0x1c4] ss:$16 sps:$4 sm:$0xff]   ;;  %v18283_v41 = vld [vmem:[%s28291_s24 + $0x1c0] ss:$16 sps:$4 sm:$0xff]  }
  0x22   :  { %5892 = vmatpush1.bf16.msra.mxu1 %v18254_v19  ;;  %5852 = vmatprep.subr.bf16.mxu0 %v18255_v20  ;;  %v18281_v40 = vld [vmem:[%s28291_s24 + $0x3c4] ss:$16 sps:$4 sm:$0xff]   ;;  %v18284_v44 = vld [vmem:[%s28291_s24 + $0x3c0] ss:$16 sps:$4 sm:$0xff]  }
  0x23   :  { %5893 = vmatprep.subr.bf16.mxu1 %v18257_v21  ;;  %v18285_v45 = vld [vmem:[%s28291_s24 + $0x1a4] ss:$16 sps:$4 sm:$0xff]   ;;  %v18289_v47 = vld [vmem:[%s28291_s24 + $0x1a0] ss:$16 sps:$4 sm:$0xff]  }
  0x24   :  { %v18287_v46 = vld [vmem:[%s28291_s24 + $0x3a4] ss:$16 sps:$4 sm:$0xff]   ;;  %v18290_v48 = vld [vmem:[%s28291_s24 + $0x3a0] ss:$16 sps:$4 sm:$0xff]  }
  0x25   :  { %5853 = vmatpush1.bf16.msra.mxu0 %v18259_v22  ;;  %v18291_v50 = vld [vmem:[%s28291_s24 + $0x184] ss:$16 sps:$4 sm:$0xff]   ;;  %v18295_v53 = vld [vmem:[%s28291_s24 + $0x180] ss:$16 sps:$4 sm:$0xff]  }
  0x26   :  { %5894 = vmatpush1.bf16.msra.mxu1 %v18260_v23  ;;  %5854 = vmatprep.subr.bf16.mxu0 %v18261_v24  ;;  %v18293_v51 = vld [vmem:[%s28291_s24 + $0x384] ss:$16 sps:$4 sm:$0xff]   ;;  %v18296_v56 = vld [vmem:[%s28291_s24 + $0x380] ss:$16 sps:$4 sm:$0xff]  }
  0x27   :  { %5895 = vmatprep.subr.bf16.mxu1 %v18263_v25  ;;  %v72_v52 = vld [vmem:[%s28292_s28] sm:$0xff] }
  0x28   :  { %v95_v54 = vrot.slane %v72_v52, %v21597_v49  ;;  %v88_v55 = vcombine.high %v72_v52, %v72_v52  ;;  %v18297_v57 = vld [vmem:[%s28291_s24 + $0x164] ss:$16 sps:$4 sm:$0xff]   ;;  %v18301_v61 = vld [vmem:[%s28291_s24 + $0x160] ss:$16 sps:$4 sm:$0xff]  }
  0x29   :  { %5855 = vmatpush1.bf16.msra.mxu0 %v18265_v26  ;;  %v18299_v58 = vld [vmem:[%s28291_s24 + $0x364] ss:$16 sps:$4 sm:$0xff]   ;;  %v18302_v0 = vld [vmem:[%s28291_s24 + $0x360] ss:$16 sps:$4 sm:$0xff]  }
  0x2a   :  { %5896 = vmatpush1.bf16.msra.mxu1 %v18266_v27  ;;  %5856 = vmatprep.subr.bf16.mxu0 %v18267_v28  ;;  %v103_v59 = vcombine.high %v95_v54, %v95_v54  ;;  %v102_v60 = vrot.slane %v88_v55, %v21597_v49  ;;  %v18303_v1 = vld [vmem:[%s28291_s24 + $0x144] ss:$16 sps:$4 sm:$0xff]   ;;  %v18307_v4 = vld [vmem:[%s28291_s24 + $0x140] ss:$16 sps:$4 sm:$0xff]   ;;  %v21676_v16 = vpack.c.bf16 %v95_v54, %v95_v54 }
  0x2b   :  { %5897 = vmatprep.subr.bf16.mxu1 %v18269_v29  ;;  %v18305_v2 = vld [vmem:[%s28291_s24 + $0x344] ss:$16 sps:$4 sm:$0xff]   ;;  %v18308_v5 = vld [vmem:[%s28291_s24 + $0x340] ss:$16 sps:$4 sm:$0xff]  }
  0x2c   :  { %v21625_v62 = vpack.c.bf16 %v103_v59, %v103_v59  ;;  %v104_v63 = vcombine.high %v102_v60, %v102_v60  ;;  %v18309_v6 = vld [vmem:[%s28291_s24 + $0x124] ss:$16 sps:$4 sm:$0xff]   ;;  %v18313_v8 = vld [vmem:[%s28291_s24 + $0x120] ss:$16 sps:$4 sm:$0xff]   ;;  %v21678_v17 = vpack.c.bf16 %v102_v60, %v102_v60 }
  0x2d   :  { %5857 = vmatpush1.bf16.msra.mxu0 %v18271_v30  ;;  %v18311_v7 = vld [vmem:[%s28291_s24 + $0x324] ss:$16 sps:$4 sm:$0xff]   ;;  %v18314_v9 = vld [vmem:[%s28291_s24 + $0x320] ss:$16 sps:$4 sm:$0xff]  }
  0x2e   :  { %5898 = vmatpush1.bf16.msra.mxu1 %v18272_v31  ;;  %5858 = vmatprep.subr.bf16.mxu0 %v18273_v32  ;;  %v21636_v3 = vpack.c.bf16 %v104_v63, %v104_v63  ;;  %v18315_v10 = vld [vmem:[%s28291_s24 + $0x104] ss:$16 sps:$4 sm:$0xff]   ;;  %v18319_v12 = vld [vmem:[%s28291_s24 + $0x100] ss:$16 sps:$4 sm:$0xff]  }
  0x2f   :  { %5899 = vmatprep.subr.bf16.mxu1 %v18275_v33  ;;  %5874 = vmatprep.mubr.bf16.mxu0 %v21625_v62  ;;  %v18317_v11 = vld [vmem:[%s28291_s24 + $0x304] ss:$16 sps:$4 sm:$0xff]   ;;  %v18320_v13 = vld [vmem:[%s28291_s24 + $0x300] ss:$16 sps:$4 sm:$0xff]  }
  0x30   :  { %5915 = vmatprep.mubr.bf16.mxu1 %v21636_v3  ;;  %v18324_v14 = vld [vmem:[%s28291_s24 + $0x4e4] ss:$16 sps:$4 sm:$0xff]   ;;  %v18322_v18 = vld [vmem:[%s28291_s24 + $0x4e0] ss:$16 sps:$4 sm:$0xff]  }
  0x31   :  { %5859 = vmatpush2.bf16.msra.mxu0 %v18277_v34  ;;  %v18327_v15 = vld [vmem:[%s28291_s24 + $0x6e4] ss:$16 sps:$4 sm:$0xff]   ;;  %v18325_v19 = vld [vmem:[%s28291_s24 + $0x6e0] ss:$16 sps:$4 sm:$0xff]  }
  0x32   :  { %5900 = vmatpush2.bf16.msra.mxu1 %v18278_v35  ;;  %5860 = vmatprep.subr.bf16.mxu0 %v18279_v39  ;;  %v18330_v20 = vld [vmem:[%s28291_s24 + $0x4c4] ss:$16 sps:$4 sm:$0xff]   ;;  %v18328_v22 = vld [vmem:[%s28291_s24 + $0x4c0] ss:$16 sps:$4 sm:$0xff]  }
  0x33   :  { %5901 = vmatprep.subr.bf16.mxu1 %v18281_v40  ;;  %v18333_v21 = vld [vmem:[%s28291_s24 + $0x6c4] ss:$16 sps:$4 sm:$0xff]   ;;  %v18331_v23 = vld [vmem:[%s28291_s24 + $0x6c0] ss:$16 sps:$4 sm:$0xff]  }
  0x34   :  { %v18336_v24 = vld [vmem:[%s28291_s24 + $0x4a4] ss:$16 sps:$4 sm:$0xff]   ;;  %v18334_v26 = vld [vmem:[%s28291_s24 + $0x4a0] ss:$16 sps:$4 sm:$0xff]  }
  0x35   :  { %5861 = vmatpush2.bf16.msra.mxu0 %v18283_v41  ;;  %v18339_v25 = vld [vmem:[%s28291_s24 + $0x6a4] ss:$16 sps:$4 sm:$0xff]   ;;  %v18337_v27 = vld [vmem:[%s28291_s24 + $0x6a0] ss:$16 sps:$4 sm:$0xff]  }
  0x36   :  { %5902 = vmatpush2.bf16.msra.mxu1 %v18284_v44  ;;  %5862 = vmatprep.subr.bf16.mxu0 %v18285_v45  ;;  %v18342_v28 = vld [vmem:[%s28291_s24 + $0x484] ss:$16 sps:$4 sm:$0xff]   ;;  %v18340_v30 = vld [vmem:[%s28291_s24 + $0x480] ss:$16 sps:$4 sm:$0xff]   ;;  %v21758_v44 = vrot.slane %v73_v42, %v21597_v49  ;;  %v105_v45 = vcombine.high %v73_v42, %v73_v42 }
  0x37   :  { %5903 = vmatprep.subr.bf16.mxu1 %v18287_v46  ;;  %v18345_v29 = vld [vmem:[%s28291_s24 + $0x684] ss:$16 sps:$4 sm:$0xff]   ;;  %v18343_v31 = vld [vmem:[%s28291_s24 + $0x680] ss:$16 sps:$4 sm:$0xff]  }
  0x38   :  { %v18348_v32 = vld [vmem:[%s28291_s24 + $0x464] ss:$16 sps:$4 sm:$0xff]   ;;  %v18346_v34 = vld [vmem:[%s28291_s24 + $0x460] ss:$16 sps:$4 sm:$0xff]  }
  0x39   :  { %5863 = vmatpush2.bf16.msra.mxu0 %v18289_v47  ;;  %v18351_v33 = vld [vmem:[%s28291_s24 + $0x664] ss:$16 sps:$4 sm:$0xff]   ;;  %v18349_v35 = vld [vmem:[%s28291_s24 + $0x660] ss:$16 sps:$4 sm:$0xff]  }
  0x3a   :  { %5904 = vmatpush2.bf16.msra.mxu1 %v18290_v48  ;;  %5864 = vmatprep.subr.bf16.mxu0 %v18291_v50  ;;  %v18354_v36 = vld [vmem:[%s28291_s24 + $0x444] ss:$16 sps:$4 sm:$0xff]   ;;  %v18352_v38 = vld [vmem:[%s28291_s24 + $0x440] ss:$16 sps:$4 sm:$0xff]   ;;  %v120_v48 = vcombine.high %v21758_v44, %v21758_v44  ;;  %v21769_v50 = vrot.slane %v105_v45, %v21597_v49 }
  0x3b   :  { %5905 = vmatprep.subr.bf16.mxu1 %v18293_v51  ;;  %v18357_v37 = vld [vmem:[%s28291_s24 + $0x644] ss:$16 sps:$4 sm:$0xff]   ;;  %v18355_v39 = vld [vmem:[%s28291_s24 + $0x640] ss:$16 sps:$4 sm:$0xff]  }
  0x3c   :  { %v18360_v40 = vld [vmem:[%s28291_s24 + $0x424] ss:$16 sps:$4 sm:$0xff]   ;;  %v18358_v46 = vld [vmem:[%s28291_s24 + $0x420] ss:$16 sps:$4 sm:$0xff]   ;;  %v121_v54 = vcombine.high %v21769_v50, %v21769_v50 }
  0x3d   :  { %5865 = vmatpush2.bf16.msra.mxu0 %v18295_v53  ;;  %v18363_v41 = vld [vmem:[%s28291_s24 + $0x624] ss:$16 sps:$4 sm:$0xff]   ;;  %v18361_v47 = vld [vmem:[%s28291_s24 + $0x620] ss:$16 sps:$4 sm:$0xff]   ;;  %v21777_v53 = vpack.c.bf16 %v120_v48, %v120_v48 }
  0x3e   :  { %5906 = vmatpush2.bf16.msra.mxu1 %v18296_v56  ;;  %5866 = vmatprep.subr.bf16.mxu0 %v18297_v57  ;;  %v18366_v51 = vld [vmem:[%s28291_s24 + $0x404] ss:$16 sps:$4 sm:$0xff]   ;;  %v18364_v55 = vld [vmem:[%s28291_s24 + $0x400] ss:$16 sps:$4 sm:$0xff]   ;;  %v21787_v57 = vpack.c.bf16 %v121_v54, %v121_v54 }
  0x3f   :  { %5907 = vmatprep.subr.bf16.mxu1 %v18299_v58  ;;  %v18369_v52 = vld [vmem:[%s28291_s24 + $0x604] ss:$16 sps:$4 sm:$0xff]   ;;  %v18367_v56 = vld [vmem:[%s28291_s24 + $0x600] ss:$16 sps:$4 sm:$0xff]  }
  0x40   :  { %v18372_v58 = vld [vmem:[%s28291_s24 + $0x5e4] ss:$16 sps:$4 sm:$0xff]   ;;  %v18370_v60 = vld [vmem:[%s28291_s24 + $0x5e0] ss:$16 sps:$4 sm:$0xff]  }
  0x41   :  { %5867 = vmatpush2.bf16.msra.mxu0 %v18301_v61  ;;  %v18375_v59 = vld [vmem:[%s28291_s24 + $0x7e4] ss:$16 sps:$4 sm:$0xff]   ;;  %v18373_v61 = vld [vmem:[%s28291_s24 + $0x7e0] ss:$16 sps:$4 sm:$0xff]  }
  0x42   :  { %5908 = vmatpush2.bf16.msra.mxu1 %v18302_v0  ;;  %5868 = vmatprep.subr.bf16.mxu0 %v18303_v1  ;;  %v18378_v63 = vld [vmem:[%s28291_s24 + $0x5c4] ss:$16 sps:$4 sm:$0xff]   ;;  %v18376_v1 = vld [vmem:[%s28291_s24 + $0x5c0] ss:$16 sps:$4 sm:$0xff]  }
  0x43   :  { %5909 = vmatprep.subr.bf16.mxu1 %v18305_v2  ;;  %v18381_v0 = vld [vmem:[%s28291_s24 + $0x7c4] ss:$16 sps:$4 sm:$0xff]   ;;  %v18379_v2 = vld [vmem:[%s28291_s24 + $0x7c0] ss:$16 sps:$4 sm:$0xff]  }
  0x44   :  { %v18428_v45 = vld [vmem:[%s28291_s24 + $0xac0] ss:$16 sps:$4 sm:$0xff]  }
  0x45   :  { %5869 = vmatpush2.bf16.msra.mxu0 %v18307_v4  ;;  %v18384_v4 = vld [vmem:[%s28291_s24 + $0x5a4] ss:$16 sps:$4 sm:$0xff]   ;;  %v18434_v54 = vld [vmem:[%s28291_s24 + $0xaa0] ss:$16 sps:$4 sm:$0xff]  }
  0x46   :  { %5910 = vmatpush2.bf16.msra.mxu1 %v18308_v5  ;;  %5870 = vmatprep.subr.bf16.mxu0 %v18309_v6  ;;  %v18387_v5 = vld [vmem:[%s28291_s24 + $0x7a4] ss:$16 sps:$4 sm:$0xff]   ;;  %v18382_v6 = vld [vmem:[%s28291_s24 + $0x5a0] ss:$16 sps:$4 sm:$0xff]  }
  0x47   :  { %5911 = vmatprep.subr.bf16.mxu1 %v18311_v7  ;;  %v18385_v7 = vld [vmem:[%s28291_s24 + $0x7a0] ss:$16 sps:$4 sm:$0xff]  }
  0x49   :  { %5871 = vmatpush2.bf16.msra.mxu0 %v18313_v8  ;;  %v18390_v8 = vld [vmem:[%s28291_s24 + $0x584] ss:$16 sps:$4 sm:$0xff]  }
  0x4a   :  { %5912 = vmatpush2.bf16.msra.mxu1 %v18314_v9  ;;  %5872 = vmatprep.subr.bf16.mxu0 %v18315_v10  ;;  %v18393_v9 = vld [vmem:[%s28291_s24 + $0x784] ss:$16 sps:$4 sm:$0xff]   ;;  %v18388_v10 = vld [vmem:[%s28291_s24 + $0x580] ss:$16 sps:$4 sm:$0xff]  }
  0x4b   :  { %5913 = vmatprep.subr.bf16.mxu1 %v18317_v11  ;;  %v18391_v11 = vld [vmem:[%s28291_s24 + $0x780] ss:$16 sps:$4 sm:$0xff]  }
  0x4d   :  { %5873 = vmatpush2.bf16.msra.mxu0 %v18319_v12  ;;  %v18396_v12 = vld [vmem:[%s28291_s24 + $0x564] ss:$16 sps:$4 sm:$0xff]  }
  0x4e   :  { %5914 = vmatpush2.bf16.msra.mxu1 %v18320_v13  ;;  %5924 = vmatprep.subr.bf16.mxu0 %v18324_v14  ;;  %v18399_v13 = vld [vmem:[%s28291_s24 + $0x764] ss:$16 sps:$4 sm:$0xff]   ;;  %v18394_v14 = vld [vmem:[%s28291_s24 + $0x560] ss:$16 sps:$4 sm:$0xff]  }
  0x4f   :  { %5965 = vmatprep.subr.bf16.mxu1 %v18327_v15  ;;  %v18397_v15 = vld [vmem:[%s28291_s24 + $0x760] ss:$16 sps:$4 sm:$0xff]  }
  0x50   :  { %5875 = vmatmul.mubr.bf16.vlgmr.msra.gmra.mxu0 %v21676_v16 }
  0x51   :  { %5916 = vmatmul.mubr.bf16.vlgmr.msra.gmra.mxu1 %v21678_v17  ;;  %5925 = vmatpush1.bf16.msra.mxu0 %v18322_v18  ;;  %v18402_v18 = vld [vmem:[%s28291_s24 + $0x544] ss:$16 sps:$4 sm:$0xff]  }
  0x52   :  { %5966 = vmatpush1.bf16.msra.mxu1 %v18325_v19  ;;  %5926 = vmatprep.subr.bf16.mxu0 %v18330_v20  ;;  %v18405_v19 = vld [vmem:[%s28291_s24 + $0x744] ss:$16 sps:$4 sm:$0xff]   ;;  %v18400_v20 = vld [vmem:[%s28291_s24 + $0x540] ss:$16 sps:$4 sm:$0xff]  }
  0x53   :  { %5967 = vmatprep.subr.bf16.mxu1 %v18333_v21  ;;  %5956 = vmatprep.mubr.bf16.mxu0 %v21777_v53  ;;  %v18403_v21 = vld [vmem:[%s28291_s24 + $0x740] ss:$16 sps:$4 sm:$0xff]  }
  0x54   :  { %5997 = vmatprep.mubr.bf16.mxu1 %v21787_v57 }
  0x55   :  { %5927 = vmatpush1.bf16.msra.mxu0 %v18328_v22  ;;  %v18408_v22 = vld [vmem:[%s28291_s24 + $0x524] ss:$16 sps:$4 sm:$0xff]  }
  0x56   :  { %5968 = vmatpush1.bf16.msra.mxu1 %v18331_v23  ;;  %5928 = vmatprep.subr.bf16.mxu0 %v18336_v24  ;;  %v18411_v23 = vld [vmem:[%s28291_s24 + $0x724] ss:$16 sps:$4 sm:$0xff]   ;;  %v18406_v24 = vld [vmem:[%s28291_s24 + $0x520] ss:$16 sps:$4 sm:$0xff]  }
  0x57   :  { %5969 = vmatprep.subr.bf16.mxu1 %v18339_v25  ;;  %v18409_v25 = vld [vmem:[%s28291_s24 + $0x720] ss:$16 sps:$4 sm:$0xff]  }
  0x59   :  { %5929 = vmatpush1.bf16.msra.mxu0 %v18334_v26  ;;  %v18414_v26 = vld [vmem:[%s28291_s24 + $0x504] ss:$16 sps:$4 sm:$0xff]  }
  0x5a   :  { %5970 = vmatpush1.bf16.msra.mxu1 %v18337_v27  ;;  %5930 = vmatprep.subr.bf16.mxu0 %v18342_v28  ;;  %v18417_v27 = vld [vmem:[%s28291_s24 + $0x704] ss:$16 sps:$4 sm:$0xff]   ;;  %v18412_v28 = vld [vmem:[%s28291_s24 + $0x500] ss:$16 sps:$4 sm:$0xff]  }
  0x5b   :  { %5971 = vmatprep.subr.bf16.mxu1 %v18345_v29  ;;  %v18415_v29 = vld [vmem:[%s28291_s24 + $0x700] ss:$16 sps:$4 sm:$0xff]  }
  0x5d   :  { %5931 = vmatpush1.bf16.msra.mxu0 %v18340_v30  ;;  %v18421_v30 = vld [vmem:[%s28291_s24 + $0x8e4] ss:$16 sps:$4 sm:$0xff]  }
  0x5e   :  { %5972 = vmatpush1.bf16.msra.mxu1 %v18343_v31  ;;  %5932 = vmatprep.subr.bf16.mxu0 %v18348_v32  ;;  %v18424_v31 = vld [vmem:[%s28291_s24 + $0xae4] ss:$16 sps:$4 sm:$0xff]   ;;  %v21895_v32 = vpack.c.bf16 %v21758_v44, %v21758_v44 }
  0x5f   :  { %5973 = vmatprep.subr.bf16.mxu1 %v18351_v33  ;;  %v21899_v33 = vpack.c.bf16 %v21769_v50, %v21769_v50 }
  0x61   :  { %5933 = vmatpush1.bf16.msra.mxu0 %v18346_v34  ;;  %v18419_v34 = vld [vmem:[%s28291_s24 + $0x8e0] ss:$16 sps:$4 sm:$0xff]  }
  0x62   :  { %5974 = vmatpush1.bf16.msra.mxu1 %v18349_v35  ;;  %5934 = vmatprep.subr.bf16.mxu0 %v18354_v36  ;;  %v18422_v35 = vld [vmem:[%s28291_s24 + $0xae0] ss:$16 sps:$4 sm:$0xff]   ;;  %v18427_v36 = vld [vmem:[%s28291_s24 + $0x8c4] ss:$16 sps:$4 sm:$0xff]  }
  0x63   :  { %5975 = vmatprep.subr.bf16.mxu1 %v18357_v37  ;;  %v74_v37 = vld [vmem:[%s28292_s28 + $0x10] sm:$0xff] }
  0x65   :  { %5935 = vmatpush1.bf16.msra.mxu0 %v18352_v38  ;;  %v18430_v38 = vld [vmem:[%s28291_s24 + $0xac4] ss:$16 sps:$4 sm:$0xff]  }
  0x66   :  { %5976 = vmatpush1.bf16.msra.mxu1 %v18355_v39  ;;  %5936 = vmatprep.subr.bf16.mxu0 %v18360_v40  ;;  %v21917_v39 = vrot.slane %v74_v37, %v21597_v49  ;;  %v122_v40 = vcombine.high %v74_v37, %v74_v37  ;;  %v18494_v37 = vld [vmem:[%s28291_s24 + $0xb60] ss:$16 sps:$4 sm:$0xff]  }
  0x67   :  { %5977 = vmatprep.subr.bf16.mxu1 %v18363_v41  ;;  %v18425_v41 = vld [vmem:[%s28291_s24 + $0x8c0] ss:$16 sps:$4 sm:$0xff]  }
  0x68   :  { %v137_v42 = vcombine.high %v21917_v39, %v21917_v39  ;;  %v21927_v44 = vrot.slane %v122_v40, %v21597_v49  ;;  %v18502_v40 = vld [vmem:[%s28291_s24 + $0xb44] ss:$16 sps:$4 sm:$0xff]  }
  0x69   :  { %5937 = vmatpush1.bf16.msra.mxu0 %v18358_v46  ;;  %v18433_v46 = vld [vmem:[%s28291_s24 + $0x8a4] ss:$16 sps:$4 sm:$0xff]  }
  0x6a   :  { %5978 = vmatpush1.bf16.msra.mxu1 %v18361_v47  ;;  %5938 = vmatprep.subr.bf16.mxu0 %v18366_v51  ;;  %v18436_v47 = vld [vmem:[%s28291_s24 + $0xaa4] ss:$16 sps:$4 sm:$0xff]   ;;  %v21938_v48 = vpack.c.bf16 %v137_v42, %v137_v42  ;;  %v138_v50 = vcombine.high %v21927_v44, %v21927_v44  ;;  %v18431_v51 = vld [vmem:[%s28291_s24 + $0x8a0] ss:$16 sps:$4 sm:$0xff]   ;;  %v75_v42 = vld [vmem:[%s28292_s28 + $0x18] sm:$0xff] }
  0x6b   :  { %5979 = vmatprep.subr.bf16.mxu1 %v18369_v52 }
  0x6c   :  { %v21946_v52 = vpack.c.bf16 %v138_v50, %v138_v50  ;;  %v139_v50 = vcombine.high %v75_v42, %v75_v42 }
  0x6d   :  { %5939 = vmatpush1.bf16.msra.mxu0 %v18364_v55  ;;  %v18439_v55 = vld [vmem:[%s28291_s24 + $0x884] ss:$16 sps:$4 sm:$0xff]  }
  0x6e   :  { %5980 = vmatpush1.bf16.msra.mxu1 %v18367_v56  ;;  %5940 = vmatprep.subr.bf16.mxu0 %v18372_v58  ;;  %v18442_v56 = vld [vmem:[%s28291_s24 + $0xa84] ss:$16 sps:$4 sm:$0xff]   ;;  %v18437_v58 = vld [vmem:[%s28291_s24 + $0x880] ss:$16 sps:$4 sm:$0xff]  }
  0x6f   :  { %5981 = vmatprep.subr.bf16.mxu1 %v18375_v59  ;;  %v18440_v59 = vld [vmem:[%s28291_s24 + $0xa80] ss:$16 sps:$4 sm:$0xff]  }
  0x71   :  { %5941 = vmatpush2.bf16.msra.mxu0 %v18370_v60  ;;  %v18445_v60 = vld [vmem:[%s28291_s24 + $0x864] ss:$16 sps:$4 sm:$0xff]  }
  0x72   :  { %5982 = vmatpush2.bf16.msra.mxu1 %v18373_v61  ;;  %5942 = vmatprep.subr.bf16.mxu0 %v18378_v63  ;;  %v18448_v61 = vld [vmem:[%s28291_s24 + $0xa64] ss:$16 sps:$4 sm:$0xff]   ;;  %v18443_v63 = vld [vmem:[%s28291_s24 + $0x860] ss:$16 sps:$4 sm:$0xff]  }
  0x73   :  { %5983 = vmatprep.subr.bf16.mxu1 %v18381_v0  ;;  %v18446_v0 = vld [vmem:[%s28291_s24 + $0xa60] ss:$16 sps:$4 sm:$0xff]  }
  0x75   :  { %5943 = vmatpush2.bf16.msra.mxu0 %v18376_v1  ;;  %v18451_v1 = vld [vmem:[%s28291_s24 + $0x844] ss:$16 sps:$4 sm:$0xff]  }
  0x76   :  { %5984 = vmatpush2.bf16.msra.mxu1 %v18379_v2  ;;  %5944 = vmatprep.subr.bf16.mxu0 %v18384_v4  ;;  %v18454_v2 = vld [vmem:[%s28291_s24 + $0xa44] ss:$16 sps:$4 sm:$0xff]   ;;  %v18449_v4 = vld [vmem:[%s28291_s24 + $0x840] ss:$16 sps:$4 sm:$0xff]  }
  0x77   :  { %5985 = vmatprep.subr.bf16.mxu1 %v18387_v5  ;;  %v18452_v5 = vld [vmem:[%s28291_s24 + $0xa40] ss:$16 sps:$4 sm:$0xff]  }
  0x79   :  { %5945 = vmatpush2.bf16.msra.mxu0 %v18382_v6  ;;  %v18457_v6 = vld [vmem:[%s28291_s24 + $0x824] ss:$16 sps:$4 sm:$0xff]  }
  0x7a   :  { %5986 = vmatpush2.bf16.msra.mxu1 %v18385_v7  ;;  %5946 = vmatprep.subr.bf16.mxu0 %v18390_v8  ;;  %v18460_v7 = vld [vmem:[%s28291_s24 + $0xa24] ss:$16 sps:$4 sm:$0xff]   ;;  %v18455_v8 = vld [vmem:[%s28291_s24 + $0x820] ss:$16 sps:$4 sm:$0xff]  }
  0x7b   :  { %5987 = vmatprep.subr.bf16.mxu1 %v18393_v9  ;;  %v18458_v9 = vld [vmem:[%s28291_s24 + $0xa20] ss:$16 sps:$4 sm:$0xff]  }
  0x7d   :  { %5947 = vmatpush2.bf16.msra.mxu0 %v18388_v10  ;;  %v18463_v10 = vld [vmem:[%s28291_s24 + $0x804] ss:$16 sps:$4 sm:$0xff]  }
  0x7e   :  { %5988 = vmatpush2.bf16.msra.mxu1 %v18391_v11  ;;  %5948 = vmatprep.subr.bf16.mxu0 %v18396_v12  ;;  %v18466_v11 = vld [vmem:[%s28291_s24 + $0xa04] ss:$16 sps:$4 sm:$0xff]   ;;  %v18461_v12 = vld [vmem:[%s28291_s24 + $0x800] ss:$16 sps:$4 sm:$0xff]  }
  0x7f   :  { %5989 = vmatprep.subr.bf16.mxu1 %v18399_v13  ;;  %v18464_v13 = vld [vmem:[%s28291_s24 + $0xa00] ss:$16 sps:$4 sm:$0xff]  }
  0x81   :  { %5949 = vmatpush2.bf16.msra.mxu0 %v18394_v14  ;;  %v18469_v14 = vld [vmem:[%s28291_s24 + $0x9e4] ss:$16 sps:$4 sm:$0xff]  }
  0x82   :  { %5990 = vmatpush2.bf16.msra.mxu1 %v18397_v15  ;;  %5950 = vmatprep.subr.bf16.mxu0 %v18402_v18  ;;  %v18472_v15 = vld [vmem:[%s28291_s24 + $0xbe4] ss:$16 sps:$4 sm:$0xff]   ;;  %v18467_v18 = vld [vmem:[%s28291_s24 + $0x9e0] ss:$16 sps:$4 sm:$0xff]  }
  0x83   :  { %5991 = vmatprep.subr.bf16.mxu1 %v18405_v19  ;;  %v18470_v19 = vld [vmem:[%s28291_s24 + $0xbe0] ss:$16 sps:$4 sm:$0xff]  }
  0x85   :  { %5951 = vmatpush2.bf16.msra.mxu0 %v18400_v20  ;;  %v18475_v20 = vld [vmem:[%s28291_s24 + $0x9c4] ss:$16 sps:$4 sm:$0xff]  }
  0x86   :  { %5992 = vmatpush2.bf16.msra.mxu1 %v18403_v21  ;;  %5952 = vmatprep.subr.bf16.mxu0 %v18408_v22  ;;  %v18478_v21 = vld [vmem:[%s28291_s24 + $0xbc4] ss:$16 sps:$4 sm:$0xff]   ;;  %v18473_v22 = vld [vmem:[%s28291_s24 + $0x9c0] ss:$16 sps:$4 sm:$0xff]  }
  0x87   :  { %5993 = vmatprep.subr.bf16.mxu1 %v18411_v23  ;;  %v18476_v23 = vld [vmem:[%s28291_s24 + $0xbc0] ss:$16 sps:$4 sm:$0xff]  }
  0x89   :  { %5953 = vmatpush2.bf16.msra.mxu0 %v18406_v24  ;;  %v18481_v24 = vld [vmem:[%s28291_s24 + $0x9a4] ss:$16 sps:$4 sm:$0xff]  }
  0x8a   :  { %5994 = vmatpush2.bf16.msra.mxu1 %v18409_v25  ;;  %5954 = vmatprep.subr.bf16.mxu0 %v18414_v26  ;;  %v18484_v25 = vld [vmem:[%s28291_s24 + $0xba4] ss:$16 sps:$4 sm:$0xff]   ;;  %v18479_v26 = vld [vmem:[%s28291_s24 + $0x9a0] ss:$16 sps:$4 sm:$0xff]  }
  0x8b   :  { %5995 = vmatprep.subr.bf16.mxu1 %v18417_v27  ;;  %v18482_v27 = vld [vmem:[%s28291_s24 + $0xba0] ss:$16 sps:$4 sm:$0xff]  }
  0x8d   :  { %5955 = vmatpush2.bf16.msra.mxu0 %v18412_v28  ;;  %v18487_v28 = vld [vmem:[%s28291_s24 + $0x984] ss:$16 sps:$4 sm:$0xff]  }
  0x8e   :  { %5996 = vmatpush2.bf16.msra.mxu1 %v18415_v29  ;;  %6006 = vmatprep.subr.bf16.mxu0 %v18421_v30  ;;  %v18490_v29 = vld [vmem:[%s28291_s24 + $0xb84] ss:$16 sps:$4 sm:$0xff]   ;;  %v18485_v30 = vld [vmem:[%s28291_s24 + $0x980] ss:$16 sps:$4 sm:$0xff]  }
  0x8f   :  { %6047 = vmatprep.subr.bf16.mxu1 %v18424_v31  ;;  %v18488_v31 = vld [vmem:[%s28291_s24 + $0xb80] ss:$16 sps:$4 sm:$0xff]  }
  0x90   :  { %5957 = vmatmul.mubr.bf16.vlgmr.msra.gmra.mxu0 %v21895_v32 }
  0x91   :  { %5998 = vmatmul.mubr.bf16.vlgmr.msra.gmra.mxu1 %v21899_v33  ;;  %6007 = vmatpush1.bf16.msra.mxu0 %v18419_v34  ;;  %v18493_v34 = vld [vmem:[%s28291_s24 + $0x964] ss:$16 sps:$4 sm:$0xff]  }
  0x92   :  { %6048 = vmatpush1.bf16.msra.mxu1 %v18422_v35  ;;  %6008 = vmatprep.subr.bf16.mxu0 %v18427_v36  ;;  %v18496_v35 = vld [vmem:[%s28291_s24 + $0xb64] ss:$16 sps:$4 sm:$0xff]   ;;  %v18491_v36 = vld [vmem:[%s28291_s24 + $0x960] ss:$16 sps:$4 sm:$0xff]  }
  0x93   :  { %6049 = vmatprep.subr.bf16.mxu1 %v18430_v38  ;;  %6038 = vmatprep.mubr.bf16.mxu0 %v21938_v48  ;;  %v18499_v38 = vld [vmem:[%s28291_s24 + $0x944] ss:$16 sps:$4 sm:$0xff]  }
  0x94   :  { %6079 = vmatprep.mubr.bf16.mxu1 %v21946_v52 }
  0x95   :  { %6009 = vmatpush1.bf16.msra.mxu0 %v18425_v41  ;;  %v18497_v41 = vld [vmem:[%s28291_s24 + $0x940] ss:$16 sps:$4 sm:$0xff]  }
  0x96   :  { %6050 = vmatpush1.bf16.msra.mxu1 %v18428_v45  ;;  %6010 = vmatprep.subr.bf16.mxu0 %v18433_v46  ;;  %v18500_v45 = vld [vmem:[%s28291_s24 + $0xb40] ss:$16 sps:$4 sm:$0xff]   ;;  %v18505_v46 = vld [vmem:[%s28291_s24 + $0x924] ss:$16 sps:$4 sm:$0xff]  }
  0x97   :  { %6051 = vmatprep.subr.bf16.mxu1 %v18436_v47  ;;  %v18508_v47 = vld [vmem:[%s28291_s24 + $0xb24] ss:$16 sps:$4 sm:$0xff]  }
  0x99   :  { %6011 = vmatpush1.bf16.msra.mxu0 %v18431_v51  ;;  %v18503_v51 = vld [vmem:[%s28291_s24 + $0x920] ss:$16 sps:$4 sm:$0xff]  }
  0x9a   :  { %6052 = vmatpush1.bf16.msra.mxu1 %v18434_v54  ;;  %6012 = vmatprep.subr.bf16.mxu0 %v18439_v55  ;;  %v18506_v54 = vld [vmem:[%s28291_s24 + $0xb20] ss:$16 sps:$4 sm:$0xff]   ;;  %v18511_v55 = vld [vmem:[%s28291_s24 + $0x904] ss:$16 sps:$4 sm:$0xff]  }
  0x9b   :  { %6053 = vmatprep.subr.bf16.mxu1 %v18442_v56  ;;  %v18514_v56 = vld [vmem:[%s28291_s24 + $0xb04] ss:$16 sps:$4 sm:$0xff]  }
  0x9d   :  { %6013 = vmatpush1.bf16.msra.mxu0 %v18437_v58  ;;  %v22106_v58 = vrot.slane %v75_v42, %v21597_v49  ;;  %v18569_v42 = vld [vmem:[%s28291_s24 + $0xfe4] ss:$16 sps:$4 sm:$0xff]  }
  0x9e   :  { %6054 = vmatpush1.bf16.msra.mxu1 %v18440_v59  ;;  %6014 = vmatprep.subr.bf16.mxu0 %v18445_v60  ;;  %v22109_v59 = vrot.slane %v139_v50, %v21597_v49  ;;  %v18509_v60 = vld [vmem:[%s28291_s24 + $0x900] ss:$16 sps:$4 sm:$0xff]   ;;  %v18575_v50 = vld [vmem:[%s28291_s24 + $0xfc4] ss:$16 sps:$4 sm:$0xff]  }
  0x9f   :  { %6055 = vmatprep.subr.bf16.mxu1 %v18448_v61  ;;  %v18512_v61 = vld [vmem:[%s28291_s24 + $0xb00] ss:$16 sps:$4 sm:$0xff]  }
  0xa1   :  { %6015 = vmatpush1.bf16.msra.mxu0 %v18443_v63  ;;  %v18518_v63 = vld [vmem:[%s28291_s24 + $0xce4] ss:$16 sps:$4 sm:$0xff]  }
  0xa2   :  { %6056 = vmatpush1.bf16.msra.mxu1 %v18446_v0  ;;  %6016 = vmatprep.subr.bf16.mxu0 %v18451_v1  ;;  %v18521_v0 = vld [vmem:[%s28291_s24 + $0xee4] ss:$16 sps:$4 sm:$0xff]   ;;  %v154_v1 = vcombine.high %v22106_v58, %v22106_v58 }
  0xa3   :  { %6057 = vmatprep.subr.bf16.mxu1 %v18454_v2  ;;  %v155_v2 = vcombine.high %v22109_v59, %v22109_v59 }
  0xa5   :  { %6017 = vmatpush1.bf16.msra.mxu0 %v18449_v4  ;;  %v22129_v4 = vpack.c.bf16 %v21917_v39, %v21917_v39  ;;  %v18524_v39 = vld [vmem:[%s28291_s24 + $0xcc4] ss:$16 sps:$4 sm:$0xff]  }
  0xa6   :  { %6058 = vmatpush1.bf16.msra.mxu1 %v18452_v5  ;;  %6018 = vmatprep.subr.bf16.mxu0 %v18457_v6  ;;  %v22133_v5 = vpack.c.bf16 %v21927_v44, %v21927_v44  ;;  %v18516_v6 = vld [vmem:[%s28291_s24 + $0xce0] ss:$16 sps:$4 sm:$0xff]   ;;  %v18527_v44 = vld [vmem:[%s28291_s24 + $0xec4] ss:$16 sps:$4 sm:$0xff]  }
  0xa7   :  { %6059 = vmatprep.subr.bf16.mxu1 %v18460_v7  ;;  %v18519_v7 = vld [vmem:[%s28291_s24 + $0xee0] ss:$16 sps:$4 sm:$0xff]  }
  0xa9   :  { %6019 = vmatpush1.bf16.msra.mxu0 %v18455_v8  ;;  %v22147_v8 = vpack.c.bf16 %v154_v1, %v154_v1  ;;  %v18582_v1 = vld [vmem:[%s28291_s24 + $0xd80] ss:$16 sps:$4 sm:$0xff]  }
  0xaa   :  { %6060 = vmatpush1.bf16.msra.mxu1 %v18458_v9  ;;  %6020 = vmatprep.subr.bf16.mxu0 %v18463_v10  ;;  %v22149_v9 = vpack.c.bf16 %v155_v2, %v155_v2  ;;  %v18522_v10 = vld [vmem:[%s28291_s24 + $0xcc0] ss:$16 sps:$4 sm:$0xff]  }
  0xab   :  { %6061 = vmatprep.subr.bf16.mxu1 %v18466_v11  ;;  %v18525_v11 = vld [vmem:[%s28291_s24 + $0xec0] ss:$16 sps:$4 sm:$0xff]  }
  0xac   :  { %v18585_v2 = vld [vmem:[%s28291_s24 + $0xf80] ss:$16 sps:$4 sm:$0xff]  }
  0xad   :  { %6021 = vmatpush1.bf16.msra.mxu0 %v18461_v12  ;;  %v18530_v12 = vld [vmem:[%s28291_s24 + $0xca4] ss:$16 sps:$4 sm:$0xff]  }
  0xae   :  { %6062 = vmatpush1.bf16.msra.mxu1 %v18464_v13  ;;  %6022 = vmatprep.subr.bf16.mxu0 %v18469_v14  ;;  %v18533_v13 = vld [vmem:[%s28291_s24 + $0xea4] ss:$16 sps:$4 sm:$0xff]   ;;  %v18528_v14 = vld [vmem:[%s28291_s24 + $0xca0] ss:$16 sps:$4 sm:$0xff]  }
  0xaf   :  { %6063 = vmatprep.subr.bf16.mxu1 %v18472_v15  ;;  %v18531_v15 = vld [vmem:[%s28291_s24 + $0xea0] ss:$16 sps:$4 sm:$0xff]  }
  0xb1   :  { %6023 = vmatpush2.bf16.msra.mxu0 %v18467_v18  ;;  %v18536_v18 = vld [vmem:[%s28291_s24 + $0xc84] ss:$16 sps:$4 sm:$0xff]  }
  0xb2   :  { %6064 = vmatpush2.bf16.msra.mxu1 %v18470_v19  ;;  %6024 = vmatprep.subr.bf16.mxu0 %v18475_v20  ;;  %v18539_v19 = vld [vmem:[%s28291_s24 + $0xe84] ss:$16 sps:$4 sm:$0xff]   ;;  %v18534_v20 = vld [vmem:[%s28291_s24 + $0xc80] ss:$16 sps:$4 sm:$0xff]  }
  0xb3   :  { %6065 = vmatprep.subr.bf16.mxu1 %v18478_v21  ;;  %v18537_v21 = vld [vmem:[%s28291_s24 + $0xe80] ss:$16 sps:$4 sm:$0xff]  }
  0xb5   :  { %6025 = vmatpush2.bf16.msra.mxu0 %v18473_v22  ;;  %v18542_v22 = vld [vmem:[%s28291_s24 + $0xc64] ss:$16 sps:$4 sm:$0xff]  }
  0xb6   :  { %6066 = vmatpush2.bf16.msra.mxu1 %v18476_v23  ;;  %6026 = vmatprep.subr.bf16.mxu0 %v18481_v24  ;;  %v18545_v23 = vld [vmem:[%s28291_s24 + $0xe64] ss:$16 sps:$4 sm:$0xff]   ;;  %v18540_v24 = vld [vmem:[%s28291_s24 + $0xc60] ss:$16 sps:$4 sm:$0xff]  }
  0xb7   :  { %6067 = vmatprep.subr.bf16.mxu1 %v18484_v25  ;;  %v18543_v25 = vld [vmem:[%s28291_s24 + $0xe60] ss:$16 sps:$4 sm:$0xff]  }
  0xb9   :  { %6027 = vmatpush2.bf16.msra.mxu0 %v18479_v26  ;;  %v18548_v26 = vld [vmem:[%s28291_s24 + $0xc44] ss:$16 sps:$4 sm:$0xff]  }
  0xba   :  { %6068 = vmatpush2.bf16.msra.mxu1 %v18482_v27  ;;  %6028 = vmatprep.subr.bf16.mxu0 %v18487_v28  ;;  %v18551_v27 = vld [vmem:[%s28291_s24 + $0xe44] ss:$16 sps:$4 sm:$0xff]   ;;  %v18546_v28 = vld [vmem:[%s28291_s24 + $0xc40] ss:$16 sps:$4 sm:$0xff]  }
  0xbb   :  { %6069 = vmatprep.subr.bf16.mxu1 %v18490_v29  ;;  %v18549_v29 = vld [vmem:[%s28291_s24 + $0xe40] ss:$16 sps:$4 sm:$0xff]  }
  0xbd   :  { %6029 = vmatpush2.bf16.msra.mxu0 %v18485_v30  ;;  %v18554_v30 = vld [vmem:[%s28291_s24 + $0xc24] ss:$16 sps:$4 sm:$0xff]  }
  0xbe   :  { %6070 = vmatpush2.bf16.msra.mxu1 %v18488_v31  ;;  %6030 = vmatprep.subr.bf16.mxu0 %v18493_v34  ;;  %v18557_v31 = vld [vmem:[%s28291_s24 + $0xe24] ss:$16 sps:$4 sm:$0xff]   ;;  %v18552_v34 = vld [vmem:[%s28291_s24 + $0xc20] ss:$16 sps:$4 sm:$0xff]  }
  0xbf   :  { %6071 = vmatprep.subr.bf16.mxu1 %v18496_v35  ;;  %v18555_v35 = vld [vmem:[%s28291_s24 + $0xe20] ss:$16 sps:$4 sm:$0xff]  }
  0xc1   :  { %6031 = vmatpush2.bf16.msra.mxu0 %v18491_v36  ;;  %v18560_v36 = vld [vmem:[%s28291_s24 + $0xc04] ss:$16 sps:$4 sm:$0xff]  }
  0xc2   :  { %6072 = vmatpush2.bf16.msra.mxu1 %v18494_v37  ;;  %6032 = vmatprep.subr.bf16.mxu0 %v18499_v38  ;;  %v18563_v37 = vld [vmem:[%s28291_s24 + $0xe04] ss:$16 sps:$4 sm:$0xff]   ;;  %v18558_v38 = vld [vmem:[%s28291_s24 + $0xc00] ss:$16 sps:$4 sm:$0xff]  }
  0xc3   :  { %6073 = vmatprep.subr.bf16.mxu1 %v18502_v40  ;;  %v18561_v40 = vld [vmem:[%s28291_s24 + $0xe00] ss:$16 sps:$4 sm:$0xff]  }
  0xc5   :  { %6033 = vmatpush2.bf16.msra.mxu0 %v18497_v41  ;;  %v18566_v41 = vld [vmem:[%s28291_s24 + $0xde4] ss:$16 sps:$4 sm:$0xff]  }
  0xc6   :  { %6074 = vmatpush2.bf16.msra.mxu1 %v18500_v45  ;;  %6034 = vmatprep.subr.bf16.mxu0 %v18505_v46  ;;  %v18564_v45 = vld [vmem:[%s28291_s24 + $0xde0] ss:$16 sps:$4 sm:$0xff]  }
  0xc7   :  { %6075 = vmatprep.subr.bf16.mxu1 %v18508_v47  ;;  %v18567_v46 = vld [vmem:[%s28291_s24 + $0xfe0] ss:$16 sps:$4 sm:$0xff]   ;;  %v18572_v47 = vld [vmem:[%s28291_s24 + $0xdc4] ss:$16 sps:$4 sm:$0xff]  }
  0xc9   :  { %6035 = vmatpush2.bf16.msra.mxu0 %v18503_v51  ;;  %v18570_v51 = vld [vmem:[%s28291_s24 + $0xdc0] ss:$16 sps:$4 sm:$0xff]  }
  0xca   :  { %6076 = vmatpush2.bf16.msra.mxu1 %v18506_v54  ;;  %6036 = vmatprep.subr.bf16.mxu0 %v18511_v55  ;;  %v18573_v54 = vld [vmem:[%s28291_s24 + $0xfc0] ss:$16 sps:$4 sm:$0xff]   ;;  %v18578_v55 = vld [vmem:[%s28291_s24 + $0xda4] ss:$16 sps:$4 sm:$0xff]  }
  0xcb   :  { %6077 = vmatprep.subr.bf16.mxu1 %v18514_v56  ;;  %v18581_v56 = vld [vmem:[%s28291_s24 + $0xfa4] ss:$16 sps:$4 sm:$0xff]  }
  0xcd   :  { %6037 = vmatpush2.bf16.msra.mxu0 %v18509_v60  ;;  %v18576_v60 = vld [vmem:[%s28291_s24 + $0xda0] ss:$16 sps:$4 sm:$0xff]  }
  0xce   :  { %6078 = vmatpush2.bf16.msra.mxu1 %v18512_v61  ;;  %6088 = vmatprep.subr.bf16.mxu0 %v18518_v63  ;;  %v18579_v61 = vld [vmem:[%s28291_s24 + $0xfa0] ss:$16 sps:$4 sm:$0xff]   ;;  %v18584_v63 = vld [vmem:[%s28291_s24 + $0xd84] ss:$16 sps:$4 sm:$0xff]  }
  0xcf   :  { %6129 = vmatprep.subr.bf16.mxu1 %v18521_v0  ;;  %v18587_v0 = vld [vmem:[%s28291_s24 + $0xf84] ss:$16 sps:$4 sm:$0xff]  }
  0xd0   :  { %6039 = vmatmul.mubr.bf16.vlgmr.msra.gmra.mxu0 %v22129_v4 }
  0xd1   :  { %6080 = vmatmul.mubr.bf16.vlgmr.msra.gmra.mxu1 %v22133_v5  ;;  %6089 = vmatpush1.bf16.msra.mxu0 %v18516_v6  ;;  %v18590_v6 = vld [vmem:[%s28291_s24 + $0xd64] ss:$16 sps:$4 sm:$0xff]  }
  0xd2   :  { %6130 = vmatpush1.bf16.msra.mxu1 %v18519_v7  ;;  %6090 = vmatprep.subr.bf16.mxu0 %v18524_v39  ;;  %v18593_v7 = vld [vmem:[%s28291_s24 + $0xf64] ss:$16 sps:$4 sm:$0xff]   ;;  %v18588_v39 = vld [vmem:[%s28291_s24 + $0xd60] ss:$16 sps:$4 sm:$0xff]  }
  0xd3   :  { %6131 = vmatprep.subr.bf16.mxu1 %v18527_v44  ;;  %6120 = vmatprep.mubr.bf16.mxu0 %v22147_v8  ;;  %v18591_v44 = vld [vmem:[%s28291_s24 + $0xf60] ss:$16 sps:$4 sm:$0xff]  }
  0xd4   :  { %6161 = vmatprep.mubr.bf16.mxu1 %v22149_v9 }
  0xd5   :  { %6091 = vmatpush1.bf16.msra.mxu0 %v18522_v10  ;;  %v18596_v10 = vld [vmem:[%s28291_s24 + $0xd44] ss:$16 sps:$4 sm:$0xff]  }
  0xd6   :  { %6132 = vmatpush1.bf16.msra.mxu1 %v18525_v11  ;;  %6092 = vmatprep.subr.bf16.mxu0 %v18530_v12  ;;  %v18599_v11 = vld [vmem:[%s28291_s24 + $0xf44] ss:$16 sps:$4 sm:$0xff]  }
  0xd7   :  { %6133 = vmatprep.subr.bf16.mxu1 %v18533_v13  ;;  %v76_v12 = vld [vmem:[%s28292_s28 + $0x20] sm:$0xff] }
  0xd8   :  { %v18594_v13 = vld [vmem:[%s28291_s24 + $0xd40] ss:$16 sps:$4 sm:$0xff]  }
  0xd9   :  { %6093 = vmatpush1.bf16.msra.mxu0 %v18528_v14  ;;  %v18597_v14 = vld [vmem:[%s28291_s24 + $0xf40] ss:$16 sps:$4 sm:$0xff]  }
  0xda   :  { %6134 = vmatpush1.bf16.msra.mxu1 %v18531_v15  ;;  %6094 = vmatprep.subr.bf16.mxu0 %v18536_v18  ;;  %v18602_v15 = vld [vmem:[%s28291_s24 + $0xd24] ss:$16 sps:$4 sm:$0xff]  }
  0xdb   :  { %6135 = vmatprep.subr.bf16.mxu1 %v18539_v19  ;;  %v18605_v18 = vld [vmem:[%s28291_s24 + $0xf24] ss:$16 sps:$4 sm:$0xff]   ;;  %v156_v19 = vcombine.high %v76_v12, %v76_v12 }
  0xdd   :  { %6095 = vmatpush1.bf16.msra.mxu0 %v18534_v20  ;;  %v18600_v20 = vld [vmem:[%s28291_s24 + $0xd20] ss:$16 sps:$4 sm:$0xff]  }
  0xde   :  { %6136 = vmatpush1.bf16.msra.mxu1 %v18537_v21  ;;  %6096 = vmatprep.subr.bf16.mxu0 %v18542_v22  ;;  %v18603_v21 = vld [vmem:[%s28291_s24 + $0xf20] ss:$16 sps:$4 sm:$0xff]   ;;  %v18608_v22 = vld [vmem:[%s28291_s24 + $0xd04] ss:$16 sps:$4 sm:$0xff]  }
  0xdf   :  { %6137 = vmatprep.subr.bf16.mxu1 %v18545_v23  ;;  %v18611_v23 = vld [vmem:[%s28291_s24 + $0xf04] ss:$16 sps:$4 sm:$0xff]  }
  0xe1   :  { %6097 = vmatpush1.bf16.msra.mxu0 %v18540_v24  ;;  %v22327_v24 = vrot.slane %v76_v12, %v21597_v49 }
  0xe2   :  { %6138 = vmatpush1.bf16.msra.mxu1 %v18543_v25  ;;  %6098 = vmatprep.subr.bf16.mxu0 %v18548_v26  ;;  %v22330_v25 = vrot.slane %v156_v19, %v21597_v49  ;;  %v18606_v26 = vld [vmem:[%s28291_s24 + $0xd00] ss:$16 sps:$4 sm:$0xff]   ;;  %v18639_v19 = vld [vmem:[%s28291_s24 + $0x1064] ss:$16 sps:$4 sm:$0xff]  }
  0xe3   :  { %6139 = vmatprep.subr.bf16.mxu1 %v18551_v27  ;;  %v18609_v27 = vld [vmem:[%s28291_s24 + $0xf00] ss:$16 sps:$4 sm:$0xff]  }
  0xe5   :  { %6099 = vmatpush1.bf16.msra.mxu0 %v18546_v28  ;;  %v1196_v28 = vld [vmem:[%s28293_s3] sm:$0xf] }
  0xe6   :  { %6140 = vmatpush1.bf16.msra.mxu1 %v18549_v29  ;;  %6100 = vmatprep.subr.bf16.mxu0 %v18554_v30  ;;  %v22342_v29 = vsub.s32 0, %v21579_v43  ;;  %v18615_v30 = vld [vmem:[%s28291_s24 + $0x10e4] ss:$16 sps:$4 sm:$0xff]  }
  0xe7   :  { %6141 = vmatprep.subr.bf16.mxu1 %v18557_v31  ;;  %v18618_v31 = vld [vmem:[%s28291_s24 + $0x12e4] ss:$16 sps:$4 sm:$0xff]  }
  0xe9   :  { %6101 = vmatpush1.bf16.msra.mxu0 %v18552_v34  ;;  %v22351_v34 = vsub.s32 1, %v21579_v43 }
  0xea   :  { %6142 = vmatpush1.bf16.msra.mxu1 %v18555_v35  ;;  %6102 = vmatprep.subr.bf16.mxu0 %v18560_v36  ;;  %v171_v35 = vcombine.high %v22327_v24, %v22327_v24  ;;  %v172_v36 = vcombine.high %v22330_v25, %v22330_v25 }
  0xeb   :  { %6143 = vmatprep.subr.bf16.mxu1 %v18563_v37  ;;  %v22359_v37 = vpack.c.bf16 %v22106_v58, %v22106_v58  ;;  %v18621_v58 = vld [vmem:[%s28291_s24 + $0x10c4] ss:$16 sps:$4 sm:$0xff]  }
  0xed   :  { %6103 = vmatpush1.bf16.msra.mxu0 %v18558_v38  ;;  %v22363_v38 = vpack.c.bf16 %v22109_v59, %v22109_v59  ;;  %v18624_v59 = vld [vmem:[%s28291_s24 + $0x12c4] ss:$16 sps:$4 sm:$0xff]  }
  0xee   :  { %6144 = vmatpush1.bf16.msra.mxu1 %v18561_v40  ;;  %6104 = vmatprep.subr.bf16.mxu0 %v18566_v41  ;;  %v1201_v40 = vrot.slane %v1196_v28, %v22342_v29  ;;  %v18613_v41 = vld [vmem:[%s28291_s24 + $0x10e0] ss:$16 sps:$4 sm:$0xff]  }
  0xef   :  { %6145 = vmatprep.subr.bf16.mxu1 %v18569_v42  ;;  %v18616_v42 = vld [vmem:[%s28291_s24 + $0x12e0] ss:$16 sps:$4 sm:$0xff]  }
  0xf1   :  { %6105 = vmatpush2.bf16.msra.mxu0 %v18564_v45  ;;  %v1205_v45 = vrot.slane %v1196_v28, %v22351_v34  ;;  %v18646_v28 = vld [vmem:[%s28291_s24 + $0x1240] ss:$16 sps:$4 sm:$0xff]  }
  0xf2   :  { %6146 = vmatpush2.bf16.msra.mxu1 %v18567_v46  ;;  %6106 = vmatprep.subr.bf16.mxu0 %v18572_v47  ;;  %v22379_v46 = vpack.c.bf16 %v171_v35, %v171_v35  ;;  %v22381_v47 = vpack.c.bf16 %v172_v36, %v172_v36  ;;  %v18649_v35 = vld [vmem:[%s28291_s24 + $0x1020] ss:$16 sps:$4 sm:$0xff]  }
  0xf3   :  { %6147 = vmatprep.subr.bf16.mxu1 %v18575_v50  ;;  %v18652_v36 = vld [vmem:[%s28291_s24 + $0x1220] ss:$16 sps:$4 sm:$0xff]  }
  0xf5   :  { %6107 = vmatpush2.bf16.msra.mxu0 %v18570_v51 }
  0xf6   :  { %6148 = vmatpush2.bf16.msra.mxu1 %v18573_v54  ;;  %6108 = vmatprep.subr.bf16.mxu0 %v18578_v55  ;;  %v18619_v54 = vld [vmem:[%s28291_s24 + $0x10c0] ss:$16 sps:$4 sm:$0xff]  }
  0xf7   :  { %6149 = vmatprep.subr.bf16.mxu1 %v18581_v56  ;;  %v18622_v56 = vld [vmem:[%s28291_s24 + $0x12c0] ss:$16 sps:$4 sm:$0xff]  }
  0xf9   :  { %6109 = vmatpush2.bf16.msra.mxu0 %v18576_v60  ;;  %v18627_v60 = vld [vmem:[%s28291_s24 + $0x10a4] ss:$16 sps:$4 sm:$0xff]  }
  0xfa   :  { %6150 = vmatpush2.bf16.msra.mxu1 %v18579_v61  ;;  %6110 = vmatprep.subr.bf16.mxu0 %v18584_v63 }
  0xfb   :  { %6151 = vmatprep.subr.bf16.mxu1 %v18587_v0  ;;  %v18630_v0 = vld [vmem:[%s28291_s24 + $0x12a4] ss:$16 sps:$4 sm:$0xff]  }
  0xfd   :  { %6111 = vmatpush2.bf16.msra.mxu0 %v18582_v1 }
  0xfe   :  { %6152 = vmatpush2.bf16.msra.mxu1 %v18585_v2  ;;  %6112 = vmatprep.subr.bf16.mxu0 %v18590_v6 }
  0xff   :  { %6153 = vmatprep.subr.bf16.mxu1 %v18593_v7 }
 0x101   :  { %6113 = vmatpush2.bf16.msra.mxu0 %v18588_v39  ;;  %v18625_v39 = vld [vmem:[%s28291_s24 + $0x10a0] ss:$16 sps:$4 sm:$0xff]  }
 0x102   :  { %6154 = vmatpush2.bf16.msra.mxu1 %v18591_v44  ;;  %6114 = vmatprep.subr.bf16.mxu0 %v18596_v10  ;;  %v18628_v44 = vld [vmem:[%s28291_s24 + $0x12a0] ss:$16 sps:$4 sm:$0xff]  }
 0x103   :  { %6155 = vmatprep.subr.bf16.mxu1 %v18599_v11 }
 0x105   :  { %6115 = vmatpush2.bf16.msra.mxu0 %v18594_v13  ;;  %v18633_v13 = vld [vmem:[%s28291_s24 + $0x1084] ss:$16 sps:$4 sm:$0xff]  }
 0x106   :  { %6156 = vmatpush2.bf16.msra.mxu1 %v18597_v14  ;;  %6116 = vmatprep.subr.bf16.mxu0 %v18602_v15  ;;  %v18636_v14 = vld [vmem:[%s28291_s24 + $0x1284] ss:$16 sps:$4 sm:$0xff]   ;;  %v18631_v15 = vld [vmem:[%s28291_s24 + $0x1080] ss:$16 sps:$4 sm:$0xff]  }
 0x107   :  { %6157 = vmatprep.subr.bf16.mxu1 %v18605_v18  ;;  %v18634_v18 = vld [vmem:[%s28291_s24 + $0x1280] ss:$16 sps:$4 sm:$0xff]  }
 0x109   :  { %6117 = vmatpush2.bf16.msra.mxu0 %v18600_v20  ;;  %v18642_v20 = vld [vmem:[%s28291_s24 + $0x1264] ss:$16 sps:$4 sm:$0xff]  }
 0x10a   :  { %6158 = vmatpush2.bf16.msra.mxu1 %v18603_v21  ;;  %6118 = vmatprep.subr.bf16.mxu0 %v18608_v22  ;;  %v18637_v21 = vld [vmem:[%s28291_s24 + $0x1060] ss:$16 sps:$4 sm:$0xff]  }
 0x10b   :  { %6159 = vmatprep.subr.bf16.mxu1 %v18611_v23  ;;  %v18640_v22 = vld [vmem:[%s28291_s24 + $0x1260] ss:$16 sps:$4 sm:$0xff]   ;;  %v18645_v23 = vld [vmem:[%s28291_s24 + $0x1044] ss:$16 sps:$4 sm:$0xff]  }
 0x10d   :  { %6119 = vmatpush2.bf16.msra.mxu0 %v18606_v26  ;;  %v18648_v26 = vld [vmem:[%s28291_s24 + $0x1244] ss:$16 sps:$4 sm:$0xff]  }
 0x10e   :  { %6160 = vmatpush2.bf16.msra.mxu1 %v18609_v27  ;;  %6170 = vmatprep.subr.bf16.mxu0 %v18615_v30  ;;  %v18643_v27 = vld [vmem:[%s28291_s24 + $0x1040] ss:$16 sps:$4 sm:$0xff]   ;;  %v18651_v30 = vld [vmem:[%s28291_s24 + $0x1024] ss:$16 sps:$4 sm:$0xff]  }
 0x10f   :  { %6211 = vmatprep.subr.bf16.mxu1 %v18618_v31  ;;  %v18654_v31 = vld [vmem:[%s28291_s24 + $0x1224] ss:$16 sps:$4 sm:$0xff]  }
 0x110   :  { %v5876_v50 = vpop.f32.mrf.mxu0  ;;  %6121 = vmatmul.mubr.bf16.vlgmr.msra.gmra.mxu0 %v22359_v37 }
 0x111   :  { %v5917_v51 = vpop.f32.mrf.mxu1  ;;  %6162 = vmatmul.mubr.bf16.vlgmr.msra.gmra.mxu1 %v22363_v38  ;;  %v5877_v55 = vadd.f32 %v5876_v50, %v1201_v40  ;;  %6171 = vmatpush1.bf16.msra.mxu0 %v18613_v41  ;;  %v18657_v40 = vld [vmem:[%s28291_s24 + $0x1004] ss:$16 sps:$4 sm:$0xff]   ;;  %v18661_v50 = vld [vmem:[%s28291_s24 + $0x11e0] ss:$16 sps:$4 sm:$0xff]  }
 0x112   :  { %6212 = vmatpush1.bf16.msra.mxu1 %v18616_v42  ;;  %v5878_v61 = vpop.f32.mrf.mxu0  ;;  %6172 = vmatprep.subr.bf16.mxu0 %v18621_v58  ;;  %v18660_v41 = vld [vmem:[%s28291_s24 + $0x1204] ss:$16 sps:$4 sm:$0xff]   ;;  %v18655_v42 = vld [vmem:[%s28291_s24 + $0x1000] ss:$16 sps:$4 sm:$0xff]  }
 0x113   :  { %v5919_v63 = vpop.f32.mrf.mxu1  ;;  %6213 = vmatprep.subr.bf16.mxu1 %v18624_v59  ;;  %v22397_v1 = vadd.f32 %v5917_v51, %v5877_v55  ;;  %v5879_v2 = vadd.f32 %v5878_v61, %v1205_v45  ;;  %6202 = vmatprep.mubr.bf16.mxu0 %v22379_v46  ;;  %v18658_v58 = vld [vmem:[%s28291_s24 + $0x1200] ss:$16 sps:$4 sm:$0xff]   ;;  %v18663_v59 = vld [vmem:[%s28291_s24 + $0x11e4] ss:$16 sps:$4 sm:$0xff]  }
 0x114   :  { %6243 = vmatprep.mubr.bf16.mxu1 %v22381_v47  ;;  %v5880_v6 = vpop.f32.mrf.mxu0  ;;  %v18666_v45 = vld [vmem:[%s28291_s24 + $0x13e4] ss:$16 sps:$4 sm:$0xff]   ;;  %v18664_v51 = vld [vmem:[%s28291_s24 + $0x13e0] ss:$16 sps:$4 sm:$0xff]  }
 0x115   :  { %v5921_v7 = vpop.f32.mrf.mxu1  ;;  %v22407_v10 = vadd.f32 %v5919_v63, %v5879_v2  ;;  %6173 = vmatpush1.bf16.msra.mxu0 %v18619_v54  ;;  %v18669_v54 = vld [vmem:[%s28291_s24 + $0x11c4] ss:$16 sps:$4 sm:$0xff]   ;;  %v18676_v2 = vld [vmem:[%s28291_s24 + $0x13a0] ss:$16 sps:$4 sm:$0xff]  }
 0x116   :  { %6214 = vmatpush1.bf16.msra.mxu1 %v18622_v56  ;;  %v5881_v11 = vpop.f32.mrf.mxu0  ;;  %6174 = vmatprep.subr.bf16.mxu0 %v18627_v60  ;;  %v18672_v55 = vld [vmem:[%s28291_s24 + $0x13c4] ss:$16 sps:$4 sm:$0xff]   ;;  %v18667_v56 = vld [vmem:[%s28291_s24 + $0x11c0] ss:$16 sps:$4 sm:$0xff]  }
 0x117   :  { %v5922_v12 = vpop.f32.mrf.mxu1  ;;  %6215 = vmatprep.subr.bf16.mxu1 %v18630_v0  ;;  %v18670_v60 = vld [vmem:[%s28291_s24 + $0x13c0] ss:$16 sps:$4 sm:$0xff]   ;;  %v18675_v61 = vld [vmem:[%s28291_s24 + $0x11a4] ss:$16 sps:$4 sm:$0xff]  }
 0x118   :  { %v18678_v63 = vld [vmem:[%s28291_s24 + $0x13a4] ss:$16 sps:$4 sm:$0xff]   ;;  %v18673_v0 = vld [vmem:[%s28291_s24 + $0x11a0] ss:$16 sps:$4 sm:$0xff]  }
 0x119   :  { %6175 = vmatpush1.bf16.msra.mxu0 %v18625_v39  ;;  %v18681_v6 = vld [vmem:[%s28291_s24 + $0x1184] ss:$16 sps:$4 sm:$0xff]   ;;  %v18679_v39 = vld [vmem:[%s28291_s24 + $0x1180] ss:$16 sps:$4 sm:$0xff]  }
 0x11a   :  { %6216 = vmatpush1.bf16.msra.mxu1 %v18628_v44  ;;  %6176 = vmatprep.subr.bf16.mxu0 %v18633_v13  ;;  %v18684_v7 = vld [vmem:[%s28291_s24 + $0x1384] ss:$16 sps:$4 sm:$0xff]   ;;  %v18682_v44 = vld [vmem:[%s28291_s24 + $0x1380] ss:$16 sps:$4 sm:$0xff]  }
 0x11b   :  { %6217 = vmatprep.subr.bf16.mxu1 %v18636_v14  ;;  %v18687_v11 = vld [vmem:[%s28291_s24 + $0x1164] ss:$16 sps:$4 sm:$0xff]   ;;  %v18685_v13 = vld [vmem:[%s28291_s24 + $0x1160] ss:$16 sps:$4 sm:$0xff]  }
 0x11c   :  { %v18690_v12 = vld [vmem:[%s28291_s24 + $0x1364] ss:$16 sps:$4 sm:$0xff]   ;;  %v18688_v14 = vld [vmem:[%s28291_s24 + $0x1360] ss:$16 sps:$4 sm:$0xff]  }
 0x11d   :  { %6177 = vmatpush1.bf16.msra.mxu0 %v18631_v15  ;;  %v18693_v15 = vld [vmem:[%s28291_s24 + $0x1144] ss:$16 sps:$4 sm:$0xff]  }
 0x11e   :  { %6218 = vmatpush1.bf16.msra.mxu1 %v18634_v18  ;;  %6178 = vmatprep.subr.bf16.mxu0 %v18639_v19  ;;  %v18696_v18 = vld [vmem:[%s28291_s24 + $0x1344] ss:$16 sps:$4 sm:$0xff]   ;;  %v77_v19 = vld [vmem:[%s28292_s28 + $0x28] sm:$0xff] }
 0x11f   :  { %6219 = vmatprep.subr.bf16.mxu1 %v18642_v20  ;;  %v18691_v20 = vld [vmem:[%s28291_s24 + $0x1140] ss:$16 sps:$4 sm:$0xff]  }
 0x121   :  { %6179 = vmatpush1.bf16.msra.mxu0 %v18637_v21  ;;  %v18694_v21 = vld [vmem:[%s28291_s24 + $0x1340] ss:$16 sps:$4 sm:$0xff]  }
 0x122   :  { %6220 = vmatpush1.bf16.msra.mxu1 %v18640_v22  ;;  %6180 = vmatprep.subr.bf16.mxu0 %v18645_v23  ;;  %v18699_v22 = vld [vmem:[%s28291_s24 + $0x1124] ss:$16 sps:$4 sm:$0xff]  }
 0x123   :  { %6221 = vmatprep.subr.bf16.mxu1 %v18648_v26  ;;  %v18702_v23 = vld [vmem:[%s28291_s24 + $0x1324] ss:$16 sps:$4 sm:$0xff]   ;;  %v173_v26 = vcombine.high %v77_v19, %v77_v19 }
 0x125   :  { %6181 = vmatpush1.bf16.msra.mxu0 %v18643_v27  ;;  %v18697_v27 = vld [vmem:[%s28291_s24 + $0x1120] ss:$16 sps:$4 sm:$0xff]  }
 0x126   :  { %6222 = vmatpush1.bf16.msra.mxu1 %v18646_v28  ;;  %6182 = vmatprep.subr.bf16.mxu0 %v18651_v30  ;;  %v18700_v28 = vld [vmem:[%s28291_s24 + $0x1320] ss:$16 sps:$4 sm:$0xff]   ;;  %v18705_v30 = vld [vmem:[%s28291_s24 + $0x1104] ss:$16 sps:$4 sm:$0xff]  }
 0x127   :  { %6223 = vmatprep.subr.bf16.mxu1 %v18654_v31  ;;  %v18708_v31 = vld [vmem:[%s28291_s24 + $0x1304] ss:$16 sps:$4 sm:$0xff]  }
 0x129   :  { %6183 = vmatpush1.bf16.msra.mxu0 %v18649_v35  ;;  %v22563_v35 = vrot.slane %v77_v19, %v21597_v49 }
 0x12a   :  { %6224 = vmatpush1.bf16.msra.mxu1 %v18652_v36  ;;  %6184 = vmatprep.subr.bf16.mxu0 %v18657_v40  ;;  %v22566_v36 = vrot.slane %v173_v26, %v21597_v49  ;;  %v18703_v40 = vld [vmem:[%s28291_s24 + $0x1100] ss:$16 sps:$4 sm:$0xff]  }
 0x12b   :  { %6225 = vmatprep.subr.bf16.mxu1 %v18660_v41  ;;  %v18706_v41 = vld [vmem:[%s28291_s24 + $0x1300] ss:$16 sps:$4 sm:$0xff]  }
 0x12c   :  { %v18731_v26 = vld [vmem:[%s28291_s24 + $0x1680] ss:$16 sps:$4 sm:$0xff]  }
 0x12d   :  { %6185 = vmatpush1.bf16.msra.mxu0 %v18655_v42  ;;  %v18712_v42 = vld [vmem:[%s28291_s24 + $0x14e4] ss:$16 sps:$4 sm:$0xff]  }
 0x12e   :  { %6226 = vmatpush1.bf16.msra.mxu1 %v18658_v58  ;;  %6186 = vmatprep.subr.bf16.mxu0 %v18663_v59  ;;  %v18715_v58 = vld [vmem:[%s28291_s24 + $0x16e4] ss:$16 sps:$4 sm:$0xff]   ;;  %v18710_v59 = vld [vmem:[%s28291_s24 + $0x14e0] ss:$16 sps:$4 sm:$0xff]  }
 0x12f   :  { %6227 = vmatprep.subr.bf16.mxu1 %v18666_v45  ;;  %v18713_v45 = vld [vmem:[%s28291_s24 + $0x16e0] ss:$16 sps:$4 sm:$0xff]  }
 0x131   :  { %6187 = vmatpush2.bf16.msra.mxu0 %v18661_v50  ;;  %v188_v50 = vcombine.high %v22563_v35, %v22563_v35 }
 0x132   :  { %6228 = vmatpush2.bf16.msra.mxu1 %v18664_v51  ;;  %6188 = vmatprep.subr.bf16.mxu0 %v18669_v54  ;;  %v189_v51 = vcombine.high %v22566_v36, %v22566_v36  ;;  %v22592_v54 = vpack.c.bf16 %v22327_v24, %v22327_v24  ;;  %v18716_v24 = vld [vmem:[%s28291_s24 + $0x14c0] ss:$16 sps:$4 sm:$0xff]  }
 0x133   :  { %6229 = vmatprep.subr.bf16.mxu1 %v18672_v55  ;;  %v22596_v55 = vpack.c.bf16 %v22330_v25, %v22330_v25  ;;  %v18719_v25 = vld [vmem:[%s28291_s24 + $0x16c0] ss:$16 sps:$4 sm:$0xff]  }
 0x135   :  { %6189 = vmatpush2.bf16.msra.mxu0 %v18667_v56  ;;  %v18718_v56 = vld [vmem:[%s28291_s24 + $0x14c4] ss:$16 sps:$4 sm:$0xff]  }
 0x136   :  { %6230 = vmatpush2.bf16.msra.mxu1 %v18670_v60  ;;  %6190 = vmatprep.subr.bf16.mxu0 %v18675_v61  ;;  %v18721_v60 = vld [vmem:[%s28291_s24 + $0x16c4] ss:$16 sps:$4 sm:$0xff]   ;;  %v22610_v61 = vpack.c.bf16 %v188_v50, %v188_v50  ;;  %v18746_v50 = vld [vmem:[%s28291_s24 + $0x1420] ss:$16 sps:$4 sm:$0xff]  }
 0x137   :  { %6231 = vmatprep.subr.bf16.mxu1 %v18678_v63  ;;  %v22612_v63 = vpack.c.bf16 %v189_v51, %v189_v51  ;;  %v18749_v51 = vld [vmem:[%s28291_s24 + $0x1620] ss:$16 sps:$4 sm:$0xff]  }
 0x139   :  { %6191 = vmatpush2.bf16.msra.mxu0 %v18673_v0 }
 0x13a   :  { %6232 = vmatpush2.bf16.msra.mxu1 %v18676_v2  ;;  %6192 = vmatprep.subr.bf16.mxu0 %v18681_v6 }
 0x13b   :  { %6233 = vmatprep.subr.bf16.mxu1 %v18684_v7 }
 0x13d   :  { %6193 = vmatpush2.bf16.msra.mxu0 %v18679_v39 }
 0x13e   :  { %6234 = vmatpush2.bf16.msra.mxu1 %v18682_v44  ;;  %6194 = vmatprep.subr.bf16.mxu0 %v18687_v11  ;;  %v18724_v44 = vld [vmem:[%s28291_s24 + $0x14a4] ss:$16 sps:$4 sm:$0xff]  }
 0x13f   :  { %6235 = vmatprep.subr.bf16.mxu1 %v18690_v12  ;;  %v18727_v11 = vld [vmem:[%s28291_s24 + $0x16a4] ss:$16 sps:$4 sm:$0xff]  }
 0x141   :  { %6195 = vmatpush2.bf16.msra.mxu0 %v18685_v13 }
 0x142   :  { %6236 = vmatpush2.bf16.msra.mxu1 %v18688_v14  ;;  %6196 = vmatprep.subr.bf16.mxu0 %v18693_v15  ;;  %v18725_v14 = vld [vmem:[%s28291_s24 + $0x16a0] ss:$16 sps:$4 sm:$0xff]  }
 0x143   :  { %6237 = vmatprep.subr.bf16.mxu1 %v18696_v18 }
 0x145   :  { %6197 = vmatpush2.bf16.msra.mxu0 %v18691_v20 }
 0x146   :  { %6238 = vmatpush2.bf16.msra.mxu1 %v18694_v21  ;;  %6198 = vmatprep.subr.bf16.mxu0 %v18699_v22  ;;  %v18730_v21 = vld [vmem:[%s28291_s24 + $0x1484] ss:$16 sps:$4 sm:$0xff]  }
 0x147   :  { %6239 = vmatprep.subr.bf16.mxu1 %v18702_v23  ;;  %v18733_v22 = vld [vmem:[%s28291_s24 + $0x1684] ss:$16 sps:$4 sm:$0xff]   ;;  %v18728_v23 = vld [vmem:[%s28291_s24 + $0x1480] ss:$16 sps:$4 sm:$0xff]  }
 0x149   :  { %6199 = vmatpush2.bf16.msra.mxu0 %v18697_v27  ;;  %v18736_v27 = vld [vmem:[%s28291_s24 + $0x1464] ss:$16 sps:$4 sm:$0xff]  }
 0x14a   :  { %6240 = vmatpush2.bf16.msra.mxu1 %v18700_v28  ;;  %6200 = vmatprep.subr.bf16.mxu0 %v18705_v30  ;;  %v18739_v28 = vld [vmem:[%s28291_s24 + $0x1664] ss:$16 sps:$4 sm:$0xff]   ;;  %v18734_v30 = vld [vmem:[%s28291_s24 + $0x1460] ss:$16 sps:$4 sm:$0xff]  }
 0x14b   :  { %6241 = vmatprep.subr.bf16.mxu1 %v18708_v31  ;;  %v18737_v31 = vld [vmem:[%s28291_s24 + $0x1660] ss:$16 sps:$4 sm:$0xff]  }
 0x14d   :  { %6201 = vmatpush2.bf16.msra.mxu0 %v18703_v40  ;;  %v18742_v40 = vld [vmem:[%s28291_s24 + $0x1444] ss:$16 sps:$4 sm:$0xff]  }
 0x14e   :  { %6242 = vmatpush2.bf16.msra.mxu1 %v18706_v41  ;;  %6252 = vmatprep.subr.bf16.mxu0 %v18712_v42  ;;  %v18745_v41 = vld [vmem:[%s28291_s24 + $0x1644] ss:$16 sps:$4 sm:$0xff]   ;;  %v18740_v42 = vld [vmem:[%s28291_s24 + $0x1440] ss:$16 sps:$4 sm:$0xff]  }
 0x14f   :  { %6293 = vmatprep.subr.bf16.mxu1 %v18715_v58  ;;  %v18743_v58 = vld [vmem:[%s28291_s24 + $0x1640] ss:$16 sps:$4 sm:$0xff]  }
 0x150   :  { %v5958_v0 = vpop.f32.mrf.mxu0  ;;  %6203 = vmatmul.mubr.bf16.vlgmr.msra.gmra.mxu0 %v22592_v54 }
 0x151   :  { %v5999_v2 = vpop.f32.mrf.mxu1  ;;  %6244 = vmatmul.mubr.bf16.vlgmr.msra.gmra.mxu1 %v22596_v55  ;;  %v5959_v6 = vadd.f32 %v5958_v0, %v22397_v1  ;;  %6253 = vmatpush1.bf16.msra.mxu0 %v18710_v59  ;;  %v18722_v1 = vld [vmem:[%s28291_s24 + $0x14a0] ss:$16 sps:$4 sm:$0xff]   ;;  %v18748_v59 = vld [vmem:[%s28291_s24 + $0x1424] ss:$16 sps:$4 sm:$0xff]  }
 0x152   :  { %6294 = vmatpush1.bf16.msra.mxu1 %v18713_v45  ;;  %v5960_v7 = vpop.f32.mrf.mxu0  ;;  %6254 = vmatprep.subr.bf16.mxu0 %v18718_v56  ;;  %v18751_v45 = vld [vmem:[%s28291_s24 + $0x1624] ss:$16 sps:$4 sm:$0xff]  }
 0x153   :  { %v6001_v39 = vpop.f32.mrf.mxu1  ;;  %6295 = vmatprep.subr.bf16.mxu1 %v18721_v60  ;;  %v22623_v12 = vadd.f32 %v5999_v2, %v5959_v6  ;;  %v5961_v13 = vadd.f32 %v5960_v7, %v22407_v10  ;;  %6284 = vmatprep.mubr.bf16.mxu0 %v22610_v61  ;;  %v18754_v56 = vld [vmem:[%s28291_s24 + $0x1404] ss:$16 sps:$4 sm:$0xff]   ;;  %v18758_v6 = vld [vmem:[%s28291_s24 + $0x15e0] ss:$16 sps:$4 sm:$0xff]  }
 0x154   :  { %6325 = vmatprep.mubr.bf16.mxu1 %v22612_v63  ;;  %v5962_v15 = vpop.f32.mrf.mxu0  ;;  %v18757_v60 = vld [vmem:[%s28291_s24 + $0x1604] ss:$16 sps:$4 sm:$0xff]   ;;  %v18761_v7 = vld [vmem:[%s28291_s24 + $0x17e0] ss:$16 sps:$4 sm:$0xff]  }
 0x155   :  { %v6003_v18 = vpop.f32.mrf.mxu1  ;;  %v22634_v19 = vadd.f32 %v6001_v39, %v5961_v13  ;;  %6255 = vmatpush1.bf16.msra.mxu0 %v18716_v24  ;;  %v18752_v24 = vld [vmem:[%s28291_s24 + $0x1400] ss:$16 sps:$4 sm:$0xff]   ;;  %v18760_v0 = vld [vmem:[%s28291_s24 + $0x15e4] ss:$16 sps:$4 sm:$0xff]  }
 0x156   :  { %6296 = vmatpush1.bf16.msra.mxu1 %v18719_v25  ;;  %v5963_v20 = vpop.f32.mrf.mxu0  ;;  %6256 = vmatprep.subr.bf16.mxu0 %v18724_v44  ;;  %v18755_v25 = vld [vmem:[%s28291_s24 + $0x1600] ss:$16 sps:$4 sm:$0xff]   ;;  %v18763_v2 = vld [vmem:[%s28291_s24 + $0x17e4] ss:$16 sps:$4 sm:$0xff]  }
 0x157   :  { %v6004_v10 = vpop.f32.mrf.mxu1  ;;  %6297 = vmatprep.subr.bf16.mxu1 %v18727_v11  ;;  %v18766_v39 = vld [vmem:[%s28291_s24 + $0x15c4] ss:$16 sps:$4 sm:$0xff]   ;;  %v18764_v11 = vld [vmem:[%s28291_s24 + $0x15c0] ss:$16 sps:$4 sm:$0xff]  }
 0x158   :  { %v18769_v44 = vld [vmem:[%s28291_s24 + $0x17c4] ss:$16 sps:$4 sm:$0xff]   ;;  %v18767_v13 = vld [vmem:[%s28291_s24 + $0x17c0] ss:$16 sps:$4 sm:$0xff]  }
 0x159   :  { %6257 = vmatpush1.bf16.msra.mxu0 %v18722_v1  ;;  %v18772_v1 = vld [vmem:[%s28291_s24 + $0x15a4] ss:$16 sps:$4 sm:$0xff]   ;;  %v18770_v15 = vld [vmem:[%s28291_s24 + $0x15a0] ss:$16 sps:$4 sm:$0xff]  }
 0x15a   :  { %6298 = vmatpush1.bf16.msra.mxu1 %v18725_v14  ;;  %6258 = vmatprep.subr.bf16.mxu0 %v18730_v21  ;;  %v18775_v14 = vld [vmem:[%s28291_s24 + $0x17a4] ss:$16 sps:$4 sm:$0xff]   ;;  %v18773_v18 = vld [vmem:[%s28291_s24 + $0x17a0] ss:$16 sps:$4 sm:$0xff]  }
 0x15b   :  { %6299 = vmatprep.subr.bf16.mxu1 %v18733_v22  ;;  %v18778_v20 = vld [vmem:[%s28291_s24 + $0x1584] ss:$16 sps:$4 sm:$0xff]   ;;  %v18776_v21 = vld [vmem:[%s28291_s24 + $0x1580] ss:$16 sps:$4 sm:$0xff]  }
 0x15c   :  { %v18781_v10 = vld [vmem:[%s28291_s24 + $0x1784] ss:$16 sps:$4 sm:$0xff]   ;;  %v18779_v22 = vld [vmem:[%s28291_s24 + $0x1780] ss:$16 sps:$4 sm:$0xff]  }
 0x15d   :  { %6259 = vmatpush1.bf16.msra.mxu0 %v18728_v23  ;;  %v18784_v23 = vld [vmem:[%s28291_s24 + $0x1564] ss:$16 sps:$4 sm:$0xff]  }
 0x15e   :  { %6300 = vmatpush1.bf16.msra.mxu1 %v18731_v26  ;;  %6260 = vmatprep.subr.bf16.mxu0 %v18736_v27  ;;  %v18787_v26 = vld [vmem:[%s28291_s24 + $0x1764] ss:$16 sps:$4 sm:$0xff]   ;;  %v18782_v27 = vld [vmem:[%s28291_s24 + $0x1560] ss:$16 sps:$4 sm:$0xff]  }
 0x15f   :  { %6301 = vmatprep.subr.bf16.mxu1 %v18739_v28  ;;  %v18785_v28 = vld [vmem:[%s28291_s24 + $0x1760] ss:$16 sps:$4 sm:$0xff]  }
 0x161   :  { %6261 = vmatpush1.bf16.msra.mxu0 %v18734_v30  ;;  %v18790_v30 = vld [vmem:[%s28291_s24 + $0x1544] ss:$16 sps:$4 sm:$0xff]  }
 0x162   :  { %6302 = vmatpush1.bf16.msra.mxu1 %v18737_v31  ;;  %6262 = vmatprep.subr.bf16.mxu0 %v18742_v40  ;;  %v18793_v31 = vld [vmem:[%s28291_s24 + $0x1744] ss:$16 sps:$4 sm:$0xff]  }
 0x163   :  { %6303 = vmatprep.subr.bf16.mxu1 %v18745_v41  ;;  %v78_v40 = vld [vmem:[%s28292_s28 + $0x30] sm:$0xff] }
 0x164   :  { %v18788_v41 = vld [vmem:[%s28291_s24 + $0x1540] ss:$16 sps:$4 sm:$0xff]  }
 0x165   :  { %6263 = vmatpush1.bf16.msra.mxu0 %v18740_v42  ;;  %v18791_v42 = vld [vmem:[%s28291_s24 + $0x1740] ss:$16 sps:$4 sm:$0xff]  }
 0x166   :  { %6304 = vmatpush1.bf16.msra.mxu1 %v18743_v58  ;;  %6264 = vmatprep.subr.bf16.mxu0 %v18748_v59  ;;  %v18796_v58 = vld [vmem:[%s28291_s24 + $0x1524] ss:$16 sps:$4 sm:$0xff]  }
 0x167   :  { %6305 = vmatprep.subr.bf16.mxu1 %v18751_v45  ;;  %v18799_v59 = vld [vmem:[%s28291_s24 + $0x1724] ss:$16 sps:$4 sm:$0xff]   ;;  %v190_v45 = vcombine.high %v78_v40, %v78_v40 }
 0x169   :  { %6265 = vmatpush1.bf16.msra.mxu0 %v18746_v50  ;;  %v18794_v50 = vld [vmem:[%s28291_s24 + $0x1520] ss:$16 sps:$4 sm:$0xff]  }
 0x16a   :  { %6306 = vmatpush1.bf16.msra.mxu1 %v18749_v51  ;;  %6266 = vmatprep.subr.bf16.mxu0 %v18754_v56  ;;  %v18797_v51 = vld [vmem:[%s28291_s24 + $0x1720] ss:$16 sps:$4 sm:$0xff]   ;;  %v18802_v56 = vld [vmem:[%s28291_s24 + $0x1504] ss:$16 sps:$4 sm:$0xff]  }
 0x16b   :  { %6307 = vmatprep.subr.bf16.mxu1 %v18757_v60  ;;  %v18805_v60 = vld [vmem:[%s28291_s24 + $0x1704] ss:$16 sps:$4 sm:$0xff]  }
 0x16d   :  { %6267 = vmatpush1.bf16.msra.mxu0 %v18752_v24  ;;  %v22790_v24 = vrot.slane %v78_v40, %v21597_v49 }
 0x16e   :  { %6308 = vmatpush1.bf16.msra.mxu1 %v18755_v25  ;;  %6268 = vmatprep.subr.bf16.mxu0 %v18760_v0  ;;  %v22793_v25 = vrot.slane %v190_v45, %v21597_v49  ;;  %v18800_v0 = vld [vmem:[%s28291_s24 + $0x1500] ss:$16 sps:$4 sm:$0xff]  }
 0x16f   :  { %6309 = vmatprep.subr.bf16.mxu1 %v18763_v2  ;;  %v18803_v2 = vld [vmem:[%s28291_s24 + $0x1700] ss:$16 sps:$4 sm:$0xff]  }
 0x171   :  { %6269 = vmatpush2.bf16.msra.mxu0 %v18758_v6  ;;  %v18809_v6 = vld [vmem:[%s28291_s24 + $0x18e4] ss:$16 sps:$4 sm:$0xff]  }
 0x172   :  { %6310 = vmatpush2.bf16.msra.mxu1 %v18761_v7  ;;  %6270 = vmatprep.subr.bf16.mxu0 %v18766_v39  ;;  %v18812_v7 = vld [vmem:[%s28291_s24 + $0x1ae4] ss:$16 sps:$4 sm:$0xff]   ;;  %v18807_v39 = vld [vmem:[%s28291_s24 + $0x18e0] ss:$16 sps:$4 sm:$0xff]  }
 0x173   :  { %6311 = vmatprep.subr.bf16.mxu1 %v18769_v44  ;;  %v18810_v44 = vld [vmem:[%s28291_s24 + $0x1ae0] ss:$16 sps:$4 sm:$0xff]  }
 0x175   :  { %6271 = vmatpush2.bf16.msra.mxu0 %v18764_v11  ;;  %v205_v11 = vcombine.high %v22790_v24, %v22790_v24 }
 0x176   :  { %6312 = vmatpush2.bf16.msra.mxu1 %v18767_v13  ;;  %6272 = vmatprep.subr.bf16.mxu0 %v18772_v1  ;;  %v206_v13 = vcombine.high %v22793_v25, %v22793_v25  ;;  %v22819_v1 = vpack.c.bf16 %v22563_v35, %v22563_v35  ;;  %v18813_v35 = vld [vmem:[%s28291_s24 + $0x18c0] ss:$16 sps:$4 sm:$0xff]  }
 0x177   :  { %6313 = vmatprep.subr.bf16.mxu1 %v18775_v14  ;;  %v22823_v14 = vpack.c.bf16 %v22566_v36, %v22566_v36  ;;  %v18816_v36 = vld [vmem:[%s28291_s24 + $0x1ac0] ss:$16 sps:$4 sm:$0xff]  }
 0x179   :  { %6273 = vmatpush2.bf16.msra.mxu0 %v18770_v15  ;;  %v18815_v15 = vld [vmem:[%s28291_s24 + $0x18c4] ss:$16 sps:$4 sm:$0xff]  }
 0x17a   :  { %6314 = vmatpush2.bf16.msra.mxu1 %v18773_v18  ;;  %6274 = vmatprep.subr.bf16.mxu0 %v18778_v20  ;;  %v18818_v18 = vld [vmem:[%s28291_s24 + $0x1ac4] ss:$16 sps:$4 sm:$0xff]   ;;  %v22837_v20 = vpack.c.bf16 %v205_v11, %v205_v11  ;;  %v18837_v11 = vld [vmem:[%s28291_s24 + $0x1840] ss:$16 sps:$4 sm:$0xff]  }
 0x17b   :  { %6315 = vmatprep.subr.bf16.mxu1 %v18781_v10  ;;  %v22839_v10 = vpack.c.bf16 %v206_v13, %v206_v13  ;;  %v18840_v13 = vld [vmem:[%s28291_s24 + $0x1a40] ss:$16 sps:$4 sm:$0xff]  }
 0x17d   :  { %6275 = vmatpush2.bf16.msra.mxu0 %v18776_v21 }
 0x17e   :  { %6316 = vmatpush2.bf16.msra.mxu1 %v18779_v22  ;;  %6276 = vmatprep.subr.bf16.mxu0 %v18784_v23 }
 0x17f   :  { %6317 = vmatprep.subr.bf16.mxu1 %v18787_v26 }
 0x181   :  { %6277 = vmatpush2.bf16.msra.mxu0 %v18782_v27 }
 0x182   :  { %6318 = vmatpush2.bf16.msra.mxu1 %v18785_v28  ;;  %6278 = vmatprep.subr.bf16.mxu0 %v18790_v30  ;;  %v18821_v28 = vld [vmem:[%s28291_s24 + $0x18a4] ss:$16 sps:$4 sm:$0xff]  }
 0x183   :  { %6319 = vmatprep.subr.bf16.mxu1 %v18793_v31  ;;  %v18824_v30 = vld [vmem:[%s28291_s24 + $0x1aa4] ss:$16 sps:$4 sm:$0xff]  }
 0x185   :  { %6279 = vmatpush2.bf16.msra.mxu0 %v18788_v41  ;;  %v18822_v41 = vld [vmem:[%s28291_s24 + $0x1aa0] ss:$16 sps:$4 sm:$0xff]  }
 0x186   :  { %6320 = vmatpush2.bf16.msra.mxu1 %v18791_v42  ;;  %6280 = vmatprep.subr.bf16.mxu0 %v18796_v58 }
 0x187   :  { %6321 = vmatprep.subr.bf16.mxu1 %v18799_v59 }
 0x189   :  { %6281 = vmatpush2.bf16.msra.mxu0 %v18794_v50  ;;  %v18827_v50 = vld [vmem:[%s28291_s24 + $0x1884] ss:$16 sps:$4 sm:$0xff]  }
 0x18a   :  { %6322 = vmatpush2.bf16.msra.mxu1 %v18797_v51  ;;  %6282 = vmatprep.subr.bf16.mxu0 %v18802_v56  ;;  %v18830_v51 = vld [vmem:[%s28291_s24 + $0x1a84] ss:$16 sps:$4 sm:$0xff]   ;;  %v18825_v56 = vld [vmem:[%s28291_s24 + $0x1880] ss:$16 sps:$4 sm:$0xff]  }
 0x18b   :  { %6323 = vmatprep.subr.bf16.mxu1 %v18805_v60  ;;  %v18828_v60 = vld [vmem:[%s28291_s24 + $0x1a80] ss:$16 sps:$4 sm:$0xff]  }
 0x18d   :  { %6283 = vmatpush2.bf16.msra.mxu0 %v18800_v0  ;;  %v18833_v0 = vld [vmem:[%s28291_s24 + $0x1864] ss:$16 sps:$4 sm:$0xff]  }
 0x18e   :  { %6324 = vmatpush2.bf16.msra.mxu1 %v18803_v2  ;;  %6334 = vmatprep.subr.bf16.mxu0 %v18809_v6  ;;  %v18836_v2 = vld [vmem:[%s28291_s24 + $0x1a64] ss:$16 sps:$4 sm:$0xff]   ;;  %v18831_v6 = vld [vmem:[%s28291_s24 + $0x1860] ss:$16 sps:$4 sm:$0xff]  }
 0x18f   :  { %6375 = vmatprep.subr.bf16.mxu1 %v18812_v7  ;;  %v18834_v7 = vld [vmem:[%s28291_s24 + $0x1a60] ss:$16 sps:$4 sm:$0xff]  }
 0x190   :  { %v6040_v21 = vpop.f32.mrf.mxu0  ;;  %6285 = vmatmul.mubr.bf16.vlgmr.msra.gmra.mxu0 %v22819_v1 }
 0x191   :  { %v6081_v22 = vpop.f32.mrf.mxu1  ;;  %6326 = vmatmul.mubr.bf16.vlgmr.msra.gmra.mxu1 %v22823_v14  ;;  %v6041_v23 = vadd.f32 %v6040_v21, %v22623_v12  ;;  %6335 = vmatpush1.bf16.msra.mxu0 %v18807_v39  ;;  %v18819_v12 = vld [vmem:[%s28291_s24 + $0x18a0] ss:$16 sps:$4 sm:$0xff]   ;;  %v18839_v39 = vld [vmem:[%s28291_s24 + $0x1844] ss:$16 sps:$4 sm:$0xff]  }
 0x192   :  { %6376 = vmatpush1.bf16.msra.mxu1 %v18810_v44  ;;  %v6042_v26 = vpop.f32.mrf.mxu0  ;;  %6336 = vmatprep.subr.bf16.mxu0 %v18815_v15  ;;  %v18842_v44 = vld [vmem:[%s28291_s24 + $0x1a44] ss:$16 sps:$4 sm:$0xff]  }
 0x193   :  { %v6083_v27 = vpop.f32.mrf.mxu1  ;;  %6377 = vmatprep.subr.bf16.mxu1 %v18818_v18  ;;  %v22850_v31 = vadd.f32 %v6081_v22, %v6041_v23  ;;  %v6043_v40 = vadd.f32 %v6042_v26, %v22634_v19  ;;  %6366 = vmatprep.mubr.bf16.mxu0 %v22837_v20  ;;  %v18845_v15 = vld [vmem:[%s28291_s24 + $0x1824] ss:$16 sps:$4 sm:$0xff]   ;;  %v18849_v23 = vld [vmem:[%s28291_s24 + $0x1800] ss:$16 sps:$4 sm:$0xff]  }
 0x194   :  { %6407 = vmatprep.mubr.bf16.mxu1 %v22839_v10  ;;  %v6044_v42 = vpop.f32.mrf.mxu0  ;;  %v18848_v18 = vld [vmem:[%s28291_s24 + $0x1a24] ss:$16 sps:$4 sm:$0xff]   ;;  %v18852_v26 = vld [vmem:[%s28291_s24 + $0x1a00] ss:$16 sps:$4 sm:$0xff]  }
 0x195   :  { %v6085_v58 = vpop.f32.mrf.mxu1  ;;  %v22861_v59 = vadd.f32 %v6083_v27, %v6043_v40  ;;  %6337 = vmatpush1.bf16.msra.mxu0 %v18813_v35  ;;  %v18843_v35 = vld [vmem:[%s28291_s24 + $0x1820] ss:$16 sps:$4 sm:$0xff]   ;;  %v18851_v21 = vld [vmem:[%s28291_s24 + $0x1804] ss:$16 sps:$4 sm:$0xff]  }
 0x196   :  { %6378 = vmatpush1.bf16.msra.mxu1 %v18816_v36  ;;  %v6045_v45 = vpop.f32.mrf.mxu0  ;;  %6338 = vmatprep.subr.bf16.mxu0 %v18821_v28  ;;  %v18846_v36 = vld [vmem:[%s28291_s24 + $0x1a20] ss:$16 sps:$4 sm:$0xff]   ;;  %v18854_v22 = vld [vmem:[%s28291_s24 + $0x1a04] ss:$16 sps:$4 sm:$0xff]  }
 0x197   :  { %v6086_v19 = vpop.f32.mrf.mxu1  ;;  %6379 = vmatprep.subr.bf16.mxu1 %v18824_v30  ;;  %v18857_v27 = vld [vmem:[%s28291_s24 + $0x19e4] ss:$16 sps:$4 sm:$0xff]   ;;  %v18855_v30 = vld [vmem:[%s28291_s24 + $0x19e0] ss:$16 sps:$4 sm:$0xff]  }
 0x198   :  { %v18860_v28 = vld [vmem:[%s28291_s24 + $0x1be4] ss:$16 sps:$4 sm:$0xff]   ;;  %v18858_v40 = vld [vmem:[%s28291_s24 + $0x1be0] ss:$16 sps:$4 sm:$0xff]  }
 0x199   :  { %6339 = vmatpush1.bf16.msra.mxu0 %v18819_v12  ;;  %v18863_v12 = vld [vmem:[%s28291_s24 + $0x19c4] ss:$16 sps:$4 sm:$0xff]   ;;  %v18861_v42 = vld [vmem:[%s28291_s24 + $0x19c0] ss:$16 sps:$4 sm:$0xff]  }
 0x19a   :  { %6380 = vmatpush1.bf16.msra.mxu1 %v18822_v41  ;;  %6340 = vmatprep.subr.bf16.mxu0 %v18827_v50  ;;  %v18866_v41 = vld [vmem:[%s28291_s24 + $0x1bc4] ss:$16 sps:$4 sm:$0xff]   ;;  %v18864_v58 = vld [vmem:[%s28291_s24 + $0x1bc0] ss:$16 sps:$4 sm:$0xff]  }
 0x19b   :  { %6381 = vmatprep.subr.bf16.mxu1 %v18830_v51  ;;  %v18869_v45 = vld [vmem:[%s28291_s24 + $0x19a4] ss:$16 sps:$4 sm:$0xff]   ;;  %v18867_v50 = vld [vmem:[%s28291_s24 + $0x19a0] ss:$16 sps:$4 sm:$0xff]  }
 0x19c   :  { %v18872_v19 = vld [vmem:[%s28291_s24 + $0x1ba4] ss:$16 sps:$4 sm:$0xff]   ;;  %v18870_v51 = vld [vmem:[%s28291_s24 + $0x1ba0] ss:$16 sps:$4 sm:$0xff]  }
 0x19d   :  { %6341 = vmatpush1.bf16.msra.mxu0 %v18825_v56  ;;  %v18875_v56 = vld [vmem:[%s28291_s24 + $0x1984] ss:$16 sps:$4 sm:$0xff]  }
 0x19e   :  { %6382 = vmatpush1.bf16.msra.mxu1 %v18828_v60  ;;  %6342 = vmatprep.subr.bf16.mxu0 %v18833_v0  ;;  %v18878_v60 = vld [vmem:[%s28291_s24 + $0x1b84] ss:$16 sps:$4 sm:$0xff]   ;;  %v18873_v0 = vld [vmem:[%s28291_s24 + $0x1980] ss:$16 sps:$4 sm:$0xff]  }
 0x19f   :  { %6383 = vmatprep.subr.bf16.mxu1 %v18836_v2  ;;  %v18876_v2 = vld [vmem:[%s28291_s24 + $0x1b80] ss:$16 sps:$4 sm:$0xff]  }
 0x1a1   :  { %6343 = vmatpush1.bf16.msra.mxu0 %v18831_v6  ;;  %v18881_v6 = vld [vmem:[%s28291_s24 + $0x1964] ss:$16 sps:$4 sm:$0xff]  }
 0x1a2   :  { %6384 = vmatpush1.bf16.msra.mxu1 %v18834_v7  ;;  %6344 = vmatprep.subr.bf16.mxu0 %v18839_v39  ;;  %v18884_v7 = vld [vmem:[%s28291_s24 + $0x1b64] ss:$16 sps:$4 sm:$0xff]   ;;  %v18879_v39 = vld [vmem:[%s28291_s24 + $0x1960] ss:$16 sps:$4 sm:$0xff]  }
 0x1a3   :  { %6385 = vmatprep.subr.bf16.mxu1 %v18842_v44  ;;  %v18882_v44 = vld [vmem:[%s28291_s24 + $0x1b60] ss:$16 sps:$4 sm:$0xff]  }
 0x1a5   :  { %6345 = vmatpush1.bf16.msra.mxu0 %v18837_v11  ;;  %v18887_v11 = vld [vmem:[%s28291_s24 + $0x1944] ss:$16 sps:$4 sm:$0xff]  }
 0x1a6   :  { %6386 = vmatpush1.bf16.msra.mxu1 %v18840_v13  ;;  %6346 = vmatprep.subr.bf16.mxu0 %v18845_v15  ;;  %v18890_v13 = vld [vmem:[%s28291_s24 + $0x1b44] ss:$16 sps:$4 sm:$0xff]   ;;  %v18885_v15 = vld [vmem:[%s28291_s24 + $0x1940] ss:$16 sps:$4 sm:$0xff]  }
 0x1a7   :  { %6387 = vmatprep.subr.bf16.mxu1 %v18848_v18  ;;  %v18888_v18 = vld [vmem:[%s28291_s24 + $0x1b40] ss:$16 sps:$4 sm:$0xff]  }
 0x1a9   :  { %6347 = vmatpush1.bf16.msra.mxu0 %v18843_v35  ;;  %v18893_v35 = vld [vmem:[%s28291_s24 + $0x1924] ss:$16 sps:$4 sm:$0xff]  }
 0x1aa   :  { %6388 = vmatpush1.bf16.msra.mxu1 %v18846_v36  ;;  %6348 = vmatprep.subr.bf16.mxu0 %v18851_v21  ;;  %v18896_v36 = vld [vmem:[%s28291_s24 + $0x1b24] ss:$16 sps:$4 sm:$0xff]   ;;  %v18891_v21 = vld [vmem:[%s28291_s24 + $0x1920] ss:$16 sps:$4 sm:$0xff]  }
 0x1ab   :  { %6389 = vmatprep.subr.bf16.mxu1 %v18854_v22  ;;  %v18894_v22 = vld [vmem:[%s28291_s24 + $0x1b20] ss:$16 sps:$4 sm:$0xff]  }
 0x1ad   :  { %6349 = vmatpush1.bf16.msra.mxu0 %v18849_v23  ;;  %v18899_v23 = vld [vmem:[%s28291_s24 + $0x1904] ss:$16 sps:$4 sm:$0xff]  }
 0x1ae   :  { %6390 = vmatpush1.bf16.msra.mxu1 %v18852_v26  ;;  %6350 = vmatprep.subr.bf16.mxu0 %v18857_v27  ;;  %v18902_v26 = vld [vmem:[%s28291_s24 + $0x1b04] ss:$16 sps:$4 sm:$0xff]   ;;  %v18897_v27 = vld [vmem:[%s28291_s24 + $0x1900] ss:$16 sps:$4 sm:$0xff]  }
 0x1af   :  { %6391 = vmatprep.subr.bf16.mxu1 %v18860_v28  ;;  %v18900_v28 = vld [vmem:[%s28291_s24 + $0x1b00] ss:$16 sps:$4 sm:$0xff]  }
 0x1b1   :  { %6351 = vmatpush2.bf16.msra.mxu0 %v18855_v30  ;;  %v18906_v30 = vld [vmem:[%s28291_s24 + $0x1cc4] ss:$16 sps:$4 sm:$0xff]  }
 0x1b2   :  { %6392 = vmatpush2.bf16.msra.mxu1 %v18858_v40  ;;  %6352 = vmatprep.subr.bf16.mxu0 %v18863_v12  ;;  %v18909_v40 = vld [vmem:[%s28291_s24 + $0xec] ss:$16 sps:$4 sm:$0xff]   ;;  %v18904_v12 = vld [vmem:[%s28291_s24 + $0x1cc0] ss:$16 sps:$4 sm:$0xff]  }
 0x1b3   :  { %6393 = vmatprep.subr.bf16.mxu1 %v18866_v41  ;;  %v18907_v41 = vld [vmem:[%s28291_s24 + $0xe8] ss:$16 sps:$4 sm:$0xff]  }
 0x1b5   :  { %6353 = vmatpush2.bf16.msra.mxu0 %v18861_v42  ;;  %v23033_v42 = vpack.c.bf16 %v22790_v24, %v22790_v24  ;;  %v18910_v24 = vld [vmem:[%s28291_s24 + $0x1ca0] ss:$16 sps:$4 sm:$0xff]  }
 0x1b6   :  { %6394 = vmatpush2.bf16.msra.mxu1 %v18864_v58  ;;  %6354 = vmatprep.subr.bf16.mxu0 %v18869_v45  ;;  %v23037_v58 = vpack.c.bf16 %v22793_v25, %v22793_v25  ;;  %v18912_v45 = vld [vmem:[%s28291_s24 + $0x1ca4] ss:$16 sps:$4 sm:$0xff]   ;;  %v18913_v25 = vld [vmem:[%s28291_s24 + $0xc8] ss:$16 sps:$4 sm:$0xff]  }
 0x1b7   :  { %6395 = vmatprep.subr.bf16.mxu1 %v18872_v19  ;;  %v18915_v19 = vld [vmem:[%s28291_s24 + $0xcc] ss:$16 sps:$4 sm:$0xff]  }
 0x1b9   :  { %6355 = vmatpush2.bf16.msra.mxu0 %v18867_v50 }
 0x1ba   :  { %6396 = vmatpush2.bf16.msra.mxu1 %v18870_v51  ;;  %6356 = vmatprep.subr.bf16.mxu0 %v18875_v56 }
 0x1bb   :  { %6397 = vmatprep.subr.bf16.mxu1 %v18878_v60 }
 0x1bd   :  { %6357 = vmatpush2.bf16.msra.mxu0 %v18873_v0 }
 0x1be   :  { %6398 = vmatpush2.bf16.msra.mxu1 %v18876_v2  ;;  %6358 = vmatprep.subr.bf16.mxu0 %v18881_v6  ;;  %v18918_v2 = vld [vmem:[%s28291_s24 + $0x1c84] ss:$16 sps:$4 sm:$0xff]   ;;  %v18921_v6 = vld [vmem:[%s28291_s24 + $0xac] ss:$16 sps:$4 sm:$0xff]  }
 0x1bf   :  { %6399 = vmatprep.subr.bf16.mxu1 %v18884_v7 }
 0x1c1   :  { %6359 = vmatpush2.bf16.msra.mxu0 %v18879_v39 }
 0x1c2   :  { %6400 = vmatpush2.bf16.msra.mxu1 %v18882_v44  ;;  %6360 = vmatprep.subr.bf16.mxu0 %v18887_v11  ;;  %v18919_v44 = vld [vmem:[%s28291_s24 + $0xa8] ss:$16 sps:$4 sm:$0xff]   ;;  %v21334_v11 = vmov 0  }
 0x1c3   :  { %6401 = vmatprep.subr.bf16.mxu1 %v18890_v13 }
 0x1c5   :  { %6361 = vmatpush2.bf16.msra.mxu0 %v18885_v15 }
 0x1c6   :  { %6402 = vmatpush2.bf16.msra.mxu1 %v18888_v18  ;;  %6362 = vmatprep.subr.bf16.mxu0 %v18893_v35 }
 0x1c7   :  { %6403 = vmatprep.subr.bf16.mxu1 %v18896_v36  ;;  %v18924_v36 = vld [vmem:[%s28291_s24 + $0x1c64] ss:$16 sps:$4 sm:$0xff]  }
 0x1c9   :  { %6363 = vmatpush2.bf16.msra.mxu0 %v18891_v21  ;;  %v18927_v21 = vld [vmem:[%s28291_s24 + $0x8c] ss:$16 sps:$4 sm:$0xff]  }
 0x1ca   :  { %6404 = vmatpush2.bf16.msra.mxu1 %v18894_v22  ;;  %6364 = vmatprep.subr.bf16.mxu0 %v18899_v23  ;;  %v18925_v22 = vld [vmem:[%s28291_s24 + $0x88] ss:$16 sps:$4 sm:$0xff]   ;;  %v18930_v23 = vld [vmem:[%s28291_s24 + $0x1c44] ss:$16 sps:$4 sm:$0xff]  }
 0x1cb   :  { %6405 = vmatprep.subr.bf16.mxu1 %v18902_v26  ;;  %v18933_v26 = vld [vmem:[%s28291_s24 + $0x6c] ss:$16 sps:$4 sm:$0xff]  }
 0x1cd   :  { %6365 = vmatpush2.bf16.msra.mxu0 %v18897_v27  ;;  %v18928_v27 = vld [vmem:[%s28291_s24 + $0x1c40] ss:$16 sps:$4 sm:$0xff]  }
 0x1ce   :  { %6406 = vmatpush2.bf16.msra.mxu1 %v18900_v28  ;;  %6418 = vmatprep.subr.bf16.mxu0 %v18906_v30  ;;  %v18931_v28 = vld [vmem:[%s28291_s24 + $0x68] ss:$16 sps:$4 sm:$0xff]   ;;  %v18936_v30 = vld [vmem:[%s28291_s24 + $0x1c24] ss:$16 sps:$4 sm:$0xff]  }
 0x1cf   :  { %6457 = vmatprep.subr.bf16.mxu1 %v18909_v40  ;;  %v18939_v40 = vld [vmem:[%s28291_s24 + $0x4c] ss:$16 sps:$4 sm:$0xff]  }
 0x1d0   :  { %v6122_v50 = vpop.f32.mrf.mxu0  ;;  %6367 = vmatmul.mubr.bf16.vlgmr.msra.gmra.mxu0 %v23033_v42 }
 0x1d1   :  { %v6163_v51 = vpop.f32.mrf.mxu1  ;;  %6408 = vmatmul.mubr.bf16.vlgmr.msra.gmra.mxu1 %v23037_v58  ;;  %v6123_v56 = vadd.f32 %v6122_v50, %v22850_v31  ;;  %6419 = vmatpush1.bf16.msra.mxu0 %v18904_v12  ;;  %v18916_v31 = vld [vmem:[%s28291_s24 + $0x1c80] ss:$16 sps:$4 sm:$0xff]   ;;  %v16039_v50 = vld.sshfl [vmem:[%s28292_s28 + $0x38] sm:$0x3 pattern:$0x76325410] }
 0x1d2   :  { %6458 = vmatpush1.bf16.msra.mxu1 %v18907_v41  ;;  %v6124_v60 = vpop.f32.mrf.mxu0  ;;  %6420 = vmatprep.subr.bf16.mxu0 %v18912_v45  ;;  %v18934_v12 = vld [vmem:[%s28291_s24 + $0x1c20] ss:$16 sps:$4 sm:$0xff]   ;;  %v18937_v41 = vld [vmem:[%s28291_s24 + $0x48] ss:$16 sps:$4 sm:$0xff]   ;;  %v18942_v45 = vld [vmem:[%s28291_s24 + $0x1c04] ss:$16 sps:$4 sm:$0xff]  }
 0x1d3   :  { %v6165_v0 = vpop.f32.mrf.mxu1  ;;  %6459 = vmatprep.subr.bf16.mxu1 %v18915_v19  ;;  %v23060_v7 = vadd.f32 %v6163_v51, %v6123_v56  ;;  %v6125_v39 = vadd.f32 %v6124_v60, %v22861_v59  ;;  %6448 = vmatprep.mubr.bf16.mxu0 %v21334_v11  ;;  %v18945_v19 = vld [vmem:[%s28291_s24 + $0x2c] ss:$16 sps:$4 sm:$0xff]   ;;  %v18946_v60 = vld [vmem:[%s28291_s24 + $0x8] ss:$16 sps:$4 sm:$0xff]  }
 0x1d4   :  { %6489 = vmatprep.mubr.bf16.mxu1 %v21625_v62  ;;  %v6126_v13 = vpop.f32.mrf.mxu0  ;;  %v18922_v62 = vld [vmem:[%s28291_s24 + $0x1c60] ss:$16 sps:$4 sm:$0xff]   ;;  %v18948_v51 = vld [vmem:[%s28291_s24 + $0xc] ss:$16 sps:$4 sm:$0xff]  }
 0x1d5   :  { %v6167_v15 = vpop.f32.mrf.mxu1  ;;  %v23071_v18 = vadd.f32 %v6165_v0, %v6125_v39  ;;  %6421 = vmatpush1.bf16.msra.mxu0 %v18910_v24  ;;  %v18940_v24 = vld [vmem:[%s28291_s24 + $0x1c00] ss:$16 sps:$4 sm:$0xff]   ;;  %v18951_v56 = vld [vmem:[%s28291_s24 + $0x2ec] ss:$16 sps:$4 sm:$0xff]   ;;  %v18949_v0 = vld [vmem:[%s28291_s24 + $0x2e8] ss:$16 sps:$4 sm:$0xff]  }
 0x1d6   :  { %6460 = vmatpush1.bf16.msra.mxu1 %v18913_v25  ;;  %v6127_v59 = vpop.f32.mrf.mxu0  ;;  %6422 = vmatprep.subr.bf16.mxu0 %v18918_v2  ;;  %v18943_v25 = vld [vmem:[%s28291_s24 + $0x28] ss:$16 sps:$4 sm:$0xff]   ;;  %v23136_v2 = vpack.c.bf16 %v16039_v50, %v16039_v50  ;;  %v18957_v39 = vld [vmem:[%s28291_s24 + $0x2cc] ss:$16 sps:$4 sm:$0xff]  }
 0x1d7   :  { %v6168_v35 = vpop.f32.mrf.mxu1  ;;  %6461 = vmatprep.subr.bf16.mxu1 %v18921_v6  ;;  %v18954_v6 = vld [vmem:[%s28291_s24 + $0x1ec] ss:$16 sps:$4 sm:$0xff]   ;;  %v18958_v59 = vld [vmem:[%s28291_s24 + $0x1c8] ss:$16 sps:$4 sm:$0xff]  }
 0x1d8   :  { %v18960_v13 = vld [vmem:[%s28291_s24 + $0x1cc] ss:$16 sps:$4 sm:$0xff]   ;;  %v18961_v35 = vld [vmem:[%s28291_s24 + $0x2a8] ss:$16 sps:$4 sm:$0xff]  }
 0x1d9   :  { %6423 = vmatpush1.bf16.msra.mxu0 %v18916_v31  ;;  %v18952_v31 = vld [vmem:[%s28291_s24 + $0x1e8] ss:$16 sps:$4 sm:$0xff]   ;;  %v18963_v15 = vld [vmem:[%s28291_s24 + $0x2ac] ss:$16 sps:$4 sm:$0xff]  }
 0x1da   :  { %6462 = vmatpush1.bf16.msra.mxu1 %v18919_v44  ;;  %6424 = vmatprep.subr.bf16.mxu0 %v18924_v36  ;;  %v18955_v44 = vld [vmem:[%s28291_s24 + $0x2c8] ss:$16 sps:$4 sm:$0xff]   ;;  %v18966_v36 = vld [vmem:[%s28291_s24 + $0x1ac] ss:$16 sps:$4 sm:$0xff]  }
 0x1db   :  { %6463 = vmatprep.subr.bf16.mxu1 %v18927_v21  ;;  %v18964_v21 = vld [vmem:[%s28291_s24 + $0x1a8] ss:$16 sps:$4 sm:$0xff]   ;;  %v18993_v50 = vld [vmem:[%s28291_s24 + $0x20c] ss:$16 sps:$4 sm:$0xff]  }
 0x1dd   :  { %6425 = vmatpush1.bf16.msra.mxu0 %v18922_v62  ;;  %v18967_v62 = vld [vmem:[%s28291_s24 + $0x288] ss:$16 sps:$4 sm:$0xff]  }
 0x1de   :  { %6464 = vmatpush1.bf16.msra.mxu1 %v18925_v22  ;;  %6426 = vmatprep.subr.bf16.mxu0 %v18930_v23  ;;  %v18972_v22 = vld [vmem:[%s28291_s24 + $0x18c] ss:$16 sps:$4 sm:$0xff]  }
 0x1df   :  { %6465 = vmatprep.subr.bf16.mxu1 %v18933_v26  ;;  %v18975_v23 = vld [vmem:[%s28291_s24 + $0x26c] ss:$16 sps:$4 sm:$0xff]   ;;  %v18970_v26 = vld [vmem:[%s28291_s24 + $0x188] ss:$16 sps:$4 sm:$0xff]  }
 0x1e1   :  { %6427 = vmatpush1.bf16.msra.mxu0 %v18928_v27  ;;  %v18973_v27 = vld [vmem:[%s28291_s24 + $0x268] ss:$16 sps:$4 sm:$0xff]  }
 0x1e2   :  { %6466 = vmatpush1.bf16.msra.mxu1 %v18931_v28  ;;  %6428 = vmatprep.subr.bf16.mxu0 %v18936_v30  ;;  %v18978_v28 = vld [vmem:[%s28291_s24 + $0x16c] ss:$16 sps:$4 sm:$0xff]  }
 0x1e3   :  { %6467 = vmatprep.subr.bf16.mxu1 %v18939_v40  ;;  %v18981_v30 = vld [vmem:[%s28291_s24 + $0x24c] ss:$16 sps:$4 sm:$0xff]   ;;  %v18976_v40 = vld [vmem:[%s28291_s24 + $0x168] ss:$16 sps:$4 sm:$0xff]  }
 0x1e5   :  { %6429 = vmatpush1.bf16.msra.mxu0 %v18934_v12  ;;  %v18979_v12 = vld [vmem:[%s28291_s24 + $0x248] ss:$16 sps:$4 sm:$0xff]  }
 0x1e6   :  { %6468 = vmatpush1.bf16.msra.mxu1 %v18937_v41  ;;  %6430 = vmatprep.subr.bf16.mxu0 %v18942_v45  ;;  %v18984_v41 = vld [vmem:[%s28291_s24 + $0x14c] ss:$16 sps:$4 sm:$0xff]  }
 0x1e7   :  { %6469 = vmatprep.subr.bf16.mxu1 %v18945_v19  ;;  %v18987_v45 = vld [vmem:[%s28291_s24 + $0x22c] ss:$16 sps:$4 sm:$0xff]   ;;  %v18982_v19 = vld [vmem:[%s28291_s24 + $0x148] ss:$16 sps:$4 sm:$0xff]  }
 0x1e9   :  { %6431 = vmatpush1.bf16.msra.mxu0 %v18940_v24  ;;  %v18985_v24 = vld [vmem:[%s28291_s24 + $0x228] ss:$16 sps:$4 sm:$0xff]  }
 0x1ea   :  { %6470 = vmatpush1.bf16.msra.mxu1 %v18943_v25  ;;  %6498 = vmatprep.subr.bf16.mxu0 %v18951_v56  ;;  %v18990_v25 = vld [vmem:[%s28291_s24 + $0x12c] ss:$16 sps:$4 sm:$0xff]   ;;  %v18991_v56 = vld [vmem:[%s28291_s24 + $0x208] ss:$16 sps:$4 sm:$0xff]  }
 0x1eb   :  { %6471 = vmatprep.subr.bf16.mxu1 %v18948_v51  ;;  %v18988_v51 = vld [vmem:[%s28291_s24 + $0x128] ss:$16 sps:$4 sm:$0xff]  }
 0x1ec   :  { %16964 = vmatmul.mubr.msk.bf16.vlgmr.msra.gmra.mxu0 %vm5838_vm0, %v23136_v2 }
 0x1ed   :  { %6499 = vmatpush1.bf16.msra.mxu0 %v18949_v0  ;;  %6530 = vmatprep.mubr.bf16.mxu0 %v21636_v3  ;;  %v18969_v3 = vld [vmem:[%s28291_s24 + $0x28c] ss:$16 sps:$4 sm:$0xff]  }
 0x1ee   :  { %6472 = vmatpush1.bf16.msra.mxu1 %v18946_v60  ;;  %6500 = vmatprep.subr.bf16.mxu0 %v18957_v39  ;;  %v18996_v60 = vld [vmem:[%s28291_s24 + $0x10c] ss:$16 sps:$4 sm:$0xff]   ;;  %v18997_v39 = vld [vmem:[%s28291_s24 + $0x3e8] ss:$16 sps:$4 sm:$0xff]  }
 0x1ef   :  { %6473 = vmatprep.subr.bf16.mxu1 %v18954_v6  ;;  %v18999_v0 = vld [vmem:[%s28291_s24 + $0x3ec] ss:$16 sps:$4 sm:$0xff]   ;;  %v18994_v6 = vld [vmem:[%s28291_s24 + $0x108] ss:$16 sps:$4 sm:$0xff]  }
 0x1f1   :  { %6501 = vmatpush1.bf16.msra.mxu0 %v18955_v44  ;;  %v19005_v44 = vld [vmem:[%s28291_s24 + $0x4ec] ss:$16 sps:$4 sm:$0xff]  }
 0x1f2   :  { %6474 = vmatpush2.bf16.msra.mxu1 %v18952_v31  ;;  %6502 = vmatprep.subr.bf16.mxu0 %v18963_v15  ;;  %v19002_v31 = vld [vmem:[%s28291_s24 + $0x3cc] ss:$16 sps:$4 sm:$0xff]   ;;  %v19003_v15 = vld [vmem:[%s28291_s24 + $0x4e8] ss:$16 sps:$4 sm:$0xff]  }
 0x1f3   :  { %6475 = vmatprep.subr.bf16.mxu1 %v18960_v13  ;;  %v19000_v13 = vld [vmem:[%s28291_s24 + $0x3c8] ss:$16 sps:$4 sm:$0xff]  }
 0x1f5   :  { %6503 = vmatpush1.bf16.msra.mxu0 %v18961_v35  ;;  %v19011_v35 = vld [vmem:[%s28291_s24 + $0x4cc] ss:$16 sps:$4 sm:$0xff]  }
 0x1f6   :  { %6476 = vmatpush2.bf16.msra.mxu1 %v18958_v59  ;;  %6504 = vmatprep.subr.bf16.mxu0 %v18969_v3  ;;  %v19008_v59 = vld [vmem:[%s28291_s24 + $0x3ac] ss:$16 sps:$4 sm:$0xff]   ;;  %v19009_v3 = vld [vmem:[%s28291_s24 + $0x4c8] ss:$16 sps:$4 sm:$0xff]  }
 0x1f7   :  { %6477 = vmatprep.subr.bf16.mxu1 %v18966_v36  ;;  %v19006_v36 = vld [vmem:[%s28291_s24 + $0x3a8] ss:$16 sps:$4 sm:$0xff]  }
 0x1f9   :  { %6505 = vmatpush1.bf16.msra.mxu0 %v18967_v62 }
 0x1fa   :  { %6478 = vmatpush2.bf16.msra.mxu1 %v18964_v21  ;;  %6506 = vmatprep.subr.bf16.mxu0 %v18975_v23 }
 0x1fb   :  { %6479 = vmatprep.subr.bf16.mxu1 %v18972_v22 }
 0x1fd   :  { %6507 = vmatpush1.bf16.msra.mxu0 %v18973_v27  ;;  %v19014_v27 = vld [vmem:[%s28291_s24 + $0x38c] ss:$16 sps:$4 sm:$0xff]  }
 0x1fe   :  { %6480 = vmatpush2.bf16.msra.mxu1 %v18970_v26  ;;  %6508 = vmatprep.subr.bf16.mxu0 %v18981_v30 }
 0x1ff   :  { %6481 = vmatprep.subr.bf16.mxu1 %v18978_v28  ;;  %v19017_v28 = vld [vmem:[%s28291_s24 + $0x4ac] ss:$16 sps:$4 sm:$0xff]  }
 0x201   :  { %6509 = vmatpush1.bf16.msra.mxu0 %v18979_v12 }
 0x202   :  { %6482 = vmatpush2.bf16.msra.mxu1 %v18976_v40  ;;  %6510 = vmatprep.subr.bf16.mxu0 %v18987_v45  ;;  %v19015_v40 = vld [vmem:[%s28291_s24 + $0x4a8] ss:$16 sps:$4 sm:$0xff]  }
 0x203   :  { %6483 = vmatprep.subr.bf16.mxu1 %v18984_v41 }
 0x205   :  { %6511 = vmatpush1.bf16.msra.mxu0 %v18985_v24 }
 0x206   :  { %6484 = vmatpush2.bf16.msra.mxu1 %v18982_v19  ;;  %6512 = vmatprep.subr.bf16.mxu0 %v18993_v50  ;;  %v19021_v50 = vld [vmem:[%s28291_s24 + $0x488] ss:$16 sps:$4 sm:$0xff]  }
 0x207   :  { %6485 = vmatprep.subr.bf16.mxu1 %v18990_v25  ;;  %v19023_v25 = vld [vmem:[%s28291_s24 + $0x48c] ss:$16 sps:$4 sm:$0xff]  }
 0x209   :  { %6513 = vmatpush1.bf16.msra.mxu0 %v18991_v56  ;;  %v19029_v56 = vld [vmem:[%s28291_s24 + $0x46c] ss:$16 sps:$4 sm:$0xff]  }
 0x20a   :  { %6486 = vmatpush2.bf16.msra.mxu1 %v18988_v51  ;;  %6514 = vmatprep.subr.bf16.mxu0 %v18999_v0  ;;  %v19026_v51 = vld [vmem:[%s28291_s24 + $0x34c] ss:$16 sps:$4 sm:$0xff]   ;;  %v19027_v0 = vld [vmem:[%s28291_s24 + $0x468] ss:$16 sps:$4 sm:$0xff]  }
 0x20b   :  { %6487 = vmatprep.subr.bf16.mxu1 %v18996_v60  ;;  %v19024_v60 = vld [vmem:[%s28291_s24 + $0x348] ss:$16 sps:$4 sm:$0xff]  }
 0x20d   :  { %6515 = vmatpush2.bf16.msra.mxu0 %v18997_v39  ;;  %v19035_v39 = vld [vmem:[%s28291_s24 + $0x44c] ss:$16 sps:$4 sm:$0xff]  }
 0x20e   :  { %6488 = vmatpush2.bf16.msra.mxu1 %v18994_v6  ;;  %6516 = vmatprep.subr.bf16.mxu0 %v19002_v31  ;;  %v19032_v6 = vld [vmem:[%s28291_s24 + $0x32c] ss:$16 sps:$4 sm:$0xff]   ;;  %v19030_v31 = vld [vmem:[%s28291_s24 + $0x328] ss:$16 sps:$4 sm:$0xff]  }
 0x20f   :  { %6539 = vmatprep.subr.bf16.mxu1 %v19005_v44  ;;  %v19033_v44 = vld [vmem:[%s28291_s24 + $0x448] ss:$16 sps:$4 sm:$0xff]  }
 0x210   :  { %v6204_v21 = vpop.f32.mrf.mxu0 }
 0x211   :  { %v6245_v62 = vpop.f32.mrf.mxu1  ;;  %6490 = vmatmul.mubr.bf16.vlgmr.msra.gmra.mxu1 %v21676_v16  ;;  %v6205_v22 = vadd.f32 %v6204_v21, %v23060_v7  ;;  %6517 = vmatpush2.bf16.msra.mxu0 %v19000_v13  ;;  %v19012_v7 = vld [vmem:[%s28291_s24 + $0x388] ss:$16 sps:$4 sm:$0xff]   ;;  %v19038_v13 = vld [vmem:[%s28291_s24 + $0x30c] ss:$16 sps:$4 sm:$0xff]  }
 0x212   :  { %6540 = vmatpush1.bf16.msra.mxu1 %v19003_v15  ;;  %v6206_v23 = vpop.f32.mrf.mxu0  ;;  %6518 = vmatprep.subr.bf16.mxu0 %v19008_v59  ;;  %v19041_v15 = vld [vmem:[%s28291_s24 + $0x42c] ss:$16 sps:$4 sm:$0xff]   ;;  %v19036_v59 = vld [vmem:[%s28291_s24 + $0x308] ss:$16 sps:$4 sm:$0xff]  }
 0x213   :  { %v6247_v26 = vpop.f32.mrf.mxu1  ;;  %6541 = vmatprep.subr.bf16.mxu1 %v19011_v35  ;;  %v23269_v30 = vadd.f32 %v6245_v62, %v6205_v22  ;;  %v6207_v16 = vadd.f32 %v6206_v23, %v23071_v18  ;;  %6571 = vmatprep.mubr.bf16.mxu1 %v21777_v53  ;;  %v19020_v18 = vld [vmem:[%s28291_s24 + $0x36c] ss:$16 sps:$4 sm:$0xff]   ;;  %v19018_v53 = vld [vmem:[%s28291_s24 + $0x368] ss:$16 sps:$4 sm:$0xff]  }
 0x214   :  { %v6208_v12 = vpop.f32.mrf.mxu0  ;;  %v19039_v35 = vld [vmem:[%s28291_s24 + $0x428] ss:$16 sps:$4 sm:$0xff]   ;;  %v19050_v22 = vld [vmem:[%s28291_s24 + $0x5ec] ss:$16 sps:$4 sm:$0xff]  }
 0x215   :  { %v6249_v41 = vpop.f32.mrf.mxu1  ;;  %v23279_v45 = vadd.f32 %v6247_v26, %v6207_v16  ;;  %6519 = vmatpush2.bf16.msra.mxu0 %v19006_v36  ;;  %v19044_v36 = vld [vmem:[%s28291_s24 + $0x40c] ss:$16 sps:$4 sm:$0xff]   ;;  %v19042_v21 = vld [vmem:[%s28291_s24 + $0x408] ss:$16 sps:$4 sm:$0xff]  }
 0x216   :  { %6542 = vmatpush1.bf16.msra.mxu1 %v19009_v3  ;;  %v6209_v19 = vpop.f32.mrf.mxu0  ;;  %6520 = vmatprep.subr.bf16.mxu0 %v19014_v27  ;;  %v19047_v3 = vld [vmem:[%s28291_s24 + $0x6ec] ss:$16 sps:$4 sm:$0xff]   ;;  %v19045_v62 = vld [vmem:[%s28291_s24 + $0x6e8] ss:$16 sps:$4 sm:$0xff]  }
 0x217   :  { %v6250_v24 = vpop.f32.mrf.mxu1  ;;  %6543 = vmatprep.subr.bf16.mxu1 %v19017_v28  ;;  %v19053_v23 = vld [vmem:[%s28291_s24 + $0x6cc] ss:$16 sps:$4 sm:$0xff]   ;;  %v19048_v26 = vld [vmem:[%s28291_s24 + $0x5e8] ss:$16 sps:$4 sm:$0xff]  }
 0x218   :  { %v19051_v27 = vld [vmem:[%s28291_s24 + $0x6c8] ss:$16 sps:$4 sm:$0xff]   ;;  %v19056_v28 = vld [vmem:[%s28291_s24 + $0x5cc] ss:$16 sps:$4 sm:$0xff]  }
 0x219   :  { %6521 = vmatpush2.bf16.msra.mxu0 %v19012_v7  ;;  %v19059_v16 = vld [vmem:[%s28291_s24 + $0x6ac] ss:$16 sps:$4 sm:$0xff]   ;;  %v19054_v7 = vld [vmem:[%s28291_s24 + $0x5c8] ss:$16 sps:$4 sm:$0xff]  }
 0x21a   :  { %6544 = vmatpush1.bf16.msra.mxu1 %v19015_v40  ;;  %6522 = vmatprep.subr.bf16.mxu0 %v19020_v18  ;;  %v19062_v40 = vld [vmem:[%s28291_s24 + $0x5ac] ss:$16 sps:$4 sm:$0xff]   ;;  %v19060_v41 = vld [vmem:[%s28291_s24 + $0x5a8] ss:$16 sps:$4 sm:$0xff]  }
 0x21b   :  { %6545 = vmatprep.subr.bf16.mxu1 %v19023_v25  ;;  %v19065_v12 = vld [vmem:[%s28291_s24 + $0x68c] ss:$16 sps:$4 sm:$0xff]   ;;  %v19066_v18 = vld [vmem:[%s28291_s24 + $0x588] ss:$16 sps:$4 sm:$0xff]  }
 0x21c   :  { %v19068_v19 = vld [vmem:[%s28291_s24 + $0x58c] ss:$16 sps:$4 sm:$0xff]   ;;  %v19069_v25 = vld [vmem:[%s28291_s24 + $0x668] ss:$16 sps:$4 sm:$0xff]  }
 0x21d   :  { %6523 = vmatpush2.bf16.msra.mxu0 %v19018_v53  ;;  %v19071_v24 = vld [vmem:[%s28291_s24 + $0x66c] ss:$16 sps:$4 sm:$0xff]  }
 0x21e   :  { %6546 = vmatpush1.bf16.msra.mxu1 %v19021_v50  ;;  %6524 = vmatprep.subr.bf16.mxu0 %v19026_v51  ;;  %v19074_v53 = vld [vmem:[%s28291_s24 + $0x56c] ss:$16 sps:$4 sm:$0xff]   ;;  %v19072_v51 = vld [vmem:[%s28291_s24 + $0x568] ss:$16 sps:$4 sm:$0xff]  }
 0x21f   :  { %6547 = vmatprep.subr.bf16.mxu1 %v19029_v56  ;;  %v19077_v50 = vld [vmem:[%s28291_s24 + $0x64c] ss:$16 sps:$4 sm:$0xff]   ;;  %v19075_v56 = vld [vmem:[%s28291_s24 + $0x648] ss:$16 sps:$4 sm:$0xff]  }
 0x221   :  { %6525 = vmatpush2.bf16.msra.mxu0 %v19024_v60  ;;  %v19080_v60 = vld [vmem:[%s28291_s24 + $0x54c] ss:$16 sps:$4 sm:$0xff]  }
 0x222   :  { %6548 = vmatpush1.bf16.msra.mxu1 %v19027_v0  ;;  %6526 = vmatprep.subr.bf16.mxu0 %v19032_v6  ;;  %v19083_v0 = vld [vmem:[%s28291_s24 + $0x62c] ss:$16 sps:$4 sm:$0xff]   ;;  %v19078_v6 = vld [vmem:[%s28291_s24 + $0x548] ss:$16 sps:$4 sm:$0xff]  }
 0x223   :  { %6549 = vmatprep.subr.bf16.mxu1 %v19035_v39  ;;  %v19081_v39 = vld [vmem:[%s28291_s24 + $0x628] ss:$16 sps:$4 sm:$0xff]  }
 0x225   :  { %6527 = vmatpush2.bf16.msra.mxu0 %v19030_v31  ;;  %v19086_v31 = vld [vmem:[%s28291_s24 + $0x52c] ss:$16 sps:$4 sm:$0xff]  }
 0x226   :  { %6550 = vmatpush1.bf16.msra.mxu1 %v19033_v44  ;;  %6528 = vmatprep.subr.bf16.mxu0 %v19038_v13  ;;  %v19089_v44 = vld [vmem:[%s28291_s24 + $0x60c] ss:$16 sps:$4 sm:$0xff]   ;;  %v19084_v13 = vld [vmem:[%s28291_s24 + $0x528] ss:$16 sps:$4 sm:$0xff]  }
 0x227   :  { %6551 = vmatprep.subr.bf16.mxu1 %v19041_v15  ;;  %v19087_v15 = vld [vmem:[%s28291_s24 + $0x608] ss:$16 sps:$4 sm:$0xff]  }
 0x229   :  { %6529 = vmatpush2.bf16.msra.mxu0 %v19036_v59  ;;  %v19092_v59 = vld [vmem:[%s28291_s24 + $0x50c] ss:$16 sps:$4 sm:$0xff]  }
 0x22a   :  { %6552 = vmatpush1.bf16.msra.mxu1 %v19039_v35  ;;  %6580 = vmatprep.subr.bf16.mxu0 %v19047_v3  ;;  %v19095_v35 = vld [vmem:[%s28291_s24 + $0x7ec] ss:$16 sps:$4 sm:$0xff]   ;;  %v19093_v3 = vld [vmem:[%s28291_s24 + $0x7e8] ss:$16 sps:$4 sm:$0xff]  }
 0x22b   :  { %6553 = vmatprep.subr.bf16.mxu1 %v19044_v36  ;;  %v19090_v36 = vld [vmem:[%s28291_s24 + $0x508] ss:$16 sps:$4 sm:$0xff]  }
 0x22c   :  { %6531 = vmatmul.mubr.bf16.vlgmr.msra.gmra.mxu0 %v21678_v17  ;;  %v19057_v17 = vld [vmem:[%s28291_s24 + $0x6a8] ss:$16 sps:$4 sm:$0xff]  }
 0x22d   :  { %6581 = vmatpush1.bf16.msra.mxu0 %v19045_v62  ;;  %6612 = vmatprep.mubr.bf16.mxu0 %v21787_v57  ;;  %v19063_v57 = vld [vmem:[%s28291_s24 + $0x688] ss:$16 sps:$4 sm:$0xff]   ;;  %v19101_v62 = vld [vmem:[%s28291_s24 + $0x8ec] ss:$16 sps:$4 sm:$0xff]  }
 0x22e   :  { %6554 = vmatpush1.bf16.msra.mxu1 %v19042_v21  ;;  %6582 = vmatprep.subr.bf16.mxu0 %v19053_v23  ;;  %v19098_v21 = vld [vmem:[%s28291_s24 + $0x7cc] ss:$16 sps:$4 sm:$0xff]   ;;  %v19099_v23 = vld [vmem:[%s28291_s24 + $0x8e8] ss:$16 sps:$4 sm:$0xff]  }
 0x22f   :  { %6555 = vmatprep.subr.bf16.mxu1 %v19050_v22  ;;  %v19096_v22 = vld [vmem:[%s28291_s24 + $0x7c8] ss:$16 sps:$4 sm:$0xff]  }
 0x231   :  { %6583 = vmatpush1.bf16.msra.mxu0 %v19051_v27  ;;  %v19107_v27 = vld [vmem:[%s28291_s24 + $0x8cc] ss:$16 sps:$4 sm:$0xff]  }
 0x232   :  { %6556 = vmatpush2.bf16.msra.mxu1 %v19048_v26  ;;  %6584 = vmatprep.subr.bf16.mxu0 %v19059_v16  ;;  %v19104_v26 = vld [vmem:[%s28291_s24 + $0x7ac] ss:$16 sps:$4 sm:$0xff]   ;;  %v19105_v16 = vld [vmem:[%s28291_s24 + $0x8c8] ss:$16 sps:$4 sm:$0xff]  }
 0x233   :  { %6557 = vmatprep.subr.bf16.mxu1 %v19056_v28  ;;  %v19102_v28 = vld [vmem:[%s28291_s24 + $0x7a8] ss:$16 sps:$4 sm:$0xff]  }
 0x235   :  { %6585 = vmatpush1.bf16.msra.mxu0 %v19057_v17 }
 0x236   :  { %6558 = vmatpush2.bf16.msra.mxu1 %v19054_v7  ;;  %6586 = vmatprep.subr.bf16.mxu0 %v19065_v12 }
 0x237   :  { %6559 = vmatprep.subr.bf16.mxu1 %v19062_v40 }
 0x239   :  { %6587 = vmatpush1.bf16.msra.mxu0 %v19063_v57  ;;  %v19110_v57 = vld [vmem:[%s28291_s24 + $0x78c] ss:$16 sps:$4 sm:$0xff]  }
 0x23a   :  { %6560 = vmatpush2.bf16.msra.mxu1 %v19060_v41  ;;  %6588 = vmatprep.subr.bf16.mxu0 %v19071_v24 }
 0x23b   :  { %6561 = vmatprep.subr.bf16.mxu1 %v19068_v19  ;;  %v19113_v19 = vld [vmem:[%s28291_s24 + $0x8ac] ss:$16 sps:$4 sm:$0xff]  }
 0x23d   :  { %6589 = vmatpush1.bf16.msra.mxu0 %v19069_v25 }
 0x23e   :  { %6562 = vmatpush2.bf16.msra.mxu1 %v19066_v18  ;;  %6590 = vmatprep.subr.bf16.mxu0 %v19077_v50  ;;  %v19111_v18 = vld [vmem:[%s28291_s24 + $0x8a8] ss:$16 sps:$4 sm:$0xff]  }
 0x23f   :  { %6563 = vmatprep.subr.bf16.mxu1 %v19074_v53 }
 0x241   :  { %6591 = vmatpush1.bf16.msra.mxu0 %v19075_v56 }
 0x242   :  { %6564 = vmatpush2.bf16.msra.mxu1 %v19072_v51  ;;  %6592 = vmatprep.subr.bf16.mxu0 %v19083_v0  ;;  %v19117_v0 = vld [vmem:[%s28291_s24 + $0x888] ss:$16 sps:$4 sm:$0xff]  }
 0x243   :  { %6565 = vmatprep.subr.bf16.mxu1 %v19080_v60  ;;  %v19119_v60 = vld [vmem:[%s28291_s24 + $0x88c] ss:$16 sps:$4 sm:$0xff]  }
 0x245   :  { %6593 = vmatpush1.bf16.msra.mxu0 %v19081_v39  ;;  %v19125_v39 = vld [vmem:[%s28291_s24 + $0x86c] ss:$16 sps:$4 sm:$0xff]  }
 0x246   :  { %6566 = vmatpush2.bf16.msra.mxu1 %v19078_v6  ;;  %6594 = vmatprep.subr.bf16.mxu0 %v19089_v44  ;;  %v19122_v6 = vld [vmem:[%s28291_s24 + $0x74c] ss:$16 sps:$4 sm:$0xff]   ;;  %v19123_v44 = vld [vmem:[%s28291_s24 + $0x868] ss:$16 sps:$4 sm:$0xff]  }
 0x247   :  { %6567 = vmatprep.subr.bf16.mxu1 %v19086_v31  ;;  %v19120_v31 = vld [vmem:[%s28291_s24 + $0x748] ss:$16 sps:$4 sm:$0xff]  }
 0x249   :  { %6595 = vmatpush1.bf16.msra.mxu0 %v19087_v15  ;;  %v19131_v15 = vld [vmem:[%s28291_s24 + $0x84c] ss:$16 sps:$4 sm:$0xff]  }
 0x24a   :  { %6568 = vmatpush2.bf16.msra.mxu1 %v19084_v13  ;;  %6596 = vmatprep.subr.bf16.mxu0 %v19095_v35  ;;  %v19128_v13 = vld [vmem:[%s28291_s24 + $0x72c] ss:$16 sps:$4 sm:$0xff]   ;;  %v19129_v35 = vld [vmem:[%s28291_s24 + $0x848] ss:$16 sps:$4 sm:$0xff]  }
 0x24b   :  { %6569 = vmatprep.subr.bf16.mxu1 %v19092_v59  ;;  %v19126_v59 = vld [vmem:[%s28291_s24 + $0x728] ss:$16 sps:$4 sm:$0xff]  }
 0x24d   :  { %6597 = vmatpush2.bf16.msra.mxu0 %v19093_v3  ;;  %v19137_v3 = vld [vmem:[%s28291_s24 + $0x82c] ss:$16 sps:$4 sm:$0xff]  }
 0x24e   :  { %6570 = vmatpush2.bf16.msra.mxu1 %v19090_v36  ;;  %6598 = vmatprep.subr.bf16.mxu0 %v19098_v21  ;;  %v19134_v36 = vld [vmem:[%s28291_s24 + $0x70c] ss:$16 sps:$4 sm:$0xff]   ;;  %v19132_v21 = vld [vmem:[%s28291_s24 + $0x708] ss:$16 sps:$4 sm:$0xff]  }
 0x24f   :  { %6621 = vmatprep.subr.bf16.mxu1 %v19101_v62  ;;  %v19135_v62 = vld [vmem:[%s28291_s24 + $0x828] ss:$16 sps:$4 sm:$0xff]  }
 0x250   :  { %v6286_v7 = vpop.f32.mrf.mxu0 }
 0x251   :  { %v6327_v17 = vpop.f32.mrf.mxu1  ;;  %6572 = vmatmul.mubr.bf16.vlgmr.msra.gmra.mxu1 %v21895_v32  ;;  %v6287_v40 = vadd.f32 %v6286_v7, %v23269_v30  ;;  %6599 = vmatpush2.bf16.msra.mxu0 %v19096_v22  ;;  %v19108_v30 = vld [vmem:[%s28291_s24 + $0x788] ss:$16 sps:$4 sm:$0xff]   ;;  %v19140_v22 = vld [vmem:[%s28291_s24 + $0x80c] ss:$16 sps:$4 sm:$0xff]  }
 0x252   :  { %6622 = vmatpush1.bf16.msra.mxu1 %v19099_v23  ;;  %v6288_v12 = vpop.f32.mrf.mxu0  ;;  %6600 = vmatprep.subr.bf16.mxu0 %v19104_v26  ;;  %v19143_v23 = vld [vmem:[%s28291_s24 + $0xaec] ss:$16 sps:$4 sm:$0xff]   ;;  %v19138_v26 = vld [vmem:[%s28291_s24 + $0x808] ss:$16 sps:$4 sm:$0xff]  }
 0x253   :  { %v6329_v41 = vpop.f32.mrf.mxu1  ;;  %6623 = vmatprep.subr.bf16.mxu1 %v19107_v27  ;;  %v23471_v24 = vadd.f32 %v6327_v17, %v6287_v40  ;;  %v6289_v32 = vadd.f32 %v6288_v12, %v23279_v45  ;;  %6653 = vmatprep.mubr.bf16.mxu1 %v21938_v48  ;;  %v19116_v45 = vld [vmem:[%s28291_s24 + $0x76c] ss:$16 sps:$4 sm:$0xff]   ;;  %v19114_v48 = vld [vmem:[%s28291_s24 + $0x768] ss:$16 sps:$4 sm:$0xff]  }
 0x254   :  { %v6290_v25 = vpop.f32.mrf.mxu0  ;;  %v19141_v27 = vld [vmem:[%s28291_s24 + $0xae8] ss:$16 sps:$4 sm:$0xff]   ;;  %v19152_v40 = vld [vmem:[%s28291_s24 + $0x9cc] ss:$16 sps:$4 sm:$0xff]  }
 0x255   :  { %v6331_v53 = vpop.f32.mrf.mxu1  ;;  %v23481_v50 = vadd.f32 %v6329_v41, %v6289_v32  ;;  %6601 = vmatpush2.bf16.msra.mxu0 %v19102_v28  ;;  %v19146_v28 = vld [vmem:[%s28291_s24 + $0x9ec] ss:$16 sps:$4 sm:$0xff]   ;;  %v19144_v7 = vld [vmem:[%s28291_s24 + $0x9e8] ss:$16 sps:$4 sm:$0xff]  }
 0x256   :  { %6624 = vmatpush1.bf16.msra.mxu1 %v19105_v16  ;;  %v6291_v51 = vpop.f32.mrf.mxu0  ;;  %6602 = vmatprep.subr.bf16.mxu0 %v19110_v57  ;;  %v19149_v16 = vld [vmem:[%s28291_s24 + $0xacc] ss:$16 sps:$4 sm:$0xff]   ;;  %v19147_v17 = vld [vmem:[%s28291_s24 + $0xac8] ss:$16 sps:$4 sm:$0xff]  }
 0x257   :  { %v6332_v56 = vpop.f32.mrf.mxu1  ;;  %6625 = vmatprep.subr.bf16.mxu1 %v19113_v19  ;;  %v19155_v12 = vld [vmem:[%s28291_s24 + $0xaac] ss:$16 sps:$4 sm:$0xff]   ;;  %v19150_v41 = vld [vmem:[%s28291_s24 + $0x9c8] ss:$16 sps:$4 sm:$0xff]  }
 0x258   :  { %v19158_v57 = vld [vmem:[%s28291_s24 + $0x9ac] ss:$16 sps:$4 sm:$0xff]   ;;  %v19156_v32 = vld [vmem:[%s28291_s24 + $0x9a8] ss:$16 sps:$4 sm:$0xff]  }
 0x259   :  { %6603 = vmatpush2.bf16.msra.mxu0 %v19108_v30  ;;  %v19161_v19 = vld [vmem:[%s28291_s24 + $0xa8c] ss:$16 sps:$4 sm:$0xff]   ;;  %v19162_v25 = vld [vmem:[%s28291_s24 + $0x988] ss:$16 sps:$4 sm:$0xff]  }
 0x25a   :  { %6626 = vmatpush1.bf16.msra.mxu1 %v19111_v18  ;;  %6604 = vmatprep.subr.bf16.mxu0 %v19116_v45  ;;  %v19164_v30 = vld [vmem:[%s28291_s24 + $0x98c] ss:$16 sps:$4 sm:$0xff]   ;;  %v19165_v53 = vld [vmem:[%s28291_s24 + $0xa68] ss:$16 sps:$4 sm:$0xff]  }
 0x25b   :  { %6627 = vmatprep.subr.bf16.mxu1 %v19119_v60  ;;  %v19167_v18 = vld [vmem:[%s28291_s24 + $0xa6c] ss:$16 sps:$4 sm:$0xff]   ;;  %v19168_v45 = vld [vmem:[%s28291_s24 + $0x968] ss:$16 sps:$4 sm:$0xff]  }
 0x25c   :  { %v19170_v51 = vld [vmem:[%s28291_s24 + $0x96c] ss:$16 sps:$4 sm:$0xff]   ;;  %v19171_v60 = vld [vmem:[%s28291_s24 + $0xa48] ss:$16 sps:$4 sm:$0xff]  }
 0x25d   :  { %6605 = vmatpush2.bf16.msra.mxu0 %v19114_v48  ;;  %v19173_v56 = vld [vmem:[%s28291_s24 + $0xa4c] ss:$16 sps:$4 sm:$0xff]  }
 0x25e   :  { %6628 = vmatpush1.bf16.msra.mxu1 %v19117_v0  ;;  %6606 = vmatprep.subr.bf16.mxu0 %v19122_v6  ;;  %v19176_v48 = vld [vmem:[%s28291_s24 + $0x94c] ss:$16 sps:$4 sm:$0xff]   ;;  %v19174_v6 = vld [vmem:[%s28291_s24 + $0x948] ss:$16 sps:$4 sm:$0xff]  }
 0x25f   :  { %6629 = vmatprep.subr.bf16.mxu1 %v19125_v39  ;;  %v19179_v0 = vld [vmem:[%s28291_s24 + $0xa2c] ss:$16 sps:$4 sm:$0xff]   ;;  %v19177_v39 = vld [vmem:[%s28291_s24 + $0xa28] ss:$16 sps:$4 sm:$0xff]  }
 0x261   :  { %6607 = vmatpush2.bf16.msra.mxu0 %v19120_v31  ;;  %v19182_v31 = vld [vmem:[%s28291_s24 + $0x92c] ss:$16 sps:$4 sm:$0xff]  }
 0x262   :  { %6630 = vmatpush1.bf16.msra.mxu1 %v19123_v44  ;;  %6608 = vmatprep.subr.bf16.mxu0 %v19128_v13  ;;  %v19185_v44 = vld [vmem:[%s28291_s24 + $0xa0c] ss:$16 sps:$4 sm:$0xff]   ;;  %v19180_v13 = vld [vmem:[%s28291_s24 + $0x928] ss:$16 sps:$4 sm:$0xff]  }
 0x263   :  { %6631 = vmatprep.subr.bf16.mxu1 %v19131_v15  ;;  %v19183_v15 = vld [vmem:[%s28291_s24 + $0xa08] ss:$16 sps:$4 sm:$0xff]  }
 0x265   :  { %6609 = vmatpush2.bf16.msra.mxu0 %v19126_v59  ;;  %v19188_v59 = vld [vmem:[%s28291_s24 + $0x90c] ss:$16 sps:$4 sm:$0xff]  }
 0x266   :  { %6632 = vmatpush1.bf16.msra.mxu1 %v19129_v35  ;;  %6610 = vmatprep.subr.bf16.mxu0 %v19134_v36  ;;  %v19191_v35 = vld [vmem:[%s28291_s24 + $0xbec] ss:$16 sps:$4 sm:$0xff]   ;;  %v19186_v36 = vld [vmem:[%s28291_s24 + $0x908] ss:$16 sps:$4 sm:$0xff]  }
 0x267   :  { %6633 = vmatprep.subr.bf16.mxu1 %v19137_v3  ;;  %v19189_v3 = vld [vmem:[%s28291_s24 + $0xbe8] ss:$16 sps:$4 sm:$0xff]  }
 0x269   :  { %6611 = vmatpush2.bf16.msra.mxu0 %v19132_v21  ;;  %v19194_v21 = vld [vmem:[%s28291_s24 + $0xbcc] ss:$16 sps:$4 sm:$0xff]  }
 0x26a   :  { %6634 = vmatpush1.bf16.msra.mxu1 %v19135_v62  ;;  %6662 = vmatprep.subr.bf16.mxu0 %v19143_v23  ;;  %v19197_v62 = vld [vmem:[%s28291_s24 + $0xcec] ss:$16 sps:$4 sm:$0xff]   ;;  %v19195_v23 = vld [vmem:[%s28291_s24 + $0xce8] ss:$16 sps:$4 sm:$0xff]  }
 0x26b   :  { %6635 = vmatprep.subr.bf16.mxu1 %v19140_v22  ;;  %v19192_v22 = vld [vmem:[%s28291_s24 + $0xbc8] ss:$16 sps:$4 sm:$0xff]  }
 0x26c   :  { %6613 = vmatmul.mubr.bf16.vlgmr.msra.gmra.mxu0 %v21899_v33  ;;  %v19153_v33 = vld [vmem:[%s28291_s24 + $0xaa8] ss:$16 sps:$4 sm:$0xff]  }
 0x26d   :  { %6663 = vmatpush1.bf16.msra.mxu0 %v19141_v27  ;;  %6694 = vmatprep.mubr.bf16.mxu0 %v21946_v52  ;;  %v19159_v52 = vld [vmem:[%s28291_s24 + $0xa88] ss:$16 sps:$4 sm:$0xff]   ;;  %v19203_v27 = vld [vmem:[%s28291_s24 + $0xccc] ss:$16 sps:$4 sm:$0xff]  }
 0x26e   :  { %6636 = vmatpush1.bf16.msra.mxu1 %v19138_v26  ;;  %6664 = vmatprep.subr.bf16.mxu0 %v19149_v16  ;;  %v19200_v26 = vld [vmem:[%s28291_s24 + $0xbac] ss:$16 sps:$4 sm:$0xff]   ;;  %v19201_v16 = vld [vmem:[%s28291_s24 + $0xcc8] ss:$16 sps:$4 sm:$0xff]  }
 0x26f   :  { %6637 = vmatprep.subr.bf16.mxu1 %v19146_v28  ;;  %v19198_v28 = vld [vmem:[%s28291_s24 + $0xba8] ss:$16 sps:$4 sm:$0xff]  }
 0x271   :  { %6665 = vmatpush1.bf16.msra.mxu0 %v19147_v17 }
 0x272   :  { %6638 = vmatpush2.bf16.msra.mxu1 %v19144_v7  ;;  %6666 = vmatprep.subr.bf16.mxu0 %v19155_v12 }
 0x273   :  { %6639 = vmatprep.subr.bf16.mxu1 %v19152_v40 }
 0x275   :  { %6667 = vmatpush1.bf16.msra.mxu0 %v19153_v33  ;;  %v19206_v33 = vld [vmem:[%s28291_s24 + $0xb8c] ss:$16 sps:$4 sm:$0xff]  }
 0x276   :  { %6640 = vmatpush2.bf16.msra.mxu1 %v19150_v41  ;;  %6668 = vmatprep.subr.bf16.mxu0 %v19161_v19 }
 0x277   :  { %6641 = vmatprep.subr.bf16.mxu1 %v19158_v57  ;;  %v19209_v57 = vld [vmem:[%s28291_s24 + $0xcac] ss:$16 sps:$4 sm:$0xff]  }
 0x279   :  { %6669 = vmatpush1.bf16.msra.mxu0 %v19159_v52 }
 0x27a   :  { %6642 = vmatpush2.bf16.msra.mxu1 %v19156_v32  ;;  %6670 = vmatprep.subr.bf16.mxu0 %v19167_v18 }
 0x27b   :  { %6643 = vmatprep.subr.bf16.mxu1 %v19164_v30 }
 0x27d   :  { %6671 = vmatpush1.bf16.msra.mxu0 %v19165_v53 }
 0x27e   :  { %6644 = vmatpush2.bf16.msra.mxu1 %v19162_v25  ;;  %6672 = vmatprep.subr.bf16.mxu0 %v19173_v56  ;;  %v19213_v56 = vld [vmem:[%s28291_s24 + $0xc88] ss:$16 sps:$4 sm:$0xff]  }
 0x27f   :  { %6645 = vmatprep.subr.bf16.mxu1 %v19170_v51  ;;  %v19215_v51 = vld [vmem:[%s28291_s24 + $0xc8c] ss:$16 sps:$4 sm:$0xff]  }
 0x281   :  { %6673 = vmatpush1.bf16.msra.mxu0 %v19171_v60  ;;  %v19221_v60 = vld [vmem:[%s28291_s24 + $0xc6c] ss:$16 sps:$4 sm:$0xff]  }
 0x282   :  { %6646 = vmatpush2.bf16.msra.mxu1 %v19168_v45  ;;  %6674 = vmatprep.subr.bf16.mxu0 %v19179_v0  ;;  %v19218_v45 = vld [vmem:[%s28291_s24 + $0xb4c] ss:$16 sps:$4 sm:$0xff]   ;;  %v19219_v0 = vld [vmem:[%s28291_s24 + $0xc68] ss:$16 sps:$4 sm:$0xff]  }
 0x283   :  { %6647 = vmatprep.subr.bf16.mxu1 %v19176_v48  ;;  %v19216_v48 = vld [vmem:[%s28291_s24 + $0xb48] ss:$16 sps:$4 sm:$0xff]  }
 0x285   :  { %6675 = vmatpush1.bf16.msra.mxu0 %v19177_v39  ;;  %v19227_v39 = vld [vmem:[%s28291_s24 + $0xc4c] ss:$16 sps:$4 sm:$0xff]  }
 0x286   :  { %6648 = vmatpush2.bf16.msra.mxu1 %v19174_v6  ;;  %6676 = vmatprep.subr.bf16.mxu0 %v19185_v44  ;;  %v19224_v6 = vld [vmem:[%s28291_s24 + $0xb2c] ss:$16 sps:$4 sm:$0xff]   ;;  %v19225_v44 = vld [vmem:[%s28291_s24 + $0xc48] ss:$16 sps:$4 sm:$0xff]  }
 0x287   :  { %6649 = vmatprep.subr.bf16.mxu1 %v19182_v31  ;;  %v19222_v31 = vld [vmem:[%s28291_s24 + $0xb28] ss:$16 sps:$4 sm:$0xff]  }
 0x289   :  { %6677 = vmatpush1.bf16.msra.mxu0 %v19183_v15  ;;  %v19233_v15 = vld [vmem:[%s28291_s24 + $0xc2c] ss:$16 sps:$4 sm:$0xff]  }
 0x28a   :  { %6650 = vmatpush2.bf16.msra.mxu1 %v19180_v13  ;;  %6678 = vmatprep.subr.bf16.mxu0 %v19191_v35  ;;  %v19230_v13 = vld [vmem:[%s28291_s24 + $0xb0c] ss:$16 sps:$4 sm:$0xff]   ;;  %v19231_v35 = vld [vmem:[%s28291_s24 + $0xc28] ss:$16 sps:$4 sm:$0xff]  }
 0x28b   :  { %6651 = vmatprep.subr.bf16.mxu1 %v19188_v59  ;;  %v19228_v59 = vld [vmem:[%s28291_s24 + $0xb08] ss:$16 sps:$4 sm:$0xff]  }
 0x28d   :  { %6679 = vmatpush2.bf16.msra.mxu0 %v19189_v3  ;;  %v19239_v3 = vld [vmem:[%s28291_s24 + $0xeec] ss:$16 sps:$4 sm:$0xff]  }
 0x28e   :  { %6652 = vmatpush2.bf16.msra.mxu1 %v19186_v36  ;;  %6680 = vmatprep.subr.bf16.mxu0 %v19194_v21  ;;  %v19236_v36 = vld [vmem:[%s28291_s24 + $0xc0c] ss:$16 sps:$4 sm:$0xff]   ;;  %v19234_v21 = vld [vmem:[%s28291_s24 + $0xc08] ss:$16 sps:$4 sm:$0xff]  }
 0x28f   :  { %6703 = vmatprep.subr.bf16.mxu1 %v19197_v62  ;;  %v19237_v62 = vld [vmem:[%s28291_s24 + $0xee8] ss:$16 sps:$4 sm:$0xff]  }
 0x290   :  { %v6368_v7 = vpop.f32.mrf.mxu0 }
 0x291   :  { %v6409_v17 = vpop.f32.mrf.mxu1  ;;  %6654 = vmatmul.mubr.bf16.vlgmr.msra.gmra.mxu1 %v22129_v4  ;;  %v6369_v40 = vadd.f32 %v6368_v7, %v23471_v24  ;;  %6681 = vmatpush2.bf16.msra.mxu0 %v19192_v22  ;;  %v19204_v4 = vld [vmem:[%s28291_s24 + $0xb88] ss:$16 sps:$4 sm:$0xff]   ;;  %v19242_v22 = vld [vmem:[%s28291_s24 + $0xdec] ss:$16 sps:$4 sm:$0xff]  }
 0x292   :  { %6704 = vmatpush1.bf16.msra.mxu1 %v19195_v23  ;;  %v6370_v12 = vpop.f32.mrf.mxu0  ;;  %6682 = vmatprep.subr.bf16.mxu0 %v19200_v26  ;;  %v19207_v24 = vld [vmem:[%s28291_s24 + $0xca8] ss:$16 sps:$4 sm:$0xff]   ;;  %v19245_v23 = vld [vmem:[%s28291_s24 + $0xecc] ss:$16 sps:$4 sm:$0xff]  }
 0x293   :  { %v6411_v41 = vpop.f32.mrf.mxu1  ;;  %6705 = vmatprep.subr.bf16.mxu1 %v19203_v27  ;;  %v6410_v19 = vadd.f32 %v6409_v17, %v6369_v40  ;;  %v6371_v32 = vadd.f32 %v6370_v12, %v23481_v50  ;;  %6735 = vmatprep.mubr.bf16.mxu1 %v22147_v8  ;;  %v19212_v50 = vld [vmem:[%s28291_s24 + $0xb6c] ss:$16 sps:$4 sm:$0xff]   ;;  %v19210_v8 = vld [vmem:[%s28291_s24 + $0xb68] ss:$16 sps:$4 sm:$0xff]  }
 0x294   :  { %v6372_v52 = vpop.f32.mrf.mxu0  ;;  %v19240_v26 = vld [vmem:[%s28291_s24 + $0xde8] ss:$16 sps:$4 sm:$0xff]   ;;  %v19248_v17 = vld [vmem:[%s28291_s24 + $0xdcc] ss:$16 sps:$4 sm:$0xff]  }
 0x295   :  { %v6413_v30 = vpop.f32.mrf.mxu1  ;;  %v6412_v18 = vadd.f32 %v6411_v41, %v6371_v32  ;;  %6683 = vmatpush2.bf16.msra.mxu0 %v19198_v28  ;;  %v19243_v27 = vld [vmem:[%s28291_s24 + $0xec8] ss:$16 sps:$4 sm:$0xff]   ;;  %v19251_v40 = vld [vmem:[%s28291_s24 + $0xeac] ss:$16 sps:$4 sm:$0xff]  }
 0x296   :  { %6706 = vmatpush1.bf16.msra.mxu1 %v19201_v16  ;;  %v6373_v25 = vpop.f32.mrf.mxu0  ;;  %6684 = vmatprep.subr.bf16.mxu0 %v19206_v33  ;;  %v19249_v41 = vld [vmem:[%s28291_s24 + $0xea8] ss:$16 sps:$4 sm:$0xff]   ;;  %v19257_v32 = vld [vmem:[%s28291_s24 + $0xe8c] ss:$16 sps:$4 sm:$0xff]  }
 0x297   :  { %v6414_v53 = vpop.f32.mrf.mxu1  ;;  %6707 = vmatprep.subr.bf16.mxu1 %v19209_v57  ;;  %v19263_v52 = vld [vmem:[%s28291_s24 + $0xe6c] ss:$16 sps:$4 sm:$0xff]   ;;  %v19258_v30 = vld [vmem:[%s28291_s24 + $0xd88] ss:$16 sps:$4 sm:$0xff]  }
 0x298   :  { %v19266_v25 = vld [vmem:[%s28291_s24 + $0xd6c] ss:$16 sps:$4 sm:$0xff]  }
 0x299   :  { %6685 = vmatpush2.bf16.msra.mxu0 %v19204_v4  ;;  %v19255_v4 = vld [vmem:[%s28291_s24 + $0xe88] ss:$16 sps:$4 sm:$0xff]   ;;  %v19269_v53 = vld [vmem:[%s28291_s24 + $0xe4c] ss:$16 sps:$4 sm:$0xff]  }
 0x29a   :  { %6708 = vmatpush1.bf16.msra.mxu1 %v19207_v24  ;;  %6686 = vmatprep.subr.bf16.mxu0 %v19212_v50  ;;  %v19260_v24 = vld [vmem:[%s28291_s24 + $0xd8c] ss:$16 sps:$4 sm:$0xff]   ;;  %v19264_v50 = vld [vmem:[%s28291_s24 + $0xd68] ss:$16 sps:$4 sm:$0xff]  }
 0x29b   :  { %6709 = vmatprep.subr.bf16.mxu1 %v19215_v51  ;;  %v19267_v51 = vld [vmem:[%s28291_s24 + $0xe48] ss:$16 sps:$4 sm:$0xff]  }
 0x29d   :  { %6687 = vmatpush2.bf16.msra.mxu0 %v19210_v8  ;;  %v19272_v8 = vld [vmem:[%s28291_s24 + $0xd4c] ss:$16 sps:$4 sm:$0xff]  }
 0x29e   :  { %6710 = vmatpush1.bf16.msra.mxu1 %v19213_v56  ;;  %6688 = vmatprep.subr.bf16.mxu0 %v19218_v45  ;;  %v19275_v56 = vld [vmem:[%s28291_s24 + $0xe2c] ss:$16 sps:$4 sm:$0xff]   ;;  %v19270_v45 = vld [vmem:[%s28291_s24 + $0xd48] ss:$16 sps:$4 sm:$0xff]  }
 0x29f   :  { %6711 = vmatprep.subr.bf16.mxu1 %v19221_v60  ;;  %v19273_v60 = vld [vmem:[%s28291_s24 + $0xe28] ss:$16 sps:$4 sm:$0xff]  }
 0x2a1   :  { %6689 = vmatpush2.bf16.msra.mxu0 %v19216_v48  ;;  %v19278_v48 = vld [vmem:[%s28291_s24 + $0xd2c] ss:$16 sps:$4 sm:$0xff]  }
 0x2a2   :  { %6712 = vmatpush1.bf16.msra.mxu1 %v19219_v0  ;;  %6690 = vmatprep.subr.bf16.mxu0 %v19224_v6  ;;  %v19281_v0 = vld [vmem:[%s28291_s24 + $0xe0c] ss:$16 sps:$4 sm:$0xff]   ;;  %v19276_v6 = vld [vmem:[%s28291_s24 + $0xd28] ss:$16 sps:$4 sm:$0xff]  }
 0x2a3   :  { %6713 = vmatprep.subr.bf16.mxu1 %v19227_v39  ;;  %v19279_v39 = vld [vmem:[%s28291_s24 + $0xe08] ss:$16 sps:$4 sm:$0xff]  }
 0x2a5   :  { %6691 = vmatpush2.bf16.msra.mxu0 %v19222_v31  ;;  %v19284_v31 = vld [vmem:[%s28291_s24 + $0xd0c] ss:$16 sps:$4 sm:$0xff]  }
 0x2a6   :  { %6714 = vmatpush1.bf16.msra.mxu1 %v19225_v44  ;;  %6692 = vmatprep.subr.bf16.mxu0 %v19230_v13  ;;  %v19287_v44 = vld [vmem:[%s28291_s24 + $0xfec] ss:$16 sps:$4 sm:$0xff]   ;;  %v19282_v13 = vld [vmem:[%s28291_s24 + $0xd08] ss:$16 sps:$4 sm:$0xff]  }
 0x2a7   :  { %6715 = vmatprep.subr.bf16.mxu1 %v19233_v15  ;;  %v19285_v15 = vld [vmem:[%s28291_s24 + $0xfe8] ss:$16 sps:$4 sm:$0xff]  }
 0x2a9   :  { %6693 = vmatpush2.bf16.msra.mxu0 %v19228_v59  ;;  %v19290_v59 = vld [vmem:[%s28291_s24 + $0xfcc] ss:$16 sps:$4 sm:$0xff]  }
 0x2aa   :  { %6716 = vmatpush1.bf16.msra.mxu1 %v19231_v35  ;;  %6744 = vmatprep.subr.bf16.mxu0 %v19239_v3  ;;  %v19293_v35 = vld [vmem:[%s28291_s24 + $0x10ec] ss:$16 sps:$4 sm:$0xff]   ;;  %v19291_v3 = vld [vmem:[%s28291_s24 + $0x10e8] ss:$16 sps:$4 sm:$0xff]  }
 0x2ab   :  { %6717 = vmatprep.subr.bf16.mxu1 %v19236_v36  ;;  %v19288_v36 = vld [vmem:[%s28291_s24 + $0xfc8] ss:$16 sps:$4 sm:$0xff]  }
 0x2ac   :  { %v6450_v28 = vpop.f32.mrf.mxu0  ;;  %6695 = vmatmul.mubr.bf16.vlgmr.msra.gmra.mxu0 %v22133_v5  ;;  %v19246_v5 = vld [vmem:[%s28291_s24 + $0xdc8] ss:$16 sps:$4 sm:$0xff]  }
 0x2ad   :  { %v23754_v16 = vadd.f32 %v6450_v28, %v6410_v19  ;;  %6745 = vmatpush1.bf16.msra.mxu0 %v19237_v62  ;;  %6776 = vmatprep.mubr.bf16.mxu0 %v22149_v9  ;;  %v19254_v19 = vld [vmem:[%s28291_s24 + $0xdac] ss:$16 sps:$4 sm:$0xff]   ;;  %v19252_v9 = vld [vmem:[%s28291_s24 + $0xda8] ss:$16 sps:$4 sm:$0xff]  }
 0x2ae   :  { %6718 = vmatpush1.bf16.msra.mxu1 %v19234_v21  ;;  %v6452_v7 = vpop.f32.mrf.mxu0  ;;  %6746 = vmatprep.subr.bf16.mxu0 %v19245_v23  ;;  %v19296_v21 = vld [vmem:[%s28291_s24 + $0xfac] ss:$16 sps:$4 sm:$0xff]   ;;  %v19297_v23 = vld [vmem:[%s28291_s24 + $0x10c8] ss:$16 sps:$4 sm:$0xff]  }
 0x2af   :  { %6719 = vmatprep.subr.bf16.mxu1 %v19242_v22  ;;  %v23762_v12 = vadd.f32 %v6452_v7, %v6412_v18  ;;  %v19261_v18 = vld [vmem:[%s28291_s24 + $0xe68] ss:$16 sps:$4 sm:$0xff]   ;;  %v19299_v62 = vld [vmem:[%s28291_s24 + $0x10cc] ss:$16 sps:$4 sm:$0xff]  }
 0x2b0   :  { %v6454_v33 = vpop.f32.mrf.mxu0  ;;  %v19294_v22 = vld [vmem:[%s28291_s24 + $0xfa8] ss:$16 sps:$4 sm:$0xff]   ;;  %v19302_v28 = vld [vmem:[%s28291_s24 + $0xf8c] ss:$16 sps:$4 sm:$0xff]  }
 0x2b1   :  { %6747 = vmatpush1.bf16.msra.mxu0 %v19243_v27  ;;  %v19305_v7 = vld [vmem:[%s28291_s24 + $0x10ac] ss:$16 sps:$4 sm:$0xff]  }
 0x2b2   :  { %6720 = vmatpush2.bf16.msra.mxu1 %v19240_v26  ;;  %v6455_v57 = vpop.f32.mrf.mxu0  ;;  %6748 = vmatprep.subr.bf16.mxu0 %v19251_v40  ;;  %v19311_v33 = vld [vmem:[%s28291_s24 + $0x108c] ss:$16 sps:$4 sm:$0xff]  }
 0x2b3   :  { %6721 = vmatprep.subr.bf16.mxu1 %v19248_v17  ;;  %v19300_v17 = vld [vmem:[%s28291_s24 + $0xf88] ss:$16 sps:$4 sm:$0xff]  }
 0x2b4   :  { %v19309_v57 = vld [vmem:[%s28291_s24 + $0x1088] ss:$16 sps:$4 sm:$0xff]  }
 0x2b5   :  { %6749 = vmatpush1.bf16.msra.mxu0 %v19249_v41  ;;  %v19308_v41 = vld [vmem:[%s28291_s24 + $0xf6c] ss:$16 sps:$4 sm:$0xff]  }
 0x2b6   :  { %6722 = vmatpush2.bf16.msra.mxu1 %v19246_v5  ;;  %6750 = vmatprep.subr.bf16.mxu0 %v19257_v32  ;;  %v19317_v32 = vld [vmem:[%s28291_s24 + $0x106c] ss:$16 sps:$4 sm:$0xff]  }
 0x2b7   :  { %6723 = vmatprep.subr.bf16.mxu1 %v19254_v19  ;;  %v19314_v19 = vld [vmem:[%s28291_s24 + $0xf4c] ss:$16 sps:$4 sm:$0xff]  }
 0x2b9   :  { %6751 = vmatpush1.bf16.msra.mxu0 %v19255_v4  ;;  %v19315_v4 = vld [vmem:[%s28291_s24 + $0x1068] ss:$16 sps:$4 sm:$0xff]  }
 0x2ba   :  { %6724 = vmatpush2.bf16.msra.mxu1 %v19252_v9  ;;  %6752 = vmatprep.subr.bf16.mxu0 %v19263_v52  ;;  %v19312_v9 = vld [vmem:[%s28291_s24 + $0xf48] ss:$16 sps:$4 sm:$0xff]   ;;  %v19323_v52 = vld [vmem:[%s28291_s24 + $0x104c] ss:$16 sps:$4 sm:$0xff]  }
 0x2bb   :  { %6725 = vmatprep.subr.bf16.mxu1 %v19260_v24  ;;  %v19320_v24 = vld [vmem:[%s28291_s24 + $0xf2c] ss:$16 sps:$4 sm:$0xff]  }
 0x2bd   :  { %6753 = vmatpush1.bf16.msra.mxu0 %v19261_v18  ;;  %v19321_v18 = vld [vmem:[%s28291_s24 + $0x1048] ss:$16 sps:$4 sm:$0xff]  }
 0x2be   :  { %6726 = vmatpush2.bf16.msra.mxu1 %v19258_v30  ;;  %6754 = vmatprep.subr.bf16.mxu0 %v19269_v53  ;;  %v19318_v30 = vld [vmem:[%s28291_s24 + $0xf28] ss:$16 sps:$4 sm:$0xff]   ;;  %v19329_v53 = vld [vmem:[%s28291_s24 + $0x102c] ss:$16 sps:$4 sm:$0xff]  }
 0x2bf   :  { %6727 = vmatprep.subr.bf16.mxu1 %v19266_v25  ;;  %v19326_v25 = vld [vmem:[%s28291_s24 + $0xf0c] ss:$16 sps:$4 sm:$0xff]  }
 0x2c1   :  { %6755 = vmatpush1.bf16.msra.mxu0 %v19267_v51  ;;  %v23931_v51 = vsub.s32 3, %v21579_v43 }
 0x2c2   :  { %6728 = vmatpush2.bf16.msra.mxu1 %v19264_v50  ;;  %6756 = vmatprep.subr.bf16.mxu0 %v19275_v56  ;;  %v23928_v50 = vsub.s32 2, %v21579_v43  ;;  %v19327_v56 = vld [vmem:[%s28291_s24 + $0x1028] ss:$16 sps:$4 sm:$0xff]  }
 0x2c3   :  { %6729 = vmatprep.subr.bf16.mxu1 %v19272_v8  ;;  %v19324_v8 = vld [vmem:[%s28291_s24 + $0xf08] ss:$16 sps:$4 sm:$0xff]  }
 0x2c5   :  { %6757 = vmatpush1.bf16.msra.mxu0 %v19273_v60  ;;  %v19335_v60 = vld [vmem:[%s28291_s24 + $0x12ec] ss:$16 sps:$4 sm:$0xff]  }
 0x2c6   :  { %6730 = vmatpush2.bf16.msra.mxu1 %v19270_v45  ;;  %6758 = vmatprep.subr.bf16.mxu0 %v19281_v0  ;;  %v19332_v45 = vld [vmem:[%s28291_s24 + $0x100c] ss:$16 sps:$4 sm:$0xff]  }
 0x2c7   :  { %6731 = vmatprep.subr.bf16.mxu1 %v19278_v48  ;;  %v21268_v48 = vld [vmem:[%s28293_s3] sm:$0xf] }
 0x2c8   :  { %v1209_v0 = vrot.slane %v21268_v48, %v23928_v50 }
 0x2c9   :  { %6759 = vmatpush1.bf16.msra.mxu0 %v19279_v39  ;;  %v19333_v39 = vld [vmem:[%s28291_s24 + $0x12e8] ss:$16 sps:$4 sm:$0xff]  }
 0x2ca   :  { %6732 = vmatpush2.bf16.msra.mxu1 %v19276_v6  ;;  %6760 = vmatprep.subr.bf16.mxu0 %v19287_v44  ;;  %v19330_v6 = vld [vmem:[%s28291_s24 + $0x1008] ss:$16 sps:$4 sm:$0xff]   ;;  %v19338_v44 = vld [vmem:[%s28291_s24 + $0x11ec] ss:$16 sps:$4 sm:$0xff]  }
 0x2cb   :  { %6733 = vmatprep.subr.bf16.mxu1 %v19284_v31  ;;  %v1213_v31 = vrot.slane %v21268_v48, %v23931_v51  ;;  %v19381_v48 = vld [vmem:[%s28291_s24 + $0x13e8] ss:$16 sps:$4 sm:$0xff]  }
 0x2cd   :  { %6761 = vmatpush2.bf16.msra.mxu0 %v19285_v15 }
 0x2ce   :  { %6734 = vmatpush2.bf16.msra.mxu1 %v19282_v13  ;;  %6762 = vmatprep.subr.bf16.mxu0 %v19290_v59  ;;  %v19341_v13 = vld [vmem:[%s28291_s24 + $0x12cc] ss:$16 sps:$4 sm:$0xff]   ;;  %v19336_v59 = vld [vmem:[%s28291_s24 + $0x11e8] ss:$16 sps:$4 sm:$0xff]  }
 0x2cf   :  { %6785 = vmatprep.subr.bf16.mxu1 %v19293_v35  ;;  %v19339_v35 = vld [vmem:[%s28291_s24 + $0x12c8] ss:$16 sps:$4 sm:$0xff]  }
 0x2d1   :  { %v23867_v26 = vpop.f32.mrf.mxu1  ;;  %6736 = vmatmul.mubr.bf16.vlgmr.msra.gmra.mxu1 %v22359_v37  ;;  %6763 = vmatpush2.bf16.msra.mxu0 %v19288_v36  ;;  %v19303_v37 = vld [vmem:[%s28291_s24 + $0x10a8] ss:$16 sps:$4 sm:$0xff]  }
 0x2d2   :  { %6786 = vmatpush1.bf16.msra.mxu1 %v19291_v3  ;;  %6764 = vmatprep.subr.bf16.mxu0 %v19296_v21  ;;  %v6492_v15 = vadd.f32 %v23867_v26, %v1209_v0  ;;  %v19386_v0 = vld [vmem:[%s28291_s24 + $0x13cc] ss:$16 sps:$4 sm:$0xff]  }
 0x2d3   :  { %v23870_v27 = vpop.f32.mrf.mxu1  ;;  %6787 = vmatprep.subr.bf16.mxu1 %v19299_v62  ;;  %6817 = vmatprep.mubr.bf16.mxu1 %v22379_v46  ;;  %v19306_v46 = vld [vmem:[%s28291_s24 + $0xf68] ss:$16 sps:$4 sm:$0xff]  }
 0x2d4   :  { %v6494_v3 = vadd.f32 %v23870_v27, %v1213_v31  ;;  %v19345_v27 = vld [vmem:[%s28291_s24 + $0x12a8] ss:$16 sps:$4 sm:$0xff]  }
 0x2d5   :  { %v6495_v40 = vpop.f32.mrf.mxu1  ;;  %6765 = vmatpush2.bf16.msra.mxu0 %v19294_v22  ;;  %v19344_v22 = vld [vmem:[%s28291_s24 + $0x11cc] ss:$16 sps:$4 sm:$0xff]   ;;  %v19387_v31 = vld [vmem:[%s28291_s24 + $0x14e8] ss:$16 sps:$4 sm:$0xff]  }
 0x2d6   :  { %6788 = vmatpush1.bf16.msra.mxu1 %v19297_v23  ;;  %6766 = vmatprep.subr.bf16.mxu0 %v19302_v28  ;;  %v19347_v23 = vld [vmem:[%s28291_s24 + $0x12ac] ss:$16 sps:$4 sm:$0xff]   ;;  %v19351_v40 = vld [vmem:[%s28291_s24 + $0x1288] ss:$16 sps:$4 sm:$0xff]  }
 0x2d7   :  { %v6496_v5 = vpop.f32.mrf.mxu1  ;;  %6789 = vmatprep.subr.bf16.mxu1 %v19305_v7 }
 0x2d8   :  { %v19356_v5 = vld [vmem:[%s28291_s24 + $0x118c] ss:$16 sps:$4 sm:$0xff]  }
 0x2d9   :  { %6767 = vmatpush2.bf16.msra.mxu0 %v19300_v17  ;;  %v19350_v17 = vld [vmem:[%s28291_s24 + $0x11ac] ss:$16 sps:$4 sm:$0xff]  }
 0x2da   :  { %6790 = vmatpush1.bf16.msra.mxu1 %v19303_v37  ;;  %6768 = vmatprep.subr.bf16.mxu0 %v19308_v41  ;;  %v19353_v37 = vld [vmem:[%s28291_s24 + $0x128c] ss:$16 sps:$4 sm:$0xff]  }
 0x2db   :  { %6791 = vmatprep.subr.bf16.mxu1 %v19311_v33  ;;  %v19359_v41 = vld [vmem:[%s28291_s24 + $0x126c] ss:$16 sps:$4 sm:$0xff]   ;;  %v19354_v33 = vld [vmem:[%s28291_s24 + $0x1188] ss:$16 sps:$4 sm:$0xff]  }
 0x2dd   :  { %6769 = vmatpush2.bf16.msra.mxu0 %v19306_v46  ;;  %v19357_v46 = vld [vmem:[%s28291_s24 + $0x1268] ss:$16 sps:$4 sm:$0xff]  }
 0x2de   :  { %6792 = vmatpush1.bf16.msra.mxu1 %v19309_v57  ;;  %6770 = vmatprep.subr.bf16.mxu0 %v19314_v19  ;;  %v19362_v57 = vld [vmem:[%s28291_s24 + $0x116c] ss:$16 sps:$4 sm:$0xff]  }
 0x2df   :  { %6793 = vmatprep.subr.bf16.mxu1 %v19317_v32  ;;  %v19365_v19 = vld [vmem:[%s28291_s24 + $0x124c] ss:$16 sps:$4 sm:$0xff]   ;;  %v19360_v32 = vld [vmem:[%s28291_s24 + $0x1168] ss:$16 sps:$4 sm:$0xff]  }
 0x2e1   :  { %6771 = vmatpush2.bf16.msra.mxu0 %v19312_v9  ;;  %v19363_v9 = vld [vmem:[%s28291_s24 + $0x1248] ss:$16 sps:$4 sm:$0xff]  }
 0x2e2   :  { %6794 = vmatpush1.bf16.msra.mxu1 %v19315_v4  ;;  %6772 = vmatprep.subr.bf16.mxu0 %v19320_v24  ;;  %v19368_v4 = vld [vmem:[%s28291_s24 + $0x114c] ss:$16 sps:$4 sm:$0xff]  }
 0x2e3   :  { %6795 = vmatprep.subr.bf16.mxu1 %v19323_v52  ;;  %v19371_v24 = vld [vmem:[%s28291_s24 + $0x122c] ss:$16 sps:$4 sm:$0xff]   ;;  %v19366_v52 = vld [vmem:[%s28291_s24 + $0x1148] ss:$16 sps:$4 sm:$0xff]  }
 0x2e5   :  { %6773 = vmatpush2.bf16.msra.mxu0 %v19318_v30  ;;  %v19369_v30 = vld [vmem:[%s28291_s24 + $0x1228] ss:$16 sps:$4 sm:$0xff]  }
 0x2e6   :  { %6796 = vmatpush1.bf16.msra.mxu1 %v19321_v18  ;;  %6774 = vmatprep.subr.bf16.mxu0 %v19326_v25  ;;  %v19374_v18 = vld [vmem:[%s28291_s24 + $0x112c] ss:$16 sps:$4 sm:$0xff]  }
 0x2e7   :  { %6797 = vmatprep.subr.bf16.mxu1 %v19329_v53  ;;  %v19377_v25 = vld [vmem:[%s28291_s24 + $0x120c] ss:$16 sps:$4 sm:$0xff]   ;;  %v19372_v53 = vld [vmem:[%s28291_s24 + $0x1128] ss:$16 sps:$4 sm:$0xff]  }
 0x2e9   :  { %6775 = vmatpush2.bf16.msra.mxu0 %v19324_v8  ;;  %v19375_v8 = vld [vmem:[%s28291_s24 + $0x1208] ss:$16 sps:$4 sm:$0xff]  }
 0x2ea   :  { %6798 = vmatpush1.bf16.msra.mxu1 %v19327_v56  ;;  %6826 = vmatprep.subr.bf16.mxu0 %v19335_v60  ;;  %v19380_v56 = vld [vmem:[%s28291_s24 + $0x110c] ss:$16 sps:$4 sm:$0xff]   ;;  %v19378_v60 = vld [vmem:[%s28291_s24 + $0x1108] ss:$16 sps:$4 sm:$0xff]  }
 0x2eb   :  { %6799 = vmatprep.subr.bf16.mxu1 %v19332_v45  ;;  %v19383_v45 = vld [vmem:[%s28291_s24 + $0x13ec] ss:$16 sps:$4 sm:$0xff]  }
 0x2ec   :  { %v6532_v36 = vpop.f32.mrf.mxu0  ;;  %6777 = vmatmul.mubr.bf16.vlgmr.msra.gmra.mxu0 %v22363_v38  ;;  %v19342_v38 = vld [vmem:[%s28291_s24 + $0x11c8] ss:$16 sps:$4 sm:$0xff]  }
 0x2ed   :  { %v23971_v21 = vadd.f32 %v6532_v36, %v6492_v15  ;;  %6827 = vmatpush1.bf16.msra.mxu0 %v19333_v39  ;;  %6858 = vmatprep.mubr.bf16.mxu0 %v22381_v47  ;;  %v19348_v47 = vld [vmem:[%s28291_s24 + $0x11a8] ss:$16 sps:$4 sm:$0xff]  }
 0x2ee   :  { %6800 = vmatpush1.bf16.msra.mxu1 %v19330_v6  ;;  %v6534_v62 = vpop.f32.mrf.mxu0  ;;  %6828 = vmatprep.subr.bf16.mxu0 %v19341_v13  ;;  %v19389_v6 = vld [vmem:[%s28291_s24 + $0x14ec] ss:$16 sps:$4 sm:$0xff]   ;;  %v19384_v39 = vld [vmem:[%s28291_s24 + $0x13c8] ss:$16 sps:$4 sm:$0xff]  }
 0x2ef   :  { %6801 = vmatprep.subr.bf16.mxu1 %v19338_v44  ;;  %v23979_v26 = vadd.f32 %v6534_v62, %v6494_v3  ;;  %v19392_v44 = vld [vmem:[%s28291_s24 + $0x13ac] ss:$16 sps:$4 sm:$0xff]   ;;  %v19390_v15 = vld [vmem:[%s28291_s24 + $0x13a8] ss:$16 sps:$4 sm:$0xff]  }
 0x2f0   :  { %v6536_v28 = vpop.f32.mrf.mxu0  ;;  %v19395_v13 = vld [vmem:[%s28291_s24 + $0x14cc] ss:$16 sps:$4 sm:$0xff]  }
 0x2f1   :  { %6829 = vmatpush1.bf16.msra.mxu0 %v19339_v35  ;;  %v19398_v62 = vld [vmem:[%s28291_s24 + $0x138c] ss:$16 sps:$4 sm:$0xff]  }
 0x2f2   :  { %6802 = vmatpush2.bf16.msra.mxu1 %v19336_v59  ;;  %v6537_v7 = vpop.f32.mrf.mxu0  ;;  %6830 = vmatprep.subr.bf16.mxu0 %v19347_v23  ;;  %v19393_v59 = vld [vmem:[%s28291_s24 + $0x14c8] ss:$16 sps:$4 sm:$0xff]   ;;  %v19407_v28 = vld [vmem:[%s28291_s24 + $0x148c] ss:$16 sps:$4 sm:$0xff]  }
 0x2f3   :  { %6803 = vmatprep.subr.bf16.mxu1 %v19344_v22  ;;  %v19401_v22 = vld [vmem:[%s28291_s24 + $0x14ac] ss:$16 sps:$4 sm:$0xff]   ;;  %v19405_v7 = vld [vmem:[%s28291_s24 + $0x1488] ss:$16 sps:$4 sm:$0xff]  }
 0x2f5   :  { %6831 = vmatpush1.bf16.msra.mxu0 %v19345_v27 }
 0x2f6   :  { %6804 = vmatpush2.bf16.msra.mxu1 %v19342_v38  ;;  %6832 = vmatprep.subr.bf16.mxu0 %v19353_v37  ;;  %v19413_v37 = vld [vmem:[%s28291_s24 + $0x146c] ss:$16 sps:$4 sm:$0xff]  }
 0x2f7   :  { %6805 = vmatprep.subr.bf16.mxu1 %v19350_v17  ;;  %v19410_v17 = vld [vmem:[%s28291_s24 + $0x134c] ss:$16 sps:$4 sm:$0xff]  }
 0x2f9   :  { %6833 = vmatpush1.bf16.msra.mxu0 %v19351_v40  ;;  %v19411_v40 = vld [vmem:[%s28291_s24 + $0x1468] ss:$16 sps:$4 sm:$0xff]  }
 0x2fa   :  { %6806 = vmatpush2.bf16.msra.mxu1 %v19348_v47  ;;  %6834 = vmatprep.subr.bf16.mxu0 %v19359_v41  ;;  %v19408_v47 = vld [vmem:[%s28291_s24 + $0x1348] ss:$16 sps:$4 sm:$0xff]   ;;  %v19419_v41 = vld [vmem:[%s28291_s24 + $0x144c] ss:$16 sps:$4 sm:$0xff]  }
 0x2fb   :  { %6807 = vmatprep.subr.bf16.mxu1 %v19356_v5  ;;  %v19416_v5 = vld [vmem:[%s28291_s24 + $0x132c] ss:$16 sps:$4 sm:$0xff]  }
 0x2fd   :  { %6835 = vmatpush1.bf16.msra.mxu0 %v19357_v46  ;;  %v19417_v46 = vld [vmem:[%s28291_s24 + $0x1448] ss:$16 sps:$4 sm:$0xff]  }
 0x2fe   :  { %6808 = vmatpush2.bf16.msra.mxu1 %v19354_v33  ;;  %6836 = vmatprep.subr.bf16.mxu0 %v19365_v19  ;;  %v19414_v33 = vld [vmem:[%s28291_s24 + $0x1328] ss:$16 sps:$4 sm:$0xff]   ;;  %v19425_v19 = vld [vmem:[%s28291_s24 + $0x142c] ss:$16 sps:$4 sm:$0xff]  }
 0x2ff   :  { %6809 = vmatprep.subr.bf16.mxu1 %v19362_v57  ;;  %v19422_v57 = vld [vmem:[%s28291_s24 + $0x130c] ss:$16 sps:$4 sm:$0xff]  }
 0x301   :  { %6837 = vmatpush1.bf16.msra.mxu0 %v19363_v9  ;;  %v19423_v9 = vld [vmem:[%s28291_s24 + $0x1428] ss:$16 sps:$4 sm:$0xff]  }
 0x302   :  { %6810 = vmatpush2.bf16.msra.mxu1 %v19360_v32  ;;  %6838 = vmatprep.subr.bf16.mxu0 %v19371_v24  ;;  %v19420_v32 = vld [vmem:[%s28291_s24 + $0x1308] ss:$16 sps:$4 sm:$0xff]   ;;  %v19431_v24 = vld [vmem:[%s28291_s24 + $0x16ec] ss:$16 sps:$4 sm:$0xff]  }
 0x303   :  { %6811 = vmatprep.subr.bf16.mxu1 %v19368_v4  ;;  %v19428_v4 = vld [vmem:[%s28291_s24 + $0x140c] ss:$16 sps:$4 sm:$0xff]  }
 0x305   :  { %6839 = vmatpush1.bf16.msra.mxu0 %v19369_v30  ;;  %v19429_v30 = vld [vmem:[%s28291_s24 + $0x16e8] ss:$16 sps:$4 sm:$0xff]  }
 0x306   :  { %6812 = vmatpush2.bf16.msra.mxu1 %v19366_v52  ;;  %6840 = vmatprep.subr.bf16.mxu0 %v19377_v25  ;;  %v19426_v52 = vld [vmem:[%s28291_s24 + $0x1408] ss:$16 sps:$4 sm:$0xff]   ;;  %v19437_v25 = vld [vmem:[%s28291_s24 + $0x16cc] ss:$16 sps:$4 sm:$0xff]  }
 0x307   :  { %6813 = vmatprep.subr.bf16.mxu1 %v19374_v18  ;;  %v19434_v18 = vld [vmem:[%s28291_s24 + $0x15ec] ss:$16 sps:$4 sm:$0xff]  }
 0x309   :  { %6841 = vmatpush1.bf16.msra.mxu0 %v19375_v8  ;;  %v19435_v8 = vld [vmem:[%s28291_s24 + $0x16c8] ss:$16 sps:$4 sm:$0xff]  }
 0x30a   :  { %6814 = vmatpush2.bf16.msra.mxu1 %v19372_v53  ;;  %6842 = vmatprep.subr.bf16.mxu0 %v19383_v45  ;;  %v19432_v53 = vld [vmem:[%s28291_s24 + $0x15e8] ss:$16 sps:$4 sm:$0xff]   ;;  %v19440_v45 = vld [vmem:[%s28291_s24 + $0x15cc] ss:$16 sps:$4 sm:$0xff]  }
 0x30b   :  { %6815 = vmatprep.subr.bf16.mxu1 %v19380_v56 }
 0x30d   :  { %6843 = vmatpush2.bf16.msra.mxu0 %v19381_v48 }
 0x30e   :  { %6816 = vmatpush2.bf16.msra.mxu1 %v19378_v60  ;;  %6844 = vmatprep.subr.bf16.mxu0 %v19386_v0  ;;  %v19443_v0 = vld [vmem:[%s28291_s24 + $0x16ac] ss:$16 sps:$4 sm:$0xff]  }
 0x30f   :  { %6867 = vmatprep.subr.bf16.mxu1 %v19389_v6 }
 0x311   :  { %v6573_v35 = vpop.f32.mrf.mxu1  ;;  %6818 = vmatmul.mubr.bf16.vlgmr.msra.gmra.mxu1 %v22592_v54  ;;  %6845 = vmatpush2.bf16.msra.mxu0 %v19384_v39  ;;  %v19396_v54 = vld [vmem:[%s28291_s24 + $0x1388] ss:$16 sps:$4 sm:$0xff]  }
 0x312   :  { %v24086_v36 = vadd.f32 %v6573_v35, %v23971_v21  ;;  %6868 = vmatpush1.bf16.msra.mxu1 %v19387_v31  ;;  %6846 = vmatprep.subr.bf16.mxu0 %v19392_v44  ;;  %v19399_v21 = vld [vmem:[%s28291_s24 + $0x14a8] ss:$16 sps:$4 sm:$0xff]   ;;  %v19452_v35 = vld [vmem:[%s28291_s24 + $0x158c] ss:$16 sps:$4 sm:$0xff]  }
 0x313   :  { %v6575_v3 = vpop.f32.mrf.mxu1  ;;  %6869 = vmatprep.subr.bf16.mxu1 %v19395_v13  ;;  %6899 = vmatprep.mubr.bf16.mxu1 %v22610_v61  ;;  %v19402_v61 = vld [vmem:[%s28291_s24 + $0x1368] ss:$16 sps:$4 sm:$0xff]   ;;  %v19446_v13 = vld [vmem:[%s28291_s24 + $0x15ac] ss:$16 sps:$4 sm:$0xff]  }
 0x314   :  { %v24095_v23 = vadd.f32 %v6575_v3, %v23979_v26  ;;  %v19404_v26 = vld [vmem:[%s28291_s24 + $0x136c] ss:$16 sps:$4 sm:$0xff]   ;;  %v19441_v39 = vld [vmem:[%s28291_s24 + $0x16a8] ss:$16 sps:$4 sm:$0xff]  }
 0x315   :  { %v6577_v38 = vpop.f32.mrf.mxu1  ;;  %6847 = vmatpush2.bf16.msra.mxu0 %v19390_v15  ;;  %v19449_v15 = vld [vmem:[%s28291_s24 + $0x168c] ss:$16 sps:$4 sm:$0xff]   ;;  %v19450_v3 = vld [vmem:[%s28291_s24 + $0x1588] ss:$16 sps:$4 sm:$0xff]  }
 0x316   :  { %6870 = vmatpush1.bf16.msra.mxu1 %v19393_v59  ;;  %6848 = vmatprep.subr.bf16.mxu0 %v19398_v62  ;;  %v19444_v59 = vld [vmem:[%s28291_s24 + $0x15a8] ss:$16 sps:$4 sm:$0xff]   ;;  %v19464_v38 = vld [vmem:[%s28291_s24 + $0x154c] ss:$16 sps:$4 sm:$0xff]  }
 0x317   :  { %v6578_v27 = vpop.f32.mrf.mxu1  ;;  %6871 = vmatprep.subr.bf16.mxu1 %v19401_v22  ;;  %v19453_v62 = vld [vmem:[%s28291_s24 + $0x1668] ss:$16 sps:$4 sm:$0xff]   ;;  %v19458_v22 = vld [vmem:[%s28291_s24 + $0x156c] ss:$16 sps:$4 sm:$0xff]  }
 0x318   :  { %v19467_v27 = vld [vmem:[%s28291_s24 + $0x162c] ss:$16 sps:$4 sm:$0xff]  }
 0x319   :  { %6849 = vmatpush2.bf16.msra.mxu0 %v19396_v54  ;;  %v19456_v54 = vld [vmem:[%s28291_s24 + $0x1568] ss:$16 sps:$4 sm:$0xff]  }
 0x31a   :  { %6872 = vmatpush1.bf16.msra.mxu1 %v19399_v21  ;;  %6850 = vmatprep.subr.bf16.mxu0 %v19404_v26  ;;  %v19459_v21 = vld [vmem:[%s28291_s24 + $0x1648] ss:$16 sps:$4 sm:$0xff]  }
 0x31b   :  { %6873 = vmatprep.subr.bf16.mxu1 %v19407_v28  ;;  %v19462_v26 = vld [vmem:[%s28291_s24 + $0x1548] ss:$16 sps:$4 sm:$0xff]  }
 0x31c   :  { %v19465_v28 = vld [vmem:[%s28291_s24 + $0x1628] ss:$16 sps:$4 sm:$0xff]  }
 0x31d   :  { %6851 = vmatpush2.bf16.msra.mxu0 %v19402_v61  ;;  %v19470_v61 = vld [vmem:[%s28291_s24 + $0x152c] ss:$16 sps:$4 sm:$0xff]  }
 0x31e   :  { %6874 = vmatpush1.bf16.msra.mxu1 %v19405_v7  ;;  %6852 = vmatprep.subr.bf16.mxu0 %v19410_v17  ;;  %v19473_v7 = vld [vmem:[%s28291_s24 + $0x160c] ss:$16 sps:$4 sm:$0xff]   ;;  %v19468_v17 = vld [vmem:[%s28291_s24 + $0x1528] ss:$16 sps:$4 sm:$0xff]  }
 0x31f   :  { %6875 = vmatprep.subr.bf16.mxu1 %v19413_v37  ;;  %v19471_v37 = vld [vmem:[%s28291_s24 + $0x1608] ss:$16 sps:$4 sm:$0xff]  }
 0x321   :  { %6853 = vmatpush2.bf16.msra.mxu0 %v19408_v47  ;;  %v19476_v47 = vld [vmem:[%s28291_s24 + $0x150c] ss:$16 sps:$4 sm:$0xff]  }
 0x322   :  { %6876 = vmatpush1.bf16.msra.mxu1 %v19411_v40  ;;  %6854 = vmatprep.subr.bf16.mxu0 %v19416_v5  ;;  %v19479_v40 = vld [vmem:[%s28291_s24 + $0x17ec] ss:$16 sps:$4 sm:$0xff]   ;;  %v19474_v5 = vld [vmem:[%s28291_s24 + $0x1508] ss:$16 sps:$4 sm:$0xff]  }
 0x323   :  { %6877 = vmatprep.subr.bf16.mxu1 %v19419_v41  ;;  %v19477_v41 = vld [vmem:[%s28291_s24 + $0x17e8] ss:$16 sps:$4 sm:$0xff]  }
 0x325   :  { %6855 = vmatpush2.bf16.msra.mxu0 %v19414_v33  ;;  %v19482_v33 = vld [vmem:[%s28291_s24 + $0x17cc] ss:$16 sps:$4 sm:$0xff]  }
 0x326   :  { %6878 = vmatpush1.bf16.msra.mxu1 %v19417_v46  ;;  %6856 = vmatprep.subr.bf16.mxu0 %v19422_v57  ;;  %v19485_v46 = vld [vmem:[%s28291_s24 + $0x18ec] ss:$16 sps:$4 sm:$0xff]   ;;  %v19480_v57 = vld [vmem:[%s28291_s24 + $0x17c8] ss:$16 sps:$4 sm:$0xff]  }
 0x327   :  { %6879 = vmatprep.subr.bf16.mxu1 %v19425_v19  ;;  %v19483_v19 = vld [vmem:[%s28291_s24 + $0x18e8] ss:$16 sps:$4 sm:$0xff]  }
 0x329   :  { %6857 = vmatpush2.bf16.msra.mxu0 %v19420_v32  ;;  %v19488_v32 = vld [vmem:[%s28291_s24 + $0x17ac] ss:$16 sps:$4 sm:$0xff]  }
 0x32a   :  { %6880 = vmatpush1.bf16.msra.mxu1 %v19423_v9  ;;  %6908 = vmatprep.subr.bf16.mxu0 %v19431_v24  ;;  %v19491_v9 = vld [vmem:[%s28291_s24 + $0x18cc] ss:$16 sps:$4 sm:$0xff]   ;;  %v19489_v24 = vld [vmem:[%s28291_s24 + $0x18c8] ss:$16 sps:$4 sm:$0xff]  }
 0x32b   :  { %6881 = vmatprep.subr.bf16.mxu1 %v19428_v4  ;;  %v19486_v4 = vld [vmem:[%s28291_s24 + $0x17a8] ss:$16 sps:$4 sm:$0xff]  }
 0x32c   :  { %v6614_v56 = vpop.f32.mrf.mxu0  ;;  %6859 = vmatmul.mubr.bf16.vlgmr.msra.gmra.mxu0 %v22596_v55  ;;  %v19438_v55 = vld [vmem:[%s28291_s24 + $0x15c8] ss:$16 sps:$4 sm:$0xff]  }
 0x32d   :  { %v24181_v60 = vadd.f32 %v6614_v56, %v24086_v36  ;;  %6909 = vmatpush1.bf16.msra.mxu0 %v19429_v30  ;;  %6940 = vmatprep.mubr.bf16.mxu0 %v22612_v63  ;;  %v19447_v63 = vld [vmem:[%s28291_s24 + $0x1688] ss:$16 sps:$4 sm:$0xff]   ;;  %v19455_v36 = vld [vmem:[%s28291_s24 + $0x166c] ss:$16 sps:$4 sm:$0xff]  }
 0x32e   :  { %6882 = vmatpush1.bf16.msra.mxu1 %v19426_v52  ;;  %v6616_v48 = vpop.f32.mrf.mxu0  ;;  %6910 = vmatprep.subr.bf16.mxu0 %v19437_v25  ;;  %v19494_v30 = vld [vmem:[%s28291_s24 + $0x178c] ss:$16 sps:$4 sm:$0xff]   ;;  %v19495_v56 = vld [vmem:[%s28291_s24 + $0x18a8] ss:$16 sps:$4 sm:$0xff]  }
 0x32f   :  { %6883 = vmatprep.subr.bf16.mxu1 %v19434_v18  ;;  %v24187_v6 = vadd.f32 %v6616_v48, %v24095_v23  ;;  %v19461_v23 = vld [vmem:[%s28291_s24 + $0x164c] ss:$16 sps:$4 sm:$0xff]  }
 0x330   :  { %v6618_v31 = vpop.f32.mrf.mxu0  ;;  %v19500_v48 = vld [vmem:[%s28291_s24 + $0x176c] ss:$16 sps:$4 sm:$0xff]  }
 0x331   :  { %6911 = vmatpush1.bf16.msra.mxu0 %v19435_v8  ;;  %v19504_v31 = vld [vmem:[%s28291_s24 + $0x1748] ss:$16 sps:$4 sm:$0xff]  }
 0x332   :  { %6884 = vmatpush2.bf16.msra.mxu1 %v19432_v53  ;;  %v6619_v44 = vpop.f32.mrf.mxu0  ;;  %6912 = vmatprep.subr.bf16.mxu0 %v19443_v0  ;;  %v19497_v53 = vld [vmem:[%s28291_s24 + $0x18ac] ss:$16 sps:$4 sm:$0xff]  }
 0x333   :  { %6885 = vmatprep.subr.bf16.mxu1 %v19440_v45  ;;  %v19503_v0 = vld [vmem:[%s28291_s24 + $0x188c] ss:$16 sps:$4 sm:$0xff]   ;;  %v19507_v44 = vld [vmem:[%s28291_s24 + $0x1868] ss:$16 sps:$4 sm:$0xff]  }
 0x335   :  { %6913 = vmatpush1.bf16.msra.mxu0 %v19441_v39  ;;  %v19509_v39 = vld [vmem:[%s28291_s24 + $0x186c] ss:$16 sps:$4 sm:$0xff]  }
 0x336   :  { %6886 = vmatpush2.bf16.msra.mxu1 %v19438_v55  ;;  %6914 = vmatprep.subr.bf16.mxu0 %v19449_v15  ;;  %v19506_v55 = vld [vmem:[%s28291_s24 + $0x174c] ss:$16 sps:$4 sm:$0xff]  }
 0x337   :  { %6887 = vmatprep.subr.bf16.mxu1 %v19446_v13  ;;  %v19512_v13 = vld [vmem:[%s28291_s24 + $0x172c] ss:$16 sps:$4 sm:$0xff]  }
 0x338   :  { %v19515_v15 = vld [vmem:[%s28291_s24 + $0x184c] ss:$16 sps:$4 sm:$0xff]  }
 0x339   :  { %6915 = vmatpush1.bf16.msra.mxu0 %v19447_v63  ;;  %v19513_v63 = vld [vmem:[%s28291_s24 + $0x1848] ss:$16 sps:$4 sm:$0xff]  }
 0x33a   :  { %6888 = vmatpush2.bf16.msra.mxu1 %v19444_v59  ;;  %6916 = vmatprep.subr.bf16.mxu0 %v19455_v36  ;;  %v19510_v59 = vld [vmem:[%s28291_s24 + $0x1728] ss:$16 sps:$4 sm:$0xff]   ;;  %v19521_v36 = vld [vmem:[%s28291_s24 + $0x182c] ss:$16 sps:$4 sm:$0xff]  }
 0x33b   :  { %6889 = vmatprep.subr.bf16.mxu1 %v19452_v35  ;;  %v19518_v35 = vld [vmem:[%s28291_s24 + $0x170c] ss:$16 sps:$4 sm:$0xff]  }
 0x33d   :  { %6917 = vmatpush1.bf16.msra.mxu0 %v19453_v62  ;;  %v19519_v62 = vld [vmem:[%s28291_s24 + $0x1828] ss:$16 sps:$4 sm:$0xff]  }
 0x33e   :  { %6890 = vmatpush2.bf16.msra.mxu1 %v19450_v3  ;;  %6918 = vmatprep.subr.bf16.mxu0 %v19461_v23  ;;  %v19516_v3 = vld [vmem:[%s28291_s24 + $0x1708] ss:$16 sps:$4 sm:$0xff]   ;;  %v19527_v23 = vld [vmem:[%s28291_s24 + $0x1aec] ss:$16 sps:$4 sm:$0xff]  }
 0x33f   :  { %6891 = vmatprep.subr.bf16.mxu1 %v19458_v22  ;;  %v19524_v22 = vld [vmem:[%s28291_s24 + $0x180c] ss:$16 sps:$4 sm:$0xff]  }
 0x341   :  { %6919 = vmatpush1.bf16.msra.mxu0 %v19459_v21  ;;  %v19525_v21 = vld [vmem:[%s28291_s24 + $0x1ae8] ss:$16 sps:$4 sm:$0xff]  }
 0x342   :  { %6892 = vmatpush2.bf16.msra.mxu1 %v19456_v54  ;;  %6920 = vmatprep.subr.bf16.mxu0 %v19467_v27  ;;  %v19522_v54 = vld [vmem:[%s28291_s24 + $0x1808] ss:$16 sps:$4 sm:$0xff]   ;;  %v19533_v27 = vld [vmem:[%s28291_s24 + $0x1acc] ss:$16 sps:$4 sm:$0xff]  }
 0x343   :  { %6893 = vmatprep.subr.bf16.mxu1 %v19464_v38  ;;  %v19530_v38 = vld [vmem:[%s28291_s24 + $0x19ec] ss:$16 sps:$4 sm:$0xff]  }
 0x345   :  { %6921 = vmatpush1.bf16.msra.mxu0 %v19465_v28  ;;  %v19531_v28 = vld [vmem:[%s28291_s24 + $0x1ac8] ss:$16 sps:$4 sm:$0xff]  }
 0x346   :  { %6894 = vmatpush2.bf16.msra.mxu1 %v19462_v26  ;;  %6922 = vmatprep.subr.bf16.mxu0 %v19473_v7  ;;  %v19528_v26 = vld [vmem:[%s28291_s24 + $0x19e8] ss:$16 sps:$4 sm:$0xff]   ;;  %v19536_v7 = vld [vmem:[%s28291_s24 + $0x19cc] ss:$16 sps:$4 sm:$0xff]  }
 0x347   :  { %6895 = vmatprep.subr.bf16.mxu1 %v19470_v61 }
 0x349   :  { %6923 = vmatpush1.bf16.msra.mxu0 %v19471_v37 }
 0x34a   :  { %6896 = vmatpush2.bf16.msra.mxu1 %v19468_v17  ;;  %6924 = vmatprep.subr.bf16.mxu0 %v19479_v40  ;;  %v19539_v17 = vld [vmem:[%s28291_s24 + $0x1aac] ss:$16 sps:$4 sm:$0xff]  }
 0x34b   :  { %6897 = vmatprep.subr.bf16.mxu1 %v19476_v47 }
 0x34d   :  { %6925 = vmatpush2.bf16.msra.mxu0 %v19477_v41 }
 0x34e   :  { %6898 = vmatpush2.bf16.msra.mxu1 %v19474_v5  ;;  %6926 = vmatprep.subr.bf16.mxu0 %v19482_v33  ;;  %v19537_v5 = vld [vmem:[%s28291_s24 + $0x1aa8] ss:$16 sps:$4 sm:$0xff]   ;;  %v19542_v33 = vld [vmem:[%s28291_s24 + $0x19ac] ss:$16 sps:$4 sm:$0xff]  }
 0x34f   :  { %6949 = vmatprep.subr.bf16.mxu1 %v19485_v46  ;;  %v19545_v46 = vld [vmem:[%s28291_s24 + $0x1a8c] ss:$16 sps:$4 sm:$0xff]  }
 0x351   :  { %v6655_v52 = vpop.f32.mrf.mxu1  ;;  %6900 = vmatmul.mubr.bf16.vlgmr.msra.gmra.mxu1 %v22819_v1  ;;  %6927 = vmatpush2.bf16.msra.mxu0 %v19480_v57  ;;  %v19492_v1 = vld [vmem:[%s28291_s24 + $0x1788] ss:$16 sps:$4 sm:$0xff]  }
 0x352   :  { %v24297_v18 = vadd.f32 %v6655_v52, %v24181_v60  ;;  %6950 = vmatpush1.bf16.msra.mxu1 %v19483_v19  ;;  %6928 = vmatprep.subr.bf16.mxu0 %v19488_v32  ;;  %v19540_v19 = vld [vmem:[%s28291_s24 + $0x19a8] ss:$16 sps:$4 sm:$0xff]   ;;  %v19548_v32 = vld [vmem:[%s28291_s24 + $0x198c] ss:$16 sps:$4 sm:$0xff]  }
 0x353   :  { %v6657_v25 = vpop.f32.mrf.mxu1  ;;  %6951 = vmatprep.subr.bf16.mxu1 %v19491_v9  ;;  %6981 = vmatprep.mubr.bf16.mxu1 %v22837_v20  ;;  %v19501_v20 = vld [vmem:[%s28291_s24 + $0x1888] ss:$16 sps:$4 sm:$0xff]   ;;  %v19551_v9 = vld [vmem:[%s28291_s24 + $0x1a6c] ss:$16 sps:$4 sm:$0xff]  }
 0x354   :  { %v24303_v8 = vadd.f32 %v6657_v25, %v24187_v6  ;;  %v19498_v6 = vld [vmem:[%s28291_s24 + $0x1768] ss:$16 sps:$4 sm:$0xff]   ;;  %v19554_v52 = vld [vmem:[%s28291_s24 + $0x196c] ss:$16 sps:$4 sm:$0xff]  }
 0x355   :  { %v6659_v45 = vpop.f32.mrf.mxu1  ;;  %6929 = vmatpush2.bf16.msra.mxu0 %v19486_v4  ;;  %v19546_v4 = vld [vmem:[%s28291_s24 + $0x1988] ss:$16 sps:$4 sm:$0xff]  }
 0x356   :  { %6952 = vmatpush1.bf16.msra.mxu1 %v19489_v24  ;;  %6930 = vmatprep.subr.bf16.mxu0 %v19494_v30  ;;  %v19549_v24 = vld [vmem:[%s28291_s24 + $0x1a68] ss:$16 sps:$4 sm:$0xff]   ;;  %v19557_v30 = vld [vmem:[%s28291_s24 + $0x1a4c] ss:$16 sps:$4 sm:$0xff]  }
 0x357   :  { %v6660_v60 = vpop.f32.mrf.mxu1  ;;  %6953 = vmatprep.subr.bf16.mxu1 %v19497_v53  ;;  %v19555_v25 = vld [vmem:[%s28291_s24 + $0x1a48] ss:$16 sps:$4 sm:$0xff]   ;;  %v19560_v53 = vld [vmem:[%s28291_s24 + $0x194c] ss:$16 sps:$4 sm:$0xff]  }
 0x358   :  { %v19566_v45 = vld [vmem:[%s28291_s24 + $0x192c] ss:$16 sps:$4 sm:$0xff]  }
 0x359   :  { %6931 = vmatpush2.bf16.msra.mxu0 %v19492_v1  ;;  %v19558_v1 = vld [vmem:[%s28291_s24 + $0x1948] ss:$16 sps:$4 sm:$0xff]   ;;  %v19569_v60 = vld [vmem:[%s28291_s24 + $0x1a0c] ss:$16 sps:$4 sm:$0xff]  }
 0x35a   :  { %6954 = vmatpush1.bf16.msra.mxu1 %v19495_v56  ;;  %6932 = vmatprep.subr.bf16.mxu0 %v19500_v48  ;;  %v19561_v56 = vld [vmem:[%s28291_s24 + $0x1a28] ss:$16 sps:$4 sm:$0xff]  }
 0x35b   :  { %6955 = vmatprep.subr.bf16.mxu1 %v19503_v0  ;;  %v19564_v48 = vld [vmem:[%s28291_s24 + $0x1928] ss:$16 sps:$4 sm:$0xff]  }
 0x35c   :  { %v19567_v0 = vld [vmem:[%s28291_s24 + $0x1a08] ss:$16 sps:$4 sm:$0xff]  }
 0x35d   :  { %6933 = vmatpush2.bf16.msra.mxu0 %v19498_v6  ;;  %v19572_v6 = vld [vmem:[%s28291_s24 + $0x190c] ss:$16 sps:$4 sm:$0xff]  }
 0x35e   :  { %6956 = vmatpush1.bf16.msra.mxu1 %v19501_v20  ;;  %6934 = vmatprep.subr.bf16.mxu0 %v19506_v55  ;;  %v19575_v20 = vld [vmem:[%s28291_s24 + $0x1bec] ss:$16 sps:$4 sm:$0xff]   ;;  %v19570_v55 = vld [vmem:[%s28291_s24 + $0x1908] ss:$16 sps:$4 sm:$0xff]  }
 0x35f   :  { %6957 = vmatprep.subr.bf16.mxu1 %v19509_v39  ;;  %v19573_v39 = vld [vmem:[%s28291_s24 + $0x1be8] ss:$16 sps:$4 sm:$0xff]  }
 0x361   :  { %6935 = vmatpush2.bf16.msra.mxu0 %v19504_v31  ;;  %v19578_v31 = vld [vmem:[%s28291_s24 + $0x1bcc] ss:$16 sps:$4 sm:$0xff]  }
 0x362   :  { %6958 = vmatpush1.bf16.msra.mxu1 %v19507_v44  ;;  %6936 = vmatprep.subr.bf16.mxu0 %v19512_v13  ;;  %v19581_v44 = vld [vmem:[%s28291_s24 + $0x1ccc] ss:$16 sps:$4 sm:$0xff]   ;;  %v19576_v13 = vld [vmem:[%s28291_s24 + $0x1bc8] ss:$16 sps:$4 sm:$0xff]  }
 0x363   :  { %6959 = vmatprep.subr.bf16.mxu1 %v19515_v15  ;;  %v19579_v15 = vld [vmem:[%s28291_s24 + $0x1cc8] ss:$16 sps:$4 sm:$0xff]  }
 0x365   :  { %6937 = vmatpush2.bf16.msra.mxu0 %v19510_v59  ;;  %v19584_v59 = vld [vmem:[%s28291_s24 + $0x1bac] ss:$16 sps:$4 sm:$0xff]  }
 0x366   :  { %6960 = vmatpush1.bf16.msra.mxu1 %v19513_v63  ;;  %6938 = vmatprep.subr.bf16.mxu0 %v19518_v35  ;;  %v19587_v63 = vld [vmem:[%s28291_s24 + $0x1cac] ss:$16 sps:$4 sm:$0xff]   ;;  %v19582_v35 = vld [vmem:[%s28291_s24 + $0x1ba8] ss:$16 sps:$4 sm:$0xff]  }
 0x367   :  { %6961 = vmatprep.subr.bf16.mxu1 %v19521_v36  ;;  %v19585_v36 = vld [vmem:[%s28291_s24 + $0x1ca8] ss:$16 sps:$4 sm:$0xff]  }
 0x369   :  { %6939 = vmatpush2.bf16.msra.mxu0 %v19516_v3 }
 0x36a   :  { %6962 = vmatpush1.bf16.msra.mxu1 %v19519_v62  ;;  %6990 = vmatprep.subr.bf16.mxu0 %v19527_v23  ;;  %v19590_v62 = vld [vmem:[%s28291_s24 + $0x1b8c] ss:$16 sps:$4 sm:$0xff]  }
 0x36b   :  { %6963 = vmatprep.subr.bf16.mxu1 %v19524_v22  ;;  %v19593_v22 = vld [vmem:[%s28291_s24 + $0x1c8c] ss:$16 sps:$4 sm:$0xff]  }
 0x36c   :  { %v6696_v61 = vpop.f32.mrf.mxu0  ;;  %6941 = vmatmul.mubr.bf16.vlgmr.msra.gmra.mxu0 %v22823_v14  ;;  %v19534_v14 = vld [vmem:[%s28291_s24 + $0x19c8] ss:$16 sps:$4 sm:$0xff]  }
 0x36d   :  { %v24392_v37 = vadd.f32 %v6696_v61, %v24297_v18  ;;  %6991 = vmatpush1.bf16.msra.mxu0 %v19525_v21  ;;  %7022 = vmatprep.mubr.bf16.mxu0 %v22839_v10  ;;  %v19543_v10 = vld [vmem:[%s28291_s24 + $0x1a88] ss:$16 sps:$4 sm:$0xff]  }
 0x36e   :  { %6964 = vmatpush1.bf16.msra.mxu1 %v19522_v54  ;;  %v6698_v47 = vpop.f32.mrf.mxu0  ;;  %6992 = vmatprep.subr.bf16.mxu0 %v19533_v27  ;;  %v19552_v18 = vld [vmem:[%s28291_s24 + $0x1968] ss:$16 sps:$4 sm:$0xff]  }
 0x36f   :  { %6965 = vmatprep.subr.bf16.mxu1 %v19530_v38  ;;  %v24395_v40 = vadd.f32 %v6698_v47, %v24303_v8  ;;  %v19563_v8 = vld [vmem:[%s28291_s24 + $0x1a2c] ss:$16 sps:$4 sm:$0xff]   ;;  %v19591_v38 = vld [vmem:[%s28291_s24 + $0x1c88] ss:$16 sps:$4 sm:$0xff]  }
 0x370   :  { %v6700_v41 = vpop.f32.mrf.mxu0  ;;  %v19605_v47 = vld [vmem:[%s28291_s24 + $0x1c4c] ss:$16 sps:$4 sm:$0xff]  }
 0x371   :  { %6993 = vmatpush1.bf16.msra.mxu0 %v19531_v28  ;;  %v19599_v28 = vld [vmem:[%s28291_s24 + $0x1c6c] ss:$16 sps:$4 sm:$0xff]  }
 0x372   :  { %6966 = vmatpush2.bf16.msra.mxu1 %v19528_v26  ;;  %v6701_v57 = vpop.f32.mrf.mxu0  ;;  %6994 = vmatprep.subr.bf16.mxu0 %v19539_v17  ;;  %v19596_v26 = vld [vmem:[%s28291_s24 + $0x1b6c] ss:$16 sps:$4 sm:$0xff]   ;;  %v19597_v17 = vld [vmem:[%s28291_s24 + $0x1c68] ss:$16 sps:$4 sm:$0xff]  }
 0x373   :  { %6967 = vmatprep.subr.bf16.mxu1 %v19536_v7  ;;  %v19594_v7 = vld [vmem:[%s28291_s24 + $0x1b68] ss:$16 sps:$4 sm:$0xff]   ;;  %v19611_v41 = vld [vmem:[%s28291_s24 + $0x1c2c] ss:$16 sps:$4 sm:$0xff]  }
 0x374   :  { %v19614_v57 = vld [vmem:[%s28291_s24 + $0x1b0c] ss:$16 sps:$4 sm:$0xff]  }
 0x375   :  { %6995 = vmatpush1.bf16.msra.mxu0 %v19537_v5  ;;  %v19608_v5 = vld [vmem:[%s28291_s24 + $0x1b2c] ss:$16 sps:$4 sm:$0xff]  }
 0x376   :  { %6968 = vmatpush2.bf16.msra.mxu1 %v19534_v14  ;;  %6996 = vmatprep.subr.bf16.mxu0 %v19545_v46  ;;  %v19603_v14 = vld [vmem:[%s28291_s24 + $0x1c48] ss:$16 sps:$4 sm:$0xff]  }
 0x377   :  { %6969 = vmatprep.subr.bf16.mxu1 %v19542_v33  ;;  %v19606_v33 = vld [vmem:[%s28291_s24 + $0x1b28] ss:$16 sps:$4 sm:$0xff]  }
 0x378   :  { %v19609_v46 = vld [vmem:[%s28291_s24 + $0x1c28] ss:$16 sps:$4 sm:$0xff]  }
 0x379   :  { %6997 = vmatpush1.bf16.msra.mxu0 %v19543_v10  ;;  %v19612_v10 = vld [vmem:[%s28291_s24 + $0x1b08] ss:$16 sps:$4 sm:$0xff]  }
 0x37a   :  { %6970 = vmatpush2.bf16.msra.mxu1 %v19540_v19  ;;  %6998 = vmatprep.subr.bf16.mxu0 %v19551_v9  ;;  %v19617_v19 = vld [vmem:[%s28291_s24 + $0x1c0c] ss:$16 sps:$4 sm:$0xff]  }
 0x37b   :  { %6971 = vmatprep.subr.bf16.mxu1 %v19548_v32  ;;  %v19615_v32 = vld [vmem:[%s28291_s24 + $0x1c08] ss:$16 sps:$4 sm:$0xff]   ;;  %v19620_v9 = vld [vmem:[%s28294_s5 + $0x74] ss:$8 sps:$4 sm:$0xff]  }
 0x37d   :  { %6999 = vmatpush1.bf16.msra.mxu0 %v19549_v24  ;;  %v19618_v24 = vld [vmem:[%s28294_s5 + $0x70] ss:$8 sps:$4 sm:$0xff]  }
 0x37e   :  { %6972 = vmatpush2.bf16.msra.mxu1 %v19546_v4  ;;  %7000 = vmatprep.subr.bf16.mxu0 %v19557_v30  ;;  %v7073_v4 = vmax.f32 %v23762_v12, 0.0  ;;  %v19626_v12 = vld [vmem:[%s28294_s5 + $0x54] ss:$8 sps:$4 sm:$0xff]  }
 0x37f   :  { %6973 = vmatprep.subr.bf16.mxu1 %v19554_v52  ;;  %v19623_v52 = vld [vmem:[%s28294_s5 + $0x64] ss:$8 sps:$4 sm:$0xff]  }
 0x380   :  { %v7077_v30 = vpack.c.bf16 %v7073_v4, %v7073_v4  ;;  %v19695_v4 = vld [vmem:[%s28294_s5 + $0x1e4] ss:$8 sps:$4 sm:$0xff]  }
 0x381   :  { %7001 = vmatpush1.bf16.msra.mxu0 %v19555_v25 }
 0x382   :  { %6974 = vmatpush2.bf16.msra.mxu1 %v19552_v18  ;;  %7002 = vmatprep.subr.bf16.mxu0 %v19563_v8  ;;  %v19621_v18 = vld [vmem:[%s28294_s5 + $0x60] ss:$8 sps:$4 sm:$0xff]  }
 0x383   :  { %6975 = vmatprep.subr.bf16.mxu1 %v19560_v53 }
 0x385   :  { %7003 = vmatpush1.bf16.msra.mxu0 %v19561_v56  ;;  %v19624_v56 = vld [vmem:[%s28294_s5 + $0x50] ss:$8 sps:$4 sm:$0xff]  }
 0x386   :  { %6976 = vmatpush2.bf16.msra.mxu1 %v19558_v1  ;;  %7004 = vmatprep.subr.bf16.mxu0 %v19569_v60  ;;  %v19666_v60 = vld [vmem:[%s28294_s5 + $0x170] ss:$8 sps:$4 sm:$0xff]  }
 0x387   :  { %6977 = vmatprep.subr.bf16.mxu1 %v19566_v45 }
 0x389   :  { %7005 = vmatpush1.bf16.msra.mxu0 %v19567_v0  ;;  %v19671_v0 = vld [vmem:[%s28294_s5 + $0x164] ss:$8 sps:$4 sm:$0xff]  }
 0x38a   :  { %6978 = vmatpush2.bf16.msra.mxu1 %v19564_v48  ;;  %7006 = vmatprep.subr.bf16.mxu0 %v19575_v20  ;;  %v19668_v48 = vld [vmem:[%s28294_s5 + $0x174] ss:$8 sps:$4 sm:$0xff]  }
 0x38b   :  { %6979 = vmatprep.subr.bf16.mxu1 %v19572_v6  ;;  %v19627_v6 = vld [vmem:[%s28294_s5 + $0x40] ss:$8 sps:$4 sm:$0xff]   ;;  %v19632_v20 = vld [vmem:[%s28294_s5 + $0x34] ss:$8 sps:$4 sm:$0xff]  }
 0x38d   :  { %7007 = vmatpush2.bf16.msra.mxu0 %v19573_v39  ;;  %v19674_v39 = vld [vmem:[%s28294_s5 + $0x154] ss:$8 sps:$4 sm:$0xff]  }
 0x38e   :  { %6980 = vmatpush2.bf16.msra.mxu1 %v19570_v55  ;;  %7008 = vmatprep.subr.bf16.mxu0 %v19578_v31  ;;  %v19669_v55 = vld [vmem:[%s28294_s5 + $0x160] ss:$8 sps:$4 sm:$0xff]   ;;  %v19630_v31 = vld [vmem:[%s28294_s5 + $0x30] ss:$8 sps:$4 sm:$0xff]  }
 0x38f   :  { %7033 = vmatprep.subr.bf16.mxu1 %v19581_v44  ;;  %v19672_v44 = vld [vmem:[%s28294_s5 + $0x150] ss:$8 sps:$4 sm:$0xff]  }
 0x391   :  { %v6737_v3 = vpop.f32.mrf.mxu1  ;;  %6982 = vmatmul.mubr.bf16.vlgmr.msra.gmra.mxu1 %v23033_v42  ;;  %7009 = vmatpush2.bf16.msra.mxu0 %v19576_v13  ;;  %v19588_v42 = vld [vmem:[%s28291_s24 + $0x1b88] ss:$16 sps:$4 sm:$0xff]   ;;  %v19635_v13 = vld [vmem:[%s28294_s5 + $0x24] ss:$8 sps:$4 sm:$0xff]  }
 0x392   :  { %v6738_v23 = vadd.f32 %v6737_v3, %v24392_v37  ;;  %7034 = vmatpush1.bf16.msra.mxu1 %v19579_v15  ;;  %7010 = vmatprep.subr.bf16.mxu0 %v19584_v59  ;;  %v19602_v37 = vld [vmem:[%s28291_s24 + $0x1b4c] ss:$16 sps:$4 sm:$0xff]   ;;  %v19633_v59 = vld [vmem:[%s28294_s5 + $0x20] ss:$8 sps:$4 sm:$0xff]   ;;  %v19636_v3 = vld [vmem:[%s28294_s5 + $0x10] ss:$8 sps:$4 sm:$0xff]  }
 0x393   :  { %v6739_v54 = vpop.f32.mrf.mxu1  ;;  %7035 = vmatprep.subr.bf16.mxu1 %v19587_v63  ;;  %7063 = vmatprep.mubr.bf16.mxu1 %v21334_v11  ;;  %v19677_v15 = vld [vmem:[%s28294_s5 + $0x144] ss:$8 sps:$4 sm:$0xff]   ;;  %v19675_v63 = vld [vmem:[%s28294_s5 + $0x140] ss:$8 sps:$4 sm:$0xff]  }
 0x394   :  { %v6740_v21 = vadd.f32 %v6739_v54, %v24395_v40  ;;  %v19600_v40 = vld [vmem:[%s28291_s24 + $0x1b48] ss:$16 sps:$4 sm:$0xff]  }
 0x395   :  { %v6741_v27 = vpop.f32.mrf.mxu1  ;;  %7011 = vmatpush2.bf16.msra.mxu0 %v19582_v35  ;;  %v19638_v35 = vld [vmem:[%s28294_s5 + $0x14] ss:$8 sps:$4 sm:$0xff]   ;;  %v19639_v54 = vld [vmem:[%s28294_s5] ss:$8 sps:$4 sm:$0xff]  }
 0x396   :  { %7036 = vmatpush1.bf16.msra.mxu1 %v19585_v36  ;;  %7012 = vmatprep.subr.bf16.mxu0 %v19590_v62  ;;  %v19680_v36 = vld [vmem:[%s28294_s5 + $0x134] ss:$8 sps:$4 sm:$0xff]   ;;  %v19678_v62 = vld [vmem:[%s28294_s5 + $0x130] ss:$8 sps:$4 sm:$0xff]   ;;  %v19647_v27 = vld [vmem:[%s28294_s5 + $0xe4] ss:$8 sps:$4 sm:$0xff]  }
 0x397   :  { %v6742_v61 = vpop.f32.mrf.mxu1  ;;  %7037 = vmatprep.subr.bf16.mxu1 %v19593_v22  ;;  %v19641_v22 = vld [vmem:[%s28294_s5 + $0x4] ss:$8 sps:$4 sm:$0xff]  }
 0x398   :  { %v19686_v61 = vld [vmem:[%s28294_s5 + $0x114] ss:$8 sps:$4 sm:$0xff]  }
 0x399   :  { %7013 = vmatpush2.bf16.msra.mxu0 %v19588_v42  ;;  %v19644_v42 = vld [vmem:[%s28294_s5 + $0xf4] ss:$8 sps:$4 sm:$0xff]  }
 0x39a   :  { %7038 = vmatpush1.bf16.msra.mxu1 %v19591_v38  ;;  %7014 = vmatprep.subr.bf16.mxu0 %v19596_v26  ;;  %v19642_v38 = vld [vmem:[%s28294_s5 + $0xf0] ss:$8 sps:$4 sm:$0xff]   ;;  %v19645_v26 = vld [vmem:[%s28294_s5 + $0xe0] ss:$8 sps:$4 sm:$0xff]  }
 0x39b   :  { %7039 = vmatprep.subr.bf16.mxu1 %v19599_v28  ;;  %v19650_v28 = vld [vmem:[%s28294_s5 + $0xd4] ss:$8 sps:$4 sm:$0xff]  }
 0x39d   :  { %7015 = vmatpush2.bf16.msra.mxu0 %v19594_v7  ;;  %v19648_v7 = vld [vmem:[%s28294_s5 + $0xd0] ss:$8 sps:$4 sm:$0xff]  }
 0x39e   :  { %7040 = vmatpush1.bf16.msra.mxu1 %v19597_v17  ;;  %7016 = vmatprep.subr.bf16.mxu0 %v19602_v37  ;;  %v19684_v17 = vld [vmem:[%s28294_s5 + $0x110] ss:$8 sps:$4 sm:$0xff]  }
 0x39f   :  { %7041 = vmatprep.subr.bf16.mxu1 %v19605_v47  ;;  %v19653_v47 = vld [vmem:[%s28294_s5 + $0xc4] ss:$8 sps:$4 sm:$0xff]  }
 0x3a1   :  { %7017 = vmatpush2.bf16.msra.mxu0 %v19600_v40 }
 0x3a2   :  { %7042 = vmatpush1.bf16.msra.mxu1 %v19603_v14  ;;  %7018 = vmatprep.subr.bf16.mxu0 %v19608_v5  ;;  %v19689_v5 = vld [vmem:[%s28294_s5 + $0x104] ss:$8 sps:$4 sm:$0xff]  }
 0x3a3   :  { %7043 = vmatprep.subr.bf16.mxu1 %v19611_v41 }
 0x3a5   :  { %7019 = vmatpush2.bf16.msra.mxu0 %v19606_v33  ;;  %v19651_v33 = vld [vmem:[%s28294_s5 + $0xc0] ss:$8 sps:$4 sm:$0xff]  }
 0x3a6   :  { %7044 = vmatpush1.bf16.msra.mxu1 %v19609_v46  ;;  %7020 = vmatprep.subr.bf16.mxu0 %v19614_v57  ;;  %v19687_v46 = vld [vmem:[%s28294_s5 + $0x100] ss:$8 sps:$4 sm:$0xff]  }
 0x3a7   :  { %7045 = vmatprep.subr.bf16.mxu1 %v19617_v19 }
 0x3a9   :  { %7021 = vmatpush2.bf16.msra.mxu0 %v19612_v10  ;;  %v19656_v10 = vld [vmem:[%s28294_s5 + $0xb4] ss:$8 sps:$4 sm:$0xff]  }
 0x3aa   :  { %7046 = vmatpush1.bf16.msra.mxu1 %v19615_v32  ;;  %7476 = vmatprep.subr.bf16.mxu0 %v19620_v9  ;;  %v19690_v32 = vld [vmem:[%s28294_s5 + $0x1f0] ss:$8 sps:$4 sm:$0xff]   ;;  %v19692_v9 = vld [vmem:[%s28294_s5 + $0x1f4] ss:$8 sps:$4 sm:$0xff]  }
 0x3ab   :  { %7517 = vmatprep.subr.bf16.mxu1 %v19668_v48  ;;  %v7072_v48 = vmax.f32 %v23754_v16, 0.0  ;;  %v19710_v16 = vld [vmem:[%s28294_s5 + $0x194] ss:$8 sps:$4 sm:$0xff]  }
 0x3ac   :  { %v6778_v25 = vpop.f32.mrf.mxu0  ;;  %7023 = vmatmul.mubr.bf16.vlgmr.msra.gmra.mxu0 %v23037_v58 }
 0x3ad   :  { %16965 = vmatmul.mubr.msk.bf16.vlgmr.msra.gmra.mxu1 %vm5838_vm0, %v23136_v2  ;;  %v24583_v53 = vadd.f32 %v6778_v25, %v6738_v23  ;;  %7477 = vmatpush1.bf16.msra.mxu0 %v19618_v24  ;;  %v19629_v2 = vld [vmem:[%s28294_s5 + $0x44] ss:$8 sps:$4 sm:$0xff]   ;;  %v19654_v24 = vld [vmem:[%s28294_s5 + $0xb0] ss:$8 sps:$4 sm:$0xff]   ;;  %v19657_v25 = vld [vmem:[%s28294_s5 + $0xa0] ss:$8 sps:$4 sm:$0xff]  }
 0x3ae   :  { %7508 = vmatprep.mubr.bf16.mxu0 %v7077_v30  ;;  %v6780_v8 = vpop.f32.mrf.mxu0  ;;  %7478 = vmatprep.subr.bf16.mxu0 %v19623_v52  ;;  %v19683_v23 = vld [vmem:[%s28294_s5 + $0x124] ss:$8 sps:$4 sm:$0xff]   ;;  %v19693_v30 = vld [vmem:[%s28294_s5 + $0x1e0] ss:$8 sps:$4 sm:$0xff]  }
 0x3af   :  { %v24585_v1 = vadd.f32 %v6780_v8, %v6740_v21  ;;  %7518 = vmatpush1.bf16.msra.mxu1 %v19666_v60  ;;  %v19681_v21 = vld [vmem:[%s28294_s5 + $0x120] ss:$8 sps:$4 sm:$0xff]   ;;  %v19659_v52 = vld [vmem:[%s28294_s5 + $0xa4] ss:$8 sps:$4 sm:$0xff]   ;;  %v19702_v60 = vld [vmem:[%s28294_s5 + $0x1b0] ss:$8 sps:$4 sm:$0xff]  }
 0x3b0   :  { %v6782_v58 = vpop.f32.mrf.mxu0  ;;  %7519 = vmatprep.subr.bf16.mxu1 %v19671_v0  ;;  %v19701_v8 = vld [vmem:[%s28294_s5 + $0x1c4] ss:$8 sps:$4 sm:$0xff]   ;;  %v7076_v0 = vpack.c.bf16 %v7072_v48, %v7072_v48 }
 0x3b1   :  { %7479 = vmatpush1.bf16.msra.mxu0 %v19621_v18  ;;  %v19698_v18 = vld [vmem:[%s28294_s5 + $0x1d4] ss:$8 sps:$4 sm:$0xff]   ;;  %v19665_v58 = vld [vmem:[%s28294_s5 + $0x84] ss:$8 sps:$4 sm:$0xff]  }
 0x3b2   :  { %v6783_v45 = vpop.f32.mrf.mxu0  ;;  %7480 = vmatprep.subr.bf16.mxu0 %v19626_v12  ;;  %v19696_v12 = vld [vmem:[%s28294_s5 + $0x1d0] ss:$8 sps:$4 sm:$0xff]  }
 0x3b3   :  { %7520 = vmatpush1.bf16.msra.mxu1 %v19669_v55  ;;  %v19704_v45 = vld [vmem:[%s28294_s5 + $0x1b4] ss:$8 sps:$4 sm:$0xff]  }
 0x3b4   :  { %7521 = vmatprep.subr.bf16.mxu1 %v19674_v39 }
 0x3b5   :  { %7481 = vmatpush1.bf16.msra.mxu0 %v19624_v56  ;;  %v19699_v56 = vld [vmem:[%s28294_s5 + $0x1c0] ss:$8 sps:$4 sm:$0xff]  }
 0x3b6   :  { %7482 = vmatprep.subr.bf16.mxu0 %v19629_v2  ;;  %v19663_v2 = vld [vmem:[%s28294_s5 + $0x80] ss:$8 sps:$4 sm:$0xff]  }
 0x3b7   :  { %7522 = vmatpush1.bf16.msra.mxu1 %v19672_v44 }
 0x3b8   :  { %7523 = vmatprep.subr.bf16.mxu1 %v19677_v15 }
 0x3b9   :  { %7483 = vmatpush1.bf16.msra.mxu0 %v19627_v6  ;;  %v19707_v6 = vld [vmem:[%s28294_s5 + $0x1a4] ss:$8 sps:$4 sm:$0xff]  }
 0x3ba   :  { %7484 = vmatprep.subr.bf16.mxu0 %v19632_v20  ;;  %v19705_v20 = vld [vmem:[%s28294_s5 + $0x1a0] ss:$8 sps:$4 sm:$0xff]  }
 0x3bb   :  { %7524 = vmatpush1.bf16.msra.mxu1 %v19675_v63  ;;  %v19713_v63 = vld [vmem:[%s28294_s5 + $0x184] ss:$8 sps:$4 sm:$0xff]  }
 0x3bc   :  { %7525 = vmatprep.subr.bf16.mxu1 %v19680_v36 }
 0x3bd   :  { %7485 = vmatpush1.bf16.msra.mxu0 %v19630_v31 }
 0x3be   :  { %7486 = vmatprep.subr.bf16.mxu0 %v19635_v13  ;;  %v19708_v13 = vld [vmem:[%s28294_s5 + $0x190] ss:$8 sps:$4 sm:$0xff]  }
 0x3bf   :  { %7526 = vmatpush1.bf16.msra.mxu1 %v19678_v62 }
 0x3c0   :  { %7527 = vmatprep.subr.bf16.mxu1 %v19683_v23 }
 0x3c1   :  { %7487 = vmatpush1.bf16.msra.mxu0 %v19633_v59 }
 0x3c2   :  { %7488 = vmatprep.subr.bf16.mxu0 %v19638_v35  ;;  %v19711_v35 = vld [vmem:[%s28294_s5 + $0x180] ss:$8 sps:$4 sm:$0xff]  }
 0x3c3   :  { %7528 = vmatpush1.bf16.msra.mxu1 %v19681_v21 }
 0x3c4   :  { %7529 = vmatprep.subr.bf16.mxu1 %v19686_v61 }
 0x3c5   :  { %7489 = vmatpush1.bf16.msra.mxu0 %v19636_v3 }
 0x3c6   :  { %7490 = vmatprep.subr.bf16.mxu0 %v19641_v22 }
 0x3c7   :  { %7530 = vmatpush1.bf16.msra.mxu1 %v19684_v17 }
 0x3c8   :  { %7531 = vmatprep.subr.bf16.mxu1 %v19689_v5 }
 0x3c9   :  { %7491 = vmatpush1.bf16.msra.mxu0 %v19639_v54 }
 0x3ca   :  { %7492 = vmatprep.subr.bf16.mxu0 %v19644_v42 }
 0x3cb   :  { %7532 = vmatpush1.bf16.msra.mxu1 %v19687_v46 }
 0x3cc   :  { %7533 = vmatprep.subr.bf16.mxu1 %v19692_v9 }
 0x3cd   :  { %7493 = vmatpush2.bf16.msra.mxu0 %v19642_v38 }
 0x3ce   :  { %7494 = vmatprep.subr.bf16.mxu0 %v19647_v27 }
 0x3cf   :  { %7534 = vmatpush2.bf16.msra.mxu1 %v19690_v32 }
 0x3d0   :  { %7535 = vmatprep.subr.bf16.mxu1 %v19695_v4 }
 0x3d1   :  { %v6819_v37 = vpop.f32.mrf.mxu1  ;;  %7495 = vmatpush2.bf16.msra.mxu0 %v19645_v26 }
 0x3d2   :  { %v6820_v40 = vadd.f32 %v6819_v37, %v24583_v53  ;;  %7496 = vmatprep.subr.bf16.mxu0 %v19650_v28  ;;  %v19662_v53 = vld [vmem:[%s28294_s5 + $0x94] ss:$8 sps:$4 sm:$0xff]  }
 0x3d3   :  { %v6821_v14 = vpop.f32.mrf.mxu1  ;;  %7536 = vmatpush2.bf16.msra.mxu1 %v19693_v30 }
 0x3d4   :  { %v6822_v41 = vadd.f32 %v6821_v14, %v24585_v1  ;;  %7537 = vmatprep.subr.bf16.mxu1 %v19698_v18  ;;  %v19660_v1 = vld [vmem:[%s28294_s5 + $0x90] ss:$8 sps:$4 sm:$0xff]  }
 0x3d5   :  { %v6823_v57 = vpop.f32.mrf.mxu1  ;;  %7497 = vmatpush2.bf16.msra.mxu0 %v19648_v7 }
 0x3d6   :  { %7498 = vmatprep.subr.bf16.mxu0 %v19653_v47 }
 0x3d7   :  { %v6824_v19 = vpop.f32.mrf.mxu1  ;;  %7538 = vmatpush2.bf16.msra.mxu1 %v19696_v12 }
 0x3d8   :  { %7539 = vmatprep.subr.bf16.mxu1 %v19701_v8 }
 0x3d9   :  { %7499 = vmatpush2.bf16.msra.mxu0 %v19651_v33 }
 0x3da   :  { %7500 = vmatprep.subr.bf16.mxu0 %v19656_v10 }
 0x3db   :  { %7540 = vmatpush2.bf16.msra.mxu1 %v19699_v56 }
 0x3dc   :  { %7541 = vmatprep.subr.bf16.mxu1 %v19704_v45 }
 0x3dd   :  { %7501 = vmatpush2.bf16.msra.mxu0 %v19654_v24 }
 0x3de   :  { %7502 = vmatprep.subr.bf16.mxu0 %v19659_v52 }
 0x3df   :  { %7542 = vmatpush2.bf16.msra.mxu1 %v19702_v60 }
 0x3e0   :  { %7543 = vmatprep.subr.bf16.mxu1 %v19707_v6 }
 0x3e1   :  { %7503 = vmatpush2.bf16.msra.mxu0 %v19657_v25 }
 0x3e2   :  { %7504 = vmatprep.subr.bf16.mxu0 %v19662_v53 }
 0x3e3   :  { %7544 = vmatpush2.bf16.msra.mxu1 %v19705_v20 }
 0x3e4   :  { %7545 = vmatprep.subr.bf16.mxu1 %v19710_v16 }
 0x3e5   :  { %7505 = vmatpush2.bf16.msra.mxu0 %v19660_v1 }
 0x3e6   :  { %7506 = vmatprep.subr.bf16.mxu0 %v19665_v58 }
 0x3e7   :  { %7546 = vmatpush2.bf16.msra.mxu1 %v19708_v13 }
 0x3e8   :  { %7547 = vmatprep.subr.bf16.mxu1 %v19713_v63 }
 0x3e9   :  { %7507 = vmatpush2.bf16.msra.mxu0 %v19663_v2 }
 0x3eb   :  { %7548 = vmatpush2.bf16.msra.mxu1 %v19711_v35 }
 0x3ec   :  { %v6860_v55 = vpop.f32.mrf.mxu0  ;;  %7509 = vmatmul.mubr.bf16.vlgmr.msra.gmra.mxu0 %v7076_v0 }
 0x3ed   :  { %v6861_v39 = vadd.f32 %v6860_v55, %v6820_v40 }
 0x3ee   :  { %v6862_v31 = vpop.f32.mrf.mxu0 }
 0x3ef   :  { %v6863_v44 = vadd.f32 %v6862_v31, %v6822_v41 }
 0x3f0   :  { %v6864_v15 = vpop.f32.mrf.mxu0 }
 0x3f2   :  { %v6865_v59 = vpop.f32.mrf.mxu0 }
 0x411   :  { %v6901_v36 = vpop.f32.mrf.mxu1 }
 0x412   :  { %v6902_v3 = vadd.f32 %v6901_v36, %v6861_v39 }
 0x413   :  { %v6903_v62 = vpop.f32.mrf.mxu1 }
 0x414   :  { %v6904_v22 = vadd.f32 %v6903_v62, %v6863_v44 }
 0x415   :  { %v6905_v23 = vpop.f32.mrf.mxu1 }
 0x417   :  { %v6906_v54 = vpop.f32.mrf.mxu1 }
 0x418   :  { %30 = vsyncpa [#allocation5], 0  ;;  %s28295_s26 = sld [smem:[#allocation15_spill]]  ;;  %v19730_v59 = vld [vmem:[%s28262_s8 + $0x38] sm:$0xff]   ;;  %v21335_v63 = vmov 0.0   ;;  %v19731_v35 = vld [vmem:[%s28262_s8 + $0x30] sm:$0xff]  }
 0x419   :  { %18176 = vmatprep.subr.bf16.mxu1 %v21335_v63  ;;  %v19732_v36 = vld [vmem:[%s28262_s8 + $0x28] sm:$0xff]   ;;  %v19734_v62 = vld [vmem:[%s28262_s8 + $0x18] sm:$0xff]   ;;  %s28296_s3 = sld [smem:[#allocation14_spill]]  ;;  %vm21336_vm1 = vmmov 0   ;;  %s21337_s30 = smov 4   ;;  %vm8012_vm2 = vcmask 1041408  }
 0x41a   :  { %s28297_s27 = sld [smem:[#allocation16_spill]]  ;;  %vm7977_vm3 = vcmask 25600   ;;  %vm8008_vm4 = vcmask 31744  }
 0x41e   :  { %v19714_v26 = vld [vmem:[%s28295_s26 + $0x78] sm:$0xff]   ;;  %v19716_v61 = vld [vmem:[%s28295_s26 + $0x70] sm:$0xff]   ;;  %v19718_v17 = vld [vmem:[%s28295_s26 + $0x68] sm:$0xff]  }
 0x41f   :  { %v19715_v28 = vld [vmem:[%s28295_s26 + $0x38] sm:$0xff]   ;;  %18092 = vmatprep.subr.bf16.mxu0 %v19714_v26  ;;  %v19717_v7 = vld [vmem:[%s28295_s26 + $0x30] sm:$0xff]   ;;  %v19719_v37 = vld [vmem:[%s28295_s26 + $0x28] sm:$0xff]  }
 0x420   :  { %18093 = vmatpush3.bf16.msra.mxu0 %v19715_v28  ;;  %v19720_v47 = vld [vmem:[%s28295_s26 + $0x60] sm:$0xff]   ;;  %v19722_v14 = vld [vmem:[%s28295_s26 + $0x58] sm:$0xff]   ;;  %v19724_v41 = vld [vmem:[%s28295_s26 + $0x50] sm:$0xff]  }
 0x421   :  { %18094 = vmatprep.subr.bf16.mxu0 %v19716_v61  ;;  %v19721_v40 = vld [vmem:[%s28295_s26 + $0x20] sm:$0xff]   ;;  %v19723_v5 = vld [vmem:[%s28295_s26 + $0x18] sm:$0xff]   ;;  %v19725_v33 = vld [vmem:[%s28295_s26 + $0x10] sm:$0xff]  }
 0x422   :  { %v19726_v16 = vld [vmem:[%s28295_s26 + $0x48] sm:$0xff]   ;;  %v19728_v13 = vld [vmem:[%s28295_s26 + $0x40] sm:$0xff]  }
 0x423   :  { %v19727_v44 = vld [vmem:[%s28295_s26 + $0x8] sm:$0xff]   ;;  %v19729_v15 = vld [vmem:[%s28295_s26] sm:$0xff]  }
 0x424   :  { %18095 = vmatpush3.bf16.msra.mxu0 %v19717_v7 }
 0x425   :  { %18096 = vmatprep.subr.bf16.mxu0 %v19718_v17 }
 0x428   :  { %18097 = vmatpush3.bf16.msra.mxu0 %v19719_v37 }
 0x429   :  { %18098 = vmatprep.subr.bf16.mxu0 %v19720_v47 }
 0x42c   :  { %v6942_v21 = vpop.f32.mrf.mxu0  ;;  %18099 = vmatpush3.bf16.msra.mxu0 %v19721_v40 }
 0x42d   :  { %18100 = vmatprep.subr.bf16.mxu0 %v19722_v14  ;;  %v6943_v32 = vadd.f32 %v6942_v21, %v6902_v3  ;;  %v19733_v3 = vld [vmem:[%s28262_s8 + $0x20] sm:$0xff]   ;;  %v19735_v14 = vld [vmem:[%s28262_s8 + $0x10] sm:$0xff]  }
 0x42e   :  { %v6944_v42 = vpop.f32.mrf.mxu0 }
 0x42f   :  { %v6945_v9 = vadd.f32 %v6944_v42, %v6904_v22  ;;  %v7144_v22 = vld [vmem:[%s28296_s3] sm:$0x3] }
 0x430   :  { %v6946_v38 = vpop.f32.mrf.mxu0  ;;  %18101 = vmatpush3.bf16.msra.mxu0 %v19723_v5  ;;  %v7149_v23 = vrot.slane %v7144_v22, %v22342_v29  ;;  %v7153_v54 = vrot.slane %v7144_v22, %v22351_v34  ;;  %v19736_v5 = vld [vmem:[%s28262_s8 + $0x8] sm:$0xff]  }
 0x431   :  { %18102 = vmatprep.subr.bf16.mxu0 %v19724_v41  ;;  %v19737_v41 = vld [vmem:[%s28262_s8] sm:$0xff]   ;;  %s28298_s8 = sld [smem:[#allocation10_spill]] }
 0x432   :  { %v6947_v27 = vpop.f32.mrf.mxu0 }
 0x434   :  { %18103 = vmatpush3.bf16.msra.mxu0 %v19725_v33  ;;  %v19738_v33 = vld [vmem:[%s28264_s10 + $0x38] sm:$0xff]  }
 0x435   :  { %18104 = vmatprep.subr.bf16.mxu0 %v19726_v16 }
 0x438   :  { %18105 = vmatpush3.bf16.msra.mxu0 %v19727_v44 }
 0x439   :  { %18106 = vmatprep.subr.bf16.mxu0 %v19728_v13 }
 0x43c   :  { %18107 = vmatpush3.bf16.msra.mxu0 %v19729_v15 }
 0x43d   :  { %18196 = vmatprep.subr.bf16.mxu0 %v21335_v63 }
 0x451   :  { %v6983_v46 = vpop.f32.mrf.mxu1 }
 0x452   :  { %v6984_v4 = vadd.f32 %v6983_v46, %v6943_v32  ;;  %v19739_v46 = vld [vmem:[%s28264_s10 + $0x30] sm:$0xff]  }
 0x453   :  { %v6985_v57 = vpop.f32.mrf.mxu1  ;;  %v19743_v32 = vld [vmem:[%s28264_s10 + $0x10] sm:$0xff]  }
 0x454   :  { %v6986_v30 = vadd.f32 %v6985_v57, %v6945_v9  ;;  %v19740_v57 = vld [vmem:[%s28264_s10 + $0x28] sm:$0xff]  }
 0x455   :  { %v6987_v19 = vpop.f32.mrf.mxu1 }
 0x456   :  { %v19741_v19 = vld [vmem:[%s28264_s10 + $0x20] sm:$0xff]  }
 0x457   :  { %v6988_v10 = vpop.f32.mrf.mxu1 }
 0x458   :  { %v19742_v10 = vld [vmem:[%s28264_s10 + $0x18] sm:$0xff]  }
 0x46c   :  { %v7024_v24 = vpop.f32.mrf.mxu0 }
 0x46d   :  { %v7065_v52 = vpop.f32.mrf.mxu1  ;;  %v7025_v18 = vadd.f32 %v7024_v24, %v6984_v4  ;;  %v17030_v4 = vld [vmem:[%s28297_s27] ss:$0 sm:$0xff] }
 0x46e   :  { %v7026_v25 = vpop.f32.mrf.mxu0 }
 0x46f   :  { %v7067_v12 = vpop.f32.mrf.mxu1  ;;  %v7066_v53 = vadd.f32 %v7065_v52, %v7025_v18  ;;  %v7027_v8 = vadd.f32 %v7026_v25, %v6986_v30 }
 0x470   :  { %v7028_v1 = vpop.f32.mrf.mxu0 }
 0x471   :  { %v7069_v56 = vpop.f32.mrf.mxu1  ;;  %v7068_v58 = vadd.f32 %v7067_v12, %v7027_v8  ;;  %v7074_v45 = vmax.f32 %v7066_v53, 0.0  ;;  %v19744_v8 = vld [vmem:[%s28264_s10 + $0x8] sm:$0xff]   ;;  %v19745_v1 = vld [vmem:[%s28264_s10] sm:$0xff]  }
 0x472   :  { %v7029_v2 = vpop.f32.mrf.mxu0  ;;  %v7966_v56 = vld [vmem:[%s28298_s8] sm:$0x3] }
 0x473   :  { %v7070_v60 = vpop.f32.mrf.mxu1  ;;  %v7075_v48 = vmax.f32 %v7068_v58, 0.0  ;;  %v7078_v6 = vpack.c.bf16 %v7074_v45, %v7074_v45  ;;  %7968 = vrot.lane.b32.xlu0 %v7966_v56, %s21337_s30  ;;  %v19791_v56 = vld [vmem:[%s28268_s14 + $0x80] ss:$8 sps:$4 sm:$0xff]  }
 0x475   :  { %v7079_v0 = vpack.c.bf16 %v7075_v48, %v7075_v48 }
 0x477   :  { %7549 = vmatprep.mubr.bf16.mxu1 %v7079_v0 }
 0x478   :  { %7550 = vmatmul.mubr.bf16.vlgmr.msra.gmra.mxu1 %v7078_v6 }
 0x479   :  { %18177 = vmatpush3.bf16.msra.mxu1 %v19730_v59  ;;  %18192 = vmatprep.mubr.msk.bf16.mxu1 %vm21336_vm1, %v21335_v63 }
 0x47a   :  { %18178 = vmatprep.subr.bf16.mxu1 %v21335_v63 }
 0x47d   :  { %18179 = vmatpush3.bf16.msra.mxu1 %v19731_v35 }
 0x47e   :  { %18180 = vmatprep.subr.bf16.mxu1 %v21335_v63 }
 0x481   :  { %18181 = vmatpush3.bf16.msra.mxu1 %v19732_v36  ;;  %v19748_v36 = vld [vmem:[%s28268_s14 + $0x74] ss:$8 sps:$4 sm:$0xff]  }
 0x482   :  { %18182 = vmatprep.subr.bf16.mxu1 %v21335_v63 }
 0x485   :  { %18183 = vmatpush3.bf16.msra.mxu1 %v19733_v3 }
 0x486   :  { %18184 = vmatprep.subr.bf16.mxu1 %v21335_v63 }
 0x489   :  { %18185 = vmatpush3.bf16.msra.mxu1 %v19734_v62 }
 0x48a   :  { %18186 = vmatprep.subr.bf16.mxu1 %v21335_v63 }
 0x48d   :  { %18187 = vmatpush3.bf16.msra.mxu1 %v19735_v14  ;;  %v19761_v14 = vld [vmem:[%s28268_s14 + $0x20] ss:$8 sps:$4 sm:$0xff]  }
 0x48e   :  { %18188 = vmatprep.subr.bf16.mxu1 %v21335_v63 }
 0x491   :  { %18189 = vmatpush3.bf16.msra.mxu1 %v19736_v5  ;;  %v19766_v5 = vld [vmem:[%s28268_s14 + $0x14] ss:$8 sps:$4 sm:$0xff]  }
 0x492   :  { %18190 = vmatprep.subr.bf16.mxu1 %v21335_v63 }
 0x495   :  { %18191 = vmatpush3.bf16.msra.mxu1 %v19737_v41  ;;  %v19764_v41 = vld [vmem:[%s28268_s14 + $0x10] ss:$8 sps:$4 sm:$0xff]  }
 0x4ac   :  { %v7510_v20 = vpop.f32.mrf.mxu0 }
 0x4ad   :  { %v7511_v21 = vadd.f32 %v7510_v20, %v7149_v23  ;;  %v17065_v20 = vld.sshfl [vmem:[%s28266_s12] sm:$0x33 pattern:$0x76325410] }
 0x4ae   :  { %v7512_v55 = vpop.f32.mrf.mxu0 }
 0x4af   :  { %v7513_v38 = vadd.f32 %v7512_v55, %v7153_v54  ;;  %v8007_v55 = vcombine.high %v17065_v20, %v17065_v20 }
 0x4b0   :  { %v7514_v39 = vpop.f32.mrf.mxu0 }
 0x4b1   :  { %v8014_v39 = vsel %vm8012_vm2, %v17065_v20, 0  ;;  %17066 = vmatprep.subr.msk.bf16.mxu1 %vm8012_vm2, %v8007_v55  ;;  %v19812_v20 = vld [vmem:[%s28270_s16 + $0x80] ss:$16 sps:$4 sm:$0xff]   ;;  %v19820_v55 = vld [vmem:[%s28270_s16 + $0x64] ss:$16 sps:$4 sm:$0xff]  }
 0x4b2   :  { %v7515_v31 = vpop.f32.mrf.mxu0 }
 0x4b3   :  { %v17056_v31 = vld [vmem:[%s28265_s11] ss:$0 sm:$0xff]  ;;  %s21338_s11 = smov 124  }
 0x4e5   :  { %v7969_v3 = vpop.permute.xlu0 %7968 }
 0x538   :  { %v7551_v42 = vpop.f32.mrf.mxu1 }
 0x539   :  { %v7552_v27 = vadd.f32 %v7551_v42, %v7511_v21  ;;  %v19746_v42 = vld [vmem:[%s28268_s14 + $0x70] ss:$8 sps:$4 sm:$0xff]  }
 0x53a   :  { %v7553_v26 = vpop.f32.mrf.mxu1 }
 0x53b   :  { %v7554_v28 = vadd.f32 %v7553_v26, %v7513_v38  ;;  %v7558_v61 = vmax.f32 %v7552_v27, 0.0  ;;  %v19751_v27 = vld [vmem:[%s28268_s14 + $0x64] ss:$8 sps:$4 sm:$0xff]   ;;  %v19749_v26 = vld [vmem:[%s28268_s14 + $0x60] ss:$8 sps:$4 sm:$0xff]  }
 0x53c   :  { %v7555_v7 = vpop.f32.mrf.mxu1 }
 0x53d   :  { %v7559_v17 = vmax.f32 %v7554_v28, 0.0  ;;  %v7560_v40 = vpack.c.bf16 %v7558_v61, %v7558_v61  ;;  %v19754_v28 = vld [vmem:[%s28268_s14 + $0x54] ss:$8 sps:$4 sm:$0xff]   ;;  %v19752_v61 = vld [vmem:[%s28268_s14 + $0x50] ss:$8 sps:$4 sm:$0xff]  }
 0x53e   :  { %v7556_v37 = vpop.f32.mrf.mxu1  ;;  %v19757_v7 = vld [vmem:[%s28268_s14 + $0x44] ss:$8 sps:$4 sm:$0xff]  }
 0x53f   :  { %v7561_v47 = vpack.c.bf16 %v7559_v17, %v7559_v17  ;;  %v19755_v17 = vld [vmem:[%s28268_s14 + $0x40] ss:$8 sps:$4 sm:$0xff]   ;;  %v19760_v37 = vld [vmem:[%s28268_s14 + $0x34] ss:$8 sps:$4 sm:$0xff]  }
 0x541   :  { %7729 = vmatprep.mubr.bf16.mxu0 %v7561_v47  ;;  %v19758_v47 = vld [vmem:[%s28268_s14 + $0x30] ss:$8 sps:$4 sm:$0xff]  }
 0x542   :  { %7730 = vmatmul.mubr.bf16.vlgmr.msra.gmra.mxu0 %v7560_v40  ;;  %v19763_v40 = vld [vmem:[%s28268_s14 + $0x24] ss:$8 sps:$4 sm:$0xff]  }
 0x543   :  { %18212 = vmatprep.mubr.msk.bf16.mxu0 %vm21336_vm1, %v21335_v63  ;;  %18197 = vmatpush3.bf16.msra.mxu0 %v19738_v33  ;;  %v19769_v33 = vld [vmem:[%s28268_s14 + $0x4] ss:$8 sps:$4 sm:$0xff]  }
 0x544   :  { %18198 = vmatprep.subr.bf16.mxu0 %v21335_v63 }
 0x547   :  { %18199 = vmatpush3.bf16.msra.mxu0 %v19739_v46  ;;  %v19767_v46 = vld [vmem:[%s28268_s14] ss:$8 sps:$4 sm:$0xff]  }
 0x548   :  { %18200 = vmatprep.subr.bf16.mxu0 %v21335_v63 }
 0x54b   :  { %18201 = vmatpush3.bf16.msra.mxu0 %v19740_v57  ;;  %v19772_v57 = vld [vmem:[%s28268_s14 + $0xf4] ss:$8 sps:$4 sm:$0xff]  }
 0x54c   :  { %18202 = vmatprep.subr.bf16.mxu0 %v21335_v63 }
 0x54f   :  { %18203 = vmatpush3.bf16.msra.mxu0 %v19741_v19  ;;  %v19770_v19 = vld [vmem:[%s28268_s14 + $0xf0] ss:$8 sps:$4 sm:$0xff]  }
 0x550   :  { %18204 = vmatprep.subr.bf16.mxu0 %v21335_v63 }
 0x553   :  { %18205 = vmatpush3.bf16.msra.mxu0 %v19742_v10  ;;  %v19775_v10 = vld [vmem:[%s28268_s14 + $0xe4] ss:$8 sps:$4 sm:$0xff]  }
 0x554   :  { %18206 = vmatprep.subr.bf16.mxu0 %v21335_v63 }
 0x557   :  { %18207 = vmatpush3.bf16.msra.mxu0 %v19743_v32  ;;  %v19773_v32 = vld [vmem:[%s28268_s14 + $0xe0] ss:$8 sps:$4 sm:$0xff]  }
 0x558   :  { %18208 = vmatprep.subr.bf16.mxu0 %v21335_v63 }
 0x55b   :  { %18209 = vmatpush3.bf16.msra.mxu0 %v19744_v8  ;;  %v19788_v8 = vld [vmem:[%s28268_s14 + $0x90] ss:$8 sps:$4 sm:$0xff]  }
 0x55c   :  { %18210 = vmatprep.subr.bf16.mxu0 %v21335_v63 }
 0x55f   :  { %18211 = vmatpush3.bf16.msra.mxu0 %v19745_v1  ;;  %v19793_v1 = vld [vmem:[%s28268_s14 + $0x84] ss:$8 sps:$4 sm:$0xff]  }
 0x602   :  { %v18108_v9 = vpop.f32.mrf.mxu0 }
 0x604   :  { %v18109_v24 = vpop.f32.mrf.mxu0 }
 0x605   :  { %v18110_v52 = vadd.f32 %v18109_v24, %v18108_v9  ;;  %v19778_v9 = vld [vmem:[%s28268_s14 + $0xd4] ss:$8 sps:$4 sm:$0xff]   ;;  %v19781_v24 = vld [vmem:[%s28268_s14 + $0xc4] ss:$8 sps:$4 sm:$0xff]  }
 0x606   :  { %v18111_v30 = vpop.f32.mrf.mxu0 }
 0x607   :  { %v7732_v18 = vadd.f32 %v18110_v52, %v17030_v4  ;;  %v19776_v4 = vld [vmem:[%s28268_s14 + $0xd0] ss:$8 sps:$4 sm:$0xff]   ;;  %v19779_v52 = vld [vmem:[%s28268_s14 + $0xc0] ss:$8 sps:$4 sm:$0xff]   ;;  %v19784_v30 = vld [vmem:[%s28268_s14 + $0xb4] ss:$8 sps:$4 sm:$0xff]  }
 0x608   :  { %v18112_v25 = vpop.f32.mrf.mxu0 }
 0x609   :  { %v7737_v12 = vmax.f32 %v7732_v18, 0.0  ;;  %v19782_v18 = vld [vmem:[%s28268_s14 + $0xb0] ss:$8 sps:$4 sm:$0xff]   ;;  %v19787_v25 = vld [vmem:[%s28268_s14 + $0xa4] ss:$8 sps:$4 sm:$0xff]  }
 0x60b   :  { %v7738_v53 = vpack.c.bf16 %v7737_v12, %v7737_v12  ;;  %v19785_v12 = vld [vmem:[%s28268_s14 + $0xa0] ss:$8 sps:$4 sm:$0xff]  }
 0x60d   :  { %18193 = vmatmul.mubr.bf16.vlgmr.msra.gmra.mxu1 %v7738_v53  ;;  %v19790_v53 = vld [vmem:[%s28268_s14 + $0x94] ss:$8 sps:$4 sm:$0xff]  }
 0x60e   :  { %8051 = vmatprep.mubr.bf16.mxu1 %v21334_v11  ;;  %v17047_v11 = vld [vmem:[%s28263_s9] ss:$0 sm:$0xff]  ;;  %8034 = vmatpush1.bf16.msra.mxu1 %v8014_v39 }
 0x60f   :  { %8268 = vmatprep.subr.bf16.mxu1 %v19748_v36  ;;  %v19818_v39 = vld [vmem:[%s28270_s16 + $0x60] ss:$16 sps:$4 sm:$0xff]   ;;  %v19850_v36 = vld [vmem:[%s28270_s16 + $0x1c4] ss:$16 sps:$4 sm:$0xff]  }
 0x6cd   :  { %v7844_v58 = vpop.f32.mrf.mxu1 }
 0x6ce   :  { %v7845_v45 = vadd.f32 %v17047_v11, %v7844_v58  ;;  %v19794_v11 = vld [vmem:[%s28270_s16 + $0xe0] ss:$16 sps:$4 sm:$0xff]   ;;  %v19796_v58 = vld [vmem:[%s28270_s16 + $0xe4] ss:$16 sps:$4 sm:$0xff]  }
 0x6cf   :  { %v18194_v2 = vpop.f32.mrf.mxu1  ;;  %8719 = vmatprep.subr.bf16.mxu0 %v19796_v58  ;;  %v19853_v58 = vld [vmem:[%s28270_s16 + $0x1cc] ss:$16 sps:$4 sm:$0xff]  }
 0x6d0   :  { %v7850_v60 = vmax.f32 %v7845_v45, 0.0  ;;  %v19799_v45 = vld [vmem:[%s28270_s16 + $0xec] ss:$16 sps:$4 sm:$0xff]   ;;  %v19802_v2 = vld [vmem:[%s28270_s16 + $0xc4] ss:$16 sps:$4 sm:$0xff]  }
 0x6d1   :  { %v7847_v48 = vpop.f32.mrf.mxu1 }
 0x6d2   :  { %v7851_v0 = vpack.c.bf16 %v7850_v60, %v7850_v60  ;;  %v19800_v60 = vld [vmem:[%s28270_s16 + $0xc0] ss:$16 sps:$4 sm:$0xff]   ;;  %v19808_v48 = vld [vmem:[%s28270_s16 + $0xa4] ss:$16 sps:$4 sm:$0xff]  }
 0x6d3   :  { %v18195_v6 = vpop.f32.mrf.mxu1 }
 0x6d4   :  { %18213 = vmatmul.mubr.bf16.vlgmr.msra.gmra.mxu0 %v7851_v0  ;;  %v19806_v0 = vld [vmem:[%s28270_s16 + $0xa0] ss:$16 sps:$4 sm:$0xff]   ;;  %v19814_v6 = vld [vmem:[%s28270_s16 + $0x84] ss:$16 sps:$4 sm:$0xff]  }
 0x6d5   :  { %8720 = vmatpush1.bf16.msra.mxu0 %v19794_v11  ;;  %v19845_v11 = vld [vmem:[%s28270_s16 + $0x1e8] ss:$16 sps:$4 sm:$0xff]  }
 0x6d6   :  { %8721 = vmatprep.subr.bf16.mxu0 %v19802_v2  ;;  %v19859_v2 = vld [vmem:[%s28270_s16 + $0x1ac] ss:$16 sps:$4 sm:$0xff]  }
 0x6d9   :  { %8722 = vmatpush1.bf16.msra.mxu0 %v19800_v60  ;;  %v19857_v60 = vld [vmem:[%s28270_s16 + $0x1a8] ss:$16 sps:$4 sm:$0xff]  }
 0x6da   :  { %8723 = vmatprep.subr.bf16.mxu0 %v19808_v48  ;;  %v19865_v48 = vld [vmem:[%s28270_s16 + $0x18c] ss:$16 sps:$4 sm:$0xff]  }
 0x6dd   :  { %8724 = vmatpush1.bf16.msra.mxu0 %v19806_v0  ;;  %v19863_v0 = vld [vmem:[%s28270_s16 + $0x188] ss:$16 sps:$4 sm:$0xff]  }
 0x6de   :  { %8725 = vmatprep.subr.bf16.mxu0 %v19814_v6  ;;  %v19871_v6 = vld [vmem:[%s28270_s16 + $0x16c] ss:$16 sps:$4 sm:$0xff]  }
 0x6e1   :  { %8726 = vmatpush1.bf16.msra.mxu0 %v19812_v20  ;;  %v19869_v20 = vld [vmem:[%s28270_s16 + $0x168] ss:$16 sps:$4 sm:$0xff]  }
 0x6e2   :  { %8727 = vmatprep.subr.bf16.mxu0 %v19820_v55  ;;  %v19877_v55 = vld [vmem:[%s28270_s16 + $0x14c] ss:$16 sps:$4 sm:$0xff]  }
 0x6e5   :  { %8728 = vmatpush1.bf16.msra.mxu0 %v19818_v39  ;;  %v19875_v39 = vld [vmem:[%s28270_s16 + $0x148] ss:$16 sps:$4 sm:$0xff]  }
 0x794   :  { %v7957_v16 = vpop.f32.mrf.mxu0 }
 0x795   :  { %v7958_v44 = vadd.f32 %v17056_v31, %v7957_v16  ;;  %v19826_v31 = vld [vmem:[%s28270_s16 + $0x44] ss:$16 sps:$4 sm:$0xff]   ;;  %v19824_v16 = vld [vmem:[%s28270_s16 + $0x40] ss:$16 sps:$4 sm:$0xff]  }
 0x796   :  { %v18214_v13 = vpop.f32.mrf.mxu0  ;;  %8729 = vmatprep.subr.bf16.mxu0 %v19826_v31  ;;  %v19880_v31 = vld [vmem:[%s28270_s16 + $0x124] ss:$16 sps:$4 sm:$0xff]  }
 0x797   :  { %v7963_v15 = vmul.f32 0.5, %v7958_v44  ;;  %7978 = vst.msk [vmem:[#allocation2] sm:$0x3] %vm7977_vm3, %v7958_v44  ;;  %8730 = vmatpush1.bf16.msra.mxu0 %v19824_v16  ;;  %v19830_v13 = vld [vmem:[%s28270_s16 + $0x20] ss:$16 sps:$4 sm:$0xff]  }
 0x798   :  { %v7960_v59 = vpop.f32.mrf.mxu0  ;;  %v19883_v16 = vld [vmem:[%s28270_s16 + $0x12c] ss:$16 sps:$4 sm:$0xff]  }
 0x799   :  { %v7964_v63 = vmul.f32 1.442695, %v7963_v15  ;;  %v19838_v15 = vld [vmem:[%s28270_s16 + $0x4] ss:$16 sps:$4 sm:$0xff]   ;;  %v19836_v59 = vld [vmem:[%s28270_s16] ss:$16 sps:$4 sm:$0xff]  }
 0x79a   :  { %v18215_v35 = vpop.f32.mrf.mxu0 }
 0x79b   :  { %21266 = vpow2.f32 %v7964_v63  ;;  %v19844_v63 = vld [vmem:[%s28270_s16 + $0x1e4] ss:$16 sps:$4 sm:$0xff]   ;;  %v19842_v35 = vld [vmem:[%s28270_s16 + $0x1e0] ss:$16 sps:$4 sm:$0xff]  }
 0x7a8   :  { %v21267_v62 = vpop.eup %21266 }
 0x7a9   :  { %v7971_v22 = vmul.f32 %v21267_v62, %v7969_v3  ;;  %7980 = vrot.lane.b32.xlu1 %v21267_v62, %s21338_s11  ;;  %v19848_v3 = vld [vmem:[%s28270_s16 + $0x1c0] ss:$16 sps:$4 sm:$0xff]   ;;  %v19856_v62 = vld [vmem:[%s28270_s16 + $0x1a4] ss:$16 sps:$4 sm:$0xff]  }
 0x7ab   :  { %7973 = vrot.lane.b32.xlu0 %v7971_v22, %s21338_s11  ;;  %v19854_v22 = vld [vmem:[%s28270_s16 + $0x1a0] ss:$16 sps:$4 sm:$0xff]  }
 0x81b   :  { %v7981_v23 = vpop.permute.xlu1 %7980 }
 0x81c   :  { %7983 = vst.msk [vmem:[#allocation4] sm:$0x3] %vm7977_vm3, %v7981_v23  ;;  %v19862_v23 = vld [vmem:[%s28270_s16 + $0x184] ss:$16 sps:$4 sm:$0xff]  }
 0x81d   :  { %v7974_v54 = vpop.permute.xlu0 %7973 }
 0x81e   :  { %v7976_v21 = vadd.f32 %v7974_v54, %v7958_v44  ;;  %v19832_v44 = vld [vmem:[%s28270_s16 + $0x24] ss:$16 sps:$4 sm:$0xff]   ;;  %v19860_v54 = vld [vmem:[%s28270_s16 + $0x180] ss:$16 sps:$4 sm:$0xff]  }
 0x81f   :  { %8731 = vmatprep.subr.bf16.mxu0 %v19832_v44  ;;  %v19878_v44 = vld [vmem:[%s28270_s16 + $0x120] ss:$16 sps:$4 sm:$0xff]  }
 0x820   :  { %v7985_v38 = vpack.c.bf16 %v7976_v21, %v7976_v21  ;;  %7984 = vst.msk [vmem:[#allocation6] sm:$0x3] %vm7977_vm3, %v7976_v21  ;;  %8732 = vmatpush1.bf16.msra.mxu0 %v19830_v13  ;;  %v19868_v21 = vld [vmem:[%s28270_s16 + $0x164] ss:$16 sps:$4 sm:$0xff]   ;;  %v19881_v13 = vld [vmem:[%s28270_s16 + $0x128] ss:$16 sps:$4 sm:$0xff]  }
 0x821   :  { %8733 = vmatprep.subr.bf16.mxu0 %v19838_v15  ;;  %v19886_v15 = vld [vmem:[%s28270_s16 + $0x104] ss:$16 sps:$4 sm:$0xff]  }
 0x822   :  { %17067 = vmatmul.mubr.msk.bf16.vlgmr.msra.gmra.mxu1 %vm8008_vm4, %v7985_v38  ;;  %v19874_v38 = vld [vmem:[%s28270_s16 + $0x144] ss:$16 sps:$4 sm:$0xff]  }
 0x823   :  { %8269 = vmatpush1.bf16.msra.mxu1 %v19746_v42  ;;  %v19866_v42 = vld [vmem:[%s28270_s16 + $0x160] ss:$16 sps:$4 sm:$0xff]  }
 0x824   :  { %8270 = vmatprep.subr.bf16.mxu1 %v19751_v27  ;;  %8734 = vmatpush1.bf16.msra.mxu0 %v19836_v59  ;;  %v19872_v27 = vld [vmem:[%s28270_s16 + $0x140] ss:$16 sps:$4 sm:$0xff]   ;;  %v19889_v59 = vld [vmem:[%s28270_s16 + $0x10c] ss:$16 sps:$4 sm:$0xff]  }
 0x825   :  { %8735 = vmatprep.subr.bf16.mxu0 %v19844_v63  ;;  %v19884_v63 = vld [vmem:[%s28270_s16 + $0x100] ss:$16 sps:$4 sm:$0xff]  }
 0x827   :  { %8271 = vmatpush1.bf16.msra.mxu1 %v19749_v26  ;;  %v7987_v26 = vld [vmem:[%s28267_s13] sm:$0x3] }
 0x828   :  { %8272 = vmatprep.subr.bf16.mxu1 %v19754_v28  ;;  %8736 = vmatpush2.bf16.msra.mxu0 %v19842_v35  ;;  %v7992_v28 = vrot.slane %v7987_v26, %v22342_v29  ;;  %v19887_v35 = vld [vmem:[%s28270_s16 + $0x108] ss:$16 sps:$4 sm:$0xff]  }
 0x829   :  { %8737 = vmatprep.subr.bf16.mxu0 %v19850_v36  ;;  %v19892_v36 = vld [vmem:[%s28272_s18 + $0x65c] ss:$116 sps:$4 sm:$0xff]  }
 0x82b   :  { %8273 = vmatpush1.bf16.msra.mxu1 %v19752_v61  ;;  %v7996_v61 = vrot.slane %v7987_v26, %v22351_v34 }
 0x82c   :  { %8274 = vmatprep.subr.bf16.mxu1 %v19757_v7  ;;  %8738 = vmatpush2.bf16.msra.mxu0 %v19848_v3  ;;  %v19895_v3 = vld [vmem:[%s28272_s18 + $0x14dc] ss:$116 sps:$4 sm:$0xff]  }
 0x82d   :  { %8739 = vmatprep.subr.bf16.mxu0 %v19856_v62  ;;  %v8096_v62 = vld [vmem:[%s28269_s15] sm:$0x3]  ;;  %s21340_s15 = smov [#allocation2]  }
 0x82e   :  { %s16000_s30 = sshll.u32 %s21340_s15, 4  ;;  %s16001_s30 = int_to_ptr.vmem [resolvable:$true] %s16000_s30 }
 0x82f   :  { %8275 = vmatpush1.bf16.msra.mxu1 %v19755_v17 }
 0x830   :  { %8276 = vmatprep.subr.bf16.mxu1 %v19760_v37  ;;  %8740 = vmatpush2.bf16.msra.mxu0 %v19854_v22  ;;  %v8101_v22 = vrot.slane %v8096_v62, %v22342_v29 }
 0x831   :  { %8741 = vmatprep.subr.bf16.mxu0 %v19862_v23  ;;  %v8105_v23 = vrot.slane %v8096_v62, %v22351_v34  ;;  %v19959_v62 = vld [vmem:[%s28272_s18 + $0x1960] ss:$116 sps:$4 sm:$0xff]  }
 0x833   :  { %8277 = vmatpush1.bf16.msra.mxu1 %v19758_v47 }
 0x834   :  { %8278 = vmatprep.subr.bf16.mxu1 %v19763_v40  ;;  %8742 = vmatpush2.bf16.msra.mxu0 %v19860_v54 }
 0x835   :  { %8743 = vmatprep.subr.bf16.mxu0 %v19868_v21 }
 0x837   :  { %8279 = vmatpush1.bf16.msra.mxu1 %v19761_v14 }
 0x838   :  { %8280 = vmatprep.subr.bf16.mxu1 %v19766_v5  ;;  %8744 = vmatpush2.bf16.msra.mxu0 %v19866_v42 }
 0x839   :  { %8745 = vmatprep.subr.bf16.mxu0 %v19874_v38 }
 0x83b   :  { %8281 = vmatpush1.bf16.msra.mxu1 %v19764_v41 }
 0x83c   :  { %8282 = vmatprep.subr.bf16.mxu1 %v19769_v33  ;;  %8746 = vmatpush2.bf16.msra.mxu0 %v19872_v27 }
 0x83d   :  { %8747 = vmatprep.subr.bf16.mxu0 %v19880_v31  ;;  %v19949_v31 = vld [vmem:[%s28272_s18 + $0x1b34] ss:$116 sps:$4 sm:$0xff]  }
 0x83f   :  { %8283 = vmatpush1.bf16.msra.mxu1 %v19767_v46  ;;  %v19797_v46 = vld [vmem:[%s28270_s16 + $0xe8] ss:$16 sps:$4 sm:$0xff]  }
 0x840   :  { %8284 = vmatprep.subr.bf16.mxu1 %v19772_v57  ;;  %8748 = vmatpush2.bf16.msra.mxu0 %v19878_v44  ;;  %v19947_v44 = vld [vmem:[%s28272_s18 + $0x1b30] ss:$116 sps:$4 sm:$0xff]  }
 0x841   :  { %8749 = vmatprep.subr.bf16.mxu0 %v19886_v15  ;;  %v19955_v15 = vld [vmem:[%s28272_s18 + $0x1a4c] ss:$116 sps:$4 sm:$0xff]  }
 0x843   :  { %8285 = vmatpush2.bf16.msra.mxu1 %v19770_v19  ;;  %v19805_v19 = vld [vmem:[%s28270_s16 + $0xcc] ss:$16 sps:$4 sm:$0xff]  }
 0x844   :  { %8286 = vmatprep.subr.bf16.mxu1 %v19775_v10  ;;  %v19803_v10 = vld [vmem:[%s28270_s16 + $0xc8] ss:$16 sps:$4 sm:$0xff]   ;;  %8750 = vmatpush2.bf16.msra.mxu0 %v19884_v63 }
 0x845   :  { %14594 = vmatprep.subr.bf16.mxu0 %v19892_v36  ;;  %v19953_v63 = vld [vmem:[%s28272_s18 + $0x1a48] ss:$116 sps:$4 sm:$0xff]   ;;  %v19961_v36 = vld [vmem:[%s28272_s18 + $0x1964] ss:$116 sps:$4 sm:$0xff]  }
 0x847   :  { %8287 = vmatpush2.bf16.msra.mxu1 %v19773_v32  ;;  %v19811_v32 = vld [vmem:[%s28270_s16 + $0xac] ss:$16 sps:$4 sm:$0xff]  }
 0x848   :  { %8288 = vmatprep.subr.bf16.mxu1 %v19778_v9  ;;  %v19809_v9 = vld [vmem:[%s28270_s16 + $0xa8] ss:$16 sps:$4 sm:$0xff]  }
 0x84b   :  { %8289 = vmatpush2.bf16.msra.mxu1 %v19776_v4  ;;  %v19817_v4 = vld [vmem:[%s28270_s16 + $0x8c] ss:$16 sps:$4 sm:$0xff]  }
 0x84c   :  { %8290 = vmatprep.subr.bf16.mxu1 %v19781_v24  ;;  %v19815_v24 = vld [vmem:[%s28270_s16 + $0x88] ss:$16 sps:$4 sm:$0xff]  }
 0x84f   :  { %8291 = vmatpush2.bf16.msra.mxu1 %v19779_v52  ;;  %v19823_v52 = vld [vmem:[%s28270_s16 + $0x6c] ss:$16 sps:$4 sm:$0xff]  }
 0x850   :  { %8292 = vmatprep.subr.bf16.mxu1 %v19784_v30  ;;  %v19821_v30 = vld [vmem:[%s28270_s16 + $0x68] ss:$16 sps:$4 sm:$0xff]  }
 0x853   :  { %8293 = vmatpush2.bf16.msra.mxu1 %v19782_v18  ;;  %v19829_v18 = vld [vmem:[%s28270_s16 + $0x4c] ss:$16 sps:$4 sm:$0xff]  }
 0x854   :  { %8294 = vmatprep.subr.bf16.mxu1 %v19787_v25  ;;  %v19827_v25 = vld [vmem:[%s28270_s16 + $0x48] ss:$16 sps:$4 sm:$0xff]  }
 0x857   :  { %8295 = vmatpush2.bf16.msra.mxu1 %v19785_v12  ;;  %v19835_v12 = vld [vmem:[%s28270_s16 + $0x2c] ss:$16 sps:$4 sm:$0xff]  }
 0x858   :  { %8296 = vmatprep.subr.bf16.mxu1 %v19790_v53  ;;  %v19833_v53 = vld [vmem:[%s28270_s16 + $0x28] ss:$16 sps:$4 sm:$0xff]  }
 0x85b   :  { %8297 = vmatpush2.bf16.msra.mxu1 %v19788_v8  ;;  %v19841_v8 = vld [vmem:[%s28270_s16 + $0xc] ss:$16 sps:$4 sm:$0xff]  }
 0x85c   :  { %8298 = vmatprep.subr.bf16.mxu1 %v19793_v1  ;;  %v19839_v1 = vld [vmem:[%s28270_s16 + $0x8] ss:$16 sps:$4 sm:$0xff]  }
 0x85f   :  { %8299 = vmatpush2.bf16.msra.mxu1 %v19791_v56  ;;  %v19847_v56 = vld [vmem:[%s28270_s16 + $0x1ec] ss:$16 sps:$4 sm:$0xff]  }
 0x860   :  { %8760 = vmatprep.subr.bf16.mxu1 %v19799_v45  ;;  %v19851_v45 = vld [vmem:[%s28270_s16 + $0x1c8] ss:$16 sps:$4 sm:$0xff]  }
 0x8e2   :  { %v8053_v7 = vpop.f32.mrf.mxu1 }
 0x8e3   :  { %v8054_v17 = vadd.f32 %v8053_v7, %v7992_v28 }
 0x8e4   :  { %v8055_v37 = vpop.f32.mrf.mxu1 }
 0x8e5   :  { %v8056_v47 = vadd.f32 %v8055_v37, %v7996_v61  ;;  %v8060_v40 = vmax.f32 %v8054_v17, 0.0  ;;  %v19890_v17 = vld [vmem:[%s28272_s18 + $0x658] ss:$116 sps:$4 sm:$0xff]  }
 0x8e6   :  { %v8057_v14 = vpop.f32.mrf.mxu1  ;;  %v19893_v37 = vld [vmem:[%s28272_s18 + $0x14d8] ss:$116 sps:$4 sm:$0xff]  }
 0x8e7   :  { %v8061_v5 = vmax.f32 %v8056_v47, 0.0  ;;  %v8062_v57 = vpack.c.bf16 %v8060_v40, %v8060_v40  ;;  %v19898_v40 = vld [vmem:[%s28272_s18 + $0x574] ss:$116 sps:$4 sm:$0xff]  }
 0x8e8   :  { %v8058_v41 = vpop.f32.mrf.mxu1  ;;  %v19901_v14 = vld [vmem:[%s28272_s18 + $0x13f4] ss:$116 sps:$4 sm:$0xff]  }
 0x8e9   :  { %v8063_v33 = vpack.c.bf16 %v8061_v5, %v8061_v5  ;;  %v19896_v5 = vld [vmem:[%s28272_s18 + $0x570] ss:$116 sps:$4 sm:$0xff]  }
 0x8ea   :  { %v19899_v41 = vld [vmem:[%s28272_s18 + $0x13f0] ss:$116 sps:$4 sm:$0xff]  }
 0x8eb   :  { %8300 = vmatprep.mubr.bf16.mxu1 %v8063_v33  ;;  %v19904_v33 = vld [vmem:[%s28272_s18 + $0x48c] ss:$116 sps:$4 sm:$0xff]  }
 0x8ec   :  { %8301 = vmatmul.mubr.bf16.vlgmr.msra.gmra.mxu1 %v8062_v57  ;;  %v19902_v57 = vld [vmem:[%s28272_s18 + $0x488] ss:$116 sps:$4 sm:$0xff]  }
 0x8ed   :  { %8761 = vmatpush1.bf16.msra.mxu1 %v19797_v46  ;;  %v19907_v46 = vld [vmem:[%s28272_s18 + $0x130c] ss:$116 sps:$4 sm:$0xff]  }
 0x8ee   :  { %8762 = vmatprep.subr.bf16.mxu1 %v19805_v19  ;;  %v19905_v19 = vld [vmem:[%s28272_s18 + $0x1308] ss:$116 sps:$4 sm:$0xff]  }
 0x8f1   :  { %8763 = vmatpush1.bf16.msra.mxu1 %v19803_v10  ;;  %v19910_v10 = vld [vmem:[%s28272_s18 + $0x3a4] ss:$116 sps:$4 sm:$0xff]  }
 0x8f2   :  { %8764 = vmatprep.subr.bf16.mxu1 %v19811_v32  ;;  %v19913_v32 = vld [vmem:[%s28272_s18 + $0x1224] ss:$116 sps:$4 sm:$0xff]  }
 0x8f5   :  { %8765 = vmatpush1.bf16.msra.mxu1 %v19809_v9  ;;  %v19908_v9 = vld [vmem:[%s28272_s18 + $0x3a0] ss:$116 sps:$4 sm:$0xff]  }
 0x8f6   :  { %8766 = vmatprep.subr.bf16.mxu1 %v19817_v4  ;;  %v19911_v4 = vld [vmem:[%s28272_s18 + $0x1220] ss:$116 sps:$4 sm:$0xff]  }
 0x8f9   :  { %8767 = vmatpush1.bf16.msra.mxu1 %v19815_v24  ;;  %v19916_v24 = vld [vmem:[%s28272_s18 + $0x2bc] ss:$116 sps:$4 sm:$0xff]  }
 0x8fa   :  { %8768 = vmatprep.subr.bf16.mxu1 %v19823_v52  ;;  %v19919_v52 = vld [vmem:[%s28272_s18 + $0x113c] ss:$116 sps:$4 sm:$0xff]  }
 0x8fd   :  { %8769 = vmatpush1.bf16.msra.mxu1 %v19821_v30  ;;  %v19914_v30 = vld [vmem:[%s28272_s18 + $0x2b8] ss:$116 sps:$4 sm:$0xff]  }
 0x8fe   :  { %8770 = vmatprep.subr.bf16.mxu1 %v19829_v18  ;;  %v19917_v18 = vld [vmem:[%s28272_s18 + $0x1138] ss:$116 sps:$4 sm:$0xff]  }
 0x901   :  { %8771 = vmatpush1.bf16.msra.mxu1 %v19827_v25  ;;  %v19922_v25 = vld [vmem:[%s28272_s18 + $0x1d4] ss:$116 sps:$4 sm:$0xff]  }
 0x902   :  { %8772 = vmatprep.subr.bf16.mxu1 %v19835_v12  ;;  %v19925_v12 = vld [vmem:[%s28272_s18 + $0x1054] ss:$116 sps:$4 sm:$0xff]  }
 0x905   :  { %8773 = vmatpush1.bf16.msra.mxu1 %v19833_v53  ;;  %v19920_v53 = vld [vmem:[%s28272_s18 + $0x1d0] ss:$116 sps:$4 sm:$0xff]  }
 0x906   :  { %8774 = vmatprep.subr.bf16.mxu1 %v19841_v8  ;;  %v19923_v8 = vld [vmem:[%s28272_s18 + $0x1050] ss:$116 sps:$4 sm:$0xff]  }
 0x909   :  { %8775 = vmatpush1.bf16.msra.mxu1 %v19839_v1  ;;  %v19928_v1 = vld [vmem:[%s28272_s18 + $0xec] ss:$116 sps:$4 sm:$0xff]  }
 0x90a   :  { %8776 = vmatprep.subr.bf16.mxu1 %v19847_v56  ;;  %v19931_v56 = vld [vmem:[%s28272_s18 + $0xf6c] ss:$116 sps:$4 sm:$0xff]  }
 0x90d   :  { %8777 = vmatpush2.bf16.msra.mxu1 %v19845_v11  ;;  %v19926_v11 = vld [vmem:[%s28272_s18 + $0xe8] ss:$116 sps:$4 sm:$0xff]  }
 0x90e   :  { %8778 = vmatprep.subr.bf16.mxu1 %v19853_v58  ;;  %v19929_v58 = vld [vmem:[%s28272_s18 + $0xf68] ss:$116 sps:$4 sm:$0xff]  }
 0x911   :  { %8779 = vmatpush2.bf16.msra.mxu1 %v19851_v45  ;;  %v19934_v45 = vld [vmem:[%s28272_s18 + $0x4] ss:$116 sps:$4 sm:$0xff]  }
 0x912   :  { %8780 = vmatprep.subr.bf16.mxu1 %v19859_v2  ;;  %v19937_v2 = vld [vmem:[%s28272_s18 + $0xe84] ss:$116 sps:$4 sm:$0xff]  }
 0x915   :  { %8781 = vmatpush2.bf16.msra.mxu1 %v19857_v60  ;;  %v19932_v60 = vld [vmem:[%s28272_s18] ss:$116 sps:$4 sm:$0xff]  }
 0x916   :  { %8782 = vmatprep.subr.bf16.mxu1 %v19865_v48  ;;  %v19935_v48 = vld [vmem:[%s28272_s18 + $0xe80] ss:$116 sps:$4 sm:$0xff]  }
 0x919   :  { %8783 = vmatpush2.bf16.msra.mxu1 %v19863_v0  ;;  %v19940_v0 = vld [vmem:[%s28272_s18 + $0xd9c] ss:$116 sps:$4 sm:$0xff]  }
 0x91a   :  { %8784 = vmatprep.subr.bf16.mxu1 %v19871_v6  ;;  %v19943_v6 = vld [vmem:[%s28272_s18 + $0x1c1c] ss:$116 sps:$4 sm:$0xff]  }
 0x91d   :  { %8785 = vmatpush2.bf16.msra.mxu1 %v19869_v20  ;;  %v19938_v20 = vld [vmem:[%s28272_s18 + $0xd98] ss:$116 sps:$4 sm:$0xff]  }
 0x91e   :  { %8786 = vmatprep.subr.bf16.mxu1 %v19877_v55  ;;  %v19941_v55 = vld [vmem:[%s28272_s18 + $0x1c18] ss:$116 sps:$4 sm:$0xff]  }
 0x921   :  { %8787 = vmatpush2.bf16.msra.mxu1 %v19875_v39  ;;  %v19946_v39 = vld [vmem:[%s28272_s18 + $0xcb4] ss:$116 sps:$4 sm:$0xff]  }
 0x922   :  { %8788 = vmatprep.subr.bf16.mxu1 %v19883_v16  ;;  %v19944_v16 = vld [vmem:[%s28272_s18 + $0xcb0] ss:$116 sps:$4 sm:$0xff]  }
 0x925   :  { %8789 = vmatpush2.bf16.msra.mxu1 %v19881_v13  ;;  %v19952_v13 = vld [vmem:[%s28272_s18 + $0xbcc] ss:$116 sps:$4 sm:$0xff]  }
 0x926   :  { %8790 = vmatprep.subr.bf16.mxu1 %v19889_v59  ;;  %v19950_v59 = vld [vmem:[%s28272_s18 + $0xbc8] ss:$116 sps:$4 sm:$0xff]  }
 0x929   :  { %8791 = vmatpush2.bf16.msra.mxu1 %v19887_v35  ;;  %v19958_v35 = vld [vmem:[%s28272_s18 + $0xae4] ss:$116 sps:$4 sm:$0xff]  }
 0x92a   :  { %14635 = vmatprep.subr.bf16.mxu1 %v19895_v3  ;;  %v19956_v3 = vld [vmem:[%s28272_s18 + $0xae0] ss:$116 sps:$4 sm:$0xff]  }
 0x9ac   :  { %v8302_v54 = vpop.f32.mrf.mxu1 }
 0x9ad   :  { %v8303_v21 = vadd.f32 %v8302_v54, %v8101_v22  ;;  %v19964_v22 = vld [vmem:[%s28272_s18 + $0x9fc] ss:$116 sps:$4 sm:$0xff]   ;;  %v19962_v54 = vld [vmem:[%s28272_s18 + $0x9f8] ss:$116 sps:$4 sm:$0xff]  }
 0x9ae   :  { %v8304_v42 = vpop.f32.mrf.mxu1 }
 0x9af   :  { %v8305_v38 = vadd.f32 %v8304_v42, %v8105_v23  ;;  %v8309_v27 = vmax.f32 %v8303_v21, 0.0  ;;  %v19967_v23 = vld [vmem:[%s28272_s18 + $0x187c] ss:$116 sps:$4 sm:$0xff]   ;;  %v19965_v21 = vld [vmem:[%s28272_s18 + $0x1878] ss:$116 sps:$4 sm:$0xff]  }
 0x9b0   :  { %v8306_v26 = vpop.f32.mrf.mxu1  ;;  %v19970_v42 = vld [vmem:[%s28272_s18 + $0x914] ss:$116 sps:$4 sm:$0xff]  }
 0x9b1   :  { %v8310_v28 = vmax.f32 %v8305_v38, 0.0  ;;  %v8311_v47 = vpack.c.bf16 %v8309_v27, %v8309_v27  ;;  %v19973_v38 = vld [vmem:[%s28272_s18 + $0x1794] ss:$116 sps:$4 sm:$0xff]   ;;  %v19968_v27 = vld [vmem:[%s28272_s18 + $0x910] ss:$116 sps:$4 sm:$0xff]  }
 0x9b2   :  { %v8307_v61 = vpop.f32.mrf.mxu1  ;;  %v19971_v26 = vld [vmem:[%s28272_s18 + $0x1790] ss:$116 sps:$4 sm:$0xff]  }
 0x9b3   :  { %v8312_v7 = vpack.c.bf16 %v8310_v28, %v8310_v28  ;;  %v19976_v28 = vld [vmem:[%s28272_s18 + $0x82c] ss:$116 sps:$4 sm:$0xff]  }
 0x9b4   :  { %v19979_v61 = vld [vmem:[%s28272_s18 + $0x16ac] ss:$116 sps:$4 sm:$0xff]  }
 0x9b5   :  { %8751 = vmatprep.mubr.bf16.mxu0 %v8312_v7  ;;  %8792 = vmatprep.mubr.bf16.mxu1 %v8312_v7  ;;  %v19974_v7 = vld [vmem:[%s28272_s18 + $0x828] ss:$116 sps:$4 sm:$0xff]  }
 0x9b6   :  { %8752 = vmatmul.mubr.bf16.vlgmr.msra.gmra.mxu0 %v8311_v47  ;;  %8793 = vmatmul.mubr.bf16.vlgmr.msra.gmra.mxu1 %v8311_v47  ;;  %v19985_v47 = vld [vmem:[%s28272_s18 + $0x15c4] ss:$116 sps:$4 sm:$0xff]  }
 0x9b7   :  { %14595 = vmatpush1.bf16.msra.mxu0 %v19890_v17  ;;  %14636 = vmatpush1.bf16.msra.mxu1 %v19893_v37  ;;  %v19977_v17 = vld [vmem:[%s28272_s18 + $0x16a8] ss:$116 sps:$4 sm:$0xff]   ;;  %v19982_v37 = vld [vmem:[%s28272_s18 + $0x744] ss:$116 sps:$4 sm:$0xff]  }
 0x9b8   :  { %14596 = vmatprep.subr.bf16.mxu0 %v19898_v40  ;;  %14637 = vmatprep.subr.bf16.mxu1 %v19901_v14  ;;  %v19980_v40 = vld [vmem:[%s28272_s18 + $0x740] ss:$116 sps:$4 sm:$0xff]  }
 0x9b9   :  { %v19983_v14 = vld [vmem:[%s28272_s18 + $0x15c0] ss:$116 sps:$4 sm:$0xff]  }
 0x9bb   :  { %14597 = vmatpush1.bf16.msra.mxu0 %v19896_v5  ;;  %14638 = vmatpush1.bf16.msra.mxu1 %v19899_v41  ;;  %v19988_v5 = vld [vmem:[%s28272_s18 + $0x664] ss:$116 sps:$4 sm:$0xff]  }
 0x9bc   :  { %14598 = vmatprep.subr.bf16.mxu0 %v19904_v33  ;;  %14639 = vmatprep.subr.bf16.mxu1 %v19907_v46  ;;  %v19991_v41 = vld [vmem:[%s28272_s18 + $0x14e4] ss:$116 sps:$4 sm:$0xff]   ;;  %v8377_v33 = vld [vmem:[%s28271_s17] sm:$0xf] }
 0x9bd   :  { %v8382_v46 = vrot.slane %v8377_v33, %v22342_v29 }
 0x9bf   :  { %14599 = vmatpush1.bf16.msra.mxu0 %v19902_v57  ;;  %14640 = vmatpush1.bf16.msra.mxu1 %v19905_v19  ;;  %v8390_v57 = vrot.slane %v8377_v33, %v23928_v50  ;;  %v8386_v19 = vrot.slane %v8377_v33, %v22351_v34 }
 0x9c0   :  { %14600 = vmatprep.subr.bf16.mxu0 %v19910_v10  ;;  %14641 = vmatprep.subr.bf16.mxu1 %v19913_v32  ;;  %v8394_v10 = vrot.slane %v8377_v33, %v23931_v51  ;;  %v20037_v33 = vld [vmem:[%s28272_s18 + $0x1c20] ss:$116 sps:$4 sm:$0xff]  }
 0x9c3   :  { %14601 = vmatpush1.bf16.msra.mxu0 %v19908_v9  ;;  %14642 = vmatpush1.bf16.msra.mxu1 %v19911_v4 }
 0x9c4   :  { %14602 = vmatprep.subr.bf16.mxu0 %v19916_v24  ;;  %14643 = vmatprep.subr.bf16.mxu1 %v19919_v52 }
 0x9c7   :  { %14603 = vmatpush1.bf16.msra.mxu0 %v19914_v30  ;;  %14644 = vmatpush1.bf16.msra.mxu1 %v19917_v18 }
 0x9c8   :  { %14604 = vmatprep.subr.bf16.mxu0 %v19922_v25  ;;  %14645 = vmatprep.subr.bf16.mxu1 %v19925_v12 }
 0x9cb   :  { %14605 = vmatpush1.bf16.msra.mxu0 %v19920_v53  ;;  %14646 = vmatpush1.bf16.msra.mxu1 %v19923_v8 }
 0x9cc   :  { %14606 = vmatprep.subr.bf16.mxu0 %v19928_v1  ;;  %14647 = vmatprep.subr.bf16.mxu1 %v19931_v56 }
 0x9cf   :  { %14607 = vmatpush1.bf16.msra.mxu0 %v19926_v11  ;;  %14648 = vmatpush1.bf16.msra.mxu1 %v19929_v58 }
 0x9d0   :  { %14608 = vmatprep.subr.bf16.mxu0 %v19934_v45  ;;  %14649 = vmatprep.subr.bf16.mxu1 %v19937_v2 }
 0x9d3   :  { %14609 = vmatpush1.bf16.msra.mxu0 %v19932_v60  ;;  %14650 = vmatpush1.bf16.msra.mxu1 %v19935_v48  ;;  %v19986_v48 = vld [vmem:[%s28272_s18 + $0x660] ss:$116 sps:$4 sm:$0xff]  }
 0x9d4   :  { %14610 = vmatprep.subr.bf16.mxu0 %v19940_v0  ;;  %14651 = vmatprep.subr.bf16.mxu1 %v19943_v6  ;;  %v19989_v0 = vld [vmem:[%s28272_s18 + $0x14e0] ss:$116 sps:$4 sm:$0xff]  }
 0x9d7   :  { %14611 = vmatpush2.bf16.msra.mxu0 %v19938_v20  ;;  %14652 = vmatpush2.bf16.msra.mxu1 %v19941_v55  ;;  %v19994_v55 = vld [vmem:[%s28272_s18 + $0x57c] ss:$116 sps:$4 sm:$0xff]  }
 0x9d8   :  { %14612 = vmatprep.subr.bf16.mxu0 %v19946_v39  ;;  %14653 = vmatprep.subr.bf16.mxu1 %v19949_v31  ;;  %v19997_v39 = vld [vmem:[%s28272_s18 + $0x13fc] ss:$116 sps:$4 sm:$0xff]   ;;  %v19992_v31 = vld [vmem:[%s28272_s18 + $0x578] ss:$116 sps:$4 sm:$0xff]  }
 0x9db   :  { %14613 = vmatpush2.bf16.msra.mxu0 %v19944_v16  ;;  %14654 = vmatpush2.bf16.msra.mxu1 %v19947_v44  ;;  %v19995_v16 = vld [vmem:[%s28272_s18 + $0x13f8] ss:$116 sps:$4 sm:$0xff]   ;;  %v20000_v44 = vld [vmem:[%s28272_s18 + $0x494] ss:$116 sps:$4 sm:$0xff]  }
 0x9dc   :  { %14614 = vmatprep.subr.bf16.mxu0 %v19952_v13  ;;  %14655 = vmatprep.subr.bf16.mxu1 %v19955_v15  ;;  %v20003_v13 = vld [vmem:[%s28272_s18 + $0x1314] ss:$116 sps:$4 sm:$0xff]   ;;  %v19998_v15 = vld [vmem:[%s28272_s18 + $0x490] ss:$116 sps:$4 sm:$0xff]  }
 0x9df   :  { %14615 = vmatpush2.bf16.msra.mxu0 %v19950_v59  ;;  %14656 = vmatpush2.bf16.msra.mxu1 %v19953_v63  ;;  %v20001_v59 = vld [vmem:[%s28272_s18 + $0x1310] ss:$116 sps:$4 sm:$0xff]   ;;  %v20006_v63 = vld [vmem:[%s28272_s18 + $0x3ac] ss:$116 sps:$4 sm:$0xff]  }
 0x9e0   :  { %14616 = vmatprep.subr.bf16.mxu0 %v19958_v35  ;;  %14657 = vmatprep.subr.bf16.mxu1 %v19961_v36  ;;  %v20009_v35 = vld [vmem:[%s28272_s18 + $0x122c] ss:$116 sps:$4 sm:$0xff]   ;;  %v20004_v36 = vld [vmem:[%s28272_s18 + $0x3a8] ss:$116 sps:$4 sm:$0xff]  }
 0x9e3   :  { %14617 = vmatpush2.bf16.msra.mxu0 %v19956_v3  ;;  %14658 = vmatpush2.bf16.msra.mxu1 %v19959_v62  ;;  %v20007_v3 = vld [vmem:[%s28272_s18 + $0x1228] ss:$116 sps:$4 sm:$0xff]   ;;  %v20012_v62 = vld [vmem:[%s28272_s18 + $0x2c4] ss:$116 sps:$4 sm:$0xff]  }
 0x9e4   :  { %14618 = vmatprep.subr.bf16.mxu0 %v19964_v22  ;;  %14659 = vmatprep.subr.bf16.mxu1 %v19967_v23  ;;  %v20015_v22 = vld [vmem:[%s28272_s18 + $0x1144] ss:$116 sps:$4 sm:$0xff]   ;;  %v20010_v23 = vld [vmem:[%s28272_s18 + $0x2c0] ss:$116 sps:$4 sm:$0xff]  }
 0x9e7   :  { %14619 = vmatpush2.bf16.msra.mxu0 %v19962_v54  ;;  %14660 = vmatpush2.bf16.msra.mxu1 %v19965_v21  ;;  %v20013_v54 = vld [vmem:[%s28272_s18 + $0x1140] ss:$116 sps:$4 sm:$0xff]   ;;  %v20018_v21 = vld [vmem:[%s28272_s18 + $0x1dc] ss:$116 sps:$4 sm:$0xff]  }
 0x9e8   :  { %14620 = vmatprep.subr.bf16.mxu0 %v19970_v42  ;;  %14661 = vmatprep.subr.bf16.mxu1 %v19973_v38  ;;  %v20021_v42 = vld [vmem:[%s28272_s18 + $0x105c] ss:$116 sps:$4 sm:$0xff]   ;;  %v20016_v38 = vld [vmem:[%s28272_s18 + $0x1d8] ss:$116 sps:$4 sm:$0xff]  }
 0x9eb   :  { %14621 = vmatpush2.bf16.msra.mxu0 %v19968_v27  ;;  %14662 = vmatpush2.bf16.msra.mxu1 %v19971_v26  ;;  %v20019_v27 = vld [vmem:[%s28272_s18 + $0x1058] ss:$116 sps:$4 sm:$0xff]   ;;  %v20024_v26 = vld [vmem:[%s28272_s18 + $0xf4] ss:$116 sps:$4 sm:$0xff]  }
 0x9ec   :  { %14622 = vmatprep.subr.bf16.mxu0 %v19976_v28  ;;  %14663 = vmatprep.subr.bf16.mxu1 %v19979_v61  ;;  %v20027_v28 = vld [vmem:[%s28272_s18 + $0xf74] ss:$116 sps:$4 sm:$0xff]   ;;  %v20022_v61 = vld [vmem:[%s28272_s18 + $0xf0] ss:$116 sps:$4 sm:$0xff]  }
 0x9ef   :  { %14623 = vmatpush2.bf16.msra.mxu0 %v19974_v7  ;;  %14664 = vmatpush2.bf16.msra.mxu1 %v19977_v17  ;;  %v20025_v7 = vld [vmem:[%s28272_s18 + $0xf70] ss:$116 sps:$4 sm:$0xff]   ;;  %v20030_v17 = vld [vmem:[%s28272_s18 + $0xc] ss:$116 sps:$4 sm:$0xff]  }
 0x9f0   :  { %14624 = vmatprep.subr.bf16.mxu0 %v19982_v37  ;;  %14665 = vmatprep.subr.bf16.mxu1 %v19985_v47  ;;  %v20033_v37 = vld [vmem:[%s28272_s18 + $0xe8c] ss:$116 sps:$4 sm:$0xff]   ;;  %v20028_v47 = vld [vmem:[%s28272_s18 + $0x8] ss:$116 sps:$4 sm:$0xff]  }
 0x9f3   :  { %14625 = vmatpush2.bf16.msra.mxu0 %v19980_v40  ;;  %14666 = vmatpush2.bf16.msra.mxu1 %v19983_v14  ;;  %v20031_v40 = vld [vmem:[%s28272_s18 + $0xe88] ss:$116 sps:$4 sm:$0xff]   ;;  %v20036_v14 = vld [vmem:[%s28272_s18 + $0xda4] ss:$116 sps:$4 sm:$0xff]  }
 0x9f4   :  { %14676 = vmatprep.subr.bf16.mxu0 %v19988_v5  ;;  %14717 = vmatprep.subr.bf16.mxu1 %v19991_v41  ;;  %v20039_v5 = vld [vmem:[%s28272_s18 + $0x1c24] ss:$116 sps:$4 sm:$0xff]   ;;  %v20034_v41 = vld [vmem:[%s28272_s18 + $0xda0] ss:$116 sps:$4 sm:$0xff]  }
 0xa76   :  { %v8753_v32 = vpop.f32.mrf.mxu0  ;;  %v8794_v9 = vpop.f32.mrf.mxu1 }
 0xa77   :  { %v8754_v4 = vadd.f32 %v8753_v32, %v8382_v46  ;;  %v8795_v24 = vadd.f32 %v8794_v9, %v8390_v57  ;;  %v20042_v46 = vld [vmem:[%s28272_s18 + $0xcbc] ss:$116 sps:$4 sm:$0xff]   ;;  %v20048_v32 = vld [vmem:[%s28272_s18 + $0xbd4] ss:$116 sps:$4 sm:$0xff]  }
 0xa78   :  { %v8755_v52 = vpop.f32.mrf.mxu0  ;;  %v8796_v30 = vpop.f32.mrf.mxu1  ;;  %v20045_v57 = vld [vmem:[%s28272_s18 + $0x1b3c] ss:$116 sps:$4 sm:$0xff]   ;;  %v20051_v9 = vld [vmem:[%s28272_s18 + $0x1a54] ss:$116 sps:$4 sm:$0xff]  }
 0xa79   :  { %v8756_v18 = vadd.f32 %v8755_v52, %v8386_v19  ;;  %v8797_v25 = vadd.f32 %v8796_v30, %v8394_v10  ;;  %v8801_v12 = vmax.f32 %v8754_v4, 0.0  ;;  %v8803_v53 = vmax.f32 %v8795_v24, 0.0  ;;  %v20040_v19 = vld [vmem:[%s28272_s18 + $0xcb8] ss:$116 sps:$4 sm:$0xff]   ;;  %v20046_v4 = vld [vmem:[%s28272_s18 + $0xbd0] ss:$116 sps:$4 sm:$0xff]  }
 0xa7a   :  { %v8757_v8 = vpop.f32.mrf.mxu0  ;;  %v8798_v1 = vpop.f32.mrf.mxu1  ;;  %v20043_v10 = vld [vmem:[%s28272_s18 + $0x1b38] ss:$116 sps:$4 sm:$0xff]   ;;  %v20049_v24 = vld [vmem:[%s28272_s18 + $0x1a50] ss:$116 sps:$4 sm:$0xff]  }
 0xa7b   :  { %v8802_v56 = vmax.f32 %v8756_v18, 0.0  ;;  %v8804_v11 = vmax.f32 %v8797_v25, 0.0  ;;  %v25418_v6 = vpack.c.bf16 %v8801_v12, %v8801_v12  ;;  %v25420_v20 = vpack.c.bf16 %v8803_v53, %v8803_v53  ;;  %v20054_v52 = vld [vmem:[%s28272_s18 + $0xaec] ss:$116 sps:$4 sm:$0xff]   ;;  %v20052_v18 = vld [vmem:[%s28272_s18 + $0xae8] ss:$116 sps:$4 sm:$0xff]  }
 0xa7c   :  { %v8758_v58 = vpop.f32.mrf.mxu0  ;;  %v8799_v45 = vpop.f32.mrf.mxu1  ;;  %v20057_v30 = vld [vmem:[%s28272_s18 + $0x196c] ss:$116 sps:$4 sm:$0xff]   ;;  %v20055_v25 = vld [vmem:[%s28272_s18 + $0x1968] ss:$116 sps:$4 sm:$0xff]   ;;  %v20060_v12 = vld [vmem:[%s28272_s18 + $0xa04] ss:$116 sps:$4 sm:$0xff]  }
 0xa7d   :  { %v25408_v2 = vpack.c.bf16 %v8802_v56, %v8802_v56  ;;  %v25410_v60 = vpack.c.bf16 %v8804_v11, %v8804_v11  ;;  %v20063_v53 = vld [vmem:[%s28272_s18 + $0x1884] ss:$116 sps:$4 sm:$0xff]   ;;  %v20058_v8 = vld [vmem:[%s28272_s18 + $0xa00] ss:$116 sps:$4 sm:$0xff]   ;;  %v20066_v56 = vld [vmem:[%s28272_s18 + $0x91c] ss:$116 sps:$4 sm:$0xff]  }
 0xa7e   :  { %v20061_v1 = vld [vmem:[%s28272_s18 + $0x1880] ss:$116 sps:$4 sm:$0xff]   ;;  %v20069_v11 = vld [vmem:[%s28272_s18 + $0x179c] ss:$116 sps:$4 sm:$0xff]   ;;  %v20064_v58 = vld [vmem:[%s28272_s18 + $0x918] ss:$116 sps:$4 sm:$0xff]  }
 0xa7f   :  { %14626 = vmatprep.mubr.bf16.mxu0 %v25408_v2  ;;  %14667 = vmatprep.mubr.bf16.mxu1 %v25410_v60  ;;  %v20067_v45 = vld [vmem:[%s28272_s18 + $0x1798] ss:$116 sps:$4 sm:$0xff]  }
 0xa80   :  { %14627 = vmatmul.mubr.bf16.vlgmr.msra.gmra.mxu0 %v25418_v6  ;;  %14668 = vmatmul.mubr.bf16.vlgmr.msra.gmra.mxu1 %v25420_v20 }
 0xa81   :  { %14677 = vmatpush1.bf16.msra.mxu0 %v19986_v48  ;;  %14718 = vmatpush1.bf16.msra.mxu1 %v19989_v0  ;;  %v20072_v48 = vld [vmem:[%s28272_s18 + $0x834] ss:$116 sps:$4 sm:$0xff]  }
 0xa82   :  { %14708 = vmatprep.mubr.bf16.mxu0 %v25408_v2  ;;  %14749 = vmatprep.mubr.bf16.mxu1 %v25410_v60  ;;  %v20075_v0 = vld [vmem:[%s28272_s18 + $0x16b4] ss:$116 sps:$4 sm:$0xff]  }
 0xa83   :  { %14678 = vmatprep.subr.bf16.mxu0 %v19994_v55  ;;  %14719 = vmatprep.subr.bf16.mxu1 %v19997_v39  ;;  %v20070_v55 = vld [vmem:[%s28272_s18 + $0x830] ss:$116 sps:$4 sm:$0xff]  }
 0xa84   :  { %v20073_v39 = vld [vmem:[%s28272_s18 + $0x16b0] ss:$116 sps:$4 sm:$0xff]  }
 0xa85   :  { %14679 = vmatpush1.bf16.msra.mxu0 %v19992_v31  ;;  %14720 = vmatpush1.bf16.msra.mxu1 %v19995_v16  ;;  %v20078_v31 = vld [vmem:[%s28272_s18 + $0x74c] ss:$116 sps:$4 sm:$0xff]  }
 0xa86   :  { %14680 = vmatprep.subr.bf16.mxu0 %v20000_v44  ;;  %14721 = vmatprep.subr.bf16.mxu1 %v20003_v13  ;;  %v20081_v16 = vld [vmem:[%s28272_s18 + $0x15cc] ss:$116 sps:$4 sm:$0xff]   ;;  %v20076_v44 = vld [vmem:[%s28272_s18 + $0x748] ss:$116 sps:$4 sm:$0xff]  }
 0xa87   :  { %v20079_v13 = vld [vmem:[%s28272_s18 + $0x15c8] ss:$116 sps:$4 sm:$0xff]  }
 0xa89   :  { %14681 = vmatpush1.bf16.msra.mxu0 %v19998_v15  ;;  %14722 = vmatpush1.bf16.msra.mxu1 %v20001_v59  ;;  %v20084_v15 = vld [vmem:[%s28272_s18 + $0x66c] ss:$116 sps:$4 sm:$0xff]  }
 0xa8a   :  { %14682 = vmatprep.subr.bf16.mxu0 %v20006_v63  ;;  %14723 = vmatprep.subr.bf16.mxu1 %v20009_v35  ;;  %v20087_v59 = vld [vmem:[%s28272_s18 + $0x14ec] ss:$116 sps:$4 sm:$0xff]   ;;  %v20082_v63 = vld [vmem:[%s28272_s18 + $0x668] ss:$116 sps:$4 sm:$0xff]  }
 0xa8b   :  { %v20085_v35 = vld [vmem:[%s28272_s18 + $0x14e8] ss:$116 sps:$4 sm:$0xff]  }
 0xa8d   :  { %14683 = vmatpush1.bf16.msra.mxu0 %v20004_v36  ;;  %14724 = vmatpush1.bf16.msra.mxu1 %v20007_v3  ;;  %v20090_v36 = vld [vmem:[%s28272_s18 + $0x584] ss:$116 sps:$4 sm:$0xff]  }
 0xa8e   :  { %14684 = vmatprep.subr.bf16.mxu0 %v20012_v62  ;;  %14725 = vmatprep.subr.bf16.mxu1 %v20015_v22  ;;  %v20093_v3 = vld [vmem:[%s28272_s18 + $0x1404] ss:$116 sps:$4 sm:$0xff]   ;;  %v20088_v62 = vld [vmem:[%s28272_s18 + $0x580] ss:$116 sps:$4 sm:$0xff]  }
 0xa8f   :  { %v20091_v22 = vld [vmem:[%s28272_s18 + $0x1400] ss:$116 sps:$4 sm:$0xff]  }
 0xa91   :  { %14685 = vmatpush1.bf16.msra.mxu0 %v20010_v23  ;;  %14726 = vmatpush1.bf16.msra.mxu1 %v20013_v54  ;;  %v20096_v23 = vld [vmem:[%s28272_s18 + $0x49c] ss:$116 sps:$4 sm:$0xff]  }
 0xa92   :  { %14686 = vmatprep.subr.bf16.mxu0 %v20018_v21  ;;  %14727 = vmatprep.subr.bf16.mxu1 %v20021_v42  ;;  %v20099_v54 = vld [vmem:[%s28272_s18 + $0x131c] ss:$116 sps:$4 sm:$0xff]   ;;  %v20094_v21 = vld [vmem:[%s28272_s18 + $0x498] ss:$116 sps:$4 sm:$0xff]  }
 0xa93   :  { %v20097_v42 = vld [vmem:[%s28272_s18 + $0x1318] ss:$116 sps:$4 sm:$0xff]  }
 0xa95   :  { %14687 = vmatpush1.bf16.msra.mxu0 %v20016_v38  ;;  %14728 = vmatpush1.bf16.msra.mxu1 %v20019_v27  ;;  %v20102_v38 = vld [vmem:[%s28272_s18 + $0x3b4] ss:$116 sps:$4 sm:$0xff]  }
 0xa96   :  { %14688 = vmatprep.subr.bf16.mxu0 %v20024_v26  ;;  %14729 = vmatprep.subr.bf16.mxu1 %v20027_v28  ;;  %v20105_v27 = vld [vmem:[%s28272_s18 + $0x1234] ss:$116 sps:$4 sm:$0xff]   ;;  %v20100_v26 = vld [vmem:[%s28272_s18 + $0x3b0] ss:$116 sps:$4 sm:$0xff]  }
 0xa97   :  { %v20103_v28 = vld [vmem:[%s28272_s18 + $0x1230] ss:$116 sps:$4 sm:$0xff]  }
 0xa99   :  { %14689 = vmatpush1.bf16.msra.mxu0 %v20022_v61  ;;  %14730 = vmatpush1.bf16.msra.mxu1 %v20025_v7  ;;  %v20108_v61 = vld [vmem:[%s28272_s18 + $0x2cc] ss:$116 sps:$4 sm:$0xff]  }
 0xa9a   :  { %14690 = vmatprep.subr.bf16.mxu0 %v20030_v17  ;;  %14731 = vmatprep.subr.bf16.mxu1 %v20033_v37  ;;  %v20111_v7 = vld [vmem:[%s28272_s18 + $0x114c] ss:$116 sps:$4 sm:$0xff]   ;;  %v20106_v17 = vld [vmem:[%s28272_s18 + $0x2c8] ss:$116 sps:$4 sm:$0xff]  }
 0xa9b   :  { %v20109_v37 = vld [vmem:[%s28272_s18 + $0x1148] ss:$116 sps:$4 sm:$0xff]  }
 0xa9d   :  { %14691 = vmatpush1.bf16.msra.mxu0 %v20028_v47  ;;  %14732 = vmatpush1.bf16.msra.mxu1 %v20031_v40  ;;  %v20114_v47 = vld [vmem:[%s28272_s18 + $0x1e4] ss:$116 sps:$4 sm:$0xff]  }
 0xa9e   :  { %14692 = vmatprep.subr.bf16.mxu0 %v20036_v14  ;;  %14733 = vmatprep.subr.bf16.mxu1 %v20039_v5  ;;  %v20117_v40 = vld [vmem:[%s28272_s18 + $0x1064] ss:$116 sps:$4 sm:$0xff]   ;;  %v20112_v14 = vld [vmem:[%s28272_s18 + $0x1e0] ss:$116 sps:$4 sm:$0xff]  }
 0xa9f   :  { %v20115_v5 = vld [vmem:[%s28272_s18 + $0x1060] ss:$116 sps:$4 sm:$0xff]  }
 0xaa1   :  { %14693 = vmatpush2.bf16.msra.mxu0 %v20034_v41  ;;  %14734 = vmatpush2.bf16.msra.mxu1 %v20037_v33  ;;  %v20120_v41 = vld [vmem:[%s28272_s18 + $0xfc] ss:$116 sps:$4 sm:$0xff]  }
 0xaa2   :  { %14694 = vmatprep.subr.bf16.mxu0 %v20042_v46  ;;  %14735 = vmatprep.subr.bf16.mxu1 %v20045_v57  ;;  %v20123_v33 = vld [vmem:[%s28272_s18 + $0xf7c] ss:$116 sps:$4 sm:$0xff]   ;;  %v20118_v46 = vld [vmem:[%s28272_s18 + $0xf8] ss:$116 sps:$4 sm:$0xff]  }
 0xaa3   :  { %v20121_v57 = vld [vmem:[%s28272_s18 + $0xf78] ss:$116 sps:$4 sm:$0xff]  }
 0xaa5   :  { %14695 = vmatpush2.bf16.msra.mxu0 %v20040_v19  ;;  %14736 = vmatpush2.bf16.msra.mxu1 %v20043_v10  ;;  %v20126_v19 = vld [vmem:[%s28272_s18 + $0x14] ss:$116 sps:$4 sm:$0xff]  }
 0xaa6   :  { %14696 = vmatprep.subr.bf16.mxu0 %v20048_v32  ;;  %14737 = vmatprep.subr.bf16.mxu1 %v20051_v9  ;;  %v20129_v10 = vld [vmem:[%s28272_s18 + $0xe94] ss:$116 sps:$4 sm:$0xff]   ;;  %v20124_v32 = vld [vmem:[%s28272_s18 + $0x10] ss:$116 sps:$4 sm:$0xff]  }
 0xaa7   :  { %v20127_v9 = vld [vmem:[%s28272_s18 + $0xe90] ss:$116 sps:$4 sm:$0xff]  }
 0xaa9   :  { %14697 = vmatpush2.bf16.msra.mxu0 %v20046_v4  ;;  %14738 = vmatpush2.bf16.msra.mxu1 %v20049_v24  ;;  %v20132_v4 = vld [vmem:[%s28272_s18 + $0xdac] ss:$116 sps:$4 sm:$0xff]  }
 0xaaa   :  { %14698 = vmatprep.subr.bf16.mxu0 %v20054_v52  ;;  %14739 = vmatprep.subr.bf16.mxu1 %v20057_v30  ;;  %v20135_v24 = vld [vmem:[%s28272_s18 + $0x1c2c] ss:$116 sps:$4 sm:$0xff]   ;;  %v20130_v52 = vld [vmem:[%s28272_s18 + $0xda8] ss:$116 sps:$4 sm:$0xff]  }
 0xaab   :  { %v20133_v30 = vld [vmem:[%s28272_s18 + $0x1c28] ss:$116 sps:$4 sm:$0xff]  }
 0xaad   :  { %14699 = vmatpush2.bf16.msra.mxu0 %v20052_v18  ;;  %14740 = vmatpush2.bf16.msra.mxu1 %v20055_v25  ;;  %v20138_v18 = vld [vmem:[%s28272_s18 + $0xcc4] ss:$116 sps:$4 sm:$0xff]  }
 0xaae   :  { %14700 = vmatprep.subr.bf16.mxu0 %v20060_v12  ;;  %14741 = vmatprep.subr.bf16.mxu1 %v20063_v53  ;;  %v20141_v25 = vld [vmem:[%s28272_s18 + $0x1b44] ss:$116 sps:$4 sm:$0xff]   ;;  %v20136_v12 = vld [vmem:[%s28272_s18 + $0xcc0] ss:$116 sps:$4 sm:$0xff]  }
 0xaaf   :  { %v20139_v53 = vld [vmem:[%s28272_s18 + $0x1b40] ss:$116 sps:$4 sm:$0xff]  }
 0xab1   :  { %14701 = vmatpush2.bf16.msra.mxu0 %v20058_v8  ;;  %14742 = vmatpush2.bf16.msra.mxu1 %v20061_v1  ;;  %v20144_v8 = vld [vmem:[%s28272_s18 + $0xbdc] ss:$116 sps:$4 sm:$0xff]  }
 0xab2   :  { %14702 = vmatprep.subr.bf16.mxu0 %v20066_v56  ;;  %14743 = vmatprep.subr.bf16.mxu1 %v20069_v11  ;;  %v20147_v1 = vld [vmem:[%s28272_s18 + $0x1a5c] ss:$116 sps:$4 sm:$0xff]   ;;  %v20142_v56 = vld [vmem:[%s28272_s18 + $0xbd8] ss:$116 sps:$4 sm:$0xff]  }
 0xab3   :  { %v20145_v11 = vld [vmem:[%s28272_s18 + $0x1a58] ss:$116 sps:$4 sm:$0xff]  }
 0xab5   :  { %14703 = vmatpush2.bf16.msra.mxu0 %v20064_v58  ;;  %14744 = vmatpush2.bf16.msra.mxu1 %v20067_v45  ;;  %v20150_v58 = vld [vmem:[%s28272_s18 + $0xaf4] ss:$116 sps:$4 sm:$0xff]  }
 0xab6   :  { %14704 = vmatprep.subr.bf16.mxu0 %v20072_v48  ;;  %14745 = vmatprep.subr.bf16.mxu1 %v20075_v0  ;;  %v20153_v45 = vld [vmem:[%s28272_s18 + $0x1974] ss:$116 sps:$4 sm:$0xff]   ;;  %v20148_v48 = vld [vmem:[%s28272_s18 + $0xaf0] ss:$116 sps:$4 sm:$0xff]  }
 0xab7   :  { %v20151_v0 = vld [vmem:[%s28272_s18 + $0x1970] ss:$116 sps:$4 sm:$0xff]  }
 0xab9   :  { %14705 = vmatpush2.bf16.msra.mxu0 %v20070_v55  ;;  %14746 = vmatpush2.bf16.msra.mxu1 %v20073_v39  ;;  %v20156_v55 = vld [vmem:[%s28272_s18 + $0xa0c] ss:$116 sps:$4 sm:$0xff]  }
 0xaba   :  { %14706 = vmatprep.subr.bf16.mxu0 %v20078_v31  ;;  %14747 = vmatprep.subr.bf16.mxu1 %v20081_v16  ;;  %v20159_v39 = vld [vmem:[%s28272_s18 + $0x188c] ss:$116 sps:$4 sm:$0xff]   ;;  %v20154_v31 = vld [vmem:[%s28272_s18 + $0xa08] ss:$116 sps:$4 sm:$0xff]  }
 0xabb   :  { %v20157_v16 = vld [vmem:[%s28272_s18 + $0x1888] ss:$116 sps:$4 sm:$0xff]  }
 0xabd   :  { %14707 = vmatpush2.bf16.msra.mxu0 %v20076_v44  ;;  %14748 = vmatpush2.bf16.msra.mxu1 %v20079_v13  ;;  %v20162_v44 = vld [vmem:[%s28272_s18 + $0x924] ss:$116 sps:$4 sm:$0xff]  }
 0xabe   :  { %14758 = vmatprep.subr.bf16.mxu0 %v20084_v15  ;;  %14799 = vmatprep.subr.bf16.mxu1 %v20087_v59  ;;  %v20165_v13 = vld [vmem:[%s28272_s18 + $0x17a4] ss:$116 sps:$4 sm:$0xff]   ;;  %v20160_v15 = vld [vmem:[%s28272_s18 + $0x920] ss:$116 sps:$4 sm:$0xff]  }
 0xabf   :  { %v20163_v59 = vld [vmem:[%s28272_s18 + $0x17a0] ss:$116 sps:$4 sm:$0xff]  }
 0xac0   :  { %14709 = vmatmul.mubr.bf16.vlgmr.msra.gmra.mxu0 %v25418_v6  ;;  %14750 = vmatmul.mubr.bf16.vlgmr.msra.gmra.mxu1 %v25420_v20 }
 0xac1   :  { %14759 = vmatpush1.bf16.msra.mxu0 %v20082_v63  ;;  %14790 = vmatprep.mubr.bf16.mxu0 %v25408_v2  ;;  %v20168_v63 = vld [vmem:[%s28272_s18 + $0x83c] ss:$116 sps:$4 sm:$0xff]  }
 0xac2   :  { %14800 = vmatpush1.bf16.msra.mxu1 %v20085_v35  ;;  %14831 = vmatprep.mubr.bf16.mxu1 %v25410_v60  ;;  %v20171_v35 = vld [vmem:[%s28272_s18 + $0x16bc] ss:$116 sps:$4 sm:$0xff]  }
 0xac3   :  { %14760 = vmatprep.subr.bf16.mxu0 %v20090_v36  ;;  %14801 = vmatprep.subr.bf16.mxu1 %v20093_v3  ;;  %v20166_v36 = vld [vmem:[%s28272_s18 + $0x838] ss:$116 sps:$4 sm:$0xff]  }
 0xac4   :  { %v20169_v3 = vld [vmem:[%s28272_s18 + $0x16b8] ss:$116 sps:$4 sm:$0xff]  }
 0xac5   :  { %14761 = vmatpush1.bf16.msra.mxu0 %v20088_v62  ;;  %v20174_v62 = vld [vmem:[%s28272_s18 + $0x754] ss:$116 sps:$4 sm:$0xff]  }
 0xac6   :  { %14802 = vmatpush1.bf16.msra.mxu1 %v20091_v22  ;;  %14762 = vmatprep.subr.bf16.mxu0 %v20096_v23  ;;  %v20177_v22 = vld [vmem:[%s28272_s18 + $0x15d4] ss:$116 sps:$4 sm:$0xff]   ;;  %v20172_v23 = vld [vmem:[%s28272_s18 + $0x750] ss:$116 sps:$4 sm:$0xff]  }
 0xac7   :  { %14803 = vmatprep.subr.bf16.mxu1 %v20099_v54  ;;  %v20175_v54 = vld [vmem:[%s28272_s18 + $0x15d0] ss:$116 sps:$4 sm:$0xff]  }
 0xac9   :  { %14763 = vmatpush1.bf16.msra.mxu0 %v20094_v21  ;;  %v20180_v21 = vld [vmem:[%s28272_s18 + $0x674] ss:$116 sps:$4 sm:$0xff]  }
 0xaca   :  { %14804 = vmatpush1.bf16.msra.mxu1 %v20097_v42  ;;  %14764 = vmatprep.subr.bf16.mxu0 %v20102_v38  ;;  %v20183_v42 = vld [vmem:[%s28272_s18 + $0x14f4] ss:$116 sps:$4 sm:$0xff]   ;;  %v20178_v38 = vld [vmem:[%s28272_s18 + $0x670] ss:$116 sps:$4 sm:$0xff]  }
 0xacb   :  { %14805 = vmatprep.subr.bf16.mxu1 %v20105_v27  ;;  %v20181_v27 = vld [vmem:[%s28272_s18 + $0x14f0] ss:$116 sps:$4 sm:$0xff]  }
 0xacd   :  { %14765 = vmatpush1.bf16.msra.mxu0 %v20100_v26  ;;  %v20186_v26 = vld [vmem:[%s28272_s18 + $0x58c] ss:$116 sps:$4 sm:$0xff]  }
 0xace   :  { %14806 = vmatpush1.bf16.msra.mxu1 %v20103_v28  ;;  %14766 = vmatprep.subr.bf16.mxu0 %v20108_v61  ;;  %v20189_v28 = vld [vmem:[%s28272_s18 + $0x140c] ss:$116 sps:$4 sm:$0xff]   ;;  %v20184_v61 = vld [vmem:[%s28272_s18 + $0x588] ss:$116 sps:$4 sm:$0xff]  }
 0xacf   :  { %14807 = vmatprep.subr.bf16.mxu1 %v20111_v7  ;;  %v20187_v7 = vld [vmem:[%s28272_s18 + $0x1408] ss:$116 sps:$4 sm:$0xff]  }
 0xad1   :  { %14767 = vmatpush1.bf16.msra.mxu0 %v20106_v17  ;;  %v20192_v17 = vld [vmem:[%s28272_s18 + $0x4a4] ss:$116 sps:$4 sm:$0xff]  }
 0xad2   :  { %14808 = vmatpush1.bf16.msra.mxu1 %v20109_v37  ;;  %14768 = vmatprep.subr.bf16.mxu0 %v20114_v47  ;;  %v20195_v37 = vld [vmem:[%s28272_s18 + $0x1324] ss:$116 sps:$4 sm:$0xff]   ;;  %v20190_v47 = vld [vmem:[%s28272_s18 + $0x4a0] ss:$116 sps:$4 sm:$0xff]  }
 0xad3   :  { %14809 = vmatprep.subr.bf16.mxu1 %v20117_v40  ;;  %v20193_v40 = vld [vmem:[%s28272_s18 + $0x1320] ss:$116 sps:$4 sm:$0xff]  }
 0xad5   :  { %14769 = vmatpush1.bf16.msra.mxu0 %v20112_v14  ;;  %v20198_v14 = vld [vmem:[%s28272_s18 + $0x3bc] ss:$116 sps:$4 sm:$0xff]  }
 0xad6   :  { %14810 = vmatpush1.bf16.msra.mxu1 %v20115_v5  ;;  %14770 = vmatprep.subr.bf16.mxu0 %v20120_v41  ;;  %v20201_v5 = vld [vmem:[%s28272_s18 + $0x123c] ss:$116 sps:$4 sm:$0xff]   ;;  %v20196_v41 = vld [vmem:[%s28272_s18 + $0x3b8] ss:$116 sps:$4 sm:$0xff]  }
 0xad7   :  { %14811 = vmatprep.subr.bf16.mxu1 %v20123_v33  ;;  %v20199_v33 = vld [vmem:[%s28272_s18 + $0x1238] ss:$116 sps:$4 sm:$0xff]  }
 0xad9   :  { %14771 = vmatpush1.bf16.msra.mxu0 %v20118_v46  ;;  %v20204_v46 = vld [vmem:[%s28272_s18 + $0x2d4] ss:$116 sps:$4 sm:$0xff]  }
 0xada   :  { %14812 = vmatpush1.bf16.msra.mxu1 %v20121_v57  ;;  %14772 = vmatprep.subr.bf16.mxu0 %v20126_v19  ;;  %v20207_v57 = vld [vmem:[%s28272_s18 + $0x1154] ss:$116 sps:$4 sm:$0xff]   ;;  %v20202_v19 = vld [vmem:[%s28272_s18 + $0x2d0] ss:$116 sps:$4 sm:$0xff]  }
 0xadb   :  { %14813 = vmatprep.subr.bf16.mxu1 %v20129_v10  ;;  %v20205_v10 = vld [vmem:[%s28272_s18 + $0x1150] ss:$116 sps:$4 sm:$0xff]  }
 0xadd   :  { %14773 = vmatpush1.bf16.msra.mxu0 %v20124_v32  ;;  %v20210_v32 = vld [vmem:[%s28272_s18 + $0x1ec] ss:$116 sps:$4 sm:$0xff]  }
 0xade   :  { %14814 = vmatpush1.bf16.msra.mxu1 %v20127_v9  ;;  %14774 = vmatprep.subr.bf16.mxu0 %v20132_v4  ;;  %v20213_v9 = vld [vmem:[%s28272_s18 + $0x106c] ss:$116 sps:$4 sm:$0xff]   ;;  %v20208_v4 = vld [vmem:[%s28272_s18 + $0x1e8] ss:$116 sps:$4 sm:$0xff]  }
 0xadf   :  { %14815 = vmatprep.subr.bf16.mxu1 %v20135_v24  ;;  %v20211_v24 = vld [vmem:[%s28272_s18 + $0x1068] ss:$116 sps:$4 sm:$0xff]  }
 0xae1   :  { %14775 = vmatpush2.bf16.msra.mxu0 %v20130_v52  ;;  %v20216_v52 = vld [vmem:[%s28272_s18 + $0x104] ss:$116 sps:$4 sm:$0xff]  }
 0xae2   :  { %14816 = vmatpush2.bf16.msra.mxu1 %v20133_v30  ;;  %14776 = vmatprep.subr.bf16.mxu0 %v20138_v18  ;;  %v20219_v30 = vld [vmem:[%s28272_s18 + $0xf84] ss:$116 sps:$4 sm:$0xff]   ;;  %v20214_v18 = vld [vmem:[%s28272_s18 + $0x100] ss:$116 sps:$4 sm:$0xff]  }
 0xae3   :  { %14817 = vmatprep.subr.bf16.mxu1 %v20141_v25  ;;  %v20217_v25 = vld [vmem:[%s28272_s18 + $0xf80] ss:$116 sps:$4 sm:$0xff]  }
 0xae5   :  { %14777 = vmatpush2.bf16.msra.mxu0 %v20136_v12  ;;  %v20222_v12 = vld [vmem:[%s28272_s18 + $0x1c] ss:$116 sps:$4 sm:$0xff]  }
 0xae6   :  { %14818 = vmatpush2.bf16.msra.mxu1 %v20139_v53  ;;  %14778 = vmatprep.subr.bf16.mxu0 %v20144_v8  ;;  %v20225_v53 = vld [vmem:[%s28272_s18 + $0xe9c] ss:$116 sps:$4 sm:$0xff]   ;;  %v20220_v8 = vld [vmem:[%s28272_s18 + $0x18] ss:$116 sps:$4 sm:$0xff]  }
 0xae7   :  { %14819 = vmatprep.subr.bf16.mxu1 %v20147_v1  ;;  %v20223_v1 = vld [vmem:[%s28272_s18 + $0xe98] ss:$116 sps:$4 sm:$0xff]  }
 0xae9   :  { %14779 = vmatpush2.bf16.msra.mxu0 %v20142_v56  ;;  %v20228_v56 = vld [vmem:[%s28272_s18 + $0xdb4] ss:$116 sps:$4 sm:$0xff]  }
 0xaea   :  { %14820 = vmatpush2.bf16.msra.mxu1 %v20145_v11  ;;  %14780 = vmatprep.subr.bf16.mxu0 %v20150_v58  ;;  %v20231_v11 = vld [vmem:[%s28272_s18 + $0x1c34] ss:$116 sps:$4 sm:$0xff]   ;;  %v20226_v58 = vld [vmem:[%s28272_s18 + $0xdb0] ss:$116 sps:$4 sm:$0xff]  }
 0xaeb   :  { %14821 = vmatprep.subr.bf16.mxu1 %v20153_v45  ;;  %v20229_v45 = vld [vmem:[%s28272_s18 + $0x1c30] ss:$116 sps:$4 sm:$0xff]  }
 0xaed   :  { %14781 = vmatpush2.bf16.msra.mxu0 %v20148_v48  ;;  %v20234_v48 = vld [vmem:[%s28272_s18 + $0xccc] ss:$116 sps:$4 sm:$0xff]  }
 0xaee   :  { %14822 = vmatpush2.bf16.msra.mxu1 %v20151_v0  ;;  %14782 = vmatprep.subr.bf16.mxu0 %v20156_v55  ;;  %v20237_v0 = vld [vmem:[%s28272_s18 + $0x1b4c] ss:$116 sps:$4 sm:$0xff]   ;;  %v20232_v55 = vld [vmem:[%s28272_s18 + $0xcc8] ss:$116 sps:$4 sm:$0xff]  }
 0xaef   :  { %14823 = vmatprep.subr.bf16.mxu1 %v20159_v39  ;;  %v20235_v39 = vld [vmem:[%s28272_s18 + $0x1b48] ss:$116 sps:$4 sm:$0xff]  }
 0xaf1   :  { %14783 = vmatpush2.bf16.msra.mxu0 %v20154_v31  ;;  %v20240_v31 = vld [vmem:[%s28272_s18 + $0xbe4] ss:$116 sps:$4 sm:$0xff]  }
 0xaf2   :  { %14824 = vmatpush2.bf16.msra.mxu1 %v20157_v16  ;;  %14784 = vmatprep.subr.bf16.mxu0 %v20162_v44  ;;  %v20243_v16 = vld [vmem:[%s28272_s18 + $0x1a64] ss:$116 sps:$4 sm:$0xff]   ;;  %v20238_v44 = vld [vmem:[%s28272_s18 + $0xbe0] ss:$116 sps:$4 sm:$0xff]  }
 0xaf3   :  { %14825 = vmatprep.subr.bf16.mxu1 %v20165_v13  ;;  %v20241_v13 = vld [vmem:[%s28272_s18 + $0x1a60] ss:$116 sps:$4 sm:$0xff]  }
 0xaf5   :  { %14785 = vmatpush2.bf16.msra.mxu0 %v20160_v15  ;;  %v20246_v15 = vld [vmem:[%s28272_s18 + $0xafc] ss:$116 sps:$4 sm:$0xff]  }
 0xaf6   :  { %14826 = vmatpush2.bf16.msra.mxu1 %v20163_v59  ;;  %14786 = vmatprep.subr.bf16.mxu0 %v20168_v63  ;;  %v20249_v59 = vld [vmem:[%s28272_s18 + $0x197c] ss:$116 sps:$4 sm:$0xff]   ;;  %v20244_v63 = vld [vmem:[%s28272_s18 + $0xaf8] ss:$116 sps:$4 sm:$0xff]  }
 0xaf7   :  { %14827 = vmatprep.subr.bf16.mxu1 %v20171_v35  ;;  %v20247_v35 = vld [vmem:[%s28272_s18 + $0x1978] ss:$116 sps:$4 sm:$0xff]  }
 0xaf9   :  { %14787 = vmatpush2.bf16.msra.mxu0 %v20166_v36  ;;  %v20252_v36 = vld [vmem:[%s28272_s18 + $0xa14] ss:$116 sps:$4 sm:$0xff]  }
 0xafa   :  { %14828 = vmatpush2.bf16.msra.mxu1 %v20169_v3  ;;  %14788 = vmatprep.subr.bf16.mxu0 %v20174_v62  ;;  %v20255_v3 = vld [vmem:[%s28272_s18 + $0x1894] ss:$116 sps:$4 sm:$0xff]   ;;  %v20250_v62 = vld [vmem:[%s28272_s18 + $0xa10] ss:$116 sps:$4 sm:$0xff]  }
 0xafb   :  { %14829 = vmatprep.subr.bf16.mxu1 %v20177_v22  ;;  %v20253_v22 = vld [vmem:[%s28272_s18 + $0x1890] ss:$116 sps:$4 sm:$0xff]  }
 0xafd   :  { %14789 = vmatpush2.bf16.msra.mxu0 %v20172_v23  ;;  %v20258_v23 = vld [vmem:[%s28272_s18 + $0x92c] ss:$116 sps:$4 sm:$0xff]  }
 0xafe   :  { %14830 = vmatpush2.bf16.msra.mxu1 %v20175_v54  ;;  %14840 = vmatprep.subr.bf16.mxu0 %v20180_v21  ;;  %v20261_v54 = vld [vmem:[%s28272_s18 + $0x17ac] ss:$116 sps:$4 sm:$0xff]   ;;  %v20256_v21 = vld [vmem:[%s28272_s18 + $0x928] ss:$116 sps:$4 sm:$0xff]  }
 0xaff   :  { %14881 = vmatprep.subr.bf16.mxu1 %v20183_v42  ;;  %v20259_v42 = vld [vmem:[%s28272_s18 + $0x17a8] ss:$116 sps:$4 sm:$0xff]  }
 0xb00   :  { %14791 = vmatmul.mubr.bf16.vlgmr.msra.gmra.mxu0 %v25418_v6 }
 0xb01   :  { %14832 = vmatmul.mubr.bf16.vlgmr.msra.gmra.mxu1 %v25420_v20  ;;  %14841 = vmatpush1.bf16.msra.mxu0 %v20178_v38  ;;  %v20264_v38 = vld [vmem:[%s28272_s18 + $0x844] ss:$116 sps:$4 sm:$0xff]  }
 0xb02   :  { %14872 = vmatprep.mubr.bf16.mxu0 %v25408_v2  ;;  %14882 = vmatpush1.bf16.msra.mxu1 %v20181_v27  ;;  %v20267_v27 = vld [vmem:[%s28272_s18 + $0x16c4] ss:$116 sps:$4 sm:$0xff]  }
 0xb03   :  { %14913 = vmatprep.mubr.bf16.mxu1 %v25410_v60  ;;  %14842 = vmatprep.subr.bf16.mxu0 %v20186_v26  ;;  %v20262_v26 = vld [vmem:[%s28272_s18 + $0x840] ss:$116 sps:$4 sm:$0xff]  }
 0xb04   :  { %14883 = vmatprep.subr.bf16.mxu1 %v20189_v28  ;;  %v20265_v28 = vld [vmem:[%s28272_s18 + $0x16c0] ss:$116 sps:$4 sm:$0xff]  }
 0xb05   :  { %14843 = vmatpush1.bf16.msra.mxu0 %v20184_v61  ;;  %v20270_v61 = vld [vmem:[%s28272_s18 + $0x75c] ss:$116 sps:$4 sm:$0xff]  }
 0xb06   :  { %14884 = vmatpush1.bf16.msra.mxu1 %v20187_v7  ;;  %14844 = vmatprep.subr.bf16.mxu0 %v20192_v17  ;;  %v20273_v7 = vld [vmem:[%s28272_s18 + $0x15dc] ss:$116 sps:$4 sm:$0xff]   ;;  %v20268_v17 = vld [vmem:[%s28272_s18 + $0x758] ss:$116 sps:$4 sm:$0xff]  }
 0xb07   :  { %14885 = vmatprep.subr.bf16.mxu1 %v20195_v37  ;;  %v20271_v37 = vld [vmem:[%s28272_s18 + $0x15d8] ss:$116 sps:$4 sm:$0xff]  }
 0xb09   :  { %14845 = vmatpush1.bf16.msra.mxu0 %v20190_v47  ;;  %v20276_v47 = vld [vmem:[%s28272_s18 + $0x67c] ss:$116 sps:$4 sm:$0xff]  }
 0xb0a   :  { %14886 = vmatpush1.bf16.msra.mxu1 %v20193_v40  ;;  %14846 = vmatprep.subr.bf16.mxu0 %v20198_v14  ;;  %v26006_v40 = vld [vmem:[%s28273_s19] sm:$0xff]  ;;  %v20279_v14 = vld [vmem:[%s28272_s18 + $0x14fc] ss:$116 sps:$4 sm:$0xff]  }
 0xb0b   :  { %14887 = vmatprep.subr.bf16.mxu1 %v20201_v5  ;;  %v20274_v5 = vld [vmem:[%s28272_s18 + $0x678] ss:$116 sps:$4 sm:$0xff]  }
 0xb0d   :  { %14847 = vmatpush1.bf16.msra.mxu0 %v20196_v41  ;;  %v9780_v41 = vrot.slane %v26006_v40, %v22342_v29 }
 0xb0e   :  { %14888 = vmatpush1.bf16.msra.mxu1 %v20199_v33  ;;  %14848 = vmatprep.subr.bf16.mxu0 %v20204_v46  ;;  %v20277_v33 = vld [vmem:[%s28272_s18 + $0x14f8] ss:$116 sps:$4 sm:$0xff]   ;;  %v9784_v46 = vrot.slane %v26006_v40, %v22351_v34 }
 0xb0f   :  { %14889 = vmatprep.subr.bf16.mxu1 %v20207_v57  ;;  %v20282_v57 = vld [vmem:[%s28272_s18 + $0x594] ss:$116 sps:$4 sm:$0xff]  }
 0xb11   :  { %14849 = vmatpush1.bf16.msra.mxu0 %v20202_v19 }
 0xb12   :  { %14890 = vmatpush1.bf16.msra.mxu1 %v20205_v10  ;;  %14850 = vmatprep.subr.bf16.mxu0 %v20210_v32  ;;  %v20285_v32 = vld [vmem:[%s28272_s18 + $0x1414] ss:$116 sps:$4 sm:$0xff]  }
 0xb13   :  { %14891 = vmatprep.subr.bf16.mxu1 %v20213_v9 }
 0xb15   :  { %14851 = vmatpush1.bf16.msra.mxu0 %v20208_v4  ;;  %v20280_v4 = vld [vmem:[%s28272_s18 + $0x590] ss:$116 sps:$4 sm:$0xff]  }
 0xb16   :  { %14892 = vmatpush1.bf16.msra.mxu1 %v20211_v24  ;;  %14852 = vmatprep.subr.bf16.mxu0 %v20216_v52 }
 0xb17   :  { %14893 = vmatprep.subr.bf16.mxu1 %v20219_v30  ;;  %v20283_v30 = vld [vmem:[%s28272_s18 + $0x1410] ss:$116 sps:$4 sm:$0xff]  }
 0xb19   :  { %14853 = vmatpush1.bf16.msra.mxu0 %v20214_v18  ;;  %v20288_v18 = vld [vmem:[%s28272_s18 + $0x4ac] ss:$116 sps:$4 sm:$0xff]  }
 0xb1a   :  { %14894 = vmatpush1.bf16.msra.mxu1 %v20217_v25  ;;  %14854 = vmatprep.subr.bf16.mxu0 %v20222_v12 }
 0xb1b   :  { %14895 = vmatprep.subr.bf16.mxu1 %v20225_v53  ;;  %v20291_v53 = vld [vmem:[%s28272_s18 + $0x132c] ss:$116 sps:$4 sm:$0xff]  }
 0xb1d   :  { %14855 = vmatpush1.bf16.msra.mxu0 %v20220_v8 }
 0xb1e   :  { %14896 = vmatpush1.bf16.msra.mxu1 %v20223_v1  ;;  %14856 = vmatprep.subr.bf16.mxu0 %v20228_v56 }
 0xb1f   :  { %14897 = vmatprep.subr.bf16.mxu1 %v20231_v11  ;;  %v20286_v11 = vld [vmem:[%s28272_s18 + $0x4a8] ss:$116 sps:$4 sm:$0xff]  }
 0xb21   :  { %14857 = vmatpush2.bf16.msra.mxu0 %v20226_v58 }
 0xb22   :  { %14898 = vmatpush2.bf16.msra.mxu1 %v20229_v45  ;;  %14858 = vmatprep.subr.bf16.mxu0 %v20234_v48  ;;  %v20289_v48 = vld [vmem:[%s28272_s18 + $0x1328] ss:$116 sps:$4 sm:$0xff]  }
 0xb23   :  { %14899 = vmatprep.subr.bf16.mxu1 %v20237_v0  ;;  %v20294_v0 = vld [vmem:[%s28272_s18 + $0x3c4] ss:$116 sps:$4 sm:$0xff]  }
 0xb25   :  { %14859 = vmatpush2.bf16.msra.mxu0 %v20232_v55 }
 0xb26   :  { %14900 = vmatpush2.bf16.msra.mxu1 %v20235_v39  ;;  %14860 = vmatprep.subr.bf16.mxu0 %v20240_v31  ;;  %v20297_v39 = vld [vmem:[%s28272_s18 + $0x1244] ss:$116 sps:$4 sm:$0xff]   ;;  %v20292_v31 = vld [vmem:[%s28272_s18 + $0x3c0] ss:$116 sps:$4 sm:$0xff]  }
 0xb27   :  { %14901 = vmatprep.subr.bf16.mxu1 %v20243_v16  ;;  %v20295_v16 = vld [vmem:[%s28272_s18 + $0x1240] ss:$116 sps:$4 sm:$0xff]  }
 0xb29   :  { %14861 = vmatpush2.bf16.msra.mxu0 %v20238_v44  ;;  %v20300_v44 = vld [vmem:[%s28272_s18 + $0x2dc] ss:$116 sps:$4 sm:$0xff]  }
 0xb2a   :  { %14902 = vmatpush2.bf16.msra.mxu1 %v20241_v13  ;;  %14862 = vmatprep.subr.bf16.mxu0 %v20246_v15  ;;  %v20303_v13 = vld [vmem:[%s28272_s18 + $0x115c] ss:$116 sps:$4 sm:$0xff]   ;;  %v20298_v15 = vld [vmem:[%s28272_s18 + $0x2d8] ss:$116 sps:$4 sm:$0xff]  }
 0xb2b   :  { %14903 = vmatprep.subr.bf16.mxu1 %v20249_v59  ;;  %v20301_v59 = vld [vmem:[%s28272_s18 + $0x1158] ss:$116 sps:$4 sm:$0xff]  }
 0xb2d   :  { %14863 = vmatpush2.bf16.msra.mxu0 %v20244_v63  ;;  %v20306_v63 = vld [vmem:[%s28272_s18 + $0x1f4] ss:$116 sps:$4 sm:$0xff]  }
 0xb2e   :  { %14904 = vmatpush2.bf16.msra.mxu1 %v20247_v35  ;;  %14864 = vmatprep.subr.bf16.mxu0 %v20252_v36  ;;  %v20309_v35 = vld [vmem:[%s28272_s18 + $0x1074] ss:$116 sps:$4 sm:$0xff]   ;;  %v20304_v36 = vld [vmem:[%s28272_s18 + $0x1f0] ss:$116 sps:$4 sm:$0xff]  }
 0xb2f   :  { %14905 = vmatprep.subr.bf16.mxu1 %v20255_v3  ;;  %v20307_v3 = vld [vmem:[%s28272_s18 + $0x1070] ss:$116 sps:$4 sm:$0xff]  }
 0xb31   :  { %14865 = vmatpush2.bf16.msra.mxu0 %v20250_v62  ;;  %v20312_v62 = vld [vmem:[%s28272_s18 + $0x10c] ss:$116 sps:$4 sm:$0xff]  }
 0xb32   :  { %14906 = vmatpush2.bf16.msra.mxu1 %v20253_v22  ;;  %14866 = vmatprep.subr.bf16.mxu0 %v20258_v23  ;;  %v20315_v22 = vld [vmem:[%s28272_s18 + $0xf8c] ss:$116 sps:$4 sm:$0xff]   ;;  %v20310_v23 = vld [vmem:[%s28272_s18 + $0x108] ss:$116 sps:$4 sm:$0xff]  }
 0xb33   :  { %14907 = vmatprep.subr.bf16.mxu1 %v20261_v54  ;;  %v20313_v54 = vld [vmem:[%s28272_s18 + $0xf88] ss:$116 sps:$4 sm:$0xff]  }
 0xb35   :  { %14867 = vmatpush2.bf16.msra.mxu0 %v20256_v21  ;;  %v20318_v21 = vld [vmem:[%s28272_s18 + $0x24] ss:$116 sps:$4 sm:$0xff]  }
 0xb36   :  { %14908 = vmatpush2.bf16.msra.mxu1 %v20259_v42  ;;  %14868 = vmatprep.subr.bf16.mxu0 %v20264_v38  ;;  %v20321_v42 = vld [vmem:[%s28272_s18 + $0xea4] ss:$116 sps:$4 sm:$0xff]   ;;  %v20316_v38 = vld [vmem:[%s28272_s18 + $0x20] ss:$116 sps:$4 sm:$0xff]  }
 0xb37   :  { %14909 = vmatprep.subr.bf16.mxu1 %v20267_v27  ;;  %v20319_v27 = vld [vmem:[%s28272_s18 + $0xea0] ss:$116 sps:$4 sm:$0xff]  }
 0xb39   :  { %14869 = vmatpush2.bf16.msra.mxu0 %v20262_v26  ;;  %v20324_v26 = vld [vmem:[%s28272_s18 + $0xdbc] ss:$116 sps:$4 sm:$0xff]  }
 0xb3a   :  { %14910 = vmatpush2.bf16.msra.mxu1 %v20265_v28  ;;  %14870 = vmatprep.subr.bf16.mxu0 %v20270_v61  ;;  %v20327_v28 = vld [vmem:[%s28272_s18 + $0x1c3c] ss:$116 sps:$4 sm:$0xff]   ;;  %v20322_v61 = vld [vmem:[%s28272_s18 + $0xdb8] ss:$116 sps:$4 sm:$0xff]  }
 0xb3b   :  { %14911 = vmatprep.subr.bf16.mxu1 %v20273_v7  ;;  %v20325_v7 = vld [vmem:[%s28272_s18 + $0x1c38] ss:$116 sps:$4 sm:$0xff]  }
 0xb3d   :  { %14871 = vmatpush2.bf16.msra.mxu0 %v20268_v17  ;;  %v20330_v17 = vld [vmem:[%s28272_s18 + $0xcd4] ss:$116 sps:$4 sm:$0xff]  }
 0xb3e   :  { %14912 = vmatpush2.bf16.msra.mxu1 %v20271_v37  ;;  %14922 = vmatprep.subr.bf16.mxu0 %v20276_v47  ;;  %v20333_v37 = vld [vmem:[%s28272_s18 + $0x1b54] ss:$116 sps:$4 sm:$0xff]   ;;  %v20328_v47 = vld [vmem:[%s28272_s18 + $0xcd0] ss:$116 sps:$4 sm:$0xff]  }
 0xb3f   :  { %14963 = vmatprep.subr.bf16.mxu1 %v20279_v14  ;;  %v20331_v14 = vld [vmem:[%s28272_s18 + $0x1b50] ss:$116 sps:$4 sm:$0xff]  }
 0xb40   :  { %14873 = vmatmul.mubr.bf16.vlgmr.msra.gmra.mxu0 %v25418_v6  ;;  %v14628_v19 = vpop.f32.mrf.mxu0  ;;  %v14669_v10 = vpop.f32.mrf.mxu1 }
 0xb41   :  { %14914 = vmatmul.mubr.bf16.vlgmr.msra.gmra.mxu1 %v25420_v20  ;;  %v14629_v9 = vadd.f32 %v14628_v19, %v9780_v41  ;;  %14923 = vmatpush1.bf16.msra.mxu0 %v20274_v5  ;;  %v20336_v5 = vld [vmem:[%s28272_s18 + $0xbec] ss:$116 sps:$4 sm:$0xff]   ;;  %v20345_v19 = vld [vmem:[%s28272_s18 + $0x1984] ss:$116 sps:$4 sm:$0xff]  }
 0xb42   :  { %14954 = vmatprep.mubr.bf16.mxu0 %v25408_v2  ;;  %14964 = vmatpush1.bf16.msra.mxu1 %v20277_v33  ;;  %v14630_v24 = vpop.f32.mrf.mxu0  ;;  %v14671_v52 = vpop.f32.mrf.mxu1  ;;  %v20339_v41 = vld [vmem:[%s28272_s18 + $0x1a6c] ss:$116 sps:$4 sm:$0xff]   ;;  %v20334_v33 = vld [vmem:[%s28272_s18 + $0xbe8] ss:$116 sps:$4 sm:$0xff]  }
 0xb43   :  { %v26039_v25 = vadd.f32 %v14669_v10, %v14629_v9  ;;  %14995 = vmatprep.mubr.bf16.mxu1 %v25410_v60  ;;  %v14631_v12 = vadd.f32 %v14630_v24, %v9784_v46  ;;  %14924 = vmatprep.subr.bf16.mxu0 %v20282_v57  ;;  %v20337_v46 = vld [vmem:[%s28272_s18 + $0x1a68] ss:$116 sps:$4 sm:$0xff]   ;;  %v20342_v57 = vld [vmem:[%s28272_s18 + $0xb04] ss:$116 sps:$4 sm:$0xff]   ;;  %v20340_v10 = vld [vmem:[%s28272_s18 + $0xb00] ss:$116 sps:$4 sm:$0xff]  }
 0xb44   :  { %14965 = vmatprep.subr.bf16.mxu1 %v20285_v32  ;;  %v14632_v8 = vpop.f32.mrf.mxu0  ;;  %v14673_v1 = vpop.f32.mrf.mxu1  ;;  %v20343_v32 = vld [vmem:[%s28272_s18 + $0x1980] ss:$116 sps:$4 sm:$0xff]   ;;  %v20348_v9 = vld [vmem:[%s28272_s18 + $0xa1c] ss:$116 sps:$4 sm:$0xff]   ;;  %v20346_v24 = vld [vmem:[%s28272_s18 + $0xa18] ss:$116 sps:$4 sm:$0xff]  }
 0xb45   :  { %v26045_v56 = vadd.f32 %v14671_v52, %v14631_v12  ;;  %14925 = vmatpush1.bf16.msra.mxu0 %v20280_v4  ;;  %v20351_v4 = vld [vmem:[%s28272_s18 + $0x189c] ss:$116 sps:$4 sm:$0xff]   ;;  %v20349_v52 = vld [vmem:[%s28272_s18 + $0x1898] ss:$116 sps:$4 sm:$0xff]  }
 0xb46   :  { %14966 = vmatpush1.bf16.msra.mxu1 %v20283_v30  ;;  %v14633_v58 = vpop.f32.mrf.mxu0  ;;  %v14674_v45 = vpop.f32.mrf.mxu1  ;;  %14926 = vmatprep.subr.bf16.mxu0 %v20288_v18  ;;  %v20354_v30 = vld [vmem:[%s28272_s18 + $0x934] ss:$116 sps:$4 sm:$0xff]   ;;  %v20352_v12 = vld [vmem:[%s28272_s18 + $0x930] ss:$116 sps:$4 sm:$0xff]   ;;  %v20360_v8 = vld [vmem:[%s28272_s18 + $0x84c] ss:$116 sps:$4 sm:$0xff]  }
 0xb47   :  { %v15851_v55 = vcombine.low %v26039_v25, %v26045_v56  ;;  %14967 = vmatprep.subr.bf16.mxu1 %v20291_v53  ;;  %v20357_v18 = vld [vmem:[%s28272_s18 + $0x17b4] ss:$116 sps:$4 sm:$0xff]   ;;  %v20355_v53 = vld [vmem:[%s28272_s18 + $0x17b0] ss:$116 sps:$4 sm:$0xff]   ;;  %v20363_v1 = vld [vmem:[%s28272_s18 + $0x16cc] ss:$116 sps:$4 sm:$0xff]  }
 0xb48   :  { %v20361_v58 = vld [vmem:[%s28272_s18 + $0x16c8] ss:$116 sps:$4 sm:$0xff]   ;;  %v20366_v45 = vld [vmem:[%s28272_s18 + $0x764] ss:$116 sps:$4 sm:$0xff]   ;;  %v20394_v56 = vld [vmem:[%s28272_s18 + $0x2e0] ss:$116 sps:$4 sm:$0xff]  }
 0xb49   :  { %14927 = vmatpush1.bf16.msra.mxu0 %v20286_v11  ;;  %v20358_v11 = vld [vmem:[%s28272_s18 + $0x848] ss:$116 sps:$4 sm:$0xff]   ;;  %v20399_v25 = vld [vmem:[%s28272_s18 + $0x1164] ss:$116 sps:$4 sm:$0xff]  }
 0xb4a   :  { %14968 = vmatpush1.bf16.msra.mxu1 %v20289_v48  ;;  %14928 = vmatprep.subr.bf16.mxu0 %v20294_v0  ;;  %v20369_v48 = vld [vmem:[%s28272_s18 + $0x15e4] ss:$116 sps:$4 sm:$0xff]   ;;  %v20364_v0 = vld [vmem:[%s28272_s18 + $0x760] ss:$116 sps:$4 sm:$0xff]  }
 0xb4b   :  { %14969 = vmatprep.subr.bf16.mxu1 %v20297_v39  ;;  %v20367_v39 = vld [vmem:[%s28272_s18 + $0x15e0] ss:$116 sps:$4 sm:$0xff]  }
 0xb4d   :  { %14929 = vmatpush1.bf16.msra.mxu0 %v20292_v31  ;;  %v20372_v31 = vld [vmem:[%s28272_s18 + $0x684] ss:$116 sps:$4 sm:$0xff]  }
 0xb4e   :  { %14970 = vmatpush1.bf16.msra.mxu1 %v20295_v16  ;;  %14930 = vmatprep.subr.bf16.mxu0 %v20300_v44  ;;  %v20375_v16 = vld [vmem:[%s28272_s18 + $0x1504] ss:$116 sps:$4 sm:$0xff]   ;;  %v9788_v44 = vrot.slane %v26006_v40, %v23928_v50 }
 0xb4f   :  { %14971 = vmatprep.subr.bf16.mxu1 %v20303_v13  ;;  %v20370_v13 = vld [vmem:[%s28272_s18 + $0x680] ss:$116 sps:$4 sm:$0xff]  }
 0xb51   :  { %14931 = vmatpush1.bf16.msra.mxu0 %v20298_v15  ;;  %v20373_v15 = vld [vmem:[%s28272_s18 + $0x1500] ss:$116 sps:$4 sm:$0xff]  }
 0xb52   :  { %14972 = vmatpush1.bf16.msra.mxu1 %v20301_v59  ;;  %14932 = vmatprep.subr.bf16.mxu0 %v20306_v63  ;;  %v9792_v59 = vrot.slane %v26006_v40, %v23931_v51  ;;  %v20378_v63 = vld [vmem:[%s28272_s18 + $0x59c] ss:$116 sps:$4 sm:$0xff]  }
 0xb53   :  { %14973 = vmatprep.subr.bf16.mxu1 %v20309_v35 }
 0xb55   :  { %14933 = vmatpush1.bf16.msra.mxu0 %v20304_v36 }
 0xb56   :  { %14974 = vmatpush1.bf16.msra.mxu1 %v20307_v3  ;;  %14934 = vmatprep.subr.bf16.mxu0 %v20312_v62  ;;  %v20381_v3 = vld [vmem:[%s28272_s18 + $0x141c] ss:$116 sps:$4 sm:$0xff]  }
 0xb57   :  { %14975 = vmatprep.subr.bf16.mxu1 %v20315_v22  ;;  %v20376_v22 = vld [vmem:[%s28272_s18 + $0x598] ss:$116 sps:$4 sm:$0xff]  }
 0xb59   :  { %14935 = vmatpush1.bf16.msra.mxu0 %v20310_v23 }
 0xb5a   :  { %14976 = vmatpush1.bf16.msra.mxu1 %v20313_v54  ;;  %14936 = vmatprep.subr.bf16.mxu0 %v20318_v21  ;;  %v20379_v21 = vld [vmem:[%s28272_s18 + $0x1418] ss:$116 sps:$4 sm:$0xff]  }
 0xb5b   :  { %14977 = vmatprep.subr.bf16.mxu1 %v20321_v42  ;;  %v20384_v42 = vld [vmem:[%s28272_s18 + $0x4b4] ss:$116 sps:$4 sm:$0xff]  }
 0xb5d   :  { %14937 = vmatpush1.bf16.msra.mxu0 %v20316_v38 }
 0xb5e   :  { %14978 = vmatpush1.bf16.msra.mxu1 %v20319_v27  ;;  %14938 = vmatprep.subr.bf16.mxu0 %v20324_v26  ;;  %v20387_v27 = vld [vmem:[%s28272_s18 + $0x1334] ss:$116 sps:$4 sm:$0xff]  }
 0xb5f   :  { %14979 = vmatprep.subr.bf16.mxu1 %v20327_v28 }
 0xb61   :  { %14939 = vmatpush2.bf16.msra.mxu0 %v20322_v61 }
 0xb62   :  { %14980 = vmatpush2.bf16.msra.mxu1 %v20325_v7  ;;  %14940 = vmatprep.subr.bf16.mxu0 %v20330_v17  ;;  %v20382_v17 = vld [vmem:[%s28272_s18 + $0x4b0] ss:$116 sps:$4 sm:$0xff]  }
 0xb63   :  { %14981 = vmatprep.subr.bf16.mxu1 %v20333_v37 }
 0xb65   :  { %14941 = vmatpush2.bf16.msra.mxu0 %v20328_v47 }
 0xb66   :  { %14982 = vmatpush2.bf16.msra.mxu1 %v20331_v14  ;;  %14942 = vmatprep.subr.bf16.mxu0 %v20336_v5  ;;  %v20385_v14 = vld [vmem:[%s28272_s18 + $0x1330] ss:$116 sps:$4 sm:$0xff]   ;;  %v20390_v5 = vld [vmem:[%s28272_s18 + $0x3cc] ss:$116 sps:$4 sm:$0xff]  }
 0xb67   :  { %14983 = vmatprep.subr.bf16.mxu1 %v20339_v41 }
 0xb69   :  { %14943 = vmatpush2.bf16.msra.mxu0 %v20334_v33  ;;  %v20393_v33 = vld [vmem:[%s28272_s18 + $0x124c] ss:$116 sps:$4 sm:$0xff]  }
 0xb6a   :  { %14984 = vmatpush2.bf16.msra.mxu1 %v20337_v46  ;;  %14944 = vmatprep.subr.bf16.mxu0 %v20342_v57  ;;  %v15859_v46 = vrot.slane %v15851_v55, %v21597_v49  ;;  %v20397_v55 = vld [vmem:[%s28272_s18 + $0x1160] ss:$116 sps:$4 sm:$0xff]  }
 0xb6b   :  { %14985 = vmatprep.subr.bf16.mxu1 %v20345_v19  ;;  %v20388_v19 = vld [vmem:[%s28272_s18 + $0x3c8] ss:$116 sps:$4 sm:$0xff]  }
 0xb6d   :  { %14945 = vmatpush2.bf16.msra.mxu0 %v20340_v10  ;;  %v20391_v10 = vld [vmem:[%s28272_s18 + $0x1248] ss:$116 sps:$4 sm:$0xff]  }
 0xb6e   :  { %14986 = vmatpush2.bf16.msra.mxu1 %v20343_v32  ;;  %14946 = vmatprep.subr.bf16.mxu0 %v20348_v9  ;;  %v20396_v32 = vld [vmem:[%s28272_s18 + $0x2e4] ss:$116 sps:$4 sm:$0xff]  }
 0xb6f   :  { %14987 = vmatprep.subr.bf16.mxu1 %v20351_v4  ;;  %v20402_v4 = vld [vmem:[%s28272_s18 + $0x1fc] ss:$116 sps:$4 sm:$0xff]  }
 0xb71   :  { %14947 = vmatpush2.bf16.msra.mxu0 %v20346_v24  ;;  %v20405_v24 = vld [vmem:[%s28272_s18 + $0x107c] ss:$116 sps:$4 sm:$0xff]  }
 0xb72   :  { %14988 = vmatpush2.bf16.msra.mxu1 %v20349_v52  ;;  %14948 = vmatprep.subr.bf16.mxu0 %v20354_v30  ;;  %v20400_v52 = vld [vmem:[%s28272_s18 + $0x1f8] ss:$116 sps:$4 sm:$0xff]  }
 0xb73   :  { %14989 = vmatprep.subr.bf16.mxu1 %v20357_v18  ;;  %v20403_v30 = vld [vmem:[%s28272_s18 + $0x1078] ss:$116 sps:$4 sm:$0xff]   ;;  %v20408_v18 = vld [vmem:[%s28272_s18 + $0x114] ss:$116 sps:$4 sm:$0xff]  }
 0xb75   :  { %14949 = vmatpush2.bf16.msra.mxu0 %v20352_v12  ;;  %v20411_v12 = vld [vmem:[%s28272_s18 + $0xf94] ss:$116 sps:$4 sm:$0xff]  }
 0xb76   :  { %14990 = vmatpush2.bf16.msra.mxu1 %v20355_v53  ;;  %14950 = vmatprep.subr.bf16.mxu0 %v20360_v8  ;;  %v20406_v53 = vld [vmem:[%s28272_s18 + $0x110] ss:$116 sps:$4 sm:$0xff]  }
 0xb77   :  { %14991 = vmatprep.subr.bf16.mxu1 %v20363_v1  ;;  %v20409_v8 = vld [vmem:[%s28272_s18 + $0xf90] ss:$116 sps:$4 sm:$0xff]   ;;  %v20414_v1 = vld [vmem:[%s28272_s18 + $0x2c] ss:$116 sps:$4 sm:$0xff]  }
 0xb79   :  { %14951 = vmatpush2.bf16.msra.mxu0 %v20358_v11  ;;  %v20417_v11 = vld [vmem:[%s28272_s18 + $0xeac] ss:$116 sps:$4 sm:$0xff]  }
 0xb7a   :  { %14992 = vmatpush2.bf16.msra.mxu1 %v20361_v58  ;;  %14952 = vmatprep.subr.bf16.mxu0 %v20366_v45  ;;  %v20412_v58 = vld [vmem:[%s28272_s18 + $0x28] ss:$116 sps:$4 sm:$0xff]  }
 0xb7b   :  { %14993 = vmatprep.subr.bf16.mxu1 %v20369_v48  ;;  %v20415_v45 = vld [vmem:[%s28272_s18 + $0xea8] ss:$116 sps:$4 sm:$0xff]   ;;  %v20420_v48 = vld [vmem:[%s28272_s18 + $0xdc4] ss:$116 sps:$4 sm:$0xff]  }
 0xb7d   :  { %14953 = vmatpush2.bf16.msra.mxu0 %v20364_v0  ;;  %v20423_v0 = vld [vmem:[%s28272_s18 + $0x1c44] ss:$116 sps:$4 sm:$0xff]  }
 0xb7e   :  { %14994 = vmatpush2.bf16.msra.mxu1 %v20367_v39  ;;  %15004 = vmatprep.subr.bf16.mxu0 %v20372_v31  ;;  %v20418_v39 = vld [vmem:[%s28272_s18 + $0xdc0] ss:$116 sps:$4 sm:$0xff]  }
 0xb7f   :  { %15045 = vmatprep.subr.bf16.mxu1 %v20375_v16  ;;  %v20421_v31 = vld [vmem:[%s28272_s18 + $0x1c40] ss:$116 sps:$4 sm:$0xff]   ;;  %v20426_v16 = vld [vmem:[%s28272_s18 + $0xcdc] ss:$116 sps:$4 sm:$0xff]  }
 0xb80   :  { %v14710_v35 = vpop.f32.mrf.mxu0  ;;  %v14751_v36 = vpop.f32.mrf.mxu1  ;;  %14955 = vmatmul.mubr.bf16.vlgmr.msra.gmra.mxu0 %v25418_v6 }
 0xb81   :  { %v14711_v62 = vadd.f32 %v14710_v35, %v9788_v44  ;;  %14996 = vmatmul.mubr.bf16.vlgmr.msra.gmra.mxu1 %v25420_v20  ;;  %15005 = vmatpush1.bf16.msra.mxu0 %v20370_v13  ;;  %v20429_v44 = vld [vmem:[%s28272_s18 + $0x1b5c] ss:$116 sps:$4 sm:$0xff]   ;;  %v20424_v13 = vld [vmem:[%s28272_s18 + $0xcd8] ss:$116 sps:$4 sm:$0xff]  }
 0xb82   :  { %15036 = vmatprep.mubr.bf16.mxu0 %v25408_v2  ;;  %15046 = vmatpush1.bf16.msra.mxu1 %v20373_v15  ;;  %v14712_v23 = vpop.f32.mrf.mxu0  ;;  %v14753_v54 = vpop.f32.mrf.mxu1  ;;  %v20427_v15 = vld [vmem:[%s28272_s18 + $0x1b58] ss:$116 sps:$4 sm:$0xff]   ;;  %v20430_v35 = vld [vmem:[%s28272_s18 + $0xbf0] ss:$116 sps:$4 sm:$0xff]  }
 0xb83   :  { %15077 = vmatprep.mubr.bf16.mxu1 %v25410_v60  ;;  %v14713_v38 = vadd.f32 %v14712_v23, %v9792_v59  ;;  %15006 = vmatprep.subr.bf16.mxu0 %v20378_v63  ;;  %v14752_v61 = vadd.f32 %v14751_v36, %v14711_v62  ;;  %v20432_v59 = vld [vmem:[%s28272_s18 + $0xbf4] ss:$116 sps:$4 sm:$0xff]   ;;  %v20433_v36 = vld [vmem:[%s28272_s18 + $0x1a70] ss:$116 sps:$4 sm:$0xff]   ;;  %v20441_v62 = vld [vmem:[%s28272_s18 + $0x198c] ss:$116 sps:$4 sm:$0xff]  }
 0xb84   :  { %v14714_v26 = vpop.f32.mrf.mxu0  ;;  %v14755_v28 = vpop.f32.mrf.mxu1  ;;  %15047 = vmatprep.subr.bf16.mxu1 %v20381_v3  ;;  %v20435_v63 = vld [vmem:[%s28272_s18 + $0x1a74] ss:$116 sps:$4 sm:$0xff]   ;;  %v20438_v3 = vld [vmem:[%s28272_s18 + $0xb0c] ss:$116 sps:$4 sm:$0xff]  }
 0xb85   :  { %v14754_v7 = vadd.f32 %v14753_v54, %v14713_v38  ;;  %15007 = vmatpush1.bf16.msra.mxu0 %v20376_v22  ;;  %v20436_v22 = vld [vmem:[%s28272_s18 + $0xb08] ss:$116 sps:$4 sm:$0xff]   ;;  %v20444_v54 = vld [vmem:[%s28272_s18 + $0xa24] ss:$116 sps:$4 sm:$0xff]   ;;  %v20445_v38 = vld [vmem:[%s28272_s18 + $0x18a0] ss:$116 sps:$4 sm:$0xff]  }
 0xb86   :  { %15048 = vmatpush1.bf16.msra.mxu1 %v20379_v21  ;;  %v14715_v37 = vpop.f32.mrf.mxu0  ;;  %v14756_v47 = vpop.f32.mrf.mxu1  ;;  %15008 = vmatprep.subr.bf16.mxu0 %v20384_v42  ;;  %v20439_v23 = vld [vmem:[%s28272_s18 + $0x1988] ss:$116 sps:$4 sm:$0xff]   ;;  %v20447_v21 = vld [vmem:[%s28272_s18 + $0x18a4] ss:$116 sps:$4 sm:$0xff]   ;;  %v20442_v42 = vld [vmem:[%s28272_s18 + $0xa20] ss:$116 sps:$4 sm:$0xff]  }
 0xb87   :  { %v15852_v41 = vcombine.low %v14752_v61, %v14754_v7  ;;  %15049 = vmatprep.subr.bf16.mxu1 %v20387_v27  ;;  %v20450_v27 = vld [vmem:[%s28272_s18 + $0x93c] ss:$116 sps:$4 sm:$0xff]   ;;  %v20448_v28 = vld [vmem:[%s28272_s18 + $0x938] ss:$116 sps:$4 sm:$0xff]   ;;  %v20456_v7 = vld [vmem:[%s28272_s18 + $0x854] ss:$116 sps:$4 sm:$0xff]  }
 0xb88   :  { %v20453_v26 = vld [vmem:[%s28272_s18 + $0x17bc] ss:$116 sps:$4 sm:$0xff]   ;;  %v20451_v61 = vld [vmem:[%s28272_s18 + $0x17b8] ss:$116 sps:$4 sm:$0xff]  }
 0xb89   :  { %v15866_v57 = vrot.slane %v15852_v41, %v21597_v49  ;;  %15009 = vmatpush1.bf16.msra.mxu0 %v20382_v17  ;;  %v20459_v17 = vld [vmem:[%s28272_s18 + $0x16d4] ss:$116 sps:$4 sm:$0xff]   ;;  %v20454_v37 = vld [vmem:[%s28272_s18 + $0x850] ss:$116 sps:$4 sm:$0xff]  }
 0xb8a   :  { %15050 = vmatpush1.bf16.msra.mxu1 %v20385_v14  ;;  %15010 = vmatprep.subr.bf16.mxu0 %v20390_v5  ;;  %v20457_v47 = vld [vmem:[%s28272_s18 + $0x16d0] ss:$116 sps:$4 sm:$0xff]   ;;  %v20462_v14 = vld [vmem:[%s28272_s18 + $0x76c] ss:$116 sps:$4 sm:$0xff]   ;;  %v20460_v41 = vld [vmem:[%s28272_s18 + $0x768] ss:$116 sps:$4 sm:$0xff]  }
 0xb8b   :  { %v15867_v9 = vcombine.low %v15859_v46, %v15866_v57  ;;  %15051 = vmatprep.subr.bf16.mxu1 %v20393_v33  ;;  %v20465_v5 = vld [vmem:[%s28272_s18 + $0x15ec] ss:$116 sps:$4 sm:$0xff]   ;;  %v26417_v33 = vsub.s32 4, %v21579_v43  ;;  %v20463_v46 = vld [vmem:[%s28272_s18 + $0x15e8] ss:$116 sps:$4 sm:$0xff]  }
 0xb8c   :  { %v20468_v57 = vld [vmem:[%s28272_s18 + $0x68c] ss:$116 sps:$4 sm:$0xff]  }
 0xb8d   :  { %15985 = vst [vmem:[%s28277_s23] sm:$0xff] %v15867_v9  ;;  %15011 = vmatpush1.bf16.msra.mxu0 %v20388_v19  ;;  %v20471_v19 = vld [vmem:[%s28272_s18 + $0x150c] ss:$116 sps:$4 sm:$0xff]   ;;  %v20466_v9 = vld [vmem:[%s28272_s18 + $0x688] ss:$116 sps:$4 sm:$0xff]  }
 0xb8e   :  { %15052 = vmatpush1.bf16.msra.mxu1 %v20391_v10  ;;  %15012 = vmatprep.subr.bf16.mxu0 %v20396_v32  ;;  %v26429_v10 = vsub.s32 5, %v21579_v43  ;;  %v9796_v32 = vrot.slane %v26006_v40, %v26417_v33 }
 0xb8f   :  { %15053 = vmatprep.subr.bf16.mxu1 %v20399_v25  ;;  %v20469_v25 = vld [vmem:[%s28272_s18 + $0x1508] ss:$116 sps:$4 sm:$0xff]  }
 0xb91   :  { %15013 = vmatpush1.bf16.msra.mxu0 %v20394_v56  ;;  %v9800_v56 = vrot.slane %v26006_v40, %v26429_v10 }
 0xb92   :  { %15054 = vmatpush1.bf16.msra.mxu1 %v20397_v55  ;;  %15014 = vmatprep.subr.bf16.mxu0 %v20402_v4  ;;  %v20474_v55 = vld [vmem:[%s28272_s18 + $0x5a4] ss:$116 sps:$4 sm:$0xff]  }
 0xb93   :  { %15055 = vmatprep.subr.bf16.mxu1 %v20405_v24  ;;  %v20477_v24 = vld [vmem:[%s28272_s18 + $0x1424] ss:$116 sps:$4 sm:$0xff]  }
 0xb95   :  { %15015 = vmatpush1.bf16.msra.mxu0 %v20400_v52 }
 0xb96   :  { %15056 = vmatpush1.bf16.msra.mxu1 %v20403_v30  ;;  %15016 = vmatprep.subr.bf16.mxu0 %v20408_v18  ;;  %v20472_v18 = vld [vmem:[%s28272_s18 + $0x5a0] ss:$116 sps:$4 sm:$0xff]  }
 0xb97   :  { %15057 = vmatprep.subr.bf16.mxu1 %v20411_v12 }
 0xb99   :  { %15017 = vmatpush1.bf16.msra.mxu0 %v20406_v53  ;;  %v20475_v53 = vld [vmem:[%s28272_s18 + $0x1420] ss:$116 sps:$4 sm:$0xff]  }
 0xb9a   :  { %15058 = vmatpush1.bf16.msra.mxu1 %v20409_v8  ;;  %15018 = vmatprep.subr.bf16.mxu0 %v20414_v1  ;;  %v20480_v8 = vld [vmem:[%s28272_s18 + $0x4bc] ss:$116 sps:$4 sm:$0xff]  }
 0xb9b   :  { %15059 = vmatprep.subr.bf16.mxu1 %v20417_v11 }
 0xb9d   :  { %15019 = vmatpush1.bf16.msra.mxu0 %v20412_v58 }
 0xb9e   :  { %15060 = vmatpush1.bf16.msra.mxu1 %v20415_v45  ;;  %15020 = vmatprep.subr.bf16.mxu0 %v20420_v48  ;;  %v20483_v45 = vld [vmem:[%s28272_s18 + $0x133c] ss:$116 sps:$4 sm:$0xff]  }
 0xb9f   :  { %15061 = vmatprep.subr.bf16.mxu1 %v20423_v0 }
 0xba1   :  { %15021 = vmatpush2.bf16.msra.mxu0 %v20418_v39 }
 0xba2   :  { %15062 = vmatpush2.bf16.msra.mxu1 %v20421_v31  ;;  %15022 = vmatprep.subr.bf16.mxu0 %v20426_v16  ;;  %v20478_v31 = vld [vmem:[%s28272_s18 + $0x4b8] ss:$116 sps:$4 sm:$0xff]  }
 0xba3   :  { %15063 = vmatprep.subr.bf16.mxu1 %v20429_v44  ;;  %v20481_v44 = vld [vmem:[%s28272_s18 + $0x1338] ss:$116 sps:$4 sm:$0xff]  }
 0xba5   :  { %15023 = vmatpush2.bf16.msra.mxu0 %v20424_v13  ;;  %v20486_v13 = vld [vmem:[%s28272_s18 + $0x3d4] ss:$116 sps:$4 sm:$0xff]  }
 0xba6   :  { %15064 = vmatpush2.bf16.msra.mxu1 %v20427_v15  ;;  %15024 = vmatprep.subr.bf16.mxu0 %v20432_v59 }
 0xba7   :  { %15065 = vmatprep.subr.bf16.mxu1 %v20435_v63  ;;  %v20489_v63 = vld [vmem:[%s28272_s18 + $0x1254] ss:$116 sps:$4 sm:$0xff]  }
 0xba9   :  { %15025 = vmatpush2.bf16.msra.mxu0 %v20430_v35  ;;  %v20484_v35 = vld [vmem:[%s28272_s18 + $0x3d0] ss:$116 sps:$4 sm:$0xff]  }
 0xbaa   :  { %15066 = vmatpush2.bf16.msra.mxu1 %v20433_v36  ;;  %15026 = vmatprep.subr.bf16.mxu0 %v20438_v3  ;;  %v20487_v36 = vld [vmem:[%s28272_s18 + $0x1250] ss:$116 sps:$4 sm:$0xff]   ;;  %v20492_v3 = vld [vmem:[%s28272_s18 + $0x2ec] ss:$116 sps:$4 sm:$0xff]  }
 0xbab   :  { %15067 = vmatprep.subr.bf16.mxu1 %v20441_v62  ;;  %v20495_v62 = vld [vmem:[%s28272_s18 + $0x116c] ss:$116 sps:$4 sm:$0xff]  }
 0xbad   :  { %15027 = vmatpush2.bf16.msra.mxu0 %v20436_v22  ;;  %v20490_v22 = vld [vmem:[%s28272_s18 + $0x2e8] ss:$116 sps:$4 sm:$0xff]  }
 0xbae   :  { %15068 = vmatpush2.bf16.msra.mxu1 %v20439_v23  ;;  %15028 = vmatprep.subr.bf16.mxu0 %v20444_v54  ;;  %v20493_v23 = vld [vmem:[%s28272_s18 + $0x1168] ss:$116 sps:$4 sm:$0xff]   ;;  %v20498_v54 = vld [vmem:[%s28272_s18 + $0x204] ss:$116 sps:$4 sm:$0xff]  }
 0xbaf   :  { %15069 = vmatprep.subr.bf16.mxu1 %v20447_v21  ;;  %v20501_v21 = vld [vmem:[%s28272_s18 + $0x1084] ss:$116 sps:$4 sm:$0xff]  }
 0xbb1   :  { %15029 = vmatpush2.bf16.msra.mxu0 %v20442_v42  ;;  %v20496_v42 = vld [vmem:[%s28272_s18 + $0x200] ss:$116 sps:$4 sm:$0xff]  }
 0xbb2   :  { %15070 = vmatpush2.bf16.msra.mxu1 %v20445_v38  ;;  %15030 = vmatprep.subr.bf16.mxu0 %v20450_v27  ;;  %v20499_v38 = vld [vmem:[%s28272_s18 + $0x1080] ss:$116 sps:$4 sm:$0xff]   ;;  %v20504_v27 = vld [vmem:[%s28272_s18 + $0x11c] ss:$116 sps:$4 sm:$0xff]  }
 0xbb3   :  { %15071 = vmatprep.subr.bf16.mxu1 %v20453_v26  ;;  %v20507_v26 = vld [vmem:[%s28272_s18 + $0xf9c] ss:$116 sps:$4 sm:$0xff]  }
 0xbb5   :  { %15031 = vmatpush2.bf16.msra.mxu0 %v20448_v28  ;;  %v20502_v28 = vld [vmem:[%s28272_s18 + $0x118] ss:$116 sps:$4 sm:$0xff]  }
 0xbb6   :  { %15072 = vmatpush2.bf16.msra.mxu1 %v20451_v61  ;;  %15032 = vmatprep.subr.bf16.mxu0 %v20456_v7  ;;  %v20505_v61 = vld [vmem:[%s28272_s18 + $0xf98] ss:$116 sps:$4 sm:$0xff]   ;;  %v20510_v7 = vld [vmem:[%s28272_s18 + $0x34] ss:$116 sps:$4 sm:$0xff]  }
 0xbb7   :  { %15073 = vmatprep.subr.bf16.mxu1 %v20459_v17  ;;  %v20513_v17 = vld [vmem:[%s28272_s18 + $0xeb4] ss:$116 sps:$4 sm:$0xff]  }
 0xbb9   :  { %15033 = vmatpush2.bf16.msra.mxu0 %v20454_v37  ;;  %v20508_v37 = vld [vmem:[%s28272_s18 + $0x30] ss:$116 sps:$4 sm:$0xff]  }
 0xbba   :  { %15074 = vmatpush2.bf16.msra.mxu1 %v20457_v47  ;;  %15034 = vmatprep.subr.bf16.mxu0 %v20462_v14  ;;  %v20511_v47 = vld [vmem:[%s28272_s18 + $0xeb0] ss:$116 sps:$4 sm:$0xff]   ;;  %v20516_v14 = vld [vmem:[%s28272_s18 + $0xdcc] ss:$116 sps:$4 sm:$0xff]  }
 0xbbb   :  { %15075 = vmatprep.subr.bf16.mxu1 %v20465_v5  ;;  %v20519_v5 = vld [vmem:[%s28272_s18 + $0x1c4c] ss:$116 sps:$4 sm:$0xff]  }
 0xbbd   :  { %15035 = vmatpush2.bf16.msra.mxu0 %v20460_v41  ;;  %v20514_v41 = vld [vmem:[%s28272_s18 + $0xdc8] ss:$116 sps:$4 sm:$0xff]  }
 0xbbe   :  { %15076 = vmatpush2.bf16.msra.mxu1 %v20463_v46  ;;  %15086 = vmatprep.subr.bf16.mxu0 %v20468_v57  ;;  %v20517_v46 = vld [vmem:[%s28272_s18 + $0x1c48] ss:$116 sps:$4 sm:$0xff]   ;;  %v20522_v57 = vld [vmem:[%s28272_s18 + $0xce4] ss:$116 sps:$4 sm:$0xff]  }
 0xbbf   :  { %15127 = vmatprep.subr.bf16.mxu1 %v20471_v19  ;;  %v20525_v19 = vld [vmem:[%s28272_s18 + $0x1b64] ss:$116 sps:$4 sm:$0xff]  }
 0xbc0   :  { %v14792_v4 = vpop.f32.mrf.mxu0  ;;  %15037 = vmatmul.mubr.bf16.vlgmr.msra.gmra.mxu0 %v25418_v6 }
 0xbc1   :  { %v14793_v52 = vadd.f32 %v14792_v4, %v9796_v32  ;;  %v14833_v30 = vpop.f32.mrf.mxu1  ;;  %15078 = vmatmul.mubr.bf16.vlgmr.msra.gmra.mxu1 %v25420_v20  ;;  %15087 = vmatpush1.bf16.msra.mxu0 %v20466_v9  ;;  %v20520_v32 = vld [vmem:[%s28272_s18 + $0xce0] ss:$116 sps:$4 sm:$0xff]   ;;  %v20529_v4 = vld [vmem:[%s28272_s18 + $0x1a78] ss:$116 sps:$4 sm:$0xff]  }
 0xbc2   :  { %15118 = vmatprep.mubr.bf16.mxu0 %v25408_v2  ;;  %15128 = vmatpush1.bf16.msra.mxu1 %v20469_v25  ;;  %v14794_v12 = vpop.f32.mrf.mxu0  ;;  %v20523_v9 = vld [vmem:[%s28272_s18 + $0x1b60] ss:$116 sps:$4 sm:$0xff]   ;;  %v20528_v25 = vld [vmem:[%s28272_s18 + $0xbfc] ss:$116 sps:$4 sm:$0xff]  }
 0xbc3   :  { %v26459_v1 = vadd.f32 %v14833_v30, %v14793_v52  ;;  %15159 = vmatprep.mubr.bf16.mxu1 %v25410_v60  ;;  %v14795_v11 = vadd.f32 %v14794_v12, %v9800_v56  ;;  %v14835_v58 = vpop.f32.mrf.mxu1  ;;  %15088 = vmatprep.subr.bf16.mxu0 %v20474_v55  ;;  %v20531_v56 = vld [vmem:[%s28272_s18 + $0x1a7c] ss:$116 sps:$4 sm:$0xff]   ;;  %v20526_v55 = vld [vmem:[%s28272_s18 + $0xbf8] ss:$116 sps:$4 sm:$0xff]   ;;  %v20537_v52 = vld [vmem:[%s28272_s18 + $0x1994] ss:$116 sps:$4 sm:$0xff]  }
 0xbc4   :  { %v14796_v48 = vpop.f32.mrf.mxu0  ;;  %15129 = vmatprep.subr.bf16.mxu1 %v20477_v24  ;;  %v20534_v24 = vld [vmem:[%s28272_s18 + $0xb14] ss:$116 sps:$4 sm:$0xff]   ;;  %v20532_v30 = vld [vmem:[%s28272_s18 + $0xb10] ss:$116 sps:$4 sm:$0xff]   ;;  %v20540_v12 = vld [vmem:[%s28272_s18 + $0xa2c] ss:$116 sps:$4 sm:$0xff]  }
 0xbc5   :  { %v26465_v0 = vadd.f32 %v14835_v58, %v14795_v11  ;;  %v14837_v39 = vpop.f32.mrf.mxu1  ;;  %15089 = vmatpush1.bf16.msra.mxu0 %v20472_v18  ;;  %v20535_v18 = vld [vmem:[%s28272_s18 + $0x1990] ss:$116 sps:$4 sm:$0xff]   ;;  %v20541_v11 = vld [vmem:[%s28272_s18 + $0x18a8] ss:$116 sps:$4 sm:$0xff]   ;;  %v20544_v48 = vld [vmem:[%s28272_s18 + $0x940] ss:$116 sps:$4 sm:$0xff]  }
 0xbc6   :  { %15130 = vmatpush1.bf16.msra.mxu1 %v20475_v53  ;;  %v14797_v16 = vpop.f32.mrf.mxu0  ;;  %15090 = vmatprep.subr.bf16.mxu0 %v20480_v8  ;;  %v20543_v53 = vld [vmem:[%s28272_s18 + $0x18ac] ss:$116 sps:$4 sm:$0xff]   ;;  %v20538_v8 = vld [vmem:[%s28272_s18 + $0xa28] ss:$116 sps:$4 sm:$0xff]   ;;  %v20546_v58 = vld [vmem:[%s28272_s18 + $0x944] ss:$116 sps:$4 sm:$0xff]  }
 0xbc7   :  { %v15868_v15 = vcombine.low %v26459_v1, %v26465_v0  ;;  %v14838_v59 = vpop.f32.mrf.mxu1  ;;  %15131 = vmatprep.subr.bf16.mxu1 %v20483_v45  ;;  %v20549_v45 = vld [vmem:[%s28272_s18 + $0x17c4] ss:$116 sps:$4 sm:$0xff]   ;;  %v20547_v39 = vld [vmem:[%s28272_s18 + $0x17c0] ss:$116 sps:$4 sm:$0xff]   ;;  %v20555_v16 = vld [vmem:[%s28272_s18 + $0x16dc] ss:$116 sps:$4 sm:$0xff]  }
 0xbc8   :  { %v20558_v59 = vld [vmem:[%s28272_s18 + $0x774] ss:$116 sps:$4 sm:$0xff]   ;;  %v20586_v0 = vld [vmem:[%s28272_s18 + $0x2f0] ss:$116 sps:$4 sm:$0xff]  }
 0xbc9   :  { %15091 = vmatpush1.bf16.msra.mxu0 %v20478_v31  ;;  %v20552_v31 = vld [vmem:[%s28272_s18 + $0x85c] ss:$116 sps:$4 sm:$0xff]   ;;  %v20591_v1 = vld [vmem:[%s28272_s18 + $0x1174] ss:$116 sps:$4 sm:$0xff]  }
 0xbca   :  { %15132 = vmatpush1.bf16.msra.mxu1 %v20481_v44  ;;  %15092 = vmatprep.subr.bf16.mxu0 %v20486_v13  ;;  %v20550_v44 = vld [vmem:[%s28272_s18 + $0x858] ss:$116 sps:$4 sm:$0xff]  }
 0xbcb   :  { %15133 = vmatprep.subr.bf16.mxu1 %v20489_v63  ;;  %v20553_v13 = vld [vmem:[%s28272_s18 + $0x16d8] ss:$116 sps:$4 sm:$0xff]   ;;  %v20561_v63 = vld [vmem:[%s28272_s18 + $0x15f4] ss:$116 sps:$4 sm:$0xff]  }
 0xbcd   :  { %15093 = vmatpush1.bf16.msra.mxu0 %v20484_v35  ;;  %v20556_v35 = vld [vmem:[%s28272_s18 + $0x770] ss:$116 sps:$4 sm:$0xff]  }
 0xbce   :  { %15134 = vmatpush1.bf16.msra.mxu1 %v20487_v36  ;;  %15094 = vmatprep.subr.bf16.mxu0 %v20492_v3  ;;  %v26629_v36 = vsub.s32 6, %v21579_v43  ;;  %v20559_v3 = vld [vmem:[%s28272_s18 + $0x15f0] ss:$116 sps:$4 sm:$0xff]  }
 0xbcf   :  { %15135 = vmatprep.subr.bf16.mxu1 %v20495_v62  ;;  %v20564_v62 = vld [vmem:[%s28272_s18 + $0x694] ss:$116 sps:$4 sm:$0xff]  }
 0xbd1   :  { %15095 = vmatpush1.bf16.msra.mxu0 %v20490_v22  ;;  %v20567_v22 = vld [vmem:[%s28272_s18 + $0x1514] ss:$116 sps:$4 sm:$0xff]  }
 0xbd2   :  { %15136 = vmatpush1.bf16.msra.mxu1 %v20493_v23  ;;  %15096 = vmatprep.subr.bf16.mxu0 %v20498_v54  ;;  %v26641_v23 = vsub.s32 7, %v21579_v43  ;;  %v9804_v54 = vrot.slane %v26006_v40, %v26629_v36  ;;  %v20570_v43 = vld [vmem:[%s28272_s18 + $0x5ac] ss:$116 sps:$4 sm:$0xff]  }
 0xbd3   :  { %15137 = vmatprep.subr.bf16.mxu1 %v20501_v21  ;;  %v20562_v21 = vld [vmem:[%s28272_s18 + $0x690] ss:$116 sps:$4 sm:$0xff]  }
 0xbd5   :  { %15097 = vmatpush1.bf16.msra.mxu0 %v20496_v42  ;;  %v20565_v42 = vld [vmem:[%s28272_s18 + $0x1510] ss:$116 sps:$4 sm:$0xff]  }
 0xbd6   :  { %15138 = vmatpush1.bf16.msra.mxu1 %v20499_v38  ;;  %15098 = vmatprep.subr.bf16.mxu0 %v20504_v27  ;;  %v9808_v38 = vrot.slane %v26006_v40, %v26641_v23  ;;  %v20568_v40 = vld [vmem:[%s28272_s18 + $0x5a8] ss:$116 sps:$4 sm:$0xff]  }
 0xbd7   :  { %15139 = vmatprep.subr.bf16.mxu1 %v20507_v26  ;;  %v20573_v26 = vld [vmem:[%s28272_s18 + $0x142c] ss:$116 sps:$4 sm:$0xff]  }
 0xbd9   :  { %15099 = vmatpush1.bf16.msra.mxu0 %v20502_v28 }
 0xbda   :  { %15140 = vmatpush1.bf16.msra.mxu1 %v20505_v61  ;;  %15100 = vmatprep.subr.bf16.mxu0 %v20510_v7 }
 0xbdb   :  { %15141 = vmatprep.subr.bf16.mxu1 %v20513_v17  ;;  %v20571_v17 = vld [vmem:[%s28272_s18 + $0x1428] ss:$116 sps:$4 sm:$0xff]  }
 0xbdd   :  { %15101 = vmatpush1.bf16.msra.mxu0 %v20508_v37  ;;  %v20576_v37 = vld [vmem:[%s28272_s18 + $0x4c4] ss:$116 sps:$4 sm:$0xff]  }
 0xbde   :  { %15142 = vmatpush1.bf16.msra.mxu1 %v20511_v47  ;;  %15102 = vmatprep.subr.bf16.mxu0 %v20516_v14 }
 0xbdf   :  { %15143 = vmatprep.subr.bf16.mxu1 %v20519_v5  ;;  %v20579_v5 = vld [vmem:[%s28272_s18 + $0x1344] ss:$116 sps:$4 sm:$0xff]  }
 0xbe1   :  { %15103 = vmatpush2.bf16.msra.mxu0 %v20514_v41 }
 0xbe2   :  { %15144 = vmatpush2.bf16.msra.mxu1 %v20517_v46  ;;  %15104 = vmatprep.subr.bf16.mxu0 %v20522_v57 }
 0xbe3   :  { %15145 = vmatprep.subr.bf16.mxu1 %v20525_v19 }
 0xbe5   :  { %15105 = vmatpush2.bf16.msra.mxu0 %v20520_v32  ;;  %v20574_v32 = vld [vmem:[%s28272_s18 + $0x4c0] ss:$116 sps:$4 sm:$0xff]  }
 0xbe6   :  { %15146 = vmatpush2.bf16.msra.mxu1 %v20523_v9  ;;  %15106 = vmatprep.subr.bf16.mxu0 %v20528_v25  ;;  %v20577_v25 = vld [vmem:[%s28272_s18 + $0x1340] ss:$116 sps:$4 sm:$0xff]  }
 0xbe7   :  { %15147 = vmatprep.subr.bf16.mxu1 %v20531_v56  ;;  %v20582_v56 = vld [vmem:[%s28272_s18 + $0x3dc] ss:$116 sps:$4 sm:$0xff]  }
 0xbe9   :  { %15107 = vmatpush2.bf16.msra.mxu0 %v20526_v55 }
 0xbea   :  { %15148 = vmatpush2.bf16.msra.mxu1 %v20529_v4  ;;  %15108 = vmatprep.subr.bf16.mxu0 %v20534_v24  ;;  %v20585_v24 = vld [vmem:[%s28272_s18 + $0x125c] ss:$116 sps:$4 sm:$0xff]  }
 0xbeb   :  { %15149 = vmatprep.subr.bf16.mxu1 %v20537_v52  ;;  %v15876_v52 = vrot.slane %v15868_v15, %v21597_v49  ;;  %v20589_v15 = vld [vmem:[%s28272_s18 + $0x1170] ss:$116 sps:$4 sm:$0xff]  }
 0xbed   :  { %15109 = vmatpush2.bf16.msra.mxu0 %v20532_v30 }
 0xbee   :  { %15150 = vmatpush2.bf16.msra.mxu1 %v20535_v18  ;;  %15110 = vmatprep.subr.bf16.mxu0 %v20540_v12  ;;  %v20580_v18 = vld [vmem:[%s28272_s18 + $0x3d8] ss:$116 sps:$4 sm:$0xff]  }
 0xbef   :  { %15151 = vmatprep.subr.bf16.mxu1 %v20543_v53  ;;  %v20583_v12 = vld [vmem:[%s28272_s18 + $0x1258] ss:$116 sps:$4 sm:$0xff]   ;;  %v20588_v53 = vld [vmem:[%s28272_s18 + $0x2f4] ss:$116 sps:$4 sm:$0xff]  }
 0xbf1   :  { %15111 = vmatpush2.bf16.msra.mxu0 %v20538_v8 }
 0xbf2   :  { %15152 = vmatpush2.bf16.msra.mxu1 %v20541_v11  ;;  %15112 = vmatprep.subr.bf16.mxu0 %v20546_v58  ;;  %v20594_v11 = vld [vmem:[%s28272_s18 + $0x20c] ss:$116 sps:$4 sm:$0xff]  }
 0xbf3   :  { %15153 = vmatprep.subr.bf16.mxu1 %v20549_v45  ;;  %v20597_v58 = vld [vmem:[%s28272_s18 + $0x108c] ss:$116 sps:$4 sm:$0xff]   ;;  %v20592_v45 = vld [vmem:[%s28272_s18 + $0x208] ss:$116 sps:$4 sm:$0xff]  }
 0xbf5   :  { %15113 = vmatpush2.bf16.msra.mxu0 %v20544_v48  ;;  %v20595_v48 = vld [vmem:[%s28272_s18 + $0x1088] ss:$116 sps:$4 sm:$0xff]  }
 0xbf6   :  { %15154 = vmatpush2.bf16.msra.mxu1 %v20547_v39  ;;  %15114 = vmatprep.subr.bf16.mxu0 %v20552_v31  ;;  %v20600_v39 = vld [vmem:[%s28272_s18 + $0x124] ss:$116 sps:$4 sm:$0xff]  }
 0xbf7   :  { %15155 = vmatprep.subr.bf16.mxu1 %v20555_v16  ;;  %v20603_v31 = vld [vmem:[%s28272_s18 + $0xfa4] ss:$116 sps:$4 sm:$0xff]   ;;  %v20598_v16 = vld [vmem:[%s28272_s18 + $0x120] ss:$116 sps:$4 sm:$0xff]  }
 0xbf9   :  { %15115 = vmatpush2.bf16.msra.mxu0 %v20550_v44  ;;  %v20601_v44 = vld [vmem:[%s28272_s18 + $0xfa0] ss:$116 sps:$4 sm:$0xff]  }
 0xbfa   :  { %15156 = vmatpush2.bf16.msra.mxu1 %v20553_v13  ;;  %15116 = vmatprep.subr.bf16.mxu0 %v20558_v59  ;;  %v20606_v13 = vld [vmem:[%s28272_s18 + $0x3c] ss:$116 sps:$4 sm:$0xff]  }
 0xbfb   :  { %15157 = vmatprep.subr.bf16.mxu1 %v20561_v63  ;;  %v20609_v59 = vld [vmem:[%s28272_s18 + $0xebc] ss:$116 sps:$4 sm:$0xff]   ;;  %v20604_v63 = vld [vmem:[%s28272_s18 + $0x38] ss:$116 sps:$4 sm:$0xff]  }
 0xbfd   :  { %15117 = vmatpush2.bf16.msra.mxu0 %v20556_v35  ;;  %v20607_v35 = vld [vmem:[%s28272_s18 + $0xeb8] ss:$116 sps:$4 sm:$0xff]  }
 0xbfe   :  { %15158 = vmatpush2.bf16.msra.mxu1 %v20559_v3  ;;  %15168 = vmatprep.subr.bf16.mxu0 %v20564_v62  ;;  %v20612_v3 = vld [vmem:[%s28272_s18 + $0xdd4] ss:$116 sps:$4 sm:$0xff]  }
 0xbff   :  { %15209 = vmatprep.subr.bf16.mxu1 %v20567_v22  ;;  %v20615_v62 = vld [vmem:[%s28272_s18 + $0x1c54] ss:$116 sps:$4 sm:$0xff]   ;;  %v20610_v22 = vld [vmem:[%s28272_s18 + $0xdd0] ss:$116 sps:$4 sm:$0xff]  }
 0xc00   :  { %v14874_v27 = vpop.f32.mrf.mxu0  ;;  %15119 = vmatmul.mubr.bf16.vlgmr.msra.gmra.mxu0 %v25418_v6 }
 0xc01   :  { %v14875_v28 = vadd.f32 %v14874_v27, %v9804_v54  ;;  %v14915_v61 = vpop.f32.mrf.mxu1  ;;  %15160 = vmatmul.mubr.bf16.vlgmr.msra.gmra.mxu1 %v25420_v20  ;;  %15169 = vmatpush1.bf16.msra.mxu0 %v20562_v21  ;;  %v20613_v54 = vld [vmem:[%s28272_s18 + $0x1c50] ss:$116 sps:$4 sm:$0xff]   ;;  %v20618_v21 = vld [vmem:[%s28272_s18 + $0xcec] ss:$116 sps:$4 sm:$0xff]  }
 0xc02   :  { %15200 = vmatprep.mubr.bf16.mxu0 %v25408_v2  ;;  %15210 = vmatpush1.bf16.msra.mxu1 %v20565_v42  ;;  %v14876_v7 = vpop.f32.mrf.mxu0  ;;  %v20621_v42 = vld [vmem:[%s28272_s18 + $0x1b6c] ss:$116 sps:$4 sm:$0xff]   ;;  %v20624_v27 = vld [vmem:[%s28272_s18 + $0xc04] ss:$116 sps:$4 sm:$0xff]  }
 0xc03   :  { %15241 = vmatprep.mubr.bf16.mxu1 %v25410_v60  ;;  %v14877_v47 = vadd.f32 %v14876_v7, %v9808_v38  ;;  %v14917_v14 = vpop.f32.mrf.mxu1  ;;  %15170 = vmatprep.subr.bf16.mxu0 %v20570_v43  ;;  %v14916_v46 = vadd.f32 %v14915_v61, %v14875_v28  ;;  %v20616_v38 = vld [vmem:[%s28272_s18 + $0xce8] ss:$116 sps:$4 sm:$0xff]   ;;  %v20622_v28 = vld [vmem:[%s28272_s18 + $0xc00] ss:$116 sps:$4 sm:$0xff]  }
 0xc04   :  { %v14878_v41 = vpop.f32.mrf.mxu0  ;;  %15211 = vmatprep.subr.bf16.mxu1 %v20573_v26  ;;  %v20619_v43 = vld [vmem:[%s28272_s18 + $0x1b68] ss:$116 sps:$4 sm:$0xff]   ;;  %v20627_v26 = vld [vmem:[%s28272_s18 + $0x1a84] ss:$116 sps:$4 sm:$0xff]   ;;  %v20625_v61 = vld [vmem:[%s28272_s18 + $0x1a80] ss:$116 sps:$4 sm:$0xff]  }
 0xc05   :  { %v14918_v57 = vadd.f32 %v14917_v14, %v14877_v47  ;;  %v14919_v19 = vpop.f32.mrf.mxu1  ;;  %15171 = vmatpush1.bf16.msra.mxu0 %v20568_v40  ;;  %v20630_v40 = vld [vmem:[%s28272_s18 + $0xb1c] ss:$116 sps:$4 sm:$0xff]   ;;  %v20636_v47 = vld [vmem:[%s28272_s18 + $0xa34] ss:$116 sps:$4 sm:$0xff]  }
 0xc06   :  { %15212 = vmatpush1.bf16.msra.mxu1 %v20571_v17  ;;  %v14879_v9 = vpop.f32.mrf.mxu0  ;;  %15172 = vmatprep.subr.bf16.mxu0 %v20576_v37  ;;  %v20633_v7 = vld [vmem:[%s28272_s18 + $0x199c] ss:$116 sps:$4 sm:$0xff]   ;;  %v20628_v17 = vld [vmem:[%s28272_s18 + $0xb18] ss:$116 sps:$4 sm:$0xff]   ;;  %v20639_v14 = vld [vmem:[%s28272_s18 + $0x18b4] ss:$116 sps:$4 sm:$0xff]  }
 0xc07   :  { %v15869_v55 = vcombine.low %v14916_v46, %v14918_v57  ;;  %v14920_v4 = vpop.f32.mrf.mxu1  ;;  %15213 = vmatprep.subr.bf16.mxu1 %v20579_v5  ;;  %v20631_v37 = vld [vmem:[%s28272_s18 + $0x1998] ss:$116 sps:$4 sm:$0xff]   ;;  %v20634_v5 = vld [vmem:[%s28272_s18 + $0xa30] ss:$116 sps:$4 sm:$0xff]   ;;  %v20640_v19 = vld [vmem:[%s28272_s18 + $0x948] ss:$116 sps:$4 sm:$0xff]  }
 0xc08   :  { %v20637_v41 = vld [vmem:[%s28272_s18 + $0x18b0] ss:$116 sps:$4 sm:$0xff]   ;;  %v20642_v46 = vld [vmem:[%s28272_s18 + $0x94c] ss:$116 sps:$4 sm:$0xff]  }
 0xc09   :  { %v15883_v30 = vrot.slane %v15869_v55, %v21597_v49  ;;  %15173 = vmatpush1.bf16.msra.mxu0 %v20574_v32  ;;  %v20645_v57 = vld [vmem:[%s28272_s18 + $0x17cc] ss:$116 sps:$4 sm:$0xff]   ;;  %v20643_v32 = vld [vmem:[%s28272_s18 + $0x17c8] ss:$116 sps:$4 sm:$0xff]   ;;  %v20648_v9 = vld [vmem:[%s28272_s18 + $0x864] ss:$116 sps:$4 sm:$0xff]  }
 0xc0a   :  { %15214 = vmatpush1.bf16.msra.mxu1 %v20577_v25  ;;  %15174 = vmatprep.subr.bf16.mxu0 %v20582_v56  ;;  %v20651_v25 = vld [vmem:[%s28272_s18 + $0x16e4] ss:$116 sps:$4 sm:$0xff]   ;;  %v20646_v56 = vld [vmem:[%s28272_s18 + $0x860] ss:$116 sps:$4 sm:$0xff]   ;;  %v20654_v4 = vld [vmem:[%s28272_s18 + $0x77c] ss:$116 sps:$4 sm:$0xff]  }
 0xc0b   :  { %v15884_v8 = vcombine.low %v15876_v52, %v15883_v30  ;;  %15215 = vmatprep.subr.bf16.mxu1 %v20585_v24  ;;  %v20649_v55 = vld [vmem:[%s28272_s18 + $0x16e0] ss:$116 sps:$4 sm:$0xff]   ;;  %v20657_v24 = vld [vmem:[%s28272_s18 + $0x15fc] ss:$116 sps:$4 sm:$0xff]   ;;  %v20652_v52 = vld [vmem:[%s28272_s18 + $0x778] ss:$116 sps:$4 sm:$0xff]  }
 0xc0c   :  { %v20655_v30 = vld [vmem:[%s28272_s18 + $0x15f8] ss:$116 sps:$4 sm:$0xff]  }
 0xc0d   :  { %15986 = vst [vmem:[%s28277_s23 + $0x8] sm:$0xff] %v15884_v8  ;;  %15175 = vmatpush1.bf16.msra.mxu0 %v20580_v18  ;;  %v26848_v18 = vld [vmem:[%s28273_s19 + $0x8] sm:$0xff] }
 0xc0e   :  { %15216 = vmatpush1.bf16.msra.mxu1 %v20583_v12  ;;  %15176 = vmatprep.subr.bf16.mxu0 %v20588_v53  ;;  %v20660_v12 = vld [vmem:[%s28272_s18 + $0x69c] ss:$116 sps:$4 sm:$0xff]   ;;  %v9812_v8 = vrot.slane %v26848_v18, %v22342_v29 }
 0xc0f   :  { %15217 = vmatprep.subr.bf16.mxu1 %v20591_v1  ;;  %v20663_v53 = vld [vmem:[%s28272_s18 + $0x151c] ss:$116 sps:$4 sm:$0xff]   ;;  %v20658_v1 = vld [vmem:[%s28272_s18 + $0x698] ss:$116 sps:$4 sm:$0xff]  }
 0xc11   :  { %15177 = vmatpush1.bf16.msra.mxu0 %v20586_v0  ;;  %v20661_v0 = vld [vmem:[%s28272_s18 + $0x1518] ss:$116 sps:$4 sm:$0xff]  }
 0xc12   :  { %15218 = vmatpush1.bf16.msra.mxu1 %v20589_v15  ;;  %15178 = vmatprep.subr.bf16.mxu0 %v20594_v11  ;;  %v9816_v15 = vrot.slane %v26848_v18, %v22351_v34  ;;  %v20666_v11 = vld [vmem:[%s28272_s18 + $0x5b4] ss:$116 sps:$4 sm:$0xff]  }
 0xc13   :  { %15219 = vmatprep.subr.bf16.mxu1 %v20597_v58 }
 0xc15   :  { %15179 = vmatpush1.bf16.msra.mxu0 %v20592_v45  ;;  %v20669_v45 = vld [vmem:[%s28272_s18 + $0x1434] ss:$116 sps:$4 sm:$0xff]  }
 0xc16   :  { %15220 = vmatpush1.bf16.msra.mxu1 %v20595_v48  ;;  %15180 = vmatprep.subr.bf16.mxu0 %v20600_v39 }
 0xc17   :  { %15221 = vmatprep.subr.bf16.mxu1 %v20603_v31  ;;  %v20664_v31 = vld [vmem:[%s28272_s18 + $0x5b0] ss:$116 sps:$4 sm:$0xff]  }
 0xc19   :  { %15181 = vmatpush1.bf16.msra.mxu0 %v20598_v16 }
 0xc1a   :  { %15222 = vmatpush1.bf16.msra.mxu1 %v20601_v44  ;;  %15182 = vmatprep.subr.bf16.mxu0 %v20606_v13  ;;  %v20667_v44 = vld [vmem:[%s28272_s18 + $0x1430] ss:$116 sps:$4 sm:$0xff]   ;;  %v20672_v13 = vld [vmem:[%s28272_s18 + $0x4cc] ss:$116 sps:$4 sm:$0xff]  }
 0xc1b   :  { %15223 = vmatprep.subr.bf16.mxu1 %v20609_v59 }
 0xc1d   :  { %15183 = vmatpush1.bf16.msra.mxu0 %v20604_v63 }
 0xc1e   :  { %15224 = vmatpush1.bf16.msra.mxu1 %v20607_v35  ;;  %15184 = vmatprep.subr.bf16.mxu0 %v20612_v3  ;;  %v20675_v3 = vld [vmem:[%s28272_s18 + $0x134c] ss:$116 sps:$4 sm:$0xff]  }
 0xc1f   :  { %15225 = vmatprep.subr.bf16.mxu1 %v20615_v62 }
 0xc21   :  { %15185 = vmatpush2.bf16.msra.mxu0 %v20610_v22 }
 0xc22   :  { %15226 = vmatpush2.bf16.msra.mxu1 %v20613_v54  ;;  %15186 = vmatprep.subr.bf16.mxu0 %v20618_v21  ;;  %v20670_v21 = vld [vmem:[%s28272_s18 + $0x4c8] ss:$116 sps:$4 sm:$0xff]  }
 0xc23   :  { %15227 = vmatprep.subr.bf16.mxu1 %v20621_v42 }
 0xc25   :  { %15187 = vmatpush2.bf16.msra.mxu0 %v20616_v38  ;;  %v20673_v38 = vld [vmem:[%s28272_s18 + $0x1348] ss:$116 sps:$4 sm:$0xff]  }
 0xc26   :  { %15228 = vmatpush2.bf16.msra.mxu1 %v20619_v43  ;;  %15188 = vmatprep.subr.bf16.mxu0 %v20624_v27  ;;  %v20678_v43 = vld [vmem:[%s28272_s18 + $0x3e4] ss:$116 sps:$4 sm:$0xff]  }
 0xc27   :  { %15229 = vmatprep.subr.bf16.mxu1 %v20627_v26 }
 0xc29   :  { %15189 = vmatpush2.bf16.msra.mxu0 %v20622_v28  ;;  %v20681_v28 = vld [vmem:[%s28272_s18 + $0x1264] ss:$116 sps:$4 sm:$0xff]  }
 0xc2a   :  { %15230 = vmatpush2.bf16.msra.mxu1 %v20625_v61  ;;  %15190 = vmatprep.subr.bf16.mxu0 %v20630_v40  ;;  %v20676_v61 = vld [vmem:[%s28272_s18 + $0x3e0] ss:$116 sps:$4 sm:$0xff]  }
 0xc2b   :  { %15231 = vmatprep.subr.bf16.mxu1 %v20633_v7  ;;  %v20679_v40 = vld [vmem:[%s28272_s18 + $0x1260] ss:$116 sps:$4 sm:$0xff]   ;;  %v20684_v7 = vld [vmem:[%s28272_s18 + $0x2fc] ss:$116 sps:$4 sm:$0xff]  }
 0xc2d   :  { %15191 = vmatpush2.bf16.msra.mxu0 %v20628_v17  ;;  %v20687_v17 = vld [vmem:[%s28272_s18 + $0x117c] ss:$116 sps:$4 sm:$0xff]  }
 0xc2e   :  { %15232 = vmatpush2.bf16.msra.mxu1 %v20631_v37  ;;  %15192 = vmatprep.subr.bf16.mxu0 %v20636_v47  ;;  %v20682_v37 = vld [vmem:[%s28272_s18 + $0x2f8] ss:$116 sps:$4 sm:$0xff]  }
 0xc2f   :  { %15233 = vmatprep.subr.bf16.mxu1 %v20639_v14  ;;  %v20685_v47 = vld [vmem:[%s28272_s18 + $0x1178] ss:$116 sps:$4 sm:$0xff]   ;;  %v20690_v14 = vld [vmem:[%s28272_s18 + $0x214] ss:$116 sps:$4 sm:$0xff]  }
 0xc31   :  { %15193 = vmatpush2.bf16.msra.mxu0 %v20634_v5  ;;  %v20693_v5 = vld [vmem:[%s28272_s18 + $0x1094] ss:$116 sps:$4 sm:$0xff]  }
 0xc32   :  { %15234 = vmatpush2.bf16.msra.mxu1 %v20637_v41  ;;  %15194 = vmatprep.subr.bf16.mxu0 %v20642_v46  ;;  %v20688_v41 = vld [vmem:[%s28272_s18 + $0x210] ss:$116 sps:$4 sm:$0xff]  }
 0xc33   :  { %15235 = vmatprep.subr.bf16.mxu1 %v20645_v57  ;;  %v20691_v46 = vld [vmem:[%s28272_s18 + $0x1090] ss:$116 sps:$4 sm:$0xff]   ;;  %v20696_v57 = vld [vmem:[%s28272_s18 + $0x12c] ss:$116 sps:$4 sm:$0xff]  }
 0xc35   :  { %15195 = vmatpush2.bf16.msra.mxu0 %v20640_v19  ;;  %v20699_v19 = vld [vmem:[%s28272_s18 + $0xfac] ss:$116 sps:$4 sm:$0xff]  }
 0xc36   :  { %15236 = vmatpush2.bf16.msra.mxu1 %v20643_v32  ;;  %15196 = vmatprep.subr.bf16.mxu0 %v20648_v9  ;;  %v20694_v32 = vld [vmem:[%s28272_s18 + $0x128] ss:$116 sps:$4 sm:$0xff]  }
 0xc37   :  { %15237 = vmatprep.subr.bf16.mxu1 %v20651_v25  ;;  %v20697_v9 = vld [vmem:[%s28272_s18 + $0xfa8] ss:$116 sps:$4 sm:$0xff]   ;;  %v20702_v25 = vld [vmem:[%s28272_s18 + $0x44] ss:$116 sps:$4 sm:$0xff]  }
 0xc39   :  { %15197 = vmatpush2.bf16.msra.mxu0 %v20646_v56  ;;  %v20705_v56 = vld [vmem:[%s28272_s18 + $0xec4] ss:$116 sps:$4 sm:$0xff]  }
 0xc3a   :  { %15238 = vmatpush2.bf16.msra.mxu1 %v20649_v55  ;;  %15198 = vmatprep.subr.bf16.mxu0 %v20654_v4  ;;  %v20700_v55 = vld [vmem:[%s28272_s18 + $0x40] ss:$116 sps:$4 sm:$0xff]  }
 0xc3b   :  { %15239 = vmatprep.subr.bf16.mxu1 %v20657_v24  ;;  %v20703_v4 = vld [vmem:[%s28272_s18 + $0xec0] ss:$116 sps:$4 sm:$0xff]   ;;  %v20708_v24 = vld [vmem:[%s28272_s18 + $0xddc] ss:$116 sps:$4 sm:$0xff]  }
 0xc3d   :  { %15199 = vmatpush2.bf16.msra.mxu0 %v20652_v52  ;;  %v20711_v52 = vld [vmem:[%s28272_s18 + $0x1c5c] ss:$116 sps:$4 sm:$0xff]  }
 0xc3e   :  { %15240 = vmatpush2.bf16.msra.mxu1 %v20655_v30  ;;  %15250 = vmatprep.subr.bf16.mxu0 %v20660_v12  ;;  %v20706_v30 = vld [vmem:[%s28272_s18 + $0xdd8] ss:$116 sps:$4 sm:$0xff]  }
 0xc3f   :  { %15291 = vmatprep.subr.bf16.mxu1 %v20663_v53  ;;  %v20709_v12 = vld [vmem:[%s28272_s18 + $0x1c58] ss:$116 sps:$4 sm:$0xff]   ;;  %v20714_v53 = vld [vmem:[%s28272_s18 + $0xcf4] ss:$116 sps:$4 sm:$0xff]  }
 0xc40   :  { %v14956_v58 = vpop.f32.mrf.mxu0  ;;  %15201 = vmatmul.mubr.bf16.vlgmr.msra.gmra.mxu0 %v25418_v6 }
 0xc41   :  { %v14957_v48 = vadd.f32 %v14956_v58, %v9812_v8  ;;  %v14997_v39 = vpop.f32.mrf.mxu1  ;;  %15242 = vmatmul.mubr.bf16.vlgmr.msra.gmra.mxu1 %v25420_v20  ;;  %15251 = vmatpush1.bf16.msra.mxu0 %v20658_v1  ;;  %v20717_v8 = vld [vmem:[%s28272_s18 + $0x1b74] ss:$116 sps:$4 sm:$0xff]   ;;  %v20712_v1 = vld [vmem:[%s28272_s18 + $0xcf0] ss:$116 sps:$4 sm:$0xff]  }
 0xc42   :  { %15282 = vmatprep.mubr.bf16.mxu0 %v25408_v2  ;;  %15292 = vmatpush1.bf16.msra.mxu1 %v20661_v0  ;;  %v14958_v16 = vpop.f32.mrf.mxu0  ;;  %v20715_v0 = vld [vmem:[%s28272_s18 + $0x1b70] ss:$116 sps:$4 sm:$0xff]   ;;  %v20718_v58 = vld [vmem:[%s28272_s18 + $0xc08] ss:$116 sps:$4 sm:$0xff]  }
 0xc43   :  { %v26884_v59 = vadd.f32 %v14997_v39, %v14957_v48  ;;  %15323 = vmatprep.mubr.bf16.mxu1 %v25410_v60  ;;  %v14959_v63 = vadd.f32 %v14958_v16, %v9816_v15  ;;  %v14999_v35 = vpop.f32.mrf.mxu1  ;;  %15252 = vmatprep.subr.bf16.mxu0 %v20666_v11  ;;  %v20720_v15 = vld [vmem:[%s28272_s18 + $0xc0c] ss:$116 sps:$4 sm:$0xff]   ;;  %v20726_v48 = vld [vmem:[%s28272_s18 + $0xb24] ss:$116 sps:$4 sm:$0xff]  }
 0xc44   :  { %v14960_v62 = vpop.f32.mrf.mxu0  ;;  %15293 = vmatprep.subr.bf16.mxu1 %v20669_v45  ;;  %v20723_v11 = vld [vmem:[%s28272_s18 + $0x1a8c] ss:$116 sps:$4 sm:$0xff]   ;;  %v20721_v45 = vld [vmem:[%s28272_s18 + $0x1a88] ss:$116 sps:$4 sm:$0xff]   ;;  %v20729_v39 = vld [vmem:[%s28272_s18 + $0x19a4] ss:$116 sps:$4 sm:$0xff]  }
 0xc45   :  { %v26890_v22 = vadd.f32 %v14999_v35, %v14959_v63  ;;  %v15001_v54 = vpop.f32.mrf.mxu1  ;;  %15253 = vmatpush1.bf16.msra.mxu0 %v20664_v31  ;;  %v20724_v31 = vld [vmem:[%s28272_s18 + $0xb20] ss:$116 sps:$4 sm:$0xff]   ;;  %v20730_v63 = vld [vmem:[%s28272_s18 + $0xa38] ss:$116 sps:$4 sm:$0xff]  }
 0xc46   :  { %15294 = vmatpush1.bf16.msra.mxu1 %v20667_v44  ;;  %v14961_v42 = vpop.f32.mrf.mxu0  ;;  %15254 = vmatprep.subr.bf16.mxu0 %v20672_v13  ;;  %v20727_v16 = vld [vmem:[%s28272_s18 + $0x19a0] ss:$116 sps:$4 sm:$0xff]   ;;  %v20732_v44 = vld [vmem:[%s28272_s18 + $0xa3c] ss:$116 sps:$4 sm:$0xff]   ;;  %v20733_v35 = vld [vmem:[%s28272_s18 + $0x18b8] ss:$116 sps:$4 sm:$0xff]  }
 0xc47   :  { %v15885_v27 = vcombine.low %v26884_v59, %v26890_v22  ;;  %v15002_v26 = vpop.f32.mrf.mxu1  ;;  %15295 = vmatprep.subr.bf16.mxu1 %v20675_v3  ;;  %v20735_v13 = vld [vmem:[%s28272_s18 + $0x18bc] ss:$116 sps:$4 sm:$0xff]   ;;  %v20738_v3 = vld [vmem:[%s28272_s18 + $0x954] ss:$116 sps:$4 sm:$0xff]   ;;  %v20744_v42 = vld [vmem:[%s28272_s18 + $0x86c] ss:$116 sps:$4 sm:$0xff]  }
 0xc48   :  { %v20741_v62 = vld [vmem:[%s28272_s18 + $0x17d4] ss:$116 sps:$4 sm:$0xff]   ;;  %v20736_v54 = vld [vmem:[%s28272_s18 + $0x950] ss:$116 sps:$4 sm:$0xff]  }
 0xc49   :  { %15255 = vmatpush1.bf16.msra.mxu0 %v20670_v21  ;;  %v20739_v21 = vld [vmem:[%s28272_s18 + $0x17d0] ss:$116 sps:$4 sm:$0xff]   ;;  %v20745_v26 = vld [vmem:[%s28272_s18 + $0x16e8] ss:$116 sps:$4 sm:$0xff]   ;;  %v20778_v22 = vld [vmem:[%s28272_s18 + $0x300] ss:$116 sps:$4 sm:$0xff]  }
 0xc4a   :  { %15296 = vmatpush1.bf16.msra.mxu1 %v20673_v38  ;;  %15256 = vmatprep.subr.bf16.mxu0 %v20678_v43  ;;  %v20747_v38 = vld [vmem:[%s28272_s18 + $0x16ec] ss:$116 sps:$4 sm:$0xff]   ;;  %v20742_v43 = vld [vmem:[%s28272_s18 + $0x868] ss:$116 sps:$4 sm:$0xff]   ;;  %v20783_v59 = vld [vmem:[%s28272_s18 + $0x1184] ss:$116 sps:$4 sm:$0xff]  }
 0xc4b   :  { %15297 = vmatprep.subr.bf16.mxu1 %v20681_v28  ;;  %v20750_v28 = vld [vmem:[%s28272_s18 + $0x784] ss:$116 sps:$4 sm:$0xff]  }
 0xc4d   :  { %15257 = vmatpush1.bf16.msra.mxu0 %v20676_v61  ;;  %v20753_v61 = vld [vmem:[%s28272_s18 + $0x1604] ss:$116 sps:$4 sm:$0xff]  }
 0xc4e   :  { %15298 = vmatpush1.bf16.msra.mxu1 %v20679_v40  ;;  %15258 = vmatprep.subr.bf16.mxu0 %v20684_v7  ;;  %v20748_v40 = vld [vmem:[%s28272_s18 + $0x780] ss:$116 sps:$4 sm:$0xff]  }
 0xc4f   :  { %15299 = vmatprep.subr.bf16.mxu1 %v20687_v17  ;;  %v20751_v7 = vld [vmem:[%s28272_s18 + $0x1600] ss:$116 sps:$4 sm:$0xff]   ;;  %v20756_v17 = vld [vmem:[%s28272_s18 + $0x6a4] ss:$116 sps:$4 sm:$0xff]  }
 0xc51   :  { %15259 = vmatpush1.bf16.msra.mxu0 %v20682_v37  ;;  %v20759_v37 = vld [vmem:[%s28272_s18 + $0x1524] ss:$116 sps:$4 sm:$0xff]  }
 0xc52   :  { %15300 = vmatpush1.bf16.msra.mxu1 %v20685_v47  ;;  %15260 = vmatprep.subr.bf16.mxu0 %v20690_v14  ;;  %v9820_v47 = vrot.slane %v26848_v18, %v23928_v50  ;;  %v20754_v14 = vld [vmem:[%s28272_s18 + $0x6a0] ss:$116 sps:$4 sm:$0xff]  }
 0xc53   :  { %15301 = vmatprep.subr.bf16.mxu1 %v20693_v5  ;;  %v20757_v5 = vld [vmem:[%s28272_s18 + $0x1520] ss:$116 sps:$4 sm:$0xff]  }
 0xc55   :  { %15261 = vmatpush1.bf16.msra.mxu0 %v20688_v41  ;;  %v9824_v41 = vrot.slane %v26848_v18, %v23931_v51 }
 0xc56   :  { %15302 = vmatpush1.bf16.msra.mxu1 %v20691_v46  ;;  %15262 = vmatprep.subr.bf16.mxu0 %v20696_v57  ;;  %v20762_v46 = vld [vmem:[%s28272_s18 + $0x5bc] ss:$116 sps:$4 sm:$0xff]  }
 0xc57   :  { %15303 = vmatprep.subr.bf16.mxu1 %v20699_v19  ;;  %v20765_v19 = vld [vmem:[%s28272_s18 + $0x143c] ss:$116 sps:$4 sm:$0xff]  }
 0xc59   :  { %15263 = vmatpush1.bf16.msra.mxu0 %v20694_v32 }
 0xc5a   :  { %15304 = vmatpush1.bf16.msra.mxu1 %v20697_v9  ;;  %15264 = vmatprep.subr.bf16.mxu0 %v20702_v25  ;;  %v20760_v25 = vld [vmem:[%s28272_s18 + $0x5b8] ss:$116 sps:$4 sm:$0xff]  }
 0xc5b   :  { %15305 = vmatprep.subr.bf16.mxu1 %v20705_v56 }
 0xc5d   :  { %15265 = vmatpush1.bf16.msra.mxu0 %v20700_v55  ;;  %v20763_v55 = vld [vmem:[%s28272_s18 + $0x1438] ss:$116 sps:$4 sm:$0xff]  }
 0xc5e   :  { %15306 = vmatpush1.bf16.msra.mxu1 %v20703_v4  ;;  %15266 = vmatprep.subr.bf16.mxu0 %v20708_v24  ;;  %v20768_v4 = vld [vmem:[%s28272_s18 + $0x4d4] ss:$116 sps:$4 sm:$0xff]  }
 0xc5f   :  { %15307 = vmatprep.subr.bf16.mxu1 %v20711_v52 }
 0xc61   :  { %15267 = vmatpush2.bf16.msra.mxu0 %v20706_v30  ;;  %v20771_v30 = vld [vmem:[%s28272_s18 + $0x1354] ss:$116 sps:$4 sm:$0xff]  }
 0xc62   :  { %15308 = vmatpush2.bf16.msra.mxu1 %v20709_v12  ;;  %15268 = vmatprep.subr.bf16.mxu0 %v20714_v53 }
 0xc63   :  { %15309 = vmatprep.subr.bf16.mxu1 %v20717_v8 }
 0xc65   :  { %15269 = vmatpush2.bf16.msra.mxu0 %v20712_v1 }
 0xc66   :  { %15310 = vmatpush2.bf16.msra.mxu1 %v20715_v0  ;;  %15270 = vmatprep.subr.bf16.mxu0 %v20720_v15  ;;  %v20766_v0 = vld [vmem:[%s28272_s18 + $0x4d0] ss:$116 sps:$4 sm:$0xff]  }
 0xc67   :  { %15311 = vmatprep.subr.bf16.mxu1 %v20723_v11  ;;  %v20769_v11 = vld [vmem:[%s28272_s18 + $0x1350] ss:$116 sps:$4 sm:$0xff]  }
 0xc69   :  { %15271 = vmatpush2.bf16.msra.mxu0 %v20718_v58  ;;  %v20774_v58 = vld [vmem:[%s28272_s18 + $0x3ec] ss:$116 sps:$4 sm:$0xff]  }
 0xc6a   :  { %15312 = vmatpush2.bf16.msra.mxu1 %v20721_v45  ;;  %15272 = vmatprep.subr.bf16.mxu0 %v20726_v48 }
 0xc6b   :  { %15313 = vmatprep.subr.bf16.mxu1 %v20729_v39  ;;  %v20777_v39 = vld [vmem:[%s28272_s18 + $0x126c] ss:$116 sps:$4 sm:$0xff]  }
 0xc6d   :  { %15273 = vmatpush2.bf16.msra.mxu0 %v20724_v31  ;;  %v15893_v31 = vrot.slane %v15885_v27, %v21597_v49  ;;  %v20781_v27 = vld [vmem:[%s28272_s18 + $0x1180] ss:$116 sps:$4 sm:$0xff]  }
 0xc6e   :  { %15314 = vmatpush2.bf16.msra.mxu1 %v20727_v16  ;;  %15274 = vmatprep.subr.bf16.mxu0 %v20732_v44  ;;  %v20772_v44 = vld [vmem:[%s28272_s18 + $0x3e8] ss:$116 sps:$4 sm:$0xff]  }
 0xc6f   :  { %15315 = vmatprep.subr.bf16.mxu1 %v20735_v13  ;;  %v20775_v13 = vld [vmem:[%s28272_s18 + $0x1268] ss:$116 sps:$4 sm:$0xff]  }
 0xc71   :  { %15275 = vmatpush2.bf16.msra.mxu0 %v20730_v63  ;;  %v20780_v63 = vld [vmem:[%s28272_s18 + $0x304] ss:$116 sps:$4 sm:$0xff]  }
 0xc72   :  { %15316 = vmatpush2.bf16.msra.mxu1 %v20733_v35  ;;  %15276 = vmatprep.subr.bf16.mxu0 %v20738_v3  ;;  %v20786_v3 = vld [vmem:[%s28272_s18 + $0x21c] ss:$116 sps:$4 sm:$0xff]  }
 0xc73   :  { %15317 = vmatprep.subr.bf16.mxu1 %v20741_v62  ;;  %v20789_v62 = vld [vmem:[%s28272_s18 + $0x109c] ss:$116 sps:$4 sm:$0xff]  }
 0xc75   :  { %15277 = vmatpush2.bf16.msra.mxu0 %v20736_v54  ;;  %v20784_v54 = vld [vmem:[%s28272_s18 + $0x218] ss:$116 sps:$4 sm:$0xff]  }
 0xc76   :  { %15318 = vmatpush2.bf16.msra.mxu1 %v20739_v21  ;;  %15278 = vmatprep.subr.bf16.mxu0 %v20744_v42  ;;  %v20787_v21 = vld [vmem:[%s28272_s18 + $0x1098] ss:$116 sps:$4 sm:$0xff]   ;;  %v20792_v42 = vld [vmem:[%s28272_s18 + $0x134] ss:$116 sps:$4 sm:$0xff]  }
 0xc77   :  { %15319 = vmatprep.subr.bf16.mxu1 %v20747_v38  ;;  %v20795_v38 = vld [vmem:[%s28272_s18 + $0xfb4] ss:$116 sps:$4 sm:$0xff]  }
 0xc79   :  { %15279 = vmatpush2.bf16.msra.mxu0 %v20742_v43  ;;  %v20790_v43 = vld [vmem:[%s28272_s18 + $0x130] ss:$116 sps:$4 sm:$0xff]  }
 0xc7a   :  { %15320 = vmatpush2.bf16.msra.mxu1 %v20745_v26  ;;  %15280 = vmatprep.subr.bf16.mxu0 %v20750_v28  ;;  %v20793_v26 = vld [vmem:[%s28272_s18 + $0xfb0] ss:$116 sps:$4 sm:$0xff]   ;;  %v20798_v28 = vld [vmem:[%s28272_s18 + $0x4c] ss:$116 sps:$4 sm:$0xff]  }
 0xc7b   :  { %15321 = vmatprep.subr.bf16.mxu1 %v20753_v61  ;;  %v20801_v61 = vld [vmem:[%s28272_s18 + $0xecc] ss:$116 sps:$4 sm:$0xff]  }
 0xc7d   :  { %15281 = vmatpush2.bf16.msra.mxu0 %v20748_v40  ;;  %v20796_v40 = vld [vmem:[%s28272_s18 + $0x48] ss:$116 sps:$4 sm:$0xff]  }
 0xc7e   :  { %15322 = vmatpush2.bf16.msra.mxu1 %v20751_v7  ;;  %15332 = vmatprep.subr.bf16.mxu0 %v20756_v17  ;;  %v20799_v7 = vld [vmem:[%s28272_s18 + $0xec8] ss:$116 sps:$4 sm:$0xff]   ;;  %v20804_v17 = vld [vmem:[%s28272_s18 + $0xde4] ss:$116 sps:$4 sm:$0xff]  }
 0xc7f   :  { %15373 = vmatprep.subr.bf16.mxu1 %v20759_v37  ;;  %v20807_v37 = vld [vmem:[%s28272_s18 + $0x1c64] ss:$116 sps:$4 sm:$0xff]  }
 0xc80   :  { %v15038_v57 = vpop.f32.mrf.mxu0  ;;  %15283 = vmatmul.mubr.bf16.vlgmr.msra.gmra.mxu0 %v25418_v6 }
 0xc81   :  { %v15039_v32 = vadd.f32 %v15038_v57, %v9820_v47  ;;  %v15079_v9 = vpop.f32.mrf.mxu1  ;;  %15324 = vmatmul.mubr.bf16.vlgmr.msra.gmra.mxu1 %v25420_v20  ;;  %15333 = vmatpush1.bf16.msra.mxu0 %v20754_v14  ;;  %v20802_v47 = vld [vmem:[%s28272_s18 + $0xde0] ss:$116 sps:$4 sm:$0xff]   ;;  %v20811_v57 = vld [vmem:[%s28272_s18 + $0x1b78] ss:$116 sps:$4 sm:$0xff]  }
 0xc82   :  { %15364 = vmatprep.mubr.bf16.mxu0 %v25408_v2  ;;  %15374 = vmatpush1.bf16.msra.mxu1 %v20757_v5  ;;  %v15040_v56 = vpop.f32.mrf.mxu0  ;;  %v20805_v14 = vld [vmem:[%s28272_s18 + $0x1c60] ss:$116 sps:$4 sm:$0xff]   ;;  %v20810_v5 = vld [vmem:[%s28272_s18 + $0xcfc] ss:$116 sps:$4 sm:$0xff]  }
 0xc83   :  { %15405 = vmatprep.mubr.bf16.mxu1 %v25410_v60  ;;  %v15041_v24 = vadd.f32 %v15040_v56, %v9824_v41  ;;  %v15081_v52 = vpop.f32.mrf.mxu1  ;;  %15334 = vmatprep.subr.bf16.mxu0 %v20762_v46  ;;  %v15080_v53 = vadd.f32 %v15079_v9, %v15039_v32  ;;  %v20813_v41 = vld [vmem:[%s28272_s18 + $0x1b7c] ss:$116 sps:$4 sm:$0xff]   ;;  %v20808_v46 = vld [vmem:[%s28272_s18 + $0xcf8] ss:$116 sps:$4 sm:$0xff]   ;;  %v20819_v32 = vld [vmem:[%s28272_s18 + $0x1a94] ss:$116 sps:$4 sm:$0xff]  }
 0xc84   :  { %v15042_v12 = vpop.f32.mrf.mxu0  ;;  %15375 = vmatprep.subr.bf16.mxu1 %v20765_v19  ;;  %v20816_v19 = vld [vmem:[%s28272_s18 + $0xc14] ss:$116 sps:$4 sm:$0xff]   ;;  %v20814_v9 = vld [vmem:[%s28272_s18 + $0xc10] ss:$116 sps:$4 sm:$0xff]   ;;  %v20822_v56 = vld [vmem:[%s28272_s18 + $0xb2c] ss:$116 sps:$4 sm:$0xff]  }
 0xc85   :  { %v15082_v8 = vadd.f32 %v15081_v52, %v15041_v24  ;;  %v15083_v1 = vpop.f32.mrf.mxu1  ;;  %15335 = vmatpush1.bf16.msra.mxu0 %v20760_v25  ;;  %v20817_v25 = vld [vmem:[%s28272_s18 + $0x1a90] ss:$116 sps:$4 sm:$0xff]   ;;  %v20823_v24 = vld [vmem:[%s28272_s18 + $0x19a8] ss:$116 sps:$4 sm:$0xff]   ;;  %v20826_v12 = vld [vmem:[%s28272_s18 + $0xa40] ss:$116 sps:$4 sm:$0xff]  }
 0xc86   :  { %15376 = vmatpush1.bf16.msra.mxu1 %v20763_v55  ;;  %v15043_v15 = vpop.f32.mrf.mxu0  ;;  %15336 = vmatprep.subr.bf16.mxu0 %v20768_v4  ;;  %v20825_v55 = vld [vmem:[%s28272_s18 + $0x19ac] ss:$116 sps:$4 sm:$0xff]   ;;  %v20820_v4 = vld [vmem:[%s28272_s18 + $0xb28] ss:$116 sps:$4 sm:$0xff]   ;;  %v20828_v52 = vld [vmem:[%s28272_s18 + $0xa44] ss:$116 sps:$4 sm:$0xff]  }
 0xc87   :  { %v15886_v45 = vcombine.low %v15080_v53, %v15082_v8  ;;  %v15084_v48 = vpop.f32.mrf.mxu1  ;;  %15377 = vmatprep.subr.bf16.mxu1 %v20771_v30  ;;  %v20831_v30 = vld [vmem:[%s28272_s18 + $0x18c4] ss:$116 sps:$4 sm:$0xff]   ;;  %v20829_v53 = vld [vmem:[%s28272_s18 + $0x18c0] ss:$116 sps:$4 sm:$0xff]   ;;  %v20834_v8 = vld [vmem:[%s28272_s18 + $0x95c] ss:$116 sps:$4 sm:$0xff]  }
 0xc88   :  { %v20837_v1 = vld [vmem:[%s28272_s18 + $0x17dc] ss:$116 sps:$4 sm:$0xff]   ;;  %v20835_v15 = vld [vmem:[%s28272_s18 + $0x17d8] ss:$116 sps:$4 sm:$0xff]  }
 0xc89   :  { %v15900_v16 = vrot.slane %v15886_v45, %v21597_v49  ;;  %15337 = vmatpush1.bf16.msra.mxu0 %v20766_v0  ;;  %v20832_v0 = vld [vmem:[%s28272_s18 + $0x958] ss:$116 sps:$4 sm:$0xff]   ;;  %v20838_v45 = vld [vmem:[%s28272_s18 + $0x870] ss:$116 sps:$4 sm:$0xff]  }
 0xc8a   :  { %15378 = vmatpush1.bf16.msra.mxu1 %v20769_v11  ;;  %15338 = vmatprep.subr.bf16.mxu0 %v20774_v58  ;;  %v20840_v11 = vld [vmem:[%s28272_s18 + $0x874] ss:$116 sps:$4 sm:$0xff]   ;;  %v20841_v48 = vld [vmem:[%s28272_s18 + $0x16f0] ss:$116 sps:$4 sm:$0xff]  }
 0xc8b   :  { %v15901_v35 = vcombine.low %v15893_v31, %v15900_v16  ;;  %15379 = vmatprep.subr.bf16.mxu1 %v20777_v39  ;;  %v20843_v58 = vld [vmem:[%s28272_s18 + $0x16f4] ss:$116 sps:$4 sm:$0xff]   ;;  %v20846_v39 = vld [vmem:[%s28272_s18 + $0x78c] ss:$116 sps:$4 sm:$0xff]  }
 0xc8c   :  { %v20849_v31 = vld [vmem:[%s28272_s18 + $0x160c] ss:$116 sps:$4 sm:$0xff]   ;;  %v20844_v16 = vld [vmem:[%s28272_s18 + $0x788] ss:$116 sps:$4 sm:$0xff]  }
 0xc8d   :  { %15987 = vst [vmem:[%s28277_s23 + $0x10] sm:$0xff] %v15901_v35  ;;  %15339 = vmatpush1.bf16.msra.mxu0 %v20772_v44  ;;  %v20847_v44 = vld [vmem:[%s28272_s18 + $0x1608] ss:$116 sps:$4 sm:$0xff]   ;;  %v9828_v35 = vrot.slane %v26848_v18, %v26417_v33 }
 0xc8e   :  { %15380 = vmatpush1.bf16.msra.mxu1 %v20775_v13  ;;  %15340 = vmatprep.subr.bf16.mxu0 %v20780_v63  ;;  %v20852_v13 = vld [vmem:[%s28272_s18 + $0x6ac] ss:$116 sps:$4 sm:$0xff]  }
 0xc8f   :  { %15381 = vmatprep.subr.bf16.mxu1 %v20783_v59  ;;  %v20855_v63 = vld [vmem:[%s28272_s18 + $0x152c] ss:$116 sps:$4 sm:$0xff]   ;;  %v20850_v59 = vld [vmem:[%s28272_s18 + $0x6a8] ss:$116 sps:$4 sm:$0xff]  }
 0xc91   :  { %15341 = vmatpush1.bf16.msra.mxu0 %v20778_v22  ;;  %v20853_v22 = vld [vmem:[%s28272_s18 + $0x1528] ss:$116 sps:$4 sm:$0xff]  }
 0xc92   :  { %15382 = vmatpush1.bf16.msra.mxu1 %v20781_v27  ;;  %15342 = vmatprep.subr.bf16.mxu0 %v20786_v3  ;;  %v9832_v27 = vrot.slane %v26848_v18, %v26429_v10  ;;  %v20858_v3 = vld [vmem:[%s28272_s18 + $0x5c4] ss:$116 sps:$4 sm:$0xff]  }
 0xc93   :  { %15383 = vmatprep.subr.bf16.mxu1 %v20789_v62 }
 0xc95   :  { %15343 = vmatpush1.bf16.msra.mxu0 %v20784_v54  ;;  %v20861_v54 = vld [vmem:[%s28272_s18 + $0x1444] ss:$116 sps:$4 sm:$0xff]  }
 0xc96   :  { %15384 = vmatpush1.bf16.msra.mxu1 %v20787_v21  ;;  %15344 = vmatprep.subr.bf16.mxu0 %v20792_v42 }
 0xc97   :  { %15385 = vmatprep.subr.bf16.mxu1 %v20795_v38  ;;  %v20856_v38 = vld [vmem:[%s28272_s18 + $0x5c0] ss:$116 sps:$4 sm:$0xff]  }
 0xc99   :  { %15345 = vmatpush1.bf16.msra.mxu0 %v20790_v43 }
 0xc9a   :  { %15386 = vmatpush1.bf16.msra.mxu1 %v20793_v26  ;;  %15346 = vmatprep.subr.bf16.mxu0 %v20798_v28  ;;  %v20859_v26 = vld [vmem:[%s28272_s18 + $0x1440] ss:$116 sps:$4 sm:$0xff]   ;;  %v20864_v28 = vld [vmem:[%s28272_s18 + $0x4dc] ss:$116 sps:$4 sm:$0xff]  }
 0xc9b   :  { %15387 = vmatprep.subr.bf16.mxu1 %v20801_v61 }
 0xc9d   :  { %15347 = vmatpush1.bf16.msra.mxu0 %v20796_v40 }
 0xc9e   :  { %15388 = vmatpush1.bf16.msra.mxu1 %v20799_v7  ;;  %15348 = vmatprep.subr.bf16.mxu0 %v20804_v17  ;;  %v20867_v17 = vld [vmem:[%s28272_s18 + $0x135c] ss:$116 sps:$4 sm:$0xff]  }
 0xc9f   :  { %15389 = vmatprep.subr.bf16.mxu1 %v20807_v37 }
 0xca1   :  { %15349 = vmatpush2.bf16.msra.mxu0 %v20802_v47 }
 0xca2   :  { %15390 = vmatpush2.bf16.msra.mxu1 %v20805_v14  ;;  %15350 = vmatprep.subr.bf16.mxu0 %v20810_v5  ;;  %v20862_v5 = vld [vmem:[%s28272_s18 + $0x4d8] ss:$116 sps:$4 sm:$0xff]  }
 0xca3   :  { %15391 = vmatprep.subr.bf16.mxu1 %v20813_v41 }
 0xca5   :  { %15351 = vmatpush2.bf16.msra.mxu0 %v20808_v46  ;;  %v20865_v46 = vld [vmem:[%s28272_s18 + $0x1358] ss:$116 sps:$4 sm:$0xff]  }
 0xca6   :  { %15392 = vmatpush2.bf16.msra.mxu1 %v20811_v57  ;;  %15352 = vmatprep.subr.bf16.mxu0 %v20816_v19  ;;  %v20870_v57 = vld [vmem:[%s28272_s18 + $0x3f4] ss:$116 sps:$4 sm:$0xff]  }
 0xca7   :  { %15393 = vmatprep.subr.bf16.mxu1 %v20819_v32 }
 0xca9   :  { %15353 = vmatpush2.bf16.msra.mxu0 %v20814_v9  ;;  %v20873_v9 = vld [vmem:[%s28272_s18 + $0x1274] ss:$116 sps:$4 sm:$0xff]  }
 0xcaa   :  { %15394 = vmatpush2.bf16.msra.mxu1 %v20817_v25  ;;  %15354 = vmatprep.subr.bf16.mxu0 %v20822_v56  ;;  %v20868_v25 = vld [vmem:[%s28272_s18 + $0x3f0] ss:$116 sps:$4 sm:$0xff]  }
 0xcab   :  { %15395 = vmatprep.subr.bf16.mxu1 %v20825_v55  ;;  %v20871_v56 = vld [vmem:[%s28272_s18 + $0x1270] ss:$116 sps:$4 sm:$0xff]   ;;  %v20876_v55 = vld [vmem:[%s28272_s18 + $0x30c] ss:$116 sps:$4 sm:$0xff]  }
 0xcad   :  { %15355 = vmatpush2.bf16.msra.mxu0 %v20820_v4  ;;  %v20879_v4 = vld [vmem:[%s28272_s18 + $0x118c] ss:$116 sps:$4 sm:$0xff]  }
 0xcae   :  { %15396 = vmatpush2.bf16.msra.mxu1 %v20823_v24  ;;  %15356 = vmatprep.subr.bf16.mxu0 %v20828_v52  ;;  %v20874_v24 = vld [vmem:[%s28272_s18 + $0x308] ss:$116 sps:$4 sm:$0xff]  }
 0xcaf   :  { %15397 = vmatprep.subr.bf16.mxu1 %v20831_v30  ;;  %v20877_v52 = vld [vmem:[%s28272_s18 + $0x1188] ss:$116 sps:$4 sm:$0xff]   ;;  %v20882_v30 = vld [vmem:[%s28272_s18 + $0x224] ss:$116 sps:$4 sm:$0xff]  }
 0xcb1   :  { %15357 = vmatpush2.bf16.msra.mxu0 %v20826_v12  ;;  %v20885_v12 = vld [vmem:[%s28272_s18 + $0x10a4] ss:$116 sps:$4 sm:$0xff]  }
 0xcb2   :  { %15398 = vmatpush2.bf16.msra.mxu1 %v20829_v53  ;;  %15358 = vmatprep.subr.bf16.mxu0 %v20834_v8  ;;  %v20880_v53 = vld [vmem:[%s28272_s18 + $0x220] ss:$116 sps:$4 sm:$0xff]  }
 0xcb3   :  { %15399 = vmatprep.subr.bf16.mxu1 %v20837_v1  ;;  %v20883_v8 = vld [vmem:[%s28272_s18 + $0x10a0] ss:$116 sps:$4 sm:$0xff]   ;;  %v20888_v1 = vld [vmem:[%s28272_s18 + $0x13c] ss:$116 sps:$4 sm:$0xff]  }
 0xcb5   :  { %15359 = vmatpush2.bf16.msra.mxu0 %v20832_v0  ;;  %v20891_v0 = vld [vmem:[%s28272_s18 + $0xfbc] ss:$116 sps:$4 sm:$0xff]  }
 0xcb6   :  { %15400 = vmatpush2.bf16.msra.mxu1 %v20835_v15  ;;  %15360 = vmatprep.subr.bf16.mxu0 %v20840_v11  ;;  %v20886_v15 = vld [vmem:[%s28272_s18 + $0x138] ss:$116 sps:$4 sm:$0xff]  }
 0xcb7   :  { %15401 = vmatprep.subr.bf16.mxu1 %v20843_v58  ;;  %v20889_v11 = vld [vmem:[%s28272_s18 + $0xfb8] ss:$116 sps:$4 sm:$0xff]   ;;  %v20894_v58 = vld [vmem:[%s28272_s18 + $0x54] ss:$116 sps:$4 sm:$0xff]  }
 0xcb9   :  { %15361 = vmatpush2.bf16.msra.mxu0 %v20838_v45  ;;  %v20897_v45 = vld [vmem:[%s28272_s18 + $0xed4] ss:$116 sps:$4 sm:$0xff]  }
 0xcba   :  { %15402 = vmatpush2.bf16.msra.mxu1 %v20841_v48  ;;  %15362 = vmatprep.subr.bf16.mxu0 %v20846_v39  ;;  %v20892_v48 = vld [vmem:[%s28272_s18 + $0x50] ss:$116 sps:$4 sm:$0xff]  }
 0xcbb   :  { %15403 = vmatprep.subr.bf16.mxu1 %v20849_v31  ;;  %v20895_v39 = vld [vmem:[%s28272_s18 + $0xed0] ss:$116 sps:$4 sm:$0xff]   ;;  %v20900_v31 = vld [vmem:[%s28272_s18 + $0xdec] ss:$116 sps:$4 sm:$0xff]  }
 0xcbd   :  { %15363 = vmatpush2.bf16.msra.mxu0 %v20844_v16  ;;  %v20903_v16 = vld [vmem:[%s28272_s18 + $0x1c6c] ss:$116 sps:$4 sm:$0xff]  }
 0xcbe   :  { %15404 = vmatpush2.bf16.msra.mxu1 %v20847_v44  ;;  %15414 = vmatprep.subr.bf16.mxu0 %v20852_v13  ;;  %v20898_v44 = vld [vmem:[%s28272_s18 + $0xde8] ss:$116 sps:$4 sm:$0xff]  }
 0xcbf   :  { %15455 = vmatprep.subr.bf16.mxu1 %v20855_v63  ;;  %v20901_v13 = vld [vmem:[%s28272_s18 + $0x1c68] ss:$116 sps:$4 sm:$0xff]   ;;  %v20906_v63 = vld [vmem:[%s28272_s18 + $0xd04] ss:$116 sps:$4 sm:$0xff]  }
 0xcc0   :  { %v15120_v62 = vpop.f32.mrf.mxu0  ;;  %15365 = vmatmul.mubr.bf16.vlgmr.msra.gmra.mxu0 %v25418_v6 }
 0xcc1   :  { %v15121_v21 = vadd.f32 %v15120_v62, %v9828_v35  ;;  %v15161_v42 = vpop.f32.mrf.mxu1  ;;  %15406 = vmatmul.mubr.bf16.vlgmr.msra.gmra.mxu1 %v25420_v20  ;;  %15415 = vmatpush1.bf16.msra.mxu0 %v20850_v59  ;;  %v20909_v35 = vld [vmem:[%s28272_s18 + $0x1b84] ss:$116 sps:$4 sm:$0xff]   ;;  %v20904_v59 = vld [vmem:[%s28272_s18 + $0xd00] ss:$116 sps:$4 sm:$0xff]  }
 0xcc2   :  { %15446 = vmatprep.mubr.bf16.mxu0 %v25408_v2  ;;  %15456 = vmatpush1.bf16.msra.mxu1 %v20853_v22  ;;  %v15122_v43 = vpop.f32.mrf.mxu0  ;;  %v20907_v22 = vld [vmem:[%s28272_s18 + $0x1b80] ss:$116 sps:$4 sm:$0xff]   ;;  %v20910_v62 = vld [vmem:[%s28272_s18 + $0xc18] ss:$116 sps:$4 sm:$0xff]  }
 0xcc3   :  { %v27298_v61 = vadd.f32 %v15161_v42, %v15121_v21  ;;  %15487 = vmatprep.mubr.bf16.mxu1 %v25410_v60  ;;  %v15123_v40 = vadd.f32 %v15122_v43, %v9832_v27  ;;  %v15163_v7 = vpop.f32.mrf.mxu1  ;;  %15416 = vmatprep.subr.bf16.mxu0 %v20858_v3  ;;  %v20912_v27 = vld [vmem:[%s28272_s18 + $0xc1c] ss:$116 sps:$4 sm:$0xff]   ;;  %v20918_v21 = vld [vmem:[%s28272_s18 + $0xb34] ss:$116 sps:$4 sm:$0xff]  }
 0xcc4   :  { %v15124_v37 = vpop.f32.mrf.mxu0  ;;  %15457 = vmatprep.subr.bf16.mxu1 %v20861_v54  ;;  %v20915_v3 = vld [vmem:[%s28272_s18 + $0x1a9c] ss:$116 sps:$4 sm:$0xff]   ;;  %v20913_v54 = vld [vmem:[%s28272_s18 + $0x1a98] ss:$116 sps:$4 sm:$0xff]   ;;  %v20921_v42 = vld [vmem:[%s28272_s18 + $0x19b4] ss:$116 sps:$4 sm:$0xff]  }
 0xcc5   :  { %v27304_v47 = vadd.f32 %v15163_v7, %v15123_v40  ;;  %v15165_v14 = vpop.f32.mrf.mxu1  ;;  %15417 = vmatpush1.bf16.msra.mxu0 %v20856_v38  ;;  %v20916_v38 = vld [vmem:[%s28272_s18 + $0xb30] ss:$116 sps:$4 sm:$0xff]   ;;  %v20922_v40 = vld [vmem:[%s28272_s18 + $0xa48] ss:$116 sps:$4 sm:$0xff]  }
 0xcc6   :  { %15458 = vmatpush1.bf16.msra.mxu1 %v20859_v26  ;;  %v15125_v41 = vpop.f32.mrf.mxu0  ;;  %15418 = vmatprep.subr.bf16.mxu0 %v20864_v28  ;;  %v20919_v43 = vld [vmem:[%s28272_s18 + $0x19b0] ss:$116 sps:$4 sm:$0xff]   ;;  %v20924_v26 = vld [vmem:[%s28272_s18 + $0xa4c] ss:$116 sps:$4 sm:$0xff]   ;;  %v20925_v7 = vld [vmem:[%s28272_s18 + $0x18c8] ss:$116 sps:$4 sm:$0xff]  }
 0xcc7   :  { %v15902_v19 = vcombine.low %v27298_v61, %v27304_v47  ;;  %v15166_v32 = vpop.f32.mrf.mxu1  ;;  %15459 = vmatprep.subr.bf16.mxu1 %v20867_v17  ;;  %v20927_v28 = vld [vmem:[%s28272_s18 + $0x18cc] ss:$116 sps:$4 sm:$0xff]   ;;  %v20930_v17 = vld [vmem:[%s28272_s18 + $0x964] ss:$116 sps:$4 sm:$0xff]   ;;  %v20936_v41 = vld [vmem:[%s28272_s18 + $0x87c] ss:$116 sps:$4 sm:$0xff]  }
 0xcc8   :  { %v20933_v37 = vld [vmem:[%s28272_s18 + $0x17e4] ss:$116 sps:$4 sm:$0xff]   ;;  %v20928_v14 = vld [vmem:[%s28272_s18 + $0x960] ss:$116 sps:$4 sm:$0xff]  }
 0xcc9   :  { %15419 = vmatpush1.bf16.msra.mxu0 %v20862_v5  ;;  %v20931_v5 = vld [vmem:[%s28272_s18 + $0x17e0] ss:$116 sps:$4 sm:$0xff]   ;;  %v20937_v32 = vld [vmem:[%s28272_s18 + $0x16f8] ss:$116 sps:$4 sm:$0xff]   ;;  %v20970_v47 = vld [vmem:[%s28272_s18 + $0x310] ss:$116 sps:$4 sm:$0xff]  }
 0xcca   :  { %15460 = vmatpush1.bf16.msra.mxu1 %v20865_v46  ;;  %15420 = vmatprep.subr.bf16.mxu0 %v20870_v57  ;;  %v20939_v46 = vld [vmem:[%s28272_s18 + $0x16fc] ss:$116 sps:$4 sm:$0xff]   ;;  %v20934_v57 = vld [vmem:[%s28272_s18 + $0x878] ss:$116 sps:$4 sm:$0xff]   ;;  %v20975_v61 = vld [vmem:[%s28272_s18 + $0x1194] ss:$116 sps:$4 sm:$0xff]  }
 0xccb   :  { %15461 = vmatprep.subr.bf16.mxu1 %v20873_v9  ;;  %v20942_v9 = vld [vmem:[%s28272_s18 + $0x794] ss:$116 sps:$4 sm:$0xff]  }
 0xccd   :  { %15421 = vmatpush1.bf16.msra.mxu0 %v20868_v25  ;;  %v20945_v25 = vld [vmem:[%s28272_s18 + $0x1614] ss:$116 sps:$4 sm:$0xff]  }
 0xcce   :  { %15462 = vmatpush1.bf16.msra.mxu1 %v20871_v56  ;;  %15422 = vmatprep.subr.bf16.mxu0 %v20876_v55  ;;  %v20940_v56 = vld [vmem:[%s28272_s18 + $0x790] ss:$116 sps:$4 sm:$0xff]  }
 0xccf   :  { %15463 = vmatprep.subr.bf16.mxu1 %v20879_v4  ;;  %v20943_v55 = vld [vmem:[%s28272_s18 + $0x1610] ss:$116 sps:$4 sm:$0xff]   ;;  %v20948_v4 = vld [vmem:[%s28272_s18 + $0x6b4] ss:$116 sps:$4 sm:$0xff]  }
 0xcd1   :  { %15423 = vmatpush1.bf16.msra.mxu0 %v20874_v24  ;;  %v20951_v24 = vld [vmem:[%s28272_s18 + $0x1534] ss:$116 sps:$4 sm:$0xff]  }
 0xcd2   :  { %15464 = vmatpush1.bf16.msra.mxu1 %v20877_v52  ;;  %15424 = vmatprep.subr.bf16.mxu0 %v20882_v30  ;;  %v9836_v52 = vrot.slane %v26848_v18, %v26629_v36  ;;  %v20946_v30 = vld [vmem:[%s28272_s18 + $0x6b0] ss:$116 sps:$4 sm:$0xff]  }
 0xcd3   :  { %15465 = vmatprep.subr.bf16.mxu1 %v20885_v12  ;;  %v20949_v12 = vld [vmem:[%s28272_s18 + $0x1530] ss:$116 sps:$4 sm:$0xff]  }
 0xcd5   :  { %15425 = vmatpush1.bf16.msra.mxu0 %v20880_v53  ;;  %v9840_v53 = vrot.slane %v26848_v18, %v26641_v23  ;;  %v20952_v18 = vld [vmem:[%s28272_s18 + $0x5c8] ss:$116 sps:$4 sm:$0xff]  }
 0xcd6   :  { %15466 = vmatpush1.bf16.msra.mxu1 %v20883_v8  ;;  %15426 = vmatprep.subr.bf16.mxu0 %v20888_v1  ;;  %v20954_v8 = vld [vmem:[%s28272_s18 + $0x5cc] ss:$116 sps:$4 sm:$0xff]  }
 0xcd7   :  { %15467 = vmatprep.subr.bf16.mxu1 %v20891_v0  ;;  %v20957_v0 = vld [vmem:[%s28272_s18 + $0x144c] ss:$116 sps:$4 sm:$0xff]  }
 0xcd9   :  { %15427 = vmatpush1.bf16.msra.mxu0 %v20886_v15 }
 0xcda   :  { %15468 = vmatpush1.bf16.msra.mxu1 %v20889_v11  ;;  %15428 = vmatprep.subr.bf16.mxu0 %v20894_v58 }
 0xcdb   :  { %15469 = vmatprep.subr.bf16.mxu1 %v20897_v45  ;;  %v20955_v45 = vld [vmem:[%s28272_s18 + $0x1448] ss:$116 sps:$4 sm:$0xff]  }
 0xcdd   :  { %15429 = vmatpush1.bf16.msra.mxu0 %v20892_v48  ;;  %v20960_v48 = vld [vmem:[%s28272_s18 + $0x4e4] ss:$116 sps:$4 sm:$0xff]  }
 0xcde   :  { %15470 = vmatpush1.bf16.msra.mxu1 %v20895_v39  ;;  %15430 = vmatprep.subr.bf16.mxu0 %v20900_v31 }
 0xcdf   :  { %15471 = vmatprep.subr.bf16.mxu1 %v20903_v16  ;;  %v20963_v16 = vld [vmem:[%s28272_s18 + $0x1364] ss:$116 sps:$4 sm:$0xff]  }
 0xce1   :  { %15431 = vmatpush2.bf16.msra.mxu0 %v20898_v44 }
 0xce2   :  { %15472 = vmatpush2.bf16.msra.mxu1 %v20901_v13  ;;  %15432 = vmatprep.subr.bf16.mxu0 %v20906_v63 }
 0xce3   :  { %15473 = vmatprep.subr.bf16.mxu1 %v20909_v35 }
 0xce5   :  { %15433 = vmatpush2.bf16.msra.mxu0 %v20904_v59  ;;  %v20958_v59 = vld [vmem:[%s28272_s18 + $0x4e0] ss:$116 sps:$4 sm:$0xff]  }
 0xce6   :  { %15474 = vmatpush2.bf16.msra.mxu1 %v20907_v22  ;;  %15434 = vmatprep.subr.bf16.mxu0 %v20912_v27  ;;  %v20961_v27 = vld [vmem:[%s28272_s18 + $0x1360] ss:$116 sps:$4 sm:$0xff]  }
 0xce7   :  { %15475 = vmatprep.subr.bf16.mxu1 %v20915_v3  ;;  %v20966_v3 = vld [vmem:[%s28272_s18 + $0x3fc] ss:$116 sps:$4 sm:$0xff]  }
 0xce9   :  { %15435 = vmatpush2.bf16.msra.mxu0 %v20910_v62 }
 0xcea   :  { %15476 = vmatpush2.bf16.msra.mxu1 %v20913_v54  ;;  %15436 = vmatprep.subr.bf16.mxu0 %v20918_v21  ;;  %v20969_v21 = vld [vmem:[%s28272_s18 + $0x127c] ss:$116 sps:$4 sm:$0xff]  }
 0xceb   :  { %15477 = vmatprep.subr.bf16.mxu1 %v20921_v42  ;;  %v15910_v42 = vrot.slane %v15902_v19, %v21597_v49  ;;  %v20973_v19 = vld [vmem:[%s28272_s18 + $0x1190] ss:$116 sps:$4 sm:$0xff]  }
 0xced   :  { %15437 = vmatpush2.bf16.msra.mxu0 %v20916_v38 }
 0xcee   :  { %15478 = vmatpush2.bf16.msra.mxu1 %v20919_v43  ;;  %15438 = vmatprep.subr.bf16.mxu0 %v20924_v26  ;;  %v20964_v43 = vld [vmem:[%s28272_s18 + $0x3f8] ss:$116 sps:$4 sm:$0xff]  }
 0xcef   :  { %15479 = vmatprep.subr.bf16.mxu1 %v20927_v28  ;;  %v20967_v26 = vld [vmem:[%s28272_s18 + $0x1278] ss:$116 sps:$4 sm:$0xff]   ;;  %v20972_v28 = vld [vmem:[%s28272_s18 + $0x314] ss:$116 sps:$4 sm:$0xff]  }
 0xcf1   :  { %15439 = vmatpush2.bf16.msra.mxu0 %v20922_v40 }
 0xcf2   :  { %15480 = vmatpush2.bf16.msra.mxu1 %v20925_v7  ;;  %15440 = vmatprep.subr.bf16.mxu0 %v20930_v17  ;;  %v20978_v7 = vld [vmem:[%s28272_s18 + $0x22c] ss:$116 sps:$4 sm:$0xff]  }
 0xcf3   :  { %15481 = vmatprep.subr.bf16.mxu1 %v20933_v37  ;;  %v20981_v17 = vld [vmem:[%s28272_s18 + $0x10ac] ss:$116 sps:$4 sm:$0xff]   ;;  %v20976_v37 = vld [vmem:[%s28272_s18 + $0x228] ss:$116 sps:$4 sm:$0xff]  }
 0xcf5   :  { %15441 = vmatpush2.bf16.msra.mxu0 %v20928_v14  ;;  %v20979_v14 = vld [vmem:[%s28272_s18 + $0x10a8] ss:$116 sps:$4 sm:$0xff]  }
 0xcf6   :  { %15482 = vmatpush2.bf16.msra.mxu1 %v20931_v5  ;;  %15442 = vmatprep.subr.bf16.mxu0 %v20936_v41  ;;  %v20984_v5 = vld [vmem:[%s28272_s18 + $0x144] ss:$116 sps:$4 sm:$0xff]  }
 0xcf7   :  { %15483 = vmatprep.subr.bf16.mxu1 %v20939_v46  ;;  %v20987_v41 = vld [vmem:[%s28272_s18 + $0xfc4] ss:$116 sps:$4 sm:$0xff]   ;;  %v20982_v46 = vld [vmem:[%s28272_s18 + $0x140] ss:$116 sps:$4 sm:$0xff]  }
 0xcf9   :  { %15443 = vmatpush2.bf16.msra.mxu0 %v20934_v57  ;;  %v20985_v57 = vld [vmem:[%s28272_s18 + $0xfc0] ss:$116 sps:$4 sm:$0xff]  }
 0xcfa   :  { %15484 = vmatpush2.bf16.msra.mxu1 %v20937_v32  ;;  %15444 = vmatprep.subr.bf16.mxu0 %v20942_v9  ;;  %v20990_v32 = vld [vmem:[%s28272_s18 + $0x5c] ss:$116 sps:$4 sm:$0xff]  }
 0xcfb   :  { %15485 = vmatprep.subr.bf16.mxu1 %v20945_v25  ;;  %v20993_v9 = vld [vmem:[%s28272_s18 + $0xedc] ss:$116 sps:$4 sm:$0xff]   ;;  %v20988_v25 = vld [vmem:[%s28272_s18 + $0x58] ss:$116 sps:$4 sm:$0xff]  }
 0xcfd   :  { %15445 = vmatpush2.bf16.msra.mxu0 %v20940_v56  ;;  %v20991_v56 = vld [vmem:[%s28272_s18 + $0xed8] ss:$116 sps:$4 sm:$0xff]  }
 0xcfe   :  { %15486 = vmatpush2.bf16.msra.mxu1 %v20943_v55  ;;  %15496 = vmatprep.subr.bf16.mxu0 %v20948_v4  ;;  %v20996_v55 = vld [vmem:[%s28272_s18 + $0xdf4] ss:$116 sps:$4 sm:$0xff]  }
 0xcff   :  { %15537 = vmatprep.subr.bf16.mxu1 %v20951_v24  ;;  %v20999_v4 = vld [vmem:[%s28272_s18 + $0x1c74] ss:$116 sps:$4 sm:$0xff]   ;;  %v20994_v24 = vld [vmem:[%s28272_s18 + $0xdf0] ss:$116 sps:$4 sm:$0xff]  }
 0xd00   :  { %v15202_v1 = vpop.f32.mrf.mxu0  ;;  %15447 = vmatmul.mubr.bf16.vlgmr.msra.gmra.mxu0 %v25418_v6 }
 0xd01   :  { %v15203_v15 = vadd.f32 %v15202_v1, %v9836_v52  ;;  %v15243_v11 = vpop.f32.mrf.mxu1  ;;  %15488 = vmatmul.mubr.bf16.vlgmr.msra.gmra.mxu1 %v25420_v20  ;;  %15497 = vmatpush1.bf16.msra.mxu0 %v20946_v30  ;;  %v20997_v52 = vld [vmem:[%s28272_s18 + $0x1c70] ss:$116 sps:$4 sm:$0xff]   ;;  %v21002_v30 = vld [vmem:[%s28272_s18 + $0xd0c] ss:$116 sps:$4 sm:$0xff]  }
 0xd02   :  { %15528 = vmatprep.mubr.bf16.mxu0 %v25408_v2  ;;  %15538 = vmatpush1.bf16.msra.mxu1 %v20949_v12  ;;  %v15204_v58 = vpop.f32.mrf.mxu0  ;;  %v21005_v12 = vld [vmem:[%s28272_s18 + $0x1b8c] ss:$116 sps:$4 sm:$0xff]   ;;  %v21008_v1 = vld [vmem:[%s28272_s18 + $0xc24] ss:$116 sps:$4 sm:$0xff]  }
 0xd03   :  { %15569 = vmatprep.mubr.bf16.mxu1 %v25410_v60  ;;  %v15205_v39 = vadd.f32 %v15204_v58, %v9840_v53  ;;  %v15245_v31 = vpop.f32.mrf.mxu1  ;;  %15498 = vmatprep.subr.bf16.mxu0 %v20954_v8  ;;  %v15244_v13 = vadd.f32 %v15243_v11, %v15203_v15  ;;  %v21000_v53 = vld [vmem:[%s28272_s18 + $0xd08] ss:$116 sps:$4 sm:$0xff]   ;;  %v21006_v15 = vld [vmem:[%s28272_s18 + $0xc20] ss:$116 sps:$4 sm:$0xff]  }
 0xd04   :  { %v15206_v44 = vpop.f32.mrf.mxu0  ;;  %15539 = vmatprep.subr.bf16.mxu1 %v20957_v0  ;;  %v21003_v8 = vld [vmem:[%s28272_s18 + $0x1b88] ss:$116 sps:$4 sm:$0xff]   ;;  %v21011_v0 = vld [vmem:[%s28272_s18 + $0x1aa4] ss:$116 sps:$4 sm:$0xff]   ;;  %v21009_v11 = vld [vmem:[%s28272_s18 + $0x1aa0] ss:$116 sps:$4 sm:$0xff]  }
 0xd05   :  { %v15246_v63 = vadd.f32 %v15245_v31, %v15205_v39  ;;  %v15247_v35 = vpop.f32.mrf.mxu1  ;;  %15499 = vmatpush1.bf16.msra.mxu0 %v20952_v18  ;;  %v21014_v18 = vld [vmem:[%s28272_s18 + $0xb3c] ss:$116 sps:$4 sm:$0xff]   ;;  %v21020_v39 = vld [vmem:[%s28272_s18 + $0xa54] ss:$116 sps:$4 sm:$0xff]  }
 0xd06   :  { %15540 = vmatpush1.bf16.msra.mxu1 %v20955_v45  ;;  %v15207_v22 = vpop.f32.mrf.mxu0  ;;  %15500 = vmatprep.subr.bf16.mxu0 %v20960_v48  ;;  %v21017_v58 = vld [vmem:[%s28272_s18 + $0x19bc] ss:$116 sps:$4 sm:$0xff]   ;;  %v21012_v45 = vld [vmem:[%s28272_s18 + $0xb38] ss:$116 sps:$4 sm:$0xff]   ;;  %v21023_v31 = vld [vmem:[%s28272_s18 + $0x18d4] ss:$116 sps:$4 sm:$0xff]  }
 0xd07   :  { %v15903_v62 = vcombine.low %v15244_v13, %v15246_v63  ;;  %v15248_v54 = vpop.f32.mrf.mxu1  ;;  %15541 = vmatprep.subr.bf16.mxu1 %v20963_v16  ;;  %v21015_v48 = vld [vmem:[%s28272_s18 + $0x19b8] ss:$116 sps:$4 sm:$0xff]   ;;  %v21018_v16 = vld [vmem:[%s28272_s18 + $0xa50] ss:$116 sps:$4 sm:$0xff]   ;;  %v21024_v35 = vld [vmem:[%s28272_s18 + $0x968] ss:$116 sps:$4 sm:$0xff]  }
 0xd08   :  { %v21021_v44 = vld [vmem:[%s28272_s18 + $0x18d0] ss:$116 sps:$4 sm:$0xff]   ;;  %v21026_v13 = vld [vmem:[%s28272_s18 + $0x96c] ss:$116 sps:$4 sm:$0xff]  }
 0xd09   :  { %v15917_v38 = vrot.slane %v15903_v62, %v21597_v49  ;;  %15501 = vmatpush1.bf16.msra.mxu0 %v20958_v59  ;;  %v21029_v63 = vld [vmem:[%s28272_s18 + $0x17ec] ss:$116 sps:$4 sm:$0xff]   ;;  %v21027_v59 = vld [vmem:[%s28272_s18 + $0x17e8] ss:$116 sps:$4 sm:$0xff]   ;;  %v21032_v22 = vld [vmem:[%s28272_s18 + $0x884] ss:$116 sps:$4 sm:$0xff]  }
 0xd0a   :  { %15542 = vmatpush1.bf16.msra.mxu1 %v20961_v27  ;;  %15502 = vmatprep.subr.bf16.mxu0 %v20966_v3  ;;  %v21035_v27 = vld [vmem:[%s28272_s18 + $0x1704] ss:$116 sps:$4 sm:$0xff]   ;;  %v21030_v3 = vld [vmem:[%s28272_s18 + $0x880] ss:$116 sps:$4 sm:$0xff]   ;;  %v21038_v54 = vld [vmem:[%s28272_s18 + $0x79c] ss:$116 sps:$4 sm:$0xff]  }
 0xd0b   :  { %v15918_v40 = vcombine.low %v15910_v42, %v15917_v38  ;;  %15543 = vmatprep.subr.bf16.mxu1 %v20969_v21  ;;  %v21033_v62 = vld [vmem:[%s28272_s18 + $0x1700] ss:$116 sps:$4 sm:$0xff]   ;;  %v21041_v21 = vld [vmem:[%s28272_s18 + $0x161c] ss:$116 sps:$4 sm:$0xff]   ;;  %v21036_v42 = vld [vmem:[%s28272_s18 + $0x798] ss:$116 sps:$4 sm:$0xff]  }
 0xd0c   :  { %v21039_v38 = vld [vmem:[%s28272_s18 + $0x1618] ss:$116 sps:$4 sm:$0xff]  }
 0xd0d   :  { %15988 = vst [vmem:[%s28277_s23 + $0x18] sm:$0xff] %v15918_v40  ;;  %15503 = vmatpush1.bf16.msra.mxu0 %v20964_v43  ;;  %v27681_v43 = vld [vmem:[%s28273_s19 + $0x10] sm:$0xff] }
 0xd0e   :  { %15544 = vmatpush1.bf16.msra.mxu1 %v20967_v26  ;;  %15504 = vmatprep.subr.bf16.mxu0 %v20972_v28  ;;  %v21044_v26 = vld [vmem:[%s28272_s18 + $0x6bc] ss:$116 sps:$4 sm:$0xff]   ;;  %v9844_v40 = vrot.slane %v27681_v43, %v22342_v29 }
 0xd0f   :  { %15545 = vmatprep.subr.bf16.mxu1 %v20975_v61  ;;  %v21047_v28 = vld [vmem:[%s28272_s18 + $0x153c] ss:$116 sps:$4 sm:$0xff]   ;;  %v21042_v61 = vld [vmem:[%s28272_s18 + $0x6b8] ss:$116 sps:$4 sm:$0xff]  }
 0xd11   :  { %15505 = vmatpush1.bf16.msra.mxu0 %v20970_v47  ;;  %v21045_v47 = vld [vmem:[%s28272_s18 + $0x1538] ss:$116 sps:$4 sm:$0xff]  }
 0xd12   :  { %15546 = vmatpush1.bf16.msra.mxu1 %v20973_v19  ;;  %15506 = vmatprep.subr.bf16.mxu0 %v20978_v7  ;;  %v9848_v19 = vrot.slane %v27681_v43, %v22351_v34  ;;  %v21050_v7 = vld [vmem:[%s28272_s18 + $0x5d4] ss:$116 sps:$4 sm:$0xff]  }
 0xd13   :  { %15547 = vmatprep.subr.bf16.mxu1 %v20981_v17 }
 0xd15   :  { %15507 = vmatpush1.bf16.msra.mxu0 %v20976_v37  ;;  %v21053_v37 = vld [vmem:[%s28272_s18 + $0x1454] ss:$116 sps:$4 sm:$0xff]  }
 0xd16   :  { %15548 = vmatpush1.bf16.msra.mxu1 %v20979_v14  ;;  %15508 = vmatprep.subr.bf16.mxu0 %v20984_v5 }
 0xd17   :  { %15549 = vmatprep.subr.bf16.mxu1 %v20987_v41  ;;  %v21048_v41 = vld [vmem:[%s28272_s18 + $0x5d0] ss:$116 sps:$4 sm:$0xff]  }
 0xd19   :  { %15509 = vmatpush1.bf16.msra.mxu0 %v20982_v46 }
 0xd1a   :  { %15550 = vmatpush1.bf16.msra.mxu1 %v20985_v57  ;;  %15510 = vmatprep.subr.bf16.mxu0 %v20990_v32  ;;  %v21051_v57 = vld [vmem:[%s28272_s18 + $0x1450] ss:$116 sps:$4 sm:$0xff]   ;;  %v21056_v32 = vld [vmem:[%s28272_s18 + $0x4ec] ss:$116 sps:$4 sm:$0xff]  }
 0xd1b   :  { %15551 = vmatprep.subr.bf16.mxu1 %v20993_v9 }
 0xd1d   :  { %15511 = vmatpush1.bf16.msra.mxu0 %v20988_v25 }
 0xd1e   :  { %15552 = vmatpush1.bf16.msra.mxu1 %v20991_v56  ;;  %15512 = vmatprep.subr.bf16.mxu0 %v20996_v55  ;;  %v21059_v55 = vld [vmem:[%s28272_s18 + $0x136c] ss:$116 sps:$4 sm:$0xff]  }
 0xd1f   :  { %15553 = vmatprep.subr.bf16.mxu1 %v20999_v4 }
 0xd21   :  { %15513 = vmatpush2.bf16.msra.mxu0 %v20994_v24 }
 0xd22   :  { %15554 = vmatpush2.bf16.msra.mxu1 %v20997_v52  ;;  %15514 = vmatprep.subr.bf16.mxu0 %v21002_v30  ;;  %v21054_v30 = vld [vmem:[%s28272_s18 + $0x4e8] ss:$116 sps:$4 sm:$0xff]  }
 0xd23   :  { %15555 = vmatprep.subr.bf16.mxu1 %v21005_v12 }
 0xd25   :  { %15515 = vmatpush2.bf16.msra.mxu0 %v21000_v53  ;;  %v21057_v53 = vld [vmem:[%s28272_s18 + $0x1368] ss:$116 sps:$4 sm:$0xff]  }
 0xd26   :  { %15556 = vmatpush2.bf16.msra.mxu1 %v21003_v8  ;;  %15516 = vmatprep.subr.bf16.mxu0 %v21008_v1  ;;  %v21062_v8 = vld [vmem:[%s28272_s18 + $0x404] ss:$116 sps:$4 sm:$0xff]  }
 0xd27   :  { %15557 = vmatprep.subr.bf16.mxu1 %v21011_v0 }
 0xd29   :  { %15517 = vmatpush2.bf16.msra.mxu0 %v21006_v15  ;;  %v21065_v15 = vld [vmem:[%s28272_s18 + $0x1284] ss:$116 sps:$4 sm:$0xff]  }
 0xd2a   :  { %15558 = vmatpush2.bf16.msra.mxu1 %v21009_v11  ;;  %15518 = vmatprep.subr.bf16.mxu0 %v21014_v18  ;;  %v21060_v11 = vld [vmem:[%s28272_s18 + $0x400] ss:$116 sps:$4 sm:$0xff]  }
 0xd2b   :  { %15559 = vmatprep.subr.bf16.mxu1 %v21017_v58  ;;  %v21063_v18 = vld [vmem:[%s28272_s18 + $0x1280] ss:$116 sps:$4 sm:$0xff]   ;;  %v21068_v58 = vld [vmem:[%s28272_s18 + $0x31c] ss:$116 sps:$4 sm:$0xff]  }
 0xd2d   :  { %15519 = vmatpush2.bf16.msra.mxu0 %v21012_v45  ;;  %v21071_v45 = vld [vmem:[%s28272_s18 + $0x119c] ss:$116 sps:$4 sm:$0xff]  }
 0xd2e   :  { %15560 = vmatpush2.bf16.msra.mxu1 %v21015_v48  ;;  %15520 = vmatprep.subr.bf16.mxu0 %v21020_v39  ;;  %v21066_v48 = vld [vmem:[%s28272_s18 + $0x318] ss:$116 sps:$4 sm:$0xff]  }
 0xd2f   :  { %15561 = vmatprep.subr.bf16.mxu1 %v21023_v31  ;;  %v21069_v39 = vld [vmem:[%s28272_s18 + $0x1198] ss:$116 sps:$4 sm:$0xff]   ;;  %v21074_v31 = vld [vmem:[%s28272_s18 + $0x234] ss:$116 sps:$4 sm:$0xff]  }
 0xd31   :  { %15521 = vmatpush2.bf16.msra.mxu0 %v21018_v16  ;;  %v21077_v16 = vld [vmem:[%s28272_s18 + $0x10b4] ss:$116 sps:$4 sm:$0xff]  }
 0xd32   :  { %15562 = vmatpush2.bf16.msra.mxu1 %v21021_v44  ;;  %15522 = vmatprep.subr.bf16.mxu0 %v21026_v13  ;;  %v21072_v44 = vld [vmem:[%s28272_s18 + $0x230] ss:$116 sps:$4 sm:$0xff]  }
 0xd33   :  { %15563 = vmatprep.subr.bf16.mxu1 %v21029_v63  ;;  %v21075_v13 = vld [vmem:[%s28272_s18 + $0x10b0] ss:$116 sps:$4 sm:$0xff]   ;;  %v21080_v63 = vld [vmem:[%s28272_s18 + $0x14c] ss:$116 sps:$4 sm:$0xff]  }
 0xd35   :  { %15523 = vmatpush2.bf16.msra.mxu0 %v21024_v35  ;;  %v21083_v35 = vld [vmem:[%s28272_s18 + $0xfcc] ss:$116 sps:$4 sm:$0xff]  }
 0xd36   :  { %15564 = vmatpush2.bf16.msra.mxu1 %v21027_v59  ;;  %15524 = vmatprep.subr.bf16.mxu0 %v21032_v22  ;;  %v21078_v59 = vld [vmem:[%s28272_s18 + $0x148] ss:$116 sps:$4 sm:$0xff]  }
 0xd37   :  { %15565 = vmatprep.subr.bf16.mxu1 %v21035_v27  ;;  %v21081_v22 = vld [vmem:[%s28272_s18 + $0xfc8] ss:$116 sps:$4 sm:$0xff]   ;;  %v21086_v27 = vld [vmem:[%s28272_s18 + $0x64] ss:$116 sps:$4 sm:$0xff]  }
 0xd39   :  { %15525 = vmatpush2.bf16.msra.mxu0 %v21030_v3  ;;  %v21089_v3 = vld [vmem:[%s28272_s18 + $0xee4] ss:$116 sps:$4 sm:$0xff]  }
 0xd3a   :  { %15566 = vmatpush2.bf16.msra.mxu1 %v21033_v62  ;;  %15526 = vmatprep.subr.bf16.mxu0 %v21038_v54  ;;  %v21084_v62 = vld [vmem:[%s28272_s18 + $0x60] ss:$116 sps:$4 sm:$0xff]  }
 0xd3b   :  { %15567 = vmatprep.subr.bf16.mxu1 %v21041_v21  ;;  %v21087_v54 = vld [vmem:[%s28272_s18 + $0xee0] ss:$116 sps:$4 sm:$0xff]   ;;  %v21092_v21 = vld [vmem:[%s28272_s18 + $0xdfc] ss:$116 sps:$4 sm:$0xff]  }
 0xd3d   :  { %15527 = vmatpush2.bf16.msra.mxu0 %v21036_v42  ;;  %v21095_v42 = vld [vmem:[%s28272_s18 + $0x1c7c] ss:$116 sps:$4 sm:$0xff]  }
 0xd3e   :  { %15568 = vmatpush2.bf16.msra.mxu1 %v21039_v38  ;;  %15578 = vmatprep.subr.bf16.mxu0 %v21044_v26  ;;  %v21090_v38 = vld [vmem:[%s28272_s18 + $0xdf8] ss:$116 sps:$4 sm:$0xff]  }
 0xd3f   :  { %15619 = vmatprep.subr.bf16.mxu1 %v21047_v28  ;;  %v21093_v26 = vld [vmem:[%s28272_s18 + $0x1c78] ss:$116 sps:$4 sm:$0xff]   ;;  %v21098_v28 = vld [vmem:[%s28272_s18 + $0xd14] ss:$116 sps:$4 sm:$0xff]  }
 0xd40   :  { %v15284_v17 = vpop.f32.mrf.mxu0  ;;  %15529 = vmatmul.mubr.bf16.vlgmr.msra.gmra.mxu0 %v25418_v6 }
 0xd41   :  { %v15285_v14 = vadd.f32 %v15284_v17, %v9844_v40  ;;  %v15325_v5 = vpop.f32.mrf.mxu1  ;;  %15570 = vmatmul.mubr.bf16.vlgmr.msra.gmra.mxu1 %v25420_v20  ;;  %15579 = vmatpush1.bf16.msra.mxu0 %v21042_v61  ;;  %v21101_v40 = vld [vmem:[%s28272_s18 + $0x1b94] ss:$116 sps:$4 sm:$0xff]   ;;  %v21096_v61 = vld [vmem:[%s28272_s18 + $0xd10] ss:$116 sps:$4 sm:$0xff]  }
 0xd42   :  { %15610 = vmatprep.mubr.bf16.mxu0 %v25408_v2  ;;  %15620 = vmatpush1.bf16.msra.mxu1 %v21045_v47  ;;  %v15286_v46 = vpop.f32.mrf.mxu0  ;;  %v21099_v47 = vld [vmem:[%s28272_s18 + $0x1b90] ss:$116 sps:$4 sm:$0xff]   ;;  %v21102_v17 = vld [vmem:[%s28272_s18 + $0xc28] ss:$116 sps:$4 sm:$0xff]  }
 0xd43   :  { %v27717_v9 = vadd.f32 %v15325_v5, %v15285_v14  ;;  %15651 = vmatprep.mubr.bf16.mxu1 %v25410_v60  ;;  %v15287_v25 = vadd.f32 %v15286_v46, %v9848_v19  ;;  %v15327_v56 = vpop.f32.mrf.mxu1  ;;  %15580 = vmatprep.subr.bf16.mxu0 %v21050_v7  ;;  %v21104_v19 = vld [vmem:[%s28272_s18 + $0xc2c] ss:$116 sps:$4 sm:$0xff]   ;;  %v21110_v14 = vld [vmem:[%s28272_s18 + $0xb44] ss:$116 sps:$4 sm:$0xff]  }
 0xd44   :  { %v15288_v4 = vpop.f32.mrf.mxu0  ;;  %15621 = vmatprep.subr.bf16.mxu1 %v21053_v37  ;;  %v21107_v7 = vld [vmem:[%s28272_s18 + $0x1aac] ss:$116 sps:$4 sm:$0xff]   ;;  %v21105_v37 = vld [vmem:[%s28272_s18 + $0x1aa8] ss:$116 sps:$4 sm:$0xff]   ;;  %v21113_v5 = vld [vmem:[%s28272_s18 + $0x19c4] ss:$116 sps:$4 sm:$0xff]  }
 0xd45   :  { %v27723_v24 = vadd.f32 %v15327_v56, %v15287_v25  ;;  %v15329_v52 = vpop.f32.mrf.mxu1  ;;  %15581 = vmatpush1.bf16.msra.mxu0 %v21048_v41  ;;  %v21108_v41 = vld [vmem:[%s28272_s18 + $0xb40] ss:$116 sps:$4 sm:$0xff]   ;;  %v21114_v25 = vld [vmem:[%s28272_s18 + $0xa58] ss:$116 sps:$4 sm:$0xff]  }
 0xd46   :  { %15622 = vmatpush1.bf16.msra.mxu1 %v21051_v57  ;;  %v15289_v12 = vpop.f32.mrf.mxu0  ;;  %15582 = vmatprep.subr.bf16.mxu0 %v21056_v32  ;;  %v21111_v46 = vld [vmem:[%s28272_s18 + $0x19c0] ss:$116 sps:$4 sm:$0xff]   ;;  %v21116_v57 = vld [vmem:[%s28272_s18 + $0xa5c] ss:$116 sps:$4 sm:$0xff]   ;;  %v21117_v56 = vld [vmem:[%s28272_s18 + $0x18d8] ss:$116 sps:$4 sm:$0xff]  }
 0xd47   :  { %v15919_v1 = vcombine.low %v27717_v9, %v27723_v24  ;;  %v15330_v0 = vpop.f32.mrf.mxu1  ;;  %15623 = vmatprep.subr.bf16.mxu1 %v21059_v55  ;;  %v21119_v32 = vld [vmem:[%s28272_s18 + $0x18dc] ss:$116 sps:$4 sm:$0xff]   ;;  %v21122_v55 = vld [vmem:[%s28272_s18 + $0x974] ss:$116 sps:$4 sm:$0xff]   ;;  %v21128_v12 = vld [vmem:[%s28272_s18 + $0x88c] ss:$116 sps:$4 sm:$0xff]  }
 0xd48   :  { %v21125_v4 = vld [vmem:[%s28272_s18 + $0x17f4] ss:$116 sps:$4 sm:$0xff]   ;;  %v21120_v52 = vld [vmem:[%s28272_s18 + $0x970] ss:$116 sps:$4 sm:$0xff]  }
 0xd49   :  { %15583 = vmatpush1.bf16.msra.mxu0 %v21054_v30  ;;  %v21123_v30 = vld [vmem:[%s28272_s18 + $0x17f0] ss:$116 sps:$4 sm:$0xff]   ;;  %v21129_v0 = vld [vmem:[%s28272_s18 + $0x1708] ss:$116 sps:$4 sm:$0xff]   ;;  %v21162_v24 = vld [vmem:[%s28272_s18 + $0x320] ss:$116 sps:$4 sm:$0xff]  }
 0xd4a   :  { %15624 = vmatpush1.bf16.msra.mxu1 %v21057_v53  ;;  %15584 = vmatprep.subr.bf16.mxu0 %v21062_v8  ;;  %v21131_v53 = vld [vmem:[%s28272_s18 + $0x170c] ss:$116 sps:$4 sm:$0xff]   ;;  %v21126_v8 = vld [vmem:[%s28272_s18 + $0x888] ss:$116 sps:$4 sm:$0xff]   ;;  %v21167_v9 = vld [vmem:[%s28272_s18 + $0x11a4] ss:$116 sps:$4 sm:$0xff]  }
 0xd4b   :  { %15625 = vmatprep.subr.bf16.mxu1 %v21065_v15  ;;  %v21134_v15 = vld [vmem:[%s28272_s18 + $0x7a4] ss:$116 sps:$4 sm:$0xff]  }
 0xd4d   :  { %15585 = vmatpush1.bf16.msra.mxu0 %v21060_v11  ;;  %v21137_v11 = vld [vmem:[%s28272_s18 + $0x1624] ss:$116 sps:$4 sm:$0xff]  }
 0xd4e   :  { %15626 = vmatpush1.bf16.msra.mxu1 %v21063_v18  ;;  %15586 = vmatprep.subr.bf16.mxu0 %v21068_v58  ;;  %v21132_v18 = vld [vmem:[%s28272_s18 + $0x7a0] ss:$116 sps:$4 sm:$0xff]  }
 0xd4f   :  { %15627 = vmatprep.subr.bf16.mxu1 %v21071_v45  ;;  %v21135_v58 = vld [vmem:[%s28272_s18 + $0x1620] ss:$116 sps:$4 sm:$0xff]   ;;  %v21140_v45 = vld [vmem:[%s28272_s18 + $0x6c4] ss:$116 sps:$4 sm:$0xff]  }
 0xd51   :  { %15587 = vmatpush1.bf16.msra.mxu0 %v21066_v48  ;;  %v21143_v48 = vld [vmem:[%s28272_s18 + $0x1544] ss:$116 sps:$4 sm:$0xff]  }
 0xd52   :  { %15628 = vmatpush1.bf16.msra.mxu1 %v21069_v39  ;;  %15588 = vmatprep.subr.bf16.mxu0 %v21074_v31  ;;  %v9852_v39 = vrot.slane %v27681_v43, %v23928_v50  ;;  %v21138_v31 = vld [vmem:[%s28272_s18 + $0x6c0] ss:$116 sps:$4 sm:$0xff]  }
 0xd53   :  { %15629 = vmatprep.subr.bf16.mxu1 %v21077_v16  ;;  %v21141_v16 = vld [vmem:[%s28272_s18 + $0x1540] ss:$116 sps:$4 sm:$0xff]  }
 0xd55   :  { %15589 = vmatpush1.bf16.msra.mxu0 %v21072_v44  ;;  %v9856_v44 = vrot.slane %v27681_v43, %v23931_v51 }
 0xd56   :  { %15630 = vmatpush1.bf16.msra.mxu1 %v21075_v13  ;;  %15590 = vmatprep.subr.bf16.mxu0 %v21080_v63  ;;  %v21146_v13 = vld [vmem:[%s28272_s18 + $0x5dc] ss:$116 sps:$4 sm:$0xff]  }
 0xd57   :  { %15631 = vmatprep.subr.bf16.mxu1 %v21083_v35  ;;  %v21149_v35 = vld [vmem:[%s28272_s18 + $0x145c] ss:$116 sps:$4 sm:$0xff]  }
 0xd59   :  { %15591 = vmatpush1.bf16.msra.mxu0 %v21078_v59 }
 0xd5a   :  { %15632 = vmatpush1.bf16.msra.mxu1 %v21081_v22  ;;  %15592 = vmatprep.subr.bf16.mxu0 %v21086_v27  ;;  %v21144_v27 = vld [vmem:[%s28272_s18 + $0x5d8] ss:$116 sps:$4 sm:$0xff]  }
 0xd5b   :  { %15633 = vmatprep.subr.bf16.mxu1 %v21089_v3 }
 0xd5d   :  { %15593 = vmatpush1.bf16.msra.mxu0 %v21084_v62  ;;  %v21147_v62 = vld [vmem:[%s28272_s18 + $0x1458] ss:$116 sps:$4 sm:$0xff]  }
 0xd5e   :  { %15634 = vmatpush1.bf16.msra.mxu1 %v21087_v54  ;;  %15594 = vmatprep.subr.bf16.mxu0 %v21092_v21  ;;  %v21152_v54 = vld [vmem:[%s28272_s18 + $0x4f4] ss:$116 sps:$4 sm:$0xff]  }
 0xd5f   :  { %15635 = vmatprep.subr.bf16.mxu1 %v21095_v42 }
 0xd61   :  { %15595 = vmatpush2.bf16.msra.mxu0 %v21090_v38  ;;  %v21155_v38 = vld [vmem:[%s28272_s18 + $0x1374] ss:$116 sps:$4 sm:$0xff]  }
 0xd62   :  { %15636 = vmatpush2.bf16.msra.mxu1 %v21093_v26  ;;  %15596 = vmatprep.subr.bf16.mxu0 %v21098_v28 }
 0xd63   :  { %15637 = vmatprep.subr.bf16.mxu1 %v21101_v40 }
 0xd65   :  { %15597 = vmatpush2.bf16.msra.mxu0 %v21096_v61 }
 0xd66   :  { %15638 = vmatpush2.bf16.msra.mxu1 %v21099_v47  ;;  %15598 = vmatprep.subr.bf16.mxu0 %v21104_v19  ;;  %v21150_v47 = vld [vmem:[%s28272_s18 + $0x4f0] ss:$116 sps:$4 sm:$0xff]  }
 0xd67   :  { %15639 = vmatprep.subr.bf16.mxu1 %v21107_v7  ;;  %v21153_v7 = vld [vmem:[%s28272_s18 + $0x1370] ss:$116 sps:$4 sm:$0xff]  }
 0xd69   :  { %15599 = vmatpush2.bf16.msra.mxu0 %v21102_v17  ;;  %v21158_v17 = vld [vmem:[%s28272_s18 + $0x40c] ss:$116 sps:$4 sm:$0xff]  }
 0xd6a   :  { %15640 = vmatpush2.bf16.msra.mxu1 %v21105_v37  ;;  %15600 = vmatprep.subr.bf16.mxu0 %v21110_v14 }
 0xd6b   :  { %15641 = vmatprep.subr.bf16.mxu1 %v21113_v5  ;;  %v21161_v5 = vld [vmem:[%s28272_s18 + $0x128c] ss:$116 sps:$4 sm:$0xff]  }
 0xd6d   :  { %15601 = vmatpush2.bf16.msra.mxu0 %v21108_v41  ;;  %v15927_v41 = vrot.slane %v15919_v1, %v21597_v49  ;;  %v21165_v1 = vld [vmem:[%s28272_s18 + $0x11a0] ss:$116 sps:$4 sm:$0xff]  }
 0xd6e   :  { %15642 = vmatpush2.bf16.msra.mxu1 %v21111_v46  ;;  %15602 = vmatprep.subr.bf16.mxu0 %v21116_v57  ;;  %v21156_v57 = vld [vmem:[%s28272_s18 + $0x408] ss:$116 sps:$4 sm:$0xff]  }
 0xd6f   :  { %15643 = vmatprep.subr.bf16.mxu1 %v21119_v32  ;;  %v21159_v32 = vld [vmem:[%s28272_s18 + $0x1288] ss:$116 sps:$4 sm:$0xff]  }
 0xd71   :  { %15603 = vmatpush2.bf16.msra.mxu0 %v21114_v25  ;;  %v21164_v25 = vld [vmem:[%s28272_s18 + $0x324] ss:$116 sps:$4 sm:$0xff]  }
 0xd72   :  { %15644 = vmatpush2.bf16.msra.mxu1 %v21117_v56  ;;  %15604 = vmatprep.subr.bf16.mxu0 %v21122_v55  ;;  %v21170_v55 = vld [vmem:[%s28272_s18 + $0x23c] ss:$116 sps:$4 sm:$0xff]  }
 0xd73   :  { %15645 = vmatprep.subr.bf16.mxu1 %v21125_v4  ;;  %v21173_v4 = vld [vmem:[%s28272_s18 + $0x10bc] ss:$116 sps:$4 sm:$0xff]  }
 0xd75   :  { %15605 = vmatpush2.bf16.msra.mxu0 %v21120_v52  ;;  %v21168_v52 = vld [vmem:[%s28272_s18 + $0x238] ss:$116 sps:$4 sm:$0xff]  }
 0xd76   :  { %15646 = vmatpush2.bf16.msra.mxu1 %v21123_v30  ;;  %15606 = vmatprep.subr.bf16.mxu0 %v21128_v12  ;;  %v21171_v30 = vld [vmem:[%s28272_s18 + $0x10b8] ss:$116 sps:$4 sm:$0xff]   ;;  %v21176_v12 = vld [vmem:[%s28272_s18 + $0x154] ss:$116 sps:$4 sm:$0xff]  }
 0xd77   :  { %15647 = vmatprep.subr.bf16.mxu1 %v21131_v53  ;;  %v21179_v53 = vld [vmem:[%s28272_s18 + $0xfd4] ss:$116 sps:$4 sm:$0xff]  }
 0xd79   :  { %15607 = vmatpush2.bf16.msra.mxu0 %v21126_v8  ;;  %v21174_v8 = vld [vmem:[%s28272_s18 + $0x150] ss:$116 sps:$4 sm:$0xff]  }
 0xd7a   :  { %15648 = vmatpush2.bf16.msra.mxu1 %v21129_v0  ;;  %15608 = vmatprep.subr.bf16.mxu0 %v21134_v15  ;;  %v21177_v0 = vld [vmem:[%s28272_s18 + $0xfd0] ss:$116 sps:$4 sm:$0xff]   ;;  %v21182_v15 = vld [vmem:[%s28272_s18 + $0x6c] ss:$116 sps:$4 sm:$0xff]  }
 0xd7b   :  { %15649 = vmatprep.subr.bf16.mxu1 %v21137_v11  ;;  %v21185_v11 = vld [vmem:[%s28272_s18 + $0xeec] ss:$116 sps:$4 sm:$0xff]  }
 0xd7d   :  { %15609 = vmatpush2.bf16.msra.mxu0 %v21132_v18  ;;  %v21180_v18 = vld [vmem:[%s28272_s18 + $0x68] ss:$116 sps:$4 sm:$0xff]  }
 0xd7e   :  { %15650 = vmatpush2.bf16.msra.mxu1 %v21135_v58  ;;  %15660 = vmatprep.subr.bf16.mxu0 %v21140_v45  ;;  %v21183_v58 = vld [vmem:[%s28272_s18 + $0xee8] ss:$116 sps:$4 sm:$0xff]   ;;  %v21188_v45 = vld [vmem:[%s28272_s18 + $0xe04] ss:$116 sps:$4 sm:$0xff]  }
 0xd7f   :  { %15701 = vmatprep.subr.bf16.mxu1 %v21143_v48  ;;  %v21191_v48 = vld [vmem:[%s28272_s18 + $0x1c84] ss:$116 sps:$4 sm:$0xff]  }
 0xd80   :  { %v15366_v63 = vpop.f32.mrf.mxu0  ;;  %15611 = vmatmul.mubr.bf16.vlgmr.msra.gmra.mxu0 %v25418_v6 }
 0xd81   :  { %v15367_v59 = vadd.f32 %v15366_v63, %v9852_v39  ;;  %v15407_v22 = vpop.f32.mrf.mxu1  ;;  %15652 = vmatmul.mubr.bf16.vlgmr.msra.gmra.mxu1 %v25420_v20  ;;  %15661 = vmatpush1.bf16.msra.mxu0 %v21138_v31  ;;  %v21186_v39 = vld [vmem:[%s28272_s18 + $0xe00] ss:$116 sps:$4 sm:$0xff]   ;;  %v21195_v63 = vld [vmem:[%s28272_s18 + $0x1b98] ss:$116 sps:$4 sm:$0xff]  }
 0xd82   :  { %15692 = vmatprep.mubr.bf16.mxu0 %v25408_v2  ;;  %15702 = vmatpush1.bf16.msra.mxu1 %v21141_v16  ;;  %v15368_v3 = vpop.f32.mrf.mxu0  ;;  %v21189_v31 = vld [vmem:[%s28272_s18 + $0x1c80] ss:$116 sps:$4 sm:$0xff]   ;;  %v21194_v16 = vld [vmem:[%s28272_s18 + $0xd1c] ss:$116 sps:$4 sm:$0xff]  }
 0xd83   :  { %15733 = vmatprep.mubr.bf16.mxu1 %v25410_v60  ;;  %v15369_v21 = vadd.f32 %v15368_v3, %v9856_v44  ;;  %v15409_v42 = vpop.f32.mrf.mxu1  ;;  %15662 = vmatprep.subr.bf16.mxu0 %v21146_v13  ;;  %v15408_v28 = vadd.f32 %v15407_v22, %v15367_v59  ;;  %v21197_v44 = vld [vmem:[%s28272_s18 + $0x1b9c] ss:$116 sps:$4 sm:$0xff]   ;;  %v21192_v13 = vld [vmem:[%s28272_s18 + $0xd18] ss:$116 sps:$4 sm:$0xff]   ;;  %v21203_v59 = vld [vmem:[%s28272_s18 + $0x1ab4] ss:$116 sps:$4 sm:$0xff]  }
 0xd84   :  { %v15370_v26 = vpop.f32.mrf.mxu0  ;;  %15703 = vmatprep.subr.bf16.mxu1 %v21149_v35  ;;  %v21200_v35 = vld [vmem:[%s28272_s18 + $0xc34] ss:$116 sps:$4 sm:$0xff]   ;;  %v21198_v22 = vld [vmem:[%s28272_s18 + $0xc30] ss:$116 sps:$4 sm:$0xff]   ;;  %v21206_v3 = vld [vmem:[%s28272_s18 + $0xb4c] ss:$116 sps:$4 sm:$0xff]  }
 0xd85   :  { %v15410_v40 = vadd.f32 %v15409_v42, %v15369_v21  ;;  %v15411_v61 = vpop.f32.mrf.mxu1  ;;  %15663 = vmatpush1.bf16.msra.mxu0 %v21144_v27  ;;  %v21201_v27 = vld [vmem:[%s28272_s18 + $0x1ab0] ss:$116 sps:$4 sm:$0xff]   ;;  %v21207_v21 = vld [vmem:[%s28272_s18 + $0x19c8] ss:$116 sps:$4 sm:$0xff]   ;;  %v21210_v26 = vld [vmem:[%s28272_s18 + $0xa60] ss:$116 sps:$4 sm:$0xff]  }
 0xd86   :  { %15704 = vmatpush1.bf16.msra.mxu1 %v21147_v62  ;;  %v15371_v19 = vpop.f32.mrf.mxu0  ;;  %15664 = vmatprep.subr.bf16.mxu0 %v21152_v54  ;;  %v21209_v62 = vld [vmem:[%s28272_s18 + $0x19cc] ss:$116 sps:$4 sm:$0xff]   ;;  %v21204_v54 = vld [vmem:[%s28272_s18 + $0xb48] ss:$116 sps:$4 sm:$0xff]   ;;  %v21212_v42 = vld [vmem:[%s28272_s18 + $0xa64] ss:$116 sps:$4 sm:$0xff]  }
 0xd87   :  { %v15920_v37 = vcombine.low %v15408_v28, %v15410_v40  ;;  %v15412_v14 = vpop.f32.mrf.mxu1  ;;  %15705 = vmatprep.subr.bf16.mxu1 %v21155_v38  ;;  %v21215_v38 = vld [vmem:[%s28272_s18 + $0x18e4] ss:$116 sps:$4 sm:$0xff]   ;;  %v21213_v28 = vld [vmem:[%s28272_s18 + $0x18e0] ss:$116 sps:$4 sm:$0xff]   ;;  %v21218_v40 = vld [vmem:[%s28272_s18 + $0x97c] ss:$116 sps:$4 sm:$0xff]  }
 0xd88   :  { %v21221_v61 = vld [vmem:[%s28272_s18 + $0x17fc] ss:$116 sps:$4 sm:$0xff]   ;;  %v21219_v19 = vld [vmem:[%s28272_s18 + $0x17f8] ss:$116 sps:$4 sm:$0xff]  }
 0xd89   :  { %v15934_v46 = vrot.slane %v15920_v37, %v21597_v49  ;;  %15665 = vmatpush1.bf16.msra.mxu0 %v21150_v47  ;;  %v21216_v47 = vld [vmem:[%s28272_s18 + $0x978] ss:$116 sps:$4 sm:$0xff]   ;;  %v21222_v37 = vld [vmem:[%s28272_s18 + $0x890] ss:$116 sps:$4 sm:$0xff]  }
 0xd8a   :  { %15706 = vmatpush1.bf16.msra.mxu1 %v21153_v7  ;;  %15666 = vmatprep.subr.bf16.mxu0 %v21158_v17  ;;  %v21224_v7 = vld [vmem:[%s28272_s18 + $0x894] ss:$116 sps:$4 sm:$0xff]   ;;  %v21225_v14 = vld [vmem:[%s28272_s18 + $0x1710] ss:$116 sps:$4 sm:$0xff]  }
 0xd8b   :  { %v15935_v56 = vcombine.low %v15927_v41, %v15934_v46  ;;  %15707 = vmatprep.subr.bf16.mxu1 %v21161_v5  ;;  %v21227_v17 = vld [vmem:[%s28272_s18 + $0x1714] ss:$116 sps:$4 sm:$0xff]   ;;  %v21230_v5 = vld [vmem:[%s28272_s18 + $0x7ac] ss:$116 sps:$4 sm:$0xff]  }
 0xd8c   :  { %v21233_v41 = vld [vmem:[%s28272_s18 + $0x162c] ss:$116 sps:$4 sm:$0xff]   ;;  %v21228_v46 = vld [vmem:[%s28272_s18 + $0x7a8] ss:$116 sps:$4 sm:$0xff]  }
 0xd8d   :  { %15989 = vst [vmem:[%s28277_s23 + $0x20] sm:$0xff] %v15935_v56  ;;  %15667 = vmatpush1.bf16.msra.mxu0 %v21156_v57  ;;  %v21231_v57 = vld [vmem:[%s28272_s18 + $0x1628] ss:$116 sps:$4 sm:$0xff]  }
 0xd8e   :  { %15708 = vmatpush1.bf16.msra.mxu1 %v21159_v32  ;;  %15668 = vmatprep.subr.bf16.mxu0 %v21164_v25  ;;  %v21234_v32 = vld [vmem:[%s28272_s18 + $0xe08] ss:$116 sps:$4 sm:$0xff]   ;;  %v9860_v25 = vrot.slane %v27681_v43, %v26417_v33 }
 0xd8f   :  { %15709 = vmatprep.subr.bf16.mxu1 %v21167_v9  ;;  %v21235_v56 = vld [vmem:[%s28272_s18 + $0x6c8] ss:$116 sps:$4 sm:$0xff]   ;;  %v21236_v9 = vld [vmem:[%s28272_s18 + $0xd20] ss:$116 sps:$4 sm:$0xff]  }
 0xd91   :  { %15669 = vmatpush1.bf16.msra.mxu0 %v21162_v24  ;;  %v9864_v24 = vrot.slane %v27681_v43, %v26429_v10  ;;  %v21238_v10 = vld [vmem:[%s28272_s18 + $0xc38] ss:$116 sps:$4 sm:$0xff]  }
 0xd92   :  { %15710 = vmatpush1.bf16.msra.mxu1 %v21165_v1  ;;  %15670 = vmatprep.subr.bf16.mxu0 %v21170_v55 }
 0xd93   :  { %15711 = vmatprep.subr.bf16.mxu1 %v21173_v4 }
 0xd95   :  { %15671 = vmatpush1.bf16.msra.mxu0 %v21168_v52  ;;  %v21237_v52 = vld [vmem:[%s28272_s18 + $0x5e0] ss:$116 sps:$4 sm:$0xff]  }
 0xd96   :  { %15712 = vmatpush1.bf16.msra.mxu1 %v21171_v30  ;;  %15672 = vmatprep.subr.bf16.mxu0 %v21176_v12 }
 0xd97   :  { %15713 = vmatprep.subr.bf16.mxu1 %v21179_v53 }
 0xd99   :  { %15673 = vmatpush1.bf16.msra.mxu0 %v21174_v8 }
 0xd9a   :  { %15714 = vmatpush1.bf16.msra.mxu1 %v21177_v0  ;;  %15674 = vmatprep.subr.bf16.mxu0 %v21182_v15 }
 0xd9b   :  { %15715 = vmatprep.subr.bf16.mxu1 %v21185_v11 }
 0xd9d   :  { %15675 = vmatpush1.bf16.msra.mxu0 %v21180_v18  ;;  %v21239_v18 = vld [vmem:[%s28272_s18 + $0x4f8] ss:$116 sps:$4 sm:$0xff]  }
 0xd9e   :  { %15716 = vmatpush1.bf16.msra.mxu1 %v21183_v58  ;;  %15676 = vmatprep.subr.bf16.mxu0 %v21188_v45  ;;  %v21240_v58 = vld [vmem:[%s28272_s18 + $0xb50] ss:$116 sps:$4 sm:$0xff]  }
 0xd9f   :  { %15717 = vmatprep.subr.bf16.mxu1 %v21191_v48 }
 0xda1   :  { %15677 = vmatpush2.bf16.msra.mxu0 %v21186_v39  ;;  %v21241_v39 = vld [vmem:[%s28272_s18 + $0x410] ss:$116 sps:$4 sm:$0xff]  }
 0xda2   :  { %15718 = vmatpush2.bf16.msra.mxu1 %v21189_v31  ;;  %15678 = vmatprep.subr.bf16.mxu0 %v21194_v16  ;;  %v21242_v31 = vld [vmem:[%s28272_s18 + $0xa68] ss:$116 sps:$4 sm:$0xff]  }
 0xda3   :  { %15719 = vmatprep.subr.bf16.mxu1 %v21197_v44  ;;  %v21243_v16 = vld [vmem:[%s28272_s18 + $0x328] ss:$116 sps:$4 sm:$0xff]   ;;  %v21244_v44 = vld [vmem:[%s28272_s18 + $0x980] ss:$116 sps:$4 sm:$0xff]  }
 0xda5   :  { %15679 = vmatpush2.bf16.msra.mxu0 %v21192_v13  ;;  %v21245_v13 = vld [vmem:[%s28272_s18 + $0x240] ss:$116 sps:$4 sm:$0xff]  }
 0xda6   :  { %15720 = vmatpush2.bf16.msra.mxu1 %v21195_v63  ;;  %15680 = vmatprep.subr.bf16.mxu0 %v21200_v35  ;;  %v21246_v63 = vld [vmem:[%s28272_s18 + $0x898] ss:$116 sps:$4 sm:$0xff]  }
 0xda7   :  { %15721 = vmatprep.subr.bf16.mxu1 %v21203_v59  ;;  %v21247_v35 = vld [vmem:[%s28272_s18 + $0x158] ss:$116 sps:$4 sm:$0xff]   ;;  %v21248_v59 = vld [vmem:[%s28272_s18 + $0x7b0] ss:$116 sps:$4 sm:$0xff]  }
 0xda9   :  { %15681 = vmatpush2.bf16.msra.mxu0 %v21198_v22  ;;  %v21249_v22 = vld [vmem:[%s28272_s18 + $0x70] ss:$116 sps:$4 sm:$0xff]  }
 0xdaa   :  { %15722 = vmatpush2.bf16.msra.mxu1 %v21201_v27  ;;  %15682 = vmatprep.subr.bf16.mxu0 %v21206_v3  ;;  %v21250_v27 = vld [vmem:[%s28272_s18 + $0x1c88] ss:$116 sps:$4 sm:$0xff]  }
 0xdab   :  { %15723 = vmatprep.subr.bf16.mxu1 %v21209_v62  ;;  %v21251_v3 = vld [vmem:[%s28272_s18 + $0x1548] ss:$116 sps:$4 sm:$0xff]   ;;  %v21252_v62 = vld [vmem:[%s28272_s18 + $0x1ba0] ss:$116 sps:$4 sm:$0xff]  }
 0xdad   :  { %15683 = vmatpush2.bf16.msra.mxu0 %v21204_v54  ;;  %v21253_v54 = vld [vmem:[%s28272_s18 + $0x1460] ss:$116 sps:$4 sm:$0xff]  }
 0xdae   :  { %15724 = vmatpush2.bf16.msra.mxu1 %v21207_v21  ;;  %15684 = vmatprep.subr.bf16.mxu0 %v21212_v42  ;;  %v21254_v21 = vld [vmem:[%s28272_s18 + $0x1ab8] ss:$116 sps:$4 sm:$0xff]  }
 0xdaf   :  { %15725 = vmatprep.subr.bf16.mxu1 %v21215_v38  ;;  %v21255_v42 = vld [vmem:[%s28272_s18 + $0x1378] ss:$116 sps:$4 sm:$0xff]   ;;  %v21258_v38 = vld [vmem:[%s28272_s18 + $0x18e8] ss:$116 sps:$4 sm:$0xff]  }
 0xdb1   :  { %15685 = vmatpush2.bf16.msra.mxu0 %v21210_v26  ;;  %v21259_v26 = vld [vmem:[%s28272_s18 + $0x11a8] ss:$116 sps:$4 sm:$0xff]  }
 0xdb2   :  { %15726 = vmatpush2.bf16.msra.mxu1 %v21213_v28  ;;  %15686 = vmatprep.subr.bf16.mxu0 %v21218_v40  ;;  %v21260_v28 = vld [vmem:[%s28272_s18 + $0x1800] ss:$116 sps:$4 sm:$0xff]  }
 0xdb3   :  { %15727 = vmatprep.subr.bf16.mxu1 %v21221_v61  ;;  %v21261_v40 = vld [vmem:[%s28272_s18 + $0x10c0] ss:$116 sps:$4 sm:$0xff]   ;;  %v21262_v61 = vld [vmem:[%s28272_s18 + $0x1718] ss:$116 sps:$4 sm:$0xff]  }
 0xdb5   :  { %15687 = vmatpush2.bf16.msra.mxu0 %v21216_v47  ;;  %v21263_v47 = vld [vmem:[%s28272_s18 + $0xfd8] ss:$116 sps:$4 sm:$0xff]  }
 0xdb6   :  { %15728 = vmatpush2.bf16.msra.mxu1 %v21219_v19  ;;  %15688 = vmatprep.subr.bf16.mxu0 %v21224_v7  ;;  %v21264_v19 = vld [vmem:[%s28272_s18 + $0x1630] ss:$116 sps:$4 sm:$0xff]  }
 0xdb7   :  { %15729 = vmatprep.subr.bf16.mxu1 %v21227_v17  ;;  %v21265_v7 = vld [vmem:[%s28272_s18 + $0xef0] ss:$116 sps:$4 sm:$0xff]   ;;  %v9868_v17 = vrot.slane %v27681_v43, %v26629_v36 }
 0xdb9   :  { %15689 = vmatpush2.bf16.msra.mxu0 %v21222_v37  ;;  %v9872_v37 = vrot.slane %v27681_v43, %v26641_v23  ;;  %v28224_v43 = vld [vmem:[%s28273_s19 + $0x18] sm:$0x1f]  ;;  %s21339_s19 = smov [#allocation4]  }
 0xdba   :  { %15730 = vmatpush2.bf16.msra.mxu1 %v21225_v14  ;;  %15690 = vmatprep.subr.bf16.mxu0 %v21230_v5  ;;  %s16010_s14 = sshll.u32 %s21339_s19, 4  ;;  %s16011_s14 = int_to_ptr.vmem [resolvable:$true] %s16010_s14 }
 0xdbb   :  { %15731 = vmatprep.subr.bf16.mxu1 %v21233_v41  ;;  %s21269_s25 = scalar_lea.vmem %s16011_s14, 32  ;;  %p21274_p1 = scmp.lt.s32.totalorder %s16011_s14, %s16011_s14 }
 0xdbc   :  { %p21270_p0 = scmp.ne.s32.totalorder %s16011_s14, %s21269_s25  ;;  %p21275_p2 = scmp.lt.s32.totalorder %s21269_s25, %s21269_s25 }
 0xdbd   :  { %15691 = vmatpush2.bf16.msra.mxu0 %v21228_v46 }
 0xdbe   :  { %15732 = vmatpush2.bf16.msra.mxu1 %v21231_v57  ;;  %18132 = vmatprep.subr.bf16.mxu0 %v21234_v32  ;;  %p21276_p3 = por %p21275_p2, %p21274_p1 }
 0xdc0   :  { %v15448_v1 = vpop.f32.mrf.mxu0  ;;  %15693 = vmatmul.mubr.bf16.vlgmr.msra.gmra.mxu0 %v25418_v6  ;;  %p21277_p4 = pnand %p21276_p3, %p21270_p0 }
 0xdc1   :  { %v15449_v55 = vadd.f32 %v15448_v1, %v9860_v25  ;;  %v15489_v4 = vpop.f32.mrf.mxu1  ;;  %15734 = vmatmul.mubr.bf16.vlgmr.msra.gmra.mxu1 %v25420_v20  ;;  %18133 = vmatpush3.bf16.msra.mxu0 %v21235_v56 }
 0xdc2   :  { %15774 = vmatprep.mubr.bf16.mxu0 %v25408_v2  ;;  %v15450_v30 = vpop.f32.mrf.mxu0  ;;  %18134 = vmatprep.subr.bf16.mxu0 %v21236_v9 }
 0xdc3   :  { %v28119_v12 = vadd.f32 %v15489_v4, %v15449_v55  ;;  %v15451_v53 = vadd.f32 %v15450_v30, %v9864_v24  ;;  %v15491_v8 = vpop.f32.mrf.mxu1  ;;  %v9880_v30 = vrot.slane %v28224_v43, %v22351_v34 }
 0xdc4   :  { %v15452_v0 = vpop.f32.mrf.mxu0 }
 0xdc5   :  { %v28121_v15 = vadd.f32 %v15491_v8, %v15451_v53  ;;  %v15493_v11 = vpop.f32.mrf.mxu1  ;;  %18135 = vmatpush3.bf16.msra.mxu0 %v21237_v52  ;;  %v9876_v52 = vrot.slane %v28224_v43, %v22342_v29 }
 0xdc6   :  { %v15453_v2 = vpop.f32.mrf.mxu0  ;;  %18136 = vmatprep.subr.bf16.mxu0 %v21238_v10 }
 0xdc7   :  { %v15936_v45 = vcombine.low %v28119_v12, %v28121_v15  ;;  %v15494_v48 = vpop.f32.mrf.mxu1 }
 0xdc9   :  { %18137 = vmatpush3.bf16.msra.mxu0 %v21239_v18  ;;  %v15944_v36 = vrot.slane %v15936_v45, %v21597_v49 }
 0xdca   :  { %18138 = vmatprep.subr.bf16.mxu0 %v21240_v58 }
 0xdcd   :  { %18139 = vmatpush3.bf16.msra.mxu0 %v21241_v39 }
 0xdce   :  { %18140 = vmatprep.subr.bf16.mxu0 %v21242_v31 }
 0xdd1   :  { %18141 = vmatpush3.bf16.msra.mxu0 %v21243_v16 }
 0xdd2   :  { %18142 = vmatprep.subr.bf16.mxu0 %v21244_v44 }
 0xdd5   :  { %18143 = vmatpush3.bf16.msra.mxu0 %v21245_v13 }
 0xdd6   :  { %18144 = vmatprep.subr.bf16.mxu0 %v21246_v63 }
 0xdd9   :  { %18145 = vmatpush3.bf16.msra.mxu0 %v21247_v35 }
 0xdda   :  { %18146 = vmatprep.subr.bf16.mxu0 %v21248_v59 }
 0xddd   :  { %18147 = vmatpush3.bf16.msra.mxu0 %v21249_v22 }
 0xdde   :  { %18154 = vmatprep.subr.bf16.mxu0 %v21250_v27 }
 0xde0   :  { %15775 = vmatmul.mubr.bf16.vlgmr.msra.gmra.mxu0 %v25418_v6  ;;  %v21256_v6 = vld [vmem:[%s28272_s18 + $0x19d0] ss:$116 sps:$4 sm:$0xff]  }
 0xde1   :  { %18155 = vmatpush3.bf16.msra.mxu0 %v21251_v3  ;;  %15814 = vmatprep.mubr.bf16.mxu0 %v25410_v60  ;;  %v21257_v60 = vld [vmem:[%s28272_s18 + $0x1290] ss:$116 sps:$4 sm:$0xff]  }
 0xde2   :  { %18156 = vmatprep.subr.bf16.mxu0 %v21252_v62 }
 0xde5   :  { %18157 = vmatpush3.bf16.msra.mxu0 %v21253_v54 }
 0xde6   :  { %18158 = vmatprep.subr.bf16.mxu0 %v21254_v21 }
 0xde9   :  { %18159 = vmatpush3.bf16.msra.mxu0 %v21255_v42 }
 0xdea   :  { %18160 = vmatprep.subr.bf16.mxu0 %v21256_v6 }
 0xded   :  { %18161 = vmatpush3.bf16.msra.mxu0 %v21257_v60 }
 0xdee   :  { %18162 = vmatprep.subr.bf16.mxu0 %v21258_v38 }
 0xdf1   :  { %18163 = vmatpush3.bf16.msra.mxu0 %v21259_v26 }
 0xdf2   :  { %18164 = vmatprep.subr.bf16.mxu0 %v21260_v28 }
 0xdf5   :  { %18165 = vmatpush3.bf16.msra.mxu0 %v21261_v40 }
 0xdf6   :  { %18166 = vmatprep.subr.bf16.mxu0 %v21262_v61 }
 0xdf9   :  { %18167 = vmatpush3.bf16.msra.mxu0 %v21263_v47 }
 0xdfa   :  { %18168 = vmatprep.subr.bf16.mxu0 %v21264_v19 }
 0xdfd   :  { %18169 = vmatpush3.bf16.msra.mxu0 %v21265_v7 }
 0xe00   :  { %v15530_v14 = vpop.f32.mrf.mxu0  ;;  %15815 = vmatmul.mubr.bf16.vlgmr.msra.gmra.mxu0 %v25420_v20 }
 0xe01   :  { %v15531_v5 = vadd.f32 %v15530_v14, %v9868_v17  ;;  %v15571_v41 = vpop.f32.mrf.mxu1 }
 0xe02   :  { %v15532_v46 = vpop.f32.mrf.mxu0 }
 0xe03   :  { %v15533_v57 = vadd.f32 %v15532_v46, %v9872_v37  ;;  %v15573_v32 = vpop.f32.mrf.mxu1  ;;  %v15572_v56 = vadd.f32 %v15571_v41, %v15531_v5 }
 0xe04   :  { %v15534_v25 = vpop.f32.mrf.mxu0 }
 0xe05   :  { %v15574_v9 = vadd.f32 %v15573_v32, %v15533_v57  ;;  %v15575_v24 = vpop.f32.mrf.mxu1 }
 0xe06   :  { %v15535_v1 = vpop.f32.mrf.mxu0 }
 0xe07   :  { %v15937_v55 = vcombine.low %v15572_v56, %v15574_v9  ;;  %v15576_v4 = vpop.f32.mrf.mxu1 }
 0xe09   :  { %v15951_v23 = vrot.slane %v15937_v55, %v21597_v49 }
 0xe0b   :  { %v15952_v20 = vcombine.low %v15944_v36, %v15951_v23 }
 0xe0d   :  { %15990 = vst [vmem:[%s28277_s23 + $0x28] sm:$0xff] %v15952_v20 }
 0xe40   :  { %v15612_v10 = vpop.f32.mrf.mxu0 }
 0xe41   :  { %v15613_v12 = vadd.f32 %v15612_v10, %v9876_v52  ;;  %v15653_v53 = vpop.f32.mrf.mxu1 }
 0xe42   :  { %v15614_v8 = vpop.f32.mrf.mxu0 }
 0xe43   :  { %v15654_v0 = vadd.f32 %v15653_v53, %v15613_v12  ;;  %v15615_v15 = vadd.f32 %v15614_v8, %v9880_v30  ;;  %v15655_v11 = vpop.f32.mrf.mxu1 }
 0xe44   :  { %v15616_v18 = vpop.f32.mrf.mxu0 }
 0xe45   :  { %v15656_v2 = vadd.f32 %v15655_v11, %v15615_v15  ;;  %v15657_v58 = vpop.f32.mrf.mxu1 }
 0xe46   :  { %v15617_v45 = vpop.f32.mrf.mxu0 }
 0xe47   :  { %v15953_v48 = vcombine.low %v15654_v0, %v15656_v2  ;;  %v15658_v39 = vpop.f32.mrf.mxu1 }
 0xe48   :  { %21280 = shalt.err (!%p21277_p4)
}
 0xe49   :  { %16013 = dma.vmem_to_hbm [thread:$0]  %s16011_s14, 32, %s28275_s21, [#allocation5]  }
 0xe4a   :  { %s21289_s3 = scalar_lea.vmem %s16001_s30, 32  ;;  %p21294_p6 = scmp.lt.s32.totalorder %s16001_s30, %s16001_s30 }
 0xe4b   :  { %p21290_p5 = scmp.ne.s32.totalorder %s16001_s30, %s21289_s3  ;;  %p21295_p7 = scmp.lt.s32.totalorder %s21289_s3, %s21289_s3 }
 0xe4d   :  { %p21296_p8 = por %p21295_p7, %p21294_p6 }
 0xe4f   :  { %p21297_p9 = pnand %p21296_p8, %p21290_p5 }
 0xe51   :  { %21300 = shalt.err (!%p21297_p9)
}
 0xe52   :  { %16003 = dma.vmem_to_hbm [thread:$0]  %s16001_s30, 32, %s28274_s20, [#allocation3]  }
 0xe53   :  { %s21341_s24 = smov [#allocation6]  }
 0xe54   :  { %s16020_s9 = sshll.u32 %s21341_s24, 4  ;;  %s16021_s9 = int_to_ptr.vmem [resolvable:$true] %s16020_s9 }
 0xe55   :  { %s21309_s12 = scalar_lea.vmem %s16021_s9, 32  ;;  %p21314_p11 = scmp.lt.s32.totalorder %s16021_s9, %s16021_s9 }
 0xe56   :  { %p21310_p10 = scmp.ne.s32.totalorder %s16021_s9, %s21309_s12  ;;  %p21315_p12 = scmp.lt.s32.totalorder %s21309_s12, %s21309_s12 }
 0xe58   :  { %p21316_p13 = por %p21315_p12, %p21314_p11 }
 0xe5a   :  { %p21317_p0 = pnand %p21316_p13, %p21310_p10 }
 0xe5c   :  { %21320 = shalt.err (!%p21317_p0)
}
 0xe5d   :  { %16023 = dma.vmem_to_hbm [thread:$0]  %s16021_s9, 32, %s28276_s22, [#allocation5]   ;;  %v9884_v29 = vrot.slane %v28224_v43, %v23928_v50  ;;  %v9888_v34 = vrot.slane %v28224_v43, %v23931_v51  ;;  %v15961_v42 = vrot.slane %v15953_v48, %v21597_v49  ;;  %v9892_v28 = vrot.slane %v28224_v43, %v26417_v33 }
 0xe5e   :  { %vm15992_vm5 = vcmask 910336  }
 0xe80   :  { %v15694_v31 = vpop.f32.mrf.mxu0 }
 0xe81   :  { %v15695_v16 = vadd.f32 %v15694_v31, %v9884_v29  ;;  %v15735_v44 = vpop.f32.mrf.mxu1 }
 0xe82   :  { %v15696_v13 = vpop.f32.mrf.mxu0 }
 0xe83   :  { %v15697_v63 = vadd.f32 %v15696_v13, %v9888_v34  ;;  %v15737_v35 = vpop.f32.mrf.mxu1  ;;  %v15736_v22 = vadd.f32 %v15735_v44, %v15695_v16 }
 0xe84   :  { %v15698_v59 = vpop.f32.mrf.mxu0 }
 0xe85   :  { %v15738_v27 = vadd.f32 %v15737_v35, %v15697_v63  ;;  %v15739_v3 = vpop.f32.mrf.mxu1 }
 0xe86   :  { %v15699_v62 = vpop.f32.mrf.mxu0 }
 0xe87   :  { %v15954_v54 = vcombine.low %v15736_v22, %v15738_v27  ;;  %v15740_v21 = vpop.f32.mrf.mxu1 }
 0xe89   :  { %v15968_v50 = vrot.slane %v15954_v54, %v21597_v49 }
 0xe8b   :  { %v15969_v6 = vcombine.low %v15961_v42, %v15968_v50 }
 0xe8d   :  { %15991 = vst [vmem:[%s28277_s23 + $0x30] sm:$0xff] %v15969_v6 }
 0xea0   :  { %v18148_v51 = vpop.f32.mrf.mxu0 }
 0xea2   :  { %v18149_v60 = vpop.f32.mrf.mxu0 }
 0xea3   :  { %v18150_v40 = vadd.f32 %v18149_v60, %v18148_v51 }
 0xea4   :  { %v18151_v38 = vpop.f32.mrf.mxu0 }
 0xea5   :  { %v15777_v19 = vadd.f32 %v18150_v40, %v9892_v28 }
 0xea6   :  { %v18152_v26 = vpop.f32.mrf.mxu0 }
 0xec0   :  { %v18170_v61 = vpop.f32.mrf.mxu0 }
 0xec2   :  { %v18171_v47 = vpop.f32.mrf.mxu0 }
 0xec3   :  { %v18172_v7 = vadd.f32 %v18171_v47, %v18170_v61 }
 0xec4   :  { %v18173_v17 = vpop.f32.mrf.mxu0 }
 0xec5   :  { %v15817_v37 = vadd.f32 %v18172_v7, %v15777_v19 }
 0xec6   :  { %v18174_v14 = vpop.f32.mrf.mxu0 }
 0xec7   :  { %v15976_v5 = vrot.slane %v15817_v37, %v21597_v49 }
 0xec9   :  { %15993 = vst.msk [vmem:[%s28277_s23 + $0x38] sm:$0x3] %vm15992_vm5, %v15976_v5 }
 0xeca   :  { %21329 = dma.done.wait [#allocation3], 32  }
 0xecb   :  { %21330 = vsyncadd [#allocation3], 4294967264 }
 0xecc   :  { %21331 = dma.done.wait [#allocation5], 64  }
 0xecd   :  { %21332 = vsyncadd [#allocation5], 4294967232 }
 0xece   :  { %16037 = vsyncpa [#allocation3], 1 }
 0xecf   :  { %16038 = vsyncpa [#allocation5], 1 }

</bundles_post_ra>
